<compile_context>
chip_gen: v6e
topology: v6e:2x2x1
jax: 0.10.0
libtpu: 0.0.40
codegen_flags: <defaults>
</compile_context>

<pallas_src>
import math
import functools

import jax
import jax.numpy as jnp
from jax.experimental import pallas as pl
from jax.experimental.pallas import tpu as pltpu

# Hyperparameters implied by the PyTorch module.
VOCAB = 30000
MAX_LEN = 128
N_LAYERS = 6
N_HEAD = 8
D_MODEL = 512
D_HEAD = D_MODEL // N_HEAD
D_INNER = 1024
N_CLASSES = 2
LN_EPS = 1e-5  # PyTorch nn.LayerNorm default.

_VMEM_LIMIT = 32 * 1024 * 1024  # far above actual use (<12 MiB); safe on v5e/v6e/v7x.


def _cparams(n_axes=1):
    return pltpu.CompilerParams(
        dimension_semantics=("parallel",) * n_axes,
        vmem_limit_bytes=_VMEM_LIMIT,
    )


def _row_tile(M, cap=512):
    """Row tile for M x 512-ish activations.

    Never split small M (avoids tiny MXU tiles + per-step overhead); for large
    M pick the biggest multiple-of-8 divisor <= cap (VMEM is nowhere near
    binding at cap=512 on any generation).
    """
    if M <= cap:
        return M
    for tm in range(cap, 0, -8):          # multiples of 8 only
        if M % tm == 0:
            return tm
    return M                               # fall back to a single full block


# ----------------------------- Pallas kernels ------------------------------
def _attn_block_kernel(x_ref, wqkv_ref, bqkv_ref, wo_ref, bo_ref, g_ref, bb_ref,
                       o_ref, *, scale):
    """One batch element: LN(x + MHA(x) @ Wo + bo).  x_ref: (L, D) f32."""
    x = x_ref[...]                                             # f32 residual
    qkv = jnp.dot(x.astype(jnp.bfloat16), wqkv_ref[...],
                  preferred_element_type=jnp.float32) + bqkv_ref[...]   # (L, 3D)
    q = qkv[:, 0:D_MODEL] * scale
    k = qkv[:, D_MODEL:2 * D_MODEL]
    v = qkv[:, 2 * D_MODEL:3 * D_MODEL]

    # Accumulate the output projection head-by-head so the concat'd context is
    # never materialized; start from residual + output-proj bias.
    acc = x + bo_ref[...]                                      # (L, D) f32
    for h in range(N_HEAD):
        lo = h * D_HEAD
        qh = q[:, lo:lo + D_HEAD].astype(jnp.bfloat16)         # (L, Dh)
        kh = k[:, lo:lo + D_HEAD].astype(jnp.bfloat16)
        vh = v[:, lo:lo + D_HEAD].astype(jnp.bfloat16)
        s = jax.lax.dot_general(qh, kh, (((1,), (1,)), ((), ())),
                                preferred_element_type=jnp.float32)     # (L, L)
        s = s - jnp.max(s, axis=-1, keepdims=True)
        p = jnp.exp(s)
        p = p * pl.reciprocal(jnp.sum(p, axis=-1, keepdims=True), approx=True)
        ctx_h = jnp.dot(p.astype(jnp.bfloat16), vh,
                        preferred_element_type=jnp.float32)             # (L, Dh)
        acc = acc + jnp.dot(ctx_h.astype(jnp.bfloat16),
                            wo_ref[lo:lo + D_HEAD, :],
                            preferred_element_type=jnp.float32)         # (L, D)

    mean = jnp.mean(acc, axis=-1, keepdims=True)
    c = acc - mean
    var = jnp.mean(c * c, axis=-1, keepdims=True)
    o_ref[...] = c * jax.lax.rsqrt(var + LN_EPS) * g_ref[...] + bb_ref[...]


def attention_block(x, wqkv, bqkv, wo, bo, gamma, beta, B, L):
    """Fused QKV + MHA + Wo + residual + LN.  x: (B*L, 512) f32."""
    M, D = x.shape
    kern = functools.partial(_attn_block_kernel, scale=1.0 / math.sqrt(D_HEAD))
    vec = lambda a: a.reshape(1, -1)
    flops = B * (2 * L * D * (3 * D)                 # QKV projection
                 + N_HEAD * 4 * L * L * D_HEAD       # scores + context
                 + 2 * L * D * D)                    # output projection
    bytes_accessed = (2 * M * D * 4                  # x in + out (f32)
                      + (D * 3 * D + D * D) * 2      # bf16 weights (read once)
                      + (3 * D + 3 * D) * 4)         # biases + LN params
    cost = pl.CostEstimate(flops=flops,
                           transcendentals=B * N_HEAD * L * L,
                           bytes_accessed=bytes_accessed)
    return pl.pallas_call(
        kern,
        out_shape=jax.ShapeDtypeStruct((M, D), jnp.float32),
        grid=(B,),
        in_specs=[
            pl.BlockSpec((L, D), lambda b: (b, 0)),
            pl.BlockSpec((D, 3 * D), lambda b: (0, 0)),
            pl.BlockSpec((1, 3 * D), lambda b: (0, 0)),
            pl.BlockSpec((D, D), lambda b: (0, 0)),
            pl.BlockSpec((1, D), lambda b: (0, 0)),
            pl.BlockSpec((1, D), lambda b: (0, 0)),
            pl.BlockSpec((1, D), lambda b: (0, 0)),
        ],
        out_specs=pl.BlockSpec((L, D), lambda b: (b, 0)),
        compiler_params=_cparams(1),
        cost_estimate=cost,
    )(x, wqkv, vec(bqkv), wo, vec(bo), vec(gamma), vec(beta))


def _ffn_ln_kernel(x_ref, w1_ref, b1_ref, w2_ref, b2_ref, g_ref, bb_ref, o_ref):
    x = x_ref[...]                                             # f32 residual
    h = jnp.dot(x.astype(jnp.bfloat16), w1_ref[...],
                preferred_element_type=jnp.float32)
    h = jnp.maximum(h + b1_ref[...], 0.0)
    y = jnp.dot(h.astype(jnp.bfloat16), w2_ref[...],
                preferred_element_type=jnp.float32)
    y = y + b2_ref[...] + x
    mean = jnp.mean(y, axis=-1, keepdims=True)
    c = y - mean
    var = jnp.mean(c * c, axis=-1, keepdims=True)
    o_ref[...] = c * jax.lax.rsqrt(var + LN_EPS) * g_ref[...] + bb_ref[...]


def ffn_residual_ln(x, w1, b1, w2, b2, gamma, beta):
    """LN(x + relu(x@w1+b1)@w2 + b2), fully fused; intermediate stays in VMEM."""
    M, D = x.shape
    DI = w1.shape[1]
    TM = _row_tile(M)
    vec = lambda a: a.reshape(1, -1)
    cost = pl.CostEstimate(
        flops=4 * M * D * DI,
        transcendentals=0,
        bytes_accessed=2 * M * D * 4 + 2 * (D * DI) * 2 + (DI + 3 * D) * 4,
    )
    return pl.pallas_call(
        _ffn_ln_kernel,
        out_shape=jax.ShapeDtypeStruct((M, D), jnp.float32),
        grid=(M // TM,),
        in_specs=[
            pl.BlockSpec((TM, D), lambda i: (i, 0)),
            pl.BlockSpec((D, DI), lambda i: (0, 0)),
            pl.BlockSpec((1, DI), lambda i: (0, 0)),
            pl.BlockSpec((DI, D), lambda i: (0, 0)),
            pl.BlockSpec((1, D), lambda i: (0, 0)),
            pl.BlockSpec((1, D), lambda i: (0, 0)),
            pl.BlockSpec((1, D), lambda i: (0, 0)),
        ],
        out_specs=pl.BlockSpec((TM, D), lambda i: (i, 0)),
        compiler_params=_cparams(1),
        cost_estimate=cost,
    )(x, w1, vec(b1), w2, vec(b2), vec(gamma), vec(beta))


# ----------------------------- model forward -------------------------------
def encoder_layer(x, p, B, L):
    """Post-LN Transformer encoder layer on x:(B*L, D_MODEL) f32. 2 pallas_calls."""
    # dropout(p=0.1) is identity in eval mode.
    x = attention_block(x, p["wqkv"], p["bqkv"], p["wo"], p["bo"],
                        p["ln1_g"], p["ln1_b"], B, L)
    x = ffn_residual_ln(x, p["w1"], p["b1"], p["w2"], p["b2"],
                        p["ln2_g"], p["ln2_b"])
    return x


def transformer_classifier_forward(params, input_ids):
    B, L = input_ids.shape
    # Embedding lookup + sinusoidal positional encoding (glue, plain JAX).
    # TODO(synk): no src padding mask / embedding sqrt(d_model) scaling — the
    # reference `transformer` package is not provided to confirm either.
    x = jnp.take(params["emb"], input_ids, axis=0).astype(jnp.float32)  # (B,L,D)
    x = x + params["pos"][None, :L, :]
    x = x.reshape(B * L, D_MODEL)
    for lp in params["layers"]:
        x = encoder_layer(x, lp, B, L)
    seq = x.reshape(B, L, D_MODEL)  # sequence_heatmap
    # TODO(synk): reference `transformer` package unavailable; `sent` is taken
    # as the mean-pooled encoder output over the sequence axis.
    sent = jnp.mean(seq, axis=1)  # (B, D_MODEL)
    # Tiny (B, 2) matmul stays in plain JAX (narrow Pallas out block would
    # force masked partial stores and a pointless launch).
    logits = sent @ params["fc_w"] + params["fc_b"]
    return logits


# ------------------------------ parameters ---------------------------------
def sinusoid_table(length, dim):
    pos = jnp.arange(length, dtype=jnp.float32)[:, None]
    i = jnp.arange(dim)[None, :]
    angle = pos / jnp.power(10000.0, (2 * (i // 2)).astype(jnp.float32) / dim)
    return jnp.where(i % 2 == 0, jnp.sin(angle), jnp.cos(angle)).astype(jnp.float32)


def init_params(key):
    scale = 0.02

    def nxt():
        nonlocal key
        key, sub = jax.random.split(key)
        return sub

    def dense(shape, dtype=jnp.bfloat16):
        return (scale * jax.random.normal(nxt(), shape, jnp.float32)).astype(dtype)

    params = {
        "emb": dense((VOCAB, D_MODEL)),                 # bf16: halves HBM traffic
        "pos": sinusoid_table(MAX_LEN, D_MODEL),
        "fc_w": dense((D_MODEL, N_CLASSES), jnp.float32),
        "fc_b": jnp.zeros((N_CLASSES,), jnp.float32),
        "layers": [],
    }
    for _ in range(N_LAYERS):
        wq = dense((D_MODEL, D_MODEL))
        wk = dense((D_MODEL, D_MODEL))
        wv = dense((D_MODEL, D_MODEL))
        params["layers"].append(
            {
                "wqkv": jnp.concatenate([wq, wk, wv], axis=1),   # (512, 1536) bf16
                "bqkv": jnp.zeros((3 * D_MODEL,), jnp.float32),
                "wo": dense((D_MODEL, D_MODEL)),
                "bo": jnp.zeros((D_MODEL,), jnp.float32),
                "ln1_g": jnp.ones((D_MODEL,), jnp.float32),
                "ln1_b": jnp.zeros((D_MODEL,), jnp.float32),
                "w1": dense((D_MODEL, D_INNER)),
                "b1": jnp.zeros((D_INNER,), jnp.float32),
                "w2": dense((D_INNER, D_MODEL)),
                "b2": jnp.zeros((D_MODEL,), jnp.float32),
                "ln2_g": jnp.ones((D_MODEL,), jnp.float32),
                "ln2_b": jnp.zeros((D_MODEL,), jnp.float32),
            }
        )
    return params


if __name__ == "__main__":
    root = jax.random.PRNGKey(0)
    pkey, ikey = jax.random.split(root)
    params = init_params(pkey)

    B, L = 2, 16  # small seq (<= max_length=128); L must be a multiple of 8
    input_ids = jax.random.randint(ikey, (B, L), 0, VOCAB, dtype=jnp.int32)

    fwd = jax.jit(transformer_classifier_forward)
    logits = fwd(params, input_ids)
    jax.block_until_ready(logits)
    assert logits.shape == (B, N_CLASSES) and logits.dtype == jnp.float32
    print("KERNEL_OK")
</pallas_src>

<mosaic_0001>
module attributes {stable_mosaic.version = 11 : i64} {
  func.func @_ffn_ln_kernel(%arg0: i32, %arg1: memref<32x512xf32, #tpu.memory_space<vmem>>, %arg2: memref<512x1024xbf16, #tpu.memory_space<vmem>>, %arg3: memref<1x1024xf32, #tpu.memory_space<vmem>>, %arg4: memref<1024x512xbf16, #tpu.memory_space<vmem>>, %arg5: memref<1x512xf32, #tpu.memory_space<vmem>>, %arg6: memref<1x512xf32, #tpu.memory_space<vmem>>, %arg7: memref<1x512xf32, #tpu.memory_space<vmem>>, %arg8: memref<32x512xf32, #tpu.memory_space<vmem>>) attributes {dimension_semantics = [#tpu.dimension_semantics<parallel>], iteration_bounds = array<i64: 1>, scalar_prefetch = 0 : i64, scratch_operands = 0 : i64, tpu.core_type = #tpu.core_type<tc>, window_params = [{transform_indices = @transform_0, window_bounds = array<i64: 32, 512>}, {pipeline_mode = #tpu.pipeline_mode<synchronous>, transform_indices = @transform_1, window_bounds = array<i64: 512, 1024>}, {pipeline_mode = #tpu.pipeline_mode<synchronous>, transform_indices = @transform_2, window_bounds = array<i64: 1, 1024>}, {pipeline_mode = #tpu.pipeline_mode<synchronous>, transform_indices = @transform_3, window_bounds = array<i64: 1024, 512>}, {pipeline_mode = #tpu.pipeline_mode<synchronous>, transform_indices = @transform_4, window_bounds = array<i64: 1, 512>}, {pipeline_mode = #tpu.pipeline_mode<synchronous>, transform_indices = @transform_5, window_bounds = array<i64: 1, 512>}, {pipeline_mode = #tpu.pipeline_mode<synchronous>, transform_indices = @transform_6, window_bounds = array<i64: 1, 512>}, {transform_indices = @transform_7, window_bounds = array<i64: 32, 512>}]} {
    %c0 = arith.constant 0 : index
    %c0_0 = arith.constant 0 : index
    %0 = vector.load %arg1[%c0, %c0_0] : memref<32x512xf32, #tpu.memory_space<vmem>>, vector<32x512xf32>
    %1 = arith.truncf %0 : vector<32x512xf32> to vector<32x512xbf16>
    %c0_1 = arith.constant 0 : index
    %c0_2 = arith.constant 0 : index
    %2 = vector.load %arg2[%c0_1, %c0_2] : memref<512x1024xbf16, #tpu.memory_space<vmem>>, vector<512x1024xbf16>
    %cst = arith.constant dense<0.000000e+00> : vector<32x1024xf32>
    %3 = tpu.matmul %1, %2, %cst {dimension_numbers = #tpu.dot_dimension_numbers<[1], [0], [0], [1], [0, 0, 1, 1], [], []>} : vector<32x512xbf16>, vector<512x1024xbf16>, vector<32x1024xf32> -> vector<32x1024xf32>
    %c0_3 = arith.constant 0 : index
    %c0_4 = arith.constant 0 : index
    %4 = vector.load %arg3[%c0_3, %c0_4] : memref<1x1024xf32, #tpu.memory_space<vmem>>, vector<1x1024xf32>
    %5 = vector.broadcast %4 : vector<1x1024xf32> to vector<32x1024xf32>
    %6 = arith.addf %3, %5 : vector<32x1024xf32>
    %cst_5 = arith.constant 0.000000e+00 : f32
    %7 = vector.broadcast %cst_5 : f32 to vector<32x1024xf32>
    %8 = arith.maximumf %6, %7 : vector<32x1024xf32>
    %9 = arith.truncf %8 : vector<32x1024xf32> to vector<32x1024xbf16>
    %c0_6 = arith.constant 0 : index
    %c0_7 = arith.constant 0 : index
    %10 = vector.load %arg4[%c0_6, %c0_7] : memref<1024x512xbf16, #tpu.memory_space<vmem>>, vector<1024x512xbf16>
    %cst_8 = arith.constant dense<0.000000e+00> : vector<32x512xf32>
    %11 = tpu.matmul %9, %10, %cst_8 {dimension_numbers = #tpu.dot_dimension_numbers<[1], [0], [0], [1], [0, 0, 1, 1], [], []>} : vector<32x1024xbf16>, vector<1024x512xbf16>, vector<32x512xf32> -> vector<32x512xf32>
    %c0_9 = arith.constant 0 : index
    %c0_10 = arith.constant 0 : index
    %12 = vector.load %arg5[%c0_9, %c0_10] : memref<1x512xf32, #tpu.memory_space<vmem>>, vector<1x512xf32>
    %13 = vector.broadcast %12 : vector<1x512xf32> to vector<32x512xf32>
    %14 = arith.addf %11, %13 : vector<32x512xf32>
    %15 = arith.addf %14, %0 : vector<32x512xf32>
    %cst_11 = arith.constant dense<0.000000e+00> : vector<32xf32>
    %16 = vector.multi_reduction <add>, %15, %cst_11 [1] : vector<32x512xf32> to vector<32xf32>
    %17 = vector.shape_cast %16 : vector<32xf32> to vector<32x1xf32>
    %cst_12 = arith.constant 5.120000e+02 : f32
    %18 = vector.broadcast %cst_12 : f32 to vector<32x1xf32>
    %19 = arith.divf %17, %18 : vector<32x1xf32>
    %20 = vector.broadcast %19 : vector<32x1xf32> to vector<32x512xf32>
    %21 = arith.subf %15, %20 : vector<32x512xf32>
    %22 = arith.mulf %21, %21 : vector<32x512xf32>
    %cst_13 = arith.constant dense<0.000000e+00> : vector<32xf32>
    %23 = vector.multi_reduction <add>, %22, %cst_13 [1] : vector<32x512xf32> to vector<32xf32>
    %24 = vector.shape_cast %23 : vector<32xf32> to vector<32x1xf32>
    %cst_14 = arith.constant 5.120000e+02 : f32
    %25 = vector.broadcast %cst_14 : f32 to vector<32x1xf32>
    %26 = arith.divf %24, %25 : vector<32x1xf32>
    %cst_15 = arith.constant 9.99999974E-6 : f32
    %27 = vector.broadcast %cst_15 : f32 to vector<32x1xf32>
    %28 = arith.addf %26, %27 : vector<32x1xf32>
    %29 = math.rsqrt %28 : vector<32x1xf32>
    %30 = vector.broadcast %29 : vector<32x1xf32> to vector<32x512xf32>
    %31 = arith.mulf %21, %30 : vector<32x512xf32>
    %c0_16 = arith.constant 0 : index
    %c0_17 = arith.constant 0 : index
    %32 = vector.load %arg6[%c0_16, %c0_17] : memref<1x512xf32, #tpu.memory_space<vmem>>, vector<1x512xf32>
    %33 = vector.broadcast %32 : vector<1x512xf32> to vector<32x512xf32>
    %34 = arith.mulf %31, %33 : vector<32x512xf32>
    %c0_18 = arith.constant 0 : index
    %c0_19 = arith.constant 0 : index
    %35 = vector.load %arg7[%c0_18, %c0_19] : memref<1x512xf32, #tpu.memory_space<vmem>>, vector<1x512xf32>
    %36 = vector.broadcast %35 : vector<1x512xf32> to vector<32x512xf32>
    %37 = arith.addf %34, %36 : vector<32x512xf32>
    %c0_20 = arith.constant 0 : index
    %c0_21 = arith.constant 0 : index
    %38 = vector.load %arg8[%c0_20, %c0_21] : memref<32x512xf32, #tpu.memory_space<vmem>>, vector<32x512xf32>
    tpu.vector_store %arg8[%c0_20, %c0_21], %37 {strides = array<i32>} : memref<32x512xf32, #tpu.memory_space<vmem>>, vector<32x512xf32>,
    return
  }
  func.func @transform_0(%arg0: i32) -> (i32, i32) {
    %c0_i32 = arith.constant 0 : i32
    %c0_i32_0 = arith.constant 0 : i32
    return %arg0, %c0_i32 : i32, i32
  }
  func.func @transform_1(%arg0: i32) -> (i32, i32) {
    %c0_i32 = arith.constant 0 : i32
    %c0_i32_0 = arith.constant 0 : i32
    %c0_i32_1 = arith.constant 0 : i32
    return %c0_i32, %c0_i32_0 : i32, i32
  }
  func.func @transform_2(%arg0: i32) -> (i32, i32) {
    %c0_i32 = arith.constant 0 : i32
    %c0_i32_0 = arith.constant 0 : i32
    %c0_i32_1 = arith.constant 0 : i32
    return %c0_i32, %c0_i32_0 : i32, i32
  }
  func.func @transform_3(%arg0: i32) -> (i32, i32) {
    %c0_i32 = arith.constant 0 : i32
    %c0_i32_0 = arith.constant 0 : i32
    %c0_i32_1 = arith.constant 0 : i32
    return %c0_i32, %c0_i32_0 : i32, i32
  }
  func.func @transform_4(%arg0: i32) -> (i32, i32) {
    %c0_i32 = arith.constant 0 : i32
    %c0_i32_0 = arith.constant 0 : i32
    %c0_i32_1 = arith.constant 0 : i32
    return %c0_i32, %c0_i32_0 : i32, i32
  }
  func.func @transform_5(%arg0: i32) -> (i32, i32) {
    %c0_i32 = arith.constant 0 : i32
    %c0_i32_0 = arith.constant 0 : i32
    %c0_i32_1 = arith.constant 0 : i32
    return %c0_i32, %c0_i32_0 : i32, i32
  }
  func.func @transform_6(%arg0: i32) -> (i32, i32) {
    %c0_i32 = arith.constant 0 : i32
    %c0_i32_0 = arith.constant 0 : i32
    %c0_i32_1 = arith.constant 0 : i32
    return %c0_i32, %c0_i32_0 : i32, i32
  }
  func.func @transform_7(%arg0: i32) -> (i32, i32) {
    %c0_i32 = arith.constant 0 : i32
    %c0_i32_0 = arith.constant 0 : i32
    return %arg0, %c0_i32 : i32, i32
  }
}

module attributes {stable_mosaic.version = 11 : i64} {
  func.func @_attn_block_kernel(%arg0: i32, %arg1: memref<16x512xf32, #tpu.memory_space<vmem>>, %arg2: memref<512x1536xbf16, #tpu.memory_space<vmem>>, %arg3: memref<1x1536xf32, #tpu.memory_space<vmem>>, %arg4: memref<512x512xbf16, #tpu.memory_space<vmem>>, %arg5: memref<1x512xf32, #tpu.memory_space<vmem>>, %arg6: memref<1x512xf32, #tpu.memory_space<vmem>>, %arg7: memref<1x512xf32, #tpu.memory_space<vmem>>, %arg8: memref<16x512xf32, #tpu.memory_space<vmem>>) attributes {dimension_semantics = [#tpu.dimension_semantics<parallel>], iteration_bounds = array<i64: 2>, scalar_prefetch = 0 : i64, scratch_operands = 0 : i64, tpu.core_type = #tpu.core_type<tc>, window_params = [{transform_indices = @transform_0, window_bounds = array<i64: 16, 512>}, {pipeline_mode = #tpu.pipeline_mode<synchronous>, transform_indices = @transform_1, window_bounds = array<i64: 512, 1536>}, {pipeline_mode = #tpu.pipeline_mode<synchronous>, transform_indices = @transform_2, window_bounds = array<i64: 1, 1536>}, {pipeline_mode = #tpu.pipeline_mode<synchronous>, transform_indices = @transform_3, window_bounds = array<i64: 512, 512>}, {pipeline_mode = #tpu.pipeline_mode<synchronous>, transform_indices = @transform_4, window_bounds = array<i64: 1, 512>}, {pipeline_mode = #tpu.pipeline_mode<synchronous>, transform_indices = @transform_5, window_bounds = array<i64: 1, 512>}, {pipeline_mode = #tpu.pipeline_mode<synchronous>, transform_indices = @transform_6, window_bounds = array<i64: 1, 512>}, {transform_indices = @transform_7, window_bounds = array<i64: 16, 512>}]} {
    %c0 = arith.constant 0 : index
    %c0_0 = arith.constant 0 : index
    %0 = vector.load %arg1[%c0, %c0_0] : memref<16x512xf32, #tpu.memory_space<vmem>>, vector<16x512xf32>
    %1 = arith.truncf %0 : vector<16x512xf32> to vector<16x512xbf16>
    %c0_1 = arith.constant 0 : index
    %c0_2 = arith.constant 0 : index
    %2 = vector.load %arg2[%c0_1, %c0_2] : memref<512x1536xbf16, #tpu.memory_space<vmem>>, vector<512x1536xbf16>
    %cst = arith.constant dense<0.000000e+00> : vector<16x1536xf32>
    %3 = tpu.matmul %1, %2, %cst {dimension_numbers = #tpu.dot_dimension_numbers<[1], [0], [0], [1], [0, 0, 1, 1], [], []>} : vector<16x512xbf16>, vector<512x1536xbf16>, vector<16x1536xf32> -> vector<16x1536xf32>
    %c0_3 = arith.constant 0 : index
    %c0_4 = arith.constant 0 : index
    %4 = vector.load %arg3[%c0_3, %c0_4] : memref<1x1536xf32, #tpu.memory_space<vmem>>, vector<1x1536xf32>
    %5 = vector.broadcast %4 : vector<1x1536xf32> to vector<16x1536xf32>
    %6 = arith.addf %3, %5 : vector<16x1536xf32>
    %7 = vector.extract_strided_slice %6 {offsets = [0, 0], sizes = [16, 512], strides = [1, 1]} : vector<16x1536xf32> to vector<16x512xf32>
    %cst_5 = arith.constant 1.250000e-01 : f32
    %8 = vector.broadcast %cst_5 : f32 to vector<16x512xf32>
    %9 = arith.mulf %7, %8 : vector<16x512xf32>
    %10 = vector.extract_strided_slice %6 {offsets = [0, 512], sizes = [16, 512], strides = [1, 1]} : vector<16x1536xf32> to vector<16x512xf32>
    %11 = vector.extract_strided_slice %6 {offsets = [0, 1024], sizes = [16, 512], strides = [1, 1]} : vector<16x1536xf32> to vector<16x512xf32>
    %c0_6 = arith.constant 0 : index
    %c0_7 = arith.constant 0 : index
    %12 = vector.load %arg5[%c0_6, %c0_7] : memref<1x512xf32, #tpu.memory_space<vmem>>, vector<1x512xf32>
    %13 = vector.broadcast %12 : vector<1x512xf32> to vector<16x512xf32>
    %14 = arith.addf %0, %13 : vector<16x512xf32>
    %15 = vector.extract_strided_slice %9 {offsets = [0, 0], sizes = [16, 64], strides = [1, 1]} : vector<16x512xf32> to vector<16x64xf32>
    %16 = arith.truncf %15 : vector<16x64xf32> to vector<16x64xbf16>
    %17 = vector.extract_strided_slice %10 {offsets = [0, 0], sizes = [16, 64], strides = [1, 1]} : vector<16x512xf32> to vector<16x64xf32>
    %18 = arith.truncf %17 : vector<16x64xf32> to vector<16x64xbf16>
    %19 = vector.extract_strided_slice %11 {offsets = [0, 0], sizes = [16, 64], strides = [1, 1]} : vector<16x512xf32> to vector<16x64xf32>
    %20 = arith.truncf %19 : vector<16x64xf32> to vector<16x64xbf16>
    %cst_8 = arith.constant dense<0.000000e+00> : vector<16x16xf32>
    %21 = tpu.matmul %16, %18, %cst_8 {dimension_numbers = #tpu.dot_dimension_numbers<[1], [1], [0], [0], [0, 0, 1, 0], [], []>} : vector<16x64xbf16>, vector<16x64xbf16>, vector<16x16xf32> -> vector<16x16xf32>
    %cst_9 = arith.constant dense<0xFF800000> : vector<16xf32>
    %22 = vector.multi_reduction <maximumf>, %21, %cst_9 [1] : vector<16x16xf32> to vector<16xf32>
    %23 = vector.shape_cast %22 : vector<16xf32> to vector<16x1xf32>
    %24 = vector.broadcast %23 : vector<16x1xf32> to vector<16x16xf32>
    %25 = arith.subf %21, %24 : vector<16x16xf32>
    %26 = math.exp %25 : vector<16x16xf32>
    %cst_10 = arith.constant dense<0.000000e+00> : vector<16xf32>
    %27 = vector.multi_reduction <add>, %26, %cst_10 [1] : vector<16x16xf32> to vector<16xf32>
    %28 = vector.shape_cast %27 : vector<16xf32> to vector<16x1xf32>
    %29 = tpu.reciprocal %28 {approx = true} : vector<16x1xf32> -> vector<16x1xf32>
    %30 = vector.broadcast %29 : vector<16x1xf32> to vector<16x16xf32>
    %31 = arith.mulf %26, %30 : vector<16x16xf32>
    %32 = arith.truncf %31 : vector<16x16xf32> to vector<16x16xbf16>
    %cst_11 = arith.constant dense<0.000000e+00> : vector<16x64xf32>
    %33 = tpu.matmul %32, %20, %cst_11 {dimension_numbers = #tpu.dot_dimension_numbers<[1], [0], [0], [1], [0, 0, 1, 1], [], []>} : vector<16x16xbf16>, vector<16x64xbf16>, vector<16x64xf32> -> vector<16x64xf32>
    %34 = arith.truncf %33 : vector<16x64xf32> to vector<16x64xbf16>
    %c0_12 = arith.constant 0 : index
    %c0_13 = arith.constant 0 : index
    %35 = vector.load %arg4[%c0_12, %c0_13] : memref<512x512xbf16, #tpu.memory_space<vmem>>, vector<64x512xbf16>
    %cst_14 = arith.constant dense<0.000000e+00> : vector<16x512xf32>
    %36 = tpu.matmul %34, %35, %cst_14 {dimension_numbers = #tpu.dot_dimension_numbers<[1], [0], [0], [1], [0, 0, 1, 1], [], []>} : vector<16x64xbf16>, vector<64x512xbf16>, vector<16x512xf32> -> vector<16x512xf32>
    %37 = arith.addf %14, %36 : vector<16x512xf32>
    %38 = vector.extract_strided_slice %9 {offsets = [0, 64], sizes = [16, 64], strides = [1, 1]} : vector<16x512xf32> to vector<16x64xf32>
    %39 = arith.truncf %38 : vector<16x64xf32> to vector<16x64xbf16>
    %40 = vector.extract_strided_slice %10 {offsets = [0, 64], sizes = [16, 64], strides = [1, 1]} : vector<16x512xf32> to vector<16x64xf32>
    %41 = arith.truncf %40 : vector<16x64xf32> to vector<16x64xbf16>
    %42 = vector.extract_strided_slice %11 {offsets = [0, 64], sizes = [16, 64], strides = [1, 1]} : vector<16x512xf32> to vector<16x64xf32>
    %43 = arith.truncf %42 : vector<16x64xf32> to vector<16x64xbf16>
    %cst_15 = arith.constant dense<0.000000e+00> : vector<16x16xf32>
    %44 = tpu.matmul %39, %41, %cst_15 {dimension_numbers = #tpu.dot_dimension_numbers<[1], [1], [0], [0], [0, 0, 1, 0], [], []>} : vector<16x64xbf16>, vector<16x64xbf16>, vector<16x16xf32> -> vector<16x16xf32>
    %cst_16 = arith.constant dense<0xFF800000> : vector<16xf32>
    %45 = vector.multi_reduction <maximumf>, %44, %cst_16 [1] : vector<16x16xf32> to vector<16xf32>
    %46 = vector.shape_cast %45 : vector<16xf32> to vector<16x1xf32>
    %47 = vector.broadcast %46 : vector<16x1xf32> to vector<16x16xf32>
    %48 = arith.subf %44, %47 : vector<16x16xf32>
    %49 = math.exp %48 : vector<16x16xf32>
    %cst_17 = arith.constant dense<0.000000e+00> : vector<16xf32>
    %50 = vector.multi_reduction <add>, %49, %cst_17 [1] : vector<16x16xf32> to vector<16xf32>
    %51 = vector.shape_cast %50 : vector<16xf32> to vector<16x1xf32>
    %52 = tpu.reciprocal %51 {approx = true} : vector<16x1xf32> -> vector<16x1xf32>
    %53 = vector.broadcast %52 : vector<16x1xf32> to vector<16x16xf32>
    %54 = arith.mulf %49, %53 : vector<16x16xf32>
    %55 = arith.truncf %54 : vector<16x16xf32> to vector<16x16xbf16>
    %cst_18 = arith.constant dense<0.000000e+00> : vector<16x64xf32>
    %56 = tpu.matmul %55, %43, %cst_18 {dimension_numbers = #tpu.dot_dimension_numbers<[1], [0], [0], [1], [0, 0, 1, 1], [], []>} : vector<16x16xbf16>, vector<16x64xbf16>, vector<16x64xf32> -> vector<16x64xf32>
    %57 = arith.truncf %56 : vector<16x64xf32> to vector<16x64xbf16>
    %c64 = arith.constant 64 : index
    %c0_19 = arith.constant 0 : index
    %58 = vector.load %arg4[%c64, %c0_19] : memref<512x512xbf16, #tpu.memory_space<vmem>>, vector<64x512xbf16>
    %cst_20 = arith.constant dense<0.000000e+00> : vector<16x512xf32>
    %59 = tpu.matmul %57, %58, %cst_20 {dimension_numbers = #tpu.dot_dimension_numbers<[1], [0], [0], [1], [0, 0, 1, 1], [], []>} : vector<16x64xbf16>, vector<64x512xbf16>, vector<16x512xf32> -> vector<16x512xf32>
    %60 = arith.addf %37, %59 : vector<16x512xf32>
    %61 = vector.extract_strided_slice %9 {offsets = [0, 128], sizes = [16, 64], strides = [1, 1]} : vector<16x512xf32> to vector<16x64xf32>
    %62 = arith.truncf %61 : vector<16x64xf32> to vector<16x64xbf16>
    %63 = vector.extract_strided_slice %10 {offsets = [0, 128], sizes = [16, 64], strides = [1, 1]} : vector<16x512xf32> to vector<16x64xf32>
    %64 = arith.truncf %63 : vector<16x64xf32> to vector<16x64xbf16>
    %65 = vector.extract_strided_slice %11 {offsets = [0, 128], sizes = [16, 64], strides = [1, 1]} : vector<16x512xf32> to vector<16x64xf32>
    %66 = arith.truncf %65 : vector<16x64xf32> to vector<16x64xbf16>
    %cst_21 = arith.constant dense<0.000000e+00> : vector<16x16xf32>
    %67 = tpu.matmul %62, %64, %cst_21 {dimension_numbers = #tpu.dot_dimension_numbers<[1], [1], [0], [0], [0, 0, 1, 0], [], []>} : vector<16x64xbf16>, vector<16x64xbf16>, vector<16x16xf32> -> vector<16x16xf32>
    %cst_22 = arith.constant dense<0xFF800000> : vector<16xf32>
    %68 = vector.multi_reduction <maximumf>, %67, %cst_22 [1] : vector<16x16xf32> to vector<16xf32>
    %69 = vector.shape_cast %68 : vector<16xf32> to vector<16x1xf32>
    %70 = vector.broadcast %69 : vector<16x1xf32> to vector<16x16xf32>
    %71 = arith.subf %67, %70 : vector<16x16xf32>
    %72 = math.exp %71 : vector<16x16xf32>
    %cst_23 = arith.constant dense<0.000000e+00> : vector<16xf32>
    %73 = vector.multi_reduction <add>, %72, %cst_23 [1] : vector<16x16xf32> to vector<16xf32>
    %74 = vector.shape_cast %73 : vector<16xf32> to vector<16x1xf32>
    %75 = tpu.reciprocal %74 {approx = true} : vector<16x1xf32> -> vector<16x1xf32>
    %76 = vector.broadcast %75 : vector<16x1xf32> to vector<16x16xf32>
    %77 = arith.mulf %72, %76 : vector<16x16xf32>
    %78 = arith.truncf %77 : vector<16x16xf32> to vector<16x16xbf16>
    %cst_24 = arith.constant dense<0.000000e+00> : vector<16x64xf32>
    %79 = tpu.matmul %78, %66, %cst_24 {dimension_numbers = #tpu.dot_dimension_numbers<[1], [0], [0], [1], [0, 0, 1, 1], [], []>} : vector<16x16xbf16>, vector<16x64xbf16>, vector<16x64xf32> -> vector<16x64xf32>
    %80 = arith.truncf %79 : vector<16x64xf32> to vector<16x64xbf16>
    %c128 = arith.constant 128 : index
    %c0_25 = arith.constant 0 : index
    %81 = vector.load %arg4[%c128, %c0_25] : memref<512x512xbf16, #tpu.memory_space<vmem>>, vector<64x512xbf16>
    %cst_26 = arith.constant dense<0.000000e+00> : vector<16x512xf32>
    %82 = tpu.matmul %80, %81, %cst_26 {dimension_numbers = #tpu.dot_dimension_numbers<[1], [0], [0], [1], [0, 0, 1, 1], [], []>} : vector<16x64xbf16>, vector<64x512xbf16>, vector<16x512xf32> -> vector<16x512xf32>
    %83 = arith.addf %60, %82 : vector<16x512xf32>
    %84 = vector.extract_strided_slice %9 {offsets = [0, 192], sizes = [16, 64], strides = [1, 1]} : vector<16x512xf32> to vector<16x64xf32>
    %85 = arith.truncf %84 : vector<16x64xf32> to vector<16x64xbf16>
    %86 = vector.extract_strided_slice %10 {offsets = [0, 192], sizes = [16, 64], strides = [1, 1]} : vector<16x512xf32> to vector<16x64xf32>
    %87 = arith.truncf %86 : vector<16x64xf32> to vector<16x64xbf16>
    %88 = vector.extract_strided_slice %11 {offsets = [0, 192], sizes = [16, 64], strides = [1, 1]} : vector<16x512xf32> to vector<16x64xf32>
    %89 = arith.truncf %88 : vector<16x64xf32> to vector<16x64xbf16>
    %cst_27 = arith.constant dense<0.000000e+00> : vector<16x16xf32>
    %90 = tpu.matmul %85, %87, %cst_27 {dimension_numbers = #tpu.dot_dimension_numbers<[1], [1], [0], [0], [0, 0, 1, 0], [], []>} : vector<16x64xbf16>, vector<16x64xbf16>, vector<16x16xf32> -> vector<16x16xf32>
    %cst_28 = arith.constant dense<0xFF800000> : vector<16xf32>
    %91 = vector.multi_reduction <maximumf>, %90, %cst_28 [1] : vector<16x16xf32> to vector<16xf32>
    %92 = vector.shape_cast %91 : vector<16xf32> to vector<16x1xf32>
    %93 = vector.broadcast %92 : vector<16x1xf32> to vector<16x16xf32>
    %94 = arith.subf %90, %93 : vector<16x16xf32>
    %95 = math.exp %94 : vector<16x16xf32>
    %cst_29 = arith.constant dense<0.000000e+00> : vector<16xf32>
    %96 = vector.multi_reduction <add>, %95, %cst_29 [1] : vector<16x16xf32> to vector<16xf32>
    %97 = vector.shape_cast %96 : vector<16xf32> to vector<16x1xf32>
    %98 = tpu.reciprocal %97 {approx = true} : vector<16x1xf32> -> vector<16x1xf32>
    %99 = vector.broadcast %98 : vector<16x1xf32> to vector<16x16xf32>
    %100 = arith.mulf %95, %99 : vector<16x16xf32>
    %101 = arith.truncf %100 : vector<16x16xf32> to vector<16x16xbf16>
    %cst_30 = arith.constant dense<0.000000e+00> : vector<16x64xf32>
    %102 = tpu.matmul %101, %89, %cst_30 {dimension_numbers = #tpu.dot_dimension_numbers<[1], [0], [0], [1], [0, 0, 1, 1], [], []>} : vector<16x16xbf16>, vector<16x64xbf16>, vector<16x64xf32> -> vector<16x64xf32>
    %103 = arith.truncf %102 : vector<16x64xf32> to vector<16x64xbf16>
    %c192 = arith.constant 192 : index
    %c0_31 = arith.constant 0 : index
    %104 = vector.load %arg4[%c192, %c0_31] : memref<512x512xbf16, #tpu.memory_space<vmem>>, vector<64x512xbf16>
    %cst_32 = arith.constant dense<0.000000e+00> : vector<16x512xf32>
    %105 = tpu.matmul %103, %104, %cst_32 {dimension_numbers = #tpu.dot_dimension_numbers<[1], [0], [0], [1], [0, 0, 1, 1], [], []>} : vector<16x64xbf16>, vector<64x512xbf16>, vector<16x512xf32> -> vector<16x512xf32>
    %106 = arith.addf %83, %105 : vector<16x512xf32>
    %107 = vector.extract_strided_slice %9 {offsets = [0, 256], sizes = [16, 64], strides = [1, 1]} : vector<16x512xf32> to vector<16x64xf32>
    %108 = arith.truncf %107 : vector<16x64xf32> to vector<16x64xbf16>
    %109 = vector.extract_strided_slice %10 {offsets = [0, 256], sizes = [16, 64], strides = [1, 1]} : vector<16x512xf32> to vector<16x64xf32>
    %110 = arith.truncf %109 : vector<16x64xf32> to vector<16x64xbf16>
    %111 = vector.extract_strided_slice %11 {offsets = [0, 256], sizes = [16, 64], strides = [1, 1]} : vector<16x512xf32> to vector<16x64xf32>
    %112 = arith.truncf %111 : vector<16x64xf32> to vector<16x64xbf16>
    %cst_33 = arith.constant dense<0.000000e+00> : vector<16x16xf32>
    %113 = tpu.matmul %108, %110, %cst_33 {dimension_numbers = #tpu.dot_dimension_numbers<[1], [1], [0], [0], [0, 0, 1, 0], [], []>} : vector<16x64xbf16>, vector<16x64xbf16>, vector<16x16xf32> -> vector<16x16xf32>
    %cst_34 = arith.constant dense<0xFF800000> : vector<16xf32>
    %114 = vector.multi_reduction <maximumf>, %113, %cst_34 [1] : vector<16x16xf32> to vector<16xf32>
    %115 = vector.shape_cast %114 : vector<16xf32> to vector<16x1xf32>
    %116 = vector.broadcast %115 : vector<16x1xf32> to vector<16x16xf32>
    %117 = arith.subf %113, %116 : vector<16x16xf32>
    %118 = math.exp %117 : vector<16x16xf32>
    %cst_35 = arith.constant dense<0.000000e+00> : vector<16xf32>
    %119 = vector.multi_reduction <add>, %118, %cst_35 [1] : vector<16x16xf32> to vector<16xf32>
    %120 = vector.shape_cast %119 : vector<16xf32> to vector<16x1xf32>
    %121 = tpu.reciprocal %120 {approx = true} : vector<16x1xf32> -> vector<16x1xf32>
    %122 = vector.broadcast %121 : vector<16x1xf32> to vector<16x16xf32>
    %123 = arith.mulf %118, %122 : vector<16x16xf32>
    %124 = arith.truncf %123 : vector<16x16xf32> to vector<16x16xbf16>
    %cst_36 = arith.constant dense<0.000000e+00> : vector<16x64xf32>
    %125 = tpu.matmul %124, %112, %cst_36 {dimension_numbers = #tpu.dot_dimension_numbers<[1], [0], [0], [1], [0, 0, 1, 1], [], []>} : vector<16x16xbf16>, vector<16x64xbf16>, vector<16x64xf32> -> vector<16x64xf32>
    %126 = arith.truncf %125 : vector<16x64xf32> to vector<16x64xbf16>
    %c256 = arith.constant 256 : index
    %c0_37 = arith.constant 0 : index
    %127 = vector.load %arg4[%c256, %c0_37] : memref<512x512xbf16, #tpu.memory_space<vmem>>, vector<64x512xbf16>
    %cst_38 = arith.constant dense<0.000000e+00> : vector<16x512xf32>
    %128 = tpu.matmul %126, %127, %cst_38 {dimension_numbers = #tpu.dot_dimension_numbers<[1], [0], [0], [1], [0, 0, 1, 1], [], []>} : vector<16x64xbf16>, vector<64x512xbf16>, vector<16x512xf32> -> vector<16x512xf32>
    %129 = arith.addf %106, %128 : vector<16x512xf32>
    %130 = vector.extract_strided_slice %9 {offsets = [0, 320], sizes = [16, 64], strides = [1, 1]} : vector<16x512xf32> to vector<16x64xf32>
    %131 = arith.truncf %130 : vector<16x64xf32> to vector<16x64xbf16>
    %132 = vector.extract_strided_slice %10 {offsets = [0, 320], sizes = [16, 64], strides = [1, 1]} : vector<16x512xf32> to vector<16x64xf32>
    %133 = arith.truncf %132 : vector<16x64xf32> to vector<16x64xbf16>
    %134 = vector.extract_strided_slice %11 {offsets = [0, 320], sizes = [16, 64], strides = [1, 1]} : vector<16x512xf32> to vector<16x64xf32>
    %135 = arith.truncf %134 : vector<16x64xf32> to vector<16x64xbf16>
    %cst_39 = arith.constant dense<0.000000e+00> : vector<16x16xf32>
    %136 = tpu.matmul %131, %133, %cst_39 {dimension_numbers = #tpu.dot_dimension_numbers<[1], [1], [0], [0], [0, 0, 1, 0], [], []>} : vector<16x64xbf16>, vector<16x64xbf16>, vector<16x16xf32> -> vector<16x16xf32>
    %cst_40 = arith.constant dense<0xFF800000> : vector<16xf32>
    %137 = vector.multi_reduction <maximumf>, %136, %cst_40 [1] : vector<16x16xf32> to vector<16xf32>
    %138 = vector.shape_cast %137 : vector<16xf32> to vector<16x1xf32>
    %139 = vector.broadcast %138 : vector<16x1xf32> to vector<16x16xf32>
    %140 = arith.subf %136, %139 : vector<16x16xf32>
    %141 = math.exp %140 : vector<16x16xf32>
    %cst_41 = arith.constant dense<0.000000e+00> : vector<16xf32>
    %142 = vector.multi_reduction <add>, %141, %cst_41 [1] : vector<16x16xf32> to vector<16xf32>
    %143 = vector.shape_cast %142 : vector<16xf32> to vector<16x1xf32>
    %144 = tpu.reciprocal %143 {approx = true} : vector<16x1xf32> -> vector<16x1xf32>
    %145 = vector.broadcast %144 : vector<16x1xf32> to vector<16x16xf32>
    %146 = arith.mulf %141, %145 : vector<16x16xf32>
    %147 = arith.truncf %146 : vector<16x16xf32> to vector<16x16xbf16>
    %cst_42 = arith.constant dense<0.000000e+00> : vector<16x64xf32>
    %148 = tpu.matmul %147, %135, %cst_42 {dimension_numbers = #tpu.dot_dimension_numbers<[1], [0], [0], [1], [0, 0, 1, 1], [], []>} : vector<16x16xbf16>, vector<16x64xbf16>, vector<16x64xf32> -> vector<16x64xf32>
    %149 = arith.truncf %148 : vector<16x64xf32> to vector<16x64xbf16>
    %c320 = arith.constant 320 : index
    %c0_43 = arith.constant 0 : index
    %150 = vector.load %arg4[%c320, %c0_43] : memref<512x512xbf16, #tpu.memory_space<vmem>>, vector<64x512xbf16>
    %cst_44 = arith.constant dense<0.000000e+00> : vector<16x512xf32>
    %151 = tpu.matmul %149, %150, %cst_44 {dimension_numbers = #tpu.dot_dimension_numbers<[1], [0], [0], [1], [0, 0, 1, 1], [], []>} : vector<16x64xbf16>, vector<64x512xbf16>, vector<16x512xf32> -> vector<16x512xf32>
    %152 = arith.addf %129, %151 : vector<16x512xf32>
    %153 = vector.extract_strided_slice %9 {offsets = [0, 384], sizes = [16, 64], strides = [1, 1]} : vector<16x512xf32> to vector<16x64xf32>
    %154 = arith.truncf %153 : vector<16x64xf32> to vector<16x64xbf16>
    %155 = vector.extract_strided_slice %10 {offsets = [0, 384], sizes = [16, 64], strides = [1, 1]} : vector<16x512xf32> to vector<16x64xf32>
    %156 = arith.truncf %155 : vector<16x64xf32> to vector<16x64xbf16>
    %157 = vector.extract_strided_slice %11 {offsets = [0, 384], sizes = [16, 64], strides = [1, 1]} : vector<16x512xf32> to vector<16x64xf32>
    %158 = arith.truncf %157 : vector<16x64xf32> to vector<16x64xbf16>
    %cst_45 = arith.constant dense<0.000000e+00> : vector<16x16xf32>
    %159 = tpu.matmul %154, %156, %cst_45 {dimension_numbers = #tpu.dot_dimension_numbers<[1], [1], [0], [0], [0, 0, 1, 0], [], []>} : vector<16x64xbf16>, vector<16x64xbf16>, vector<16x16xf32> -> vector<16x16xf32>
    %cst_46 = arith.constant dense<0xFF800000> : vector<16xf32>
    %160 = vector.multi_reduction <maximumf>, %159, %cst_46 [1] : vector<16x16xf32> to vector<16xf32>
    %161 = vector.shape_cast %160 : vector<16xf32> to vector<16x1xf32>
    %162 = vector.broadcast %161 : vector<16x1xf32> to vector<16x16xf32>
    %163 = arith.subf %159, %162 : vector<16x16xf32>
    %164 = math.exp %163 : vector<16x16xf32>
    %cst_47 = arith.constant dense<0.000000e+00> : vector<16xf32>
    %165 = vector.multi_reduction <add>, %164, %cst_47 [1] : vector<16x16xf32> to vector<16xf32>
    %166 = vector.shape_cast %165 : vector<16xf32> to vector<16x1xf32>
    %167 = tpu.reciprocal %166 {approx = true} : vector<16x1xf32> -> vector<16x1xf32>
    %168 = vector.broadcast %167 : vector<16x1xf32> to vector<16x16xf32>
    %169 = arith.mulf %164, %168 : vector<16x16xf32>
    %170 = arith.truncf %169 : vector<16x16xf32> to vector<16x16xbf16>
    %cst_48 = arith.constant dense<0.000000e+00> : vector<16x64xf32>
    %171 = tpu.matmul %170, %158, %cst_48 {dimension_numbers = #tpu.dot_dimension_numbers<[1], [0], [0], [1], [0, 0, 1, 1], [], []>} : vector<16x16xbf16>, vector<16x64xbf16>, vector<16x64xf32> -> vector<16x64xf32>
    %172 = arith.truncf %171 : vector<16x64xf32> to vector<16x64xbf16>
    %c384 = arith.constant 384 : index
    %c0_49 = arith.constant 0 : index
    %173 = vector.load %arg4[%c384, %c0_49] : memref<512x512xbf16, #tpu.memory_space<vmem>>, vector<64x512xbf16>
    %cst_50 = arith.constant dense<0.000000e+00> : vector<16x512xf32>
    %174 = tpu.matmul %172, %173, %cst_50 {dimension_numbers = #tpu.dot_dimension_numbers<[1], [0], [0], [1], [0, 0, 1, 1], [], []>} : vector<16x64xbf16>, vector<64x512xbf16>, vector<16x512xf32> -> vector<16x512xf32>
    %175 = arith.addf %152, %174 : vector<16x512xf32>
    %176 = vector.extract_strided_slice %9 {offsets = [0, 448], sizes = [16, 64], strides = [1, 1]} : vector<16x512xf32> to vector<16x64xf32>
    %177 = arith.truncf %176 : vector<16x64xf32> to vector<16x64xbf16>
    %178 = vector.extract_strided_slice %10 {offsets = [0, 448], sizes = [16, 64], strides = [1, 1]} : vector<16x512xf32> to vector<16x64xf32>
    %179 = arith.truncf %178 : vector<16x64xf32> to vector<16x64xbf16>
    %180 = vector.extract_strided_slice %11 {offsets = [0, 448], sizes = [16, 64], strides = [1, 1]} : vector<16x512xf32> to vector<16x64xf32>
    %181 = arith.truncf %180 : vector<16x64xf32> to vector<16x64xbf16>
    %cst_51 = arith.constant dense<0.000000e+00> : vector<16x16xf32>
    %182 = tpu.matmul %177, %179, %cst_51 {dimension_numbers = #tpu.dot_dimension_numbers<[1], [1], [0], [0], [0, 0, 1, 0], [], []>} : vector<16x64xbf16>, vector<16x64xbf16>, vector<16x16xf32> -> vector<16x16xf32>
    %cst_52 = arith.constant dense<0xFF800000> : vector<16xf32>
    %183 = vector.multi_reduction <maximumf>, %182, %cst_52 [1] : vector<16x16xf32> to vector<16xf32>
    %184 = vector.shape_cast %183 : vector<16xf32> to vector<16x1xf32>
    %185 = vector.broadcast %184 : vector<16x1xf32> to vector<16x16xf32>
    %186 = arith.subf %182, %185 : vector<16x16xf32>
    %187 = math.exp %186 : vector<16x16xf32>
    %cst_53 = arith.constant dense<0.000000e+00> : vector<16xf32>
    %188 = vector.multi_reduction <add>, %187, %cst_53 [1] : vector<16x16xf32> to vector<16xf32>
    %189 = vector.shape_cast %188 : vector<16xf32> to vector<16x1xf32>
    %190 = tpu.reciprocal %189 {approx = true} : vector<16x1xf32> -> vector<16x1xf32>
    %191 = vector.broadcast %190 : vector<16x1xf32> to vector<16x16xf32>
    %192 = arith.mulf %187, %191 : vector<16x16xf32>
    %193 = arith.truncf %192 : vector<16x16xf32> to vector<16x16xbf16>
    %cst_54 = arith.constant dense<0.000000e+00> : vector<16x64xf32>
    %194 = tpu.matmul %193, %181, %cst_54 {dimension_numbers = #tpu.dot_dimension_numbers<[1], [0], [0], [1], [0, 0, 1, 1], [], []>} : vector<16x16xbf16>, vector<16x64xbf16>, vector<16x64xf32> -> vector<16x64xf32>
    %195 = arith.truncf %194 : vector<16x64xf32> to vector<16x64xbf16>
    %c448 = arith.constant 448 : index
    %c0_55 = arith.constant 0 : index
    %196 = vector.load %arg4[%c448, %c0_55] : memref<512x512xbf16, #tpu.memory_space<vmem>>, vector<64x512xbf16>
    %cst_56 = arith.constant dense<0.000000e+00> : vector<16x512xf32>
    %197 = tpu.matmul %195, %196, %cst_56 {dimension_numbers = #tpu.dot_dimension_numbers<[1], [0], [0], [1], [0, 0, 1, 1], [], []>} : vector<16x64xbf16>, vector<64x512xbf16>, vector<16x512xf32> -> vector<16x512xf32>
    %198 = arith.addf %175, %197 : vector<16x512xf32>
    %cst_57 = arith.constant dense<0.000000e+00> : vector<16xf32>
    %199 = vector.multi_reduction <add>, %198, %cst_57 [1] : vector<16x512xf32> to vector<16xf32>
    %200 = vector.shape_cast %199 : vector<16xf32> to vector<16x1xf32>
    %cst_58 = arith.constant 5.120000e+02 : f32
    %201 = vector.broadcast %cst_58 : f32 to vector<16x1xf32>
    %202 = arith.divf %200, %201 : vector<16x1xf32>
    %203 = vector.broadcast %202 : vector<16x1xf32> to vector<16x512xf32>
    %204 = arith.subf %198, %203 : vector<16x512xf32>
    %205 = arith.mulf %204, %204 : vector<16x512xf32>
    %cst_59 = arith.constant dense<0.000000e+00> : vector<16xf32>
    %206 = vector.multi_reduction <add>, %205, %cst_59 [1] : vector<16x512xf32> to vector<16xf32>
    %207 = vector.shape_cast %206 : vector<16xf32> to vector<16x1xf32>
    %cst_60 = arith.constant 5.120000e+02 : f32
    %208 = vector.broadcast %cst_60 : f32 to vector<16x1xf32>
    %209 = arith.divf %207, %208 : vector<16x1xf32>
    %cst_61 = arith.constant 9.99999974E-6 : f32
    %210 = vector.broadcast %cst_61 : f32 to vector<16x1xf32>
    %211 = arith.addf %209, %210 : vector<16x1xf32>
    %212 = math.rsqrt %211 : vector<16x1xf32>
    %213 = vector.broadcast %212 : vector<16x1xf32> to vector<16x512xf32>
    %214 = arith.mulf %204, %213 : vector<16x512xf32>
    %c0_62 = arith.constant 0 : index
    %c0_63 = arith.constant 0 : index
    %215 = vector.load %arg6[%c0_62, %c0_63] : memref<1x512xf32, #tpu.memory_space<vmem>>, vector<1x512xf32>
    %216 = vector.broadcast %215 : vector<1x512xf32> to vector<16x512xf32>
    %217 = arith.mulf %214, %216 : vector<16x512xf32>
    %c0_64 = arith.constant 0 : index
    %c0_65 = arith.constant 0 : index
    %218 = vector.load %arg7[%c0_64, %c0_65] : memref<1x512xf32, #tpu.memory_space<vmem>>, vector<1x512xf32>
    %219 = vector.broadcast %218 : vector<1x512xf32> to vector<16x512xf32>
    %220 = arith.addf %217, %219 : vector<16x512xf32>
    %c0_66 = arith.constant 0 : index
    %c0_67 = arith.constant 0 : index
    %221 = vector.load %arg8[%c0_66, %c0_67] : memref<16x512xf32, #tpu.memory_space<vmem>>, vector<16x512xf32>
    tpu.vector_store %arg8[%c0_66, %c0_67], %220 {strides = array<i32>} : memref<16x512xf32, #tpu.memory_space<vmem>>, vector<16x512xf32>,
    return
  }
  func.func @transform_0(%arg0: i32) -> (i32, i32) {
    %c0_i32 = arith.constant 0 : i32
    %c0_i32_0 = arith.constant 0 : i32
    return %arg0, %c0_i32 : i32, i32
  }
  func.func @transform_1(%arg0: i32) -> (i32, i32) {
    %c0_i32 = arith.constant 0 : i32
    %c0_i32_0 = arith.constant 0 : i32
    %c0_i32_1 = arith.constant 0 : i32
    return %c0_i32, %c0_i32_0 : i32, i32
  }
  func.func @transform_2(%arg0: i32) -> (i32, i32) {
    %c0_i32 = arith.constant 0 : i32
    %c0_i32_0 = arith.constant 0 : i32
    %c0_i32_1 = arith.constant 0 : i32
    return %c0_i32, %c0_i32_0 : i32, i32
  }
  func.func @transform_3(%arg0: i32) -> (i32, i32) {
    %c0_i32 = arith.constant 0 : i32
    %c0_i32_0 = arith.constant 0 : i32
    %c0_i32_1 = arith.constant 0 : i32
    return %c0_i32, %c0_i32_0 : i32, i32
  }
  func.func @transform_4(%arg0: i32) -> (i32, i32) {
    %c0_i32 = arith.constant 0 : i32
    %c0_i32_0 = arith.constant 0 : i32
    %c0_i32_1 = arith.constant 0 : i32
    return %c0_i32, %c0_i32_0 : i32, i32
  }
  func.func @transform_5(%arg0: i32) -> (i32, i32) {
    %c0_i32 = arith.constant 0 : i32
    %c0_i32_0 = arith.constant 0 : i32
    %c0_i32_1 = arith.constant 0 : i32
    return %c0_i32, %c0_i32_0 : i32, i32
  }
  func.func @transform_6(%arg0: i32) -> (i32, i32) {
    %c0_i32 = arith.constant 0 : i32
    %c0_i32_0 = arith.constant 0 : i32
    %c0_i32_1 = arith.constant 0 : i32
    return %c0_i32, %c0_i32_0 : i32, i32
  }
  func.func @transform_7(%arg0: i32) -> (i32, i32) {
    %c0_i32 = arith.constant 0 : i32
    %c0_i32_0 = arith.constant 0 : i32
    return %arg0, %c0_i32 : i32, i32
  }
}

module attributes {stable_mosaic.version = 11 : i64} {
  func.func @_attn_block_kernel(%arg0: i32, %arg1: memref<16x512xf32, #tpu.memory_space<vmem>>, %arg2: memref<512x1536xbf16, #tpu.memory_space<vmem>>, %arg3: memref<1x1536xf32, #tpu.memory_space<vmem>>, %arg4: memref<512x512xbf16, #tpu.memory_space<vmem>>, %arg5: memref<1x512xf32, #tpu.memory_space<vmem>>, %arg6: memref<1x512xf32, #tpu.memory_space<vmem>>, %arg7: memref<1x512xf32, #tpu.memory_space<vmem>>, %arg8: memref<16x512xf32, #tpu.memory_space<vmem>>) attributes {dimension_semantics = [#tpu.dimension_semantics<parallel>], iteration_bounds = array<i64: 2>, scalar_prefetch = 0 : i64, scratch_operands = 0 : i64, tpu.core_type = #tpu.core_type<tc>, window_params = [{transform_indices = @transform_0, window_bounds = array<i64: 16, 512>}, {pipeline_mode = #tpu.pipeline_mode<synchronous>, transform_indices = @transform_1, window_bounds = array<i64: 512, 1536>}, {pipeline_mode = #tpu.pipeline_mode<synchronous>, transform_indices = @transform_2, window_bounds = array<i64: 1, 1536>}, {pipeline_mode = #tpu.pipeline_mode<synchronous>, transform_indices = @transform_3, window_bounds = array<i64: 512, 512>}, {pipeline_mode = #tpu.pipeline_mode<synchronous>, transform_indices = @transform_4, window_bounds = array<i64: 1, 512>}, {pipeline_mode = #tpu.pipeline_mode<synchronous>, transform_indices = @transform_5, window_bounds = array<i64: 1, 512>}, {pipeline_mode = #tpu.pipeline_mode<synchronous>, transform_indices = @transform_6, window_bounds = array<i64: 1, 512>}, {transform_indices = @transform_7, window_bounds = array<i64: 16, 512>}]} {
    %c0 = arith.constant 0 : index
    %c0_0 = arith.constant 0 : index
    %0 = vector.load %arg1[%c0, %c0_0] : memref<16x512xf32, #tpu.memory_space<vmem>>, vector<16x512xf32>
    %1 = arith.truncf %0 : vector<16x512xf32> to vector<16x512xbf16>
    %c0_1 = arith.constant 0 : index
    %c0_2 = arith.constant 0 : index
    %2 = vector.load %arg2[%c0_1, %c0_2] : memref<512x1536xbf16, #tpu.memory_space<vmem>>, vector<512x1536xbf16>
    %cst = arith.constant dense<0.000000e+00> : vector<16x1536xf32>
    %3 = tpu.matmul %1, %2, %cst {dimension_numbers = #tpu.dot_dimension_numbers<[1], [0], [0], [1], [0, 0, 1, 1], [], []>} : vector<16x512xbf16>, vector<512x1536xbf16>, vector<16x1536xf32> -> vector<16x1536xf32>
    %c0_3 = arith.constant 0 : index
    %c0_4 = arith.constant 0 : index
    %4 = vector.load %arg3[%c0_3, %c0_4] : memref<1x1536xf32, #tpu.memory_space<vmem>>, vector<1x1536xf32>
    %5 = vector.broadcast %4 : vector<1x1536xf32> to vector<16x1536xf32>
    %6 = arith.addf %3, %5 : vector<16x1536xf32>
    %7 = vector.extract_strided_slice %6 {offsets = [0, 0], sizes = [16, 512], strides = [1, 1]} : vector<16x1536xf32> to vector<16x512xf32>
    %cst_5 = arith.constant 1.250000e-01 : f32
    %8 = vector.broadcast %cst_5 : f32 to vector<16x512xf32>
    %9 = arith.mulf %7, %8 : vector<16x512xf32>
    %10 = vector.extract_strided_slice %6 {offsets = [0, 512], sizes = [16, 512], strides = [1, 1]} : vector<16x1536xf32> to vector<16x512xf32>
    %11 = vector.extract_strided_slice %6 {offsets = [0, 1024], sizes = [16, 512], strides = [1, 1]} : vector<16x1536xf32> to vector<16x512xf32>
    %c0_6 = arith.constant 0 : index
    %c0_7 = arith.constant 0 : index
    %12 = vector.load %arg5[%c0_6, %c0_7] : memref<1x512xf32, #tpu.memory_space<vmem>>, vector<1x512xf32>
    %13 = vector.broadcast %12 : vector<1x512xf32> to vector<16x512xf32>
    %14 = arith.addf %0, %13 : vector<16x512xf32>
    %15 = vector.extract_strided_slice %9 {offsets = [0, 0], sizes = [16, 64], strides = [1, 1]} : vector<16x512xf32> to vector<16x64xf32>
    %16 = arith.truncf %15 : vector<16x64xf32> to vector<16x64xbf16>
    %17 = vector.extract_strided_slice %10 {offsets = [0, 0], sizes = [16, 64], strides = [1, 1]} : vector<16x512xf32> to vector<16x64xf32>
    %18 = arith.truncf %17 : vector<16x64xf32> to vector<16x64xbf16>
    %19 = vector.extract_strided_slice %11 {offsets = [0, 0], sizes = [16, 64], strides = [1, 1]} : vector<16x512xf32> to vector<16x64xf32>
    %20 = arith.truncf %19 : vector<16x64xf32> to vector<16x64xbf16>
    %cst_8 = arith.constant dense<0.000000e+00> : vector<16x16xf32>
    %21 = tpu.matmul %16, %18, %cst_8 {dimension_numbers = #tpu.dot_dimension_numbers<[1], [1], [0], [0], [0, 0, 1, 0], [], []>} : vector<16x64xbf16>, vector<16x64xbf16>, vector<16x16xf32> -> vector<16x16xf32>
    %cst_9 = arith.constant dense<0xFF800000> : vector<16xf32>
    %22 = vector.multi_reduction <maximumf>, %21, %cst_9 [1] : vector<16x16xf32> to vector<16xf32>
    %23 = vector.shape_cast %22 : vector<16xf32> to vector<16x1xf32>
    %24 = vector.broadcast %23 : vector<16x1xf32> to vector<16x16xf32>
    %25 = arith.subf %21, %24 : vector<16x16xf32>
    %26 = math.exp %25 : vector<16x16xf32>
    %cst_10 = arith.constant dense<0.000000e+00> : vector<16xf32>
    %27 = vector.multi_reduction <add>, %26, %cst_10 [1] : vector<16x16xf32> to vector<16xf32>
    %28 = vector.shape_cast %27 : vector<16xf32> to vector<16x1xf32>
    %29 = tpu.reciprocal %28 {approx = true} : vector<16x1xf32> -> vector<16x1xf32>
    %30 = vector.broadcast %29 : vector<16x1xf32> to vector<16x16xf32>
    %31 = arith.mulf %26, %30 : vector<16x16xf32>
    %32 = arith.truncf %31 : vector<16x16xf32> to vector<16x16xbf16>
    %cst_11 = arith.constant dense<0.000000e+00> : vector<16x64xf32>
    %33 = tpu.matmul %32, %20, %cst_11 {dimension_numbers = #tpu.dot_dimension_numbers<[1], [0], [0], [1], [0, 0, 1, 1], [], []>} : vector<16x16xbf16>, vector<16x64xbf16>, vector<16x64xf32> -> vector<16x64xf32>
    %34 = arith.truncf %33 : vector<16x64xf32> to vector<16x64xbf16>
    %c0_12 = arith.constant 0 : index
    %c0_13 = arith.constant 0 : index
    %35 = vector.load %arg4[%c0_12, %c0_13] : memref<512x512xbf16, #tpu.memory_space<vmem>>, vector<64x512xbf16>
    %cst_14 = arith.constant dense<0.000000e+00> : vector<16x512xf32>
    %36 = tpu.matmul %34, %35, %cst_14 {dimension_numbers = #tpu.dot_dimension_numbers<[1], [0], [0], [1], [0, 0, 1, 1], [], []>} : vector<16x64xbf16>, vector<64x512xbf16>, vector<16x512xf32> -> vector<16x512xf32>
    %37 = arith.addf %14, %36 : vector<16x512xf32>
    %38 = vector.extract_strided_slice %9 {offsets = [0, 64], sizes = [16, 64], strides = [1, 1]} : vector<16x512xf32> to vector<16x64xf32>
    %39 = arith.truncf %38 : vector<16x64xf32> to vector<16x64xbf16>
    %40 = vector.extract_strided_slice %10 {offsets = [0, 64], sizes = [16, 64], strides = [1, 1]} : vector<16x512xf32> to vector<16x64xf32>
    %41 = arith.truncf %40 : vector<16x64xf32> to vector<16x64xbf16>
    %42 = vector.extract_strided_slice %11 {offsets = [0, 64], sizes = [16, 64], strides = [1, 1]} : vector<16x512xf32> to vector<16x64xf32>
    %43 = arith.truncf %42 : vector<16x64xf32> to vector<16x64xbf16>
    %cst_15 = arith.constant dense<0.000000e+00> : vector<16x16xf32>
    %44 = tpu.matmul %39, %41, %cst_15 {dimension_numbers = #tpu.dot_dimension_numbers<[1], [1], [0], [0], [0, 0, 1, 0], [], []>} : vector<16x64xbf16>, vector<16x64xbf16>, vector<16x16xf32> -> vector<16x16xf32>
    %cst_16 = arith.constant dense<0xFF800000> : vector<16xf32>
    %45 = vector.multi_reduction <maximumf>, %44, %cst_16 [1] : vector<16x16xf32> to vector<16xf32>
    %46 = vector.shape_cast %45 : vector<16xf32> to vector<16x1xf32>
    %47 = vector.broadcast %46 : vector<16x1xf32> to vector<16x16xf32>
    %48 = arith.subf %44, %47 : vector<16x16xf32>
    %49 = math.exp %48 : vector<16x16xf32>
    %cst_17 = arith.constant dense<0.000000e+00> : vector<16xf32>
    %50 = vector.multi_reduction <add>, %49, %cst_17 [1] : vector<16x16xf32> to vector<16xf32>
    %51 = vector.shape_cast %50 : vector<16xf32> to vector<16x1xf32>
    %52 = tpu.reciprocal %51 {approx = true} : vector<16x1xf32> -> vector<16x1xf32>
    %53 = vector.broadcast %52 : vector<16x1xf32> to vector<16x16xf32>
    %54 = arith.mulf %49, %53 : vector<16x16xf32>
    %55 = arith.truncf %54 : vector<16x16xf32> to vector<16x16xbf16>
    %cst_18 = arith.constant dense<0.000000e+00> : vector<16x64xf32>
    %56 = tpu.matmul %55, %43, %cst_18 {dimension_numbers = #tpu.dot_dimension_numbers<[1], [0], [0], [1], [0, 0, 1, 1], [], []>} : vector<16x16xbf16>, vector<16x64xbf16>, vector<16x64xf32> -> vector<16x64xf32>
    %57 = arith.truncf %56 : vector<16x64xf32> to vector<16x64xbf16>
    %c64 = arith.constant 64 : index
    %c0_19 = arith.constant 0 : index
    %58 = vector.load %arg4[%c64, %c0_19] : memref<512x512xbf16, #tpu.memory_space<vmem>>, vector<64x512xbf16>
    %cst_20 = arith.constant dense<0.000000e+00> : vector<16x512xf32>
    %59 = tpu.matmul %57, %58, %cst_20 {dimension_numbers = #tpu.dot_dimension_numbers<[1], [0], [0], [1], [0, 0, 1, 1], [], []>} : vector<16x64xbf16>, vector<64x512xbf16>, vector<16x512xf32> -> vector<16x512xf32>
    %60 = arith.addf %37, %59 : vector<16x512xf32>
    %61 = vector.extract_strided_slice %9 {offsets = [0, 128], sizes = [16, 64], strides = [1, 1]} : vector<16x512xf32> to vector<16x64xf32>
    %62 = arith.truncf %61 : vector<16x64xf32> to vector<16x64xbf16>
    %63 = vector.extract_strided_slice %10 {offsets = [0, 128], sizes = [16, 64], strides = [1, 1]} : vector<16x512xf32> to vector<16x64xf32>
    %64 = arith.truncf %63 : vector<16x64xf32> to vector<16x64xbf16>
    %65 = vector.extract_strided_slice %11 {offsets = [0, 128], sizes = [16, 64], strides = [1, 1]} : vector<16x512xf32> to vector<16x64xf32>
    %66 = arith.truncf %65 : vector<16x64xf32> to vector<16x64xbf16>
    %cst_21 = arith.constant dense<0.000000e+00> : vector<16x16xf32>
    %67 = tpu.matmul %62, %64, %cst_21 {dimension_numbers = #tpu.dot_dimension_numbers<[1], [1], [0], [0], [0, 0, 1, 0], [], []>} : vector<16x64xbf16>, vector<16x64xbf16>, vector<16x16xf32> -> vector<16x16xf32>
    %cst_22 = arith.constant dense<0xFF800000> : vector<16xf32>
    %68 = vector.multi_reduction <maximumf>, %67, %cst_22 [1] : vector<16x16xf32> to vector<16xf32>
    %69 = vector.shape_cast %68 : vector<16xf32> to vector<16x1xf32>
    %70 = vector.broadcast %69 : vector<16x1xf32> to vector<16x16xf32>
    %71 = arith.subf %67, %70 : vector<16x16xf32>
    %72 = math.exp %71 : vector<16x16xf32>
    %cst_23 = arith.constant dense<0.000000e+00> : vector<16xf32>
    %73 = vector.multi_reduction <add>, %72, %cst_23 [1] : vector<16x16xf32> to vector<16xf32>
    %74 = vector.shape_cast %73 : vector<16xf32> to vector<16x1xf32>
    %75 = tpu.reciprocal %74 {approx = true} : vector<16x1xf32> -> vector<16x1xf32>
    %76 = vector.broadcast %75 : vector<16x1xf32> to vector<16x16xf32>
    %77 = arith.mulf %72, %76 : vector<16x16xf32>
    %78 = arith.truncf %77 : vector<16x16xf32> to vector<16x16xbf16>
    %cst_24 = arith.constant dense<0.000000e+00> : vector<16x64xf32>
    %79 = tpu.matmul %78, %66, %cst_24 {dimension_numbers = #tpu.dot_dimension_numbers<[1], [0], [0], [1], [0, 0, 1, 1], [], []>} : vector<16x16xbf16>, vector<16x64xbf16>, vector<16x64xf32> -> vector<16x64xf32>
    %80 = arith.truncf %79 : vector<16x64xf32> to vector<16x64xbf16>
    %c128 = arith.constant 128 : index
    %c0_25 = arith.constant 0 : index
    %81 = vector.load %arg4[%c128, %c0_25] : memref<512x512xbf16, #tpu.memory_space<vmem>>, vector<64x512xbf16>
    %cst_26 = arith.constant dense<0.000000e+00> : vector<16x512xf32>
    %82 = tpu.matmul %80, %81, %cst_26 {dimension_numbers = #tpu.dot_dimension_numbers<[1], [0], [0], [1], [0, 0, 1, 1], [], []>} : vector<16x64xbf16>, vector<64x512xbf16>, vector<16x512xf32> -> vector<16x512xf32>
    %83 = arith.addf %60, %82 : vector<16x512xf32>
    %84 = vector.extract_strided_slice %9 {offsets = [0, 192], sizes = [16, 64], strides = [1, 1]} : vector<16x512xf32> to vector<16x64xf32>
    %85 = arith.truncf %84 : vector<16x64xf32> to vector<16x64xbf16>
    %86 = vector.extract_strided_slice %10 {offsets = [0, 192], sizes = [16, 64], strides = [1, 1]} : vector<16x512xf32> to vector<16x64xf32>
    %87 = arith.truncf %86 : vector<16x64xf32> to vector<16x64xbf16>
    %88 = vector.extract_strided_slice %11 {offsets = [0, 192], sizes = [16, 64], strides = [1, 1]} : vector<16x512xf32> to vector<16x64xf32>
    %89 = arith.truncf %88 : vector<16x64xf32> to vector<16x64xbf16>
    %cst_27 = arith.constant dense<0.000000e+00> : vector<16x16xf32>
    %90 = tpu.matmul %85, %87, %cst_27 {dimension_numbers = #tpu.dot_dimension_numbers<[1], [1], [0], [0], [0, 0, 1, 0], [], []>} : vector<16x64xbf16>, vector<16x64xbf16>, vector<16x16xf32> -> vector<16x16xf32>
    %cst_28 = arith.constant dense<0xFF800000> : vector<16xf32>
    %91 = vector.multi_reduction <maximumf>, %90, %cst_28 [1] : vector<16x16xf32> to vector<16xf32>
    %92 = vector.shape_cast %91 : vector<16xf32> to vector<16x1xf32>
    %93 = vector.broadcast %92 : vector<16x1xf32> to vector<16x16xf32>
    %94 = arith.subf %90, %93 : vector<16x16xf32>
    %95 = math.exp %94 : vector<16x16xf32>
    %cst_29 = arith.constant dense<0.000000e+00> : vector<16xf32>
    %96 = vector.multi_reduction <add>, %95, %cst_29 [1] : vector<16x16xf32> to vector<16xf32>
    %97 = vector.shape_cast %96 : vector<16xf32> to vector<16x1xf32>
    %98 = tpu.reciprocal %97 {approx = true} : vector<16x1xf32> -> vector<16x1xf32>
    %99 = vector.broadcast %98 : vector<16x1xf32> to vector<16x16xf32>
    %100 = arith.mulf %95, %99 : vector<16x16xf32>
    %101 = arith.truncf %100 : vector<16x16xf32> to vector<16x16xbf16>
    %cst_30 = arith.constant dense<0.000000e+00> : vector<16x64xf32>
    %102 = tpu.matmul %101, %89, %cst_30 {dimension_numbers = #tpu.dot_dimension_numbers<[1], [0], [0], [1], [0, 0, 1, 1], [], []>} : vector<16x16xbf16>, vector<16x64xbf16>, vector<16x64xf32> -> vector<16x64xf32>
    %103 = arith.truncf %102 : vector<16x64xf32> to vector<16x64xbf16>
    %c192 = arith.constant 192 : index
    %c0_31 = arith.constant 0 : index
    %104 = vector.load %arg4[%c192, %c0_31] : memref<512x512xbf16, #tpu.memory_space<vmem>>, vector<64x512xbf16>
    %cst_32 = arith.constant dense<0.000000e+00> : vector<16x512xf32>
    %105 = tpu.matmul %103, %104, %cst_32 {dimension_numbers = #tpu.dot_dimension_numbers<[1], [0], [0], [1], [0, 0, 1, 1], [], []>} : vector<16x64xbf16>, vector<64x512xbf16>, vector<16x512xf32> -> vector<16x512xf32>
    %106 = arith.addf %83, %105 : vector<16x512xf32>
    %107 = vector.extract_strided_slice %9 {offsets = [0, 256], sizes = [16, 64], strides = [1, 1]} : vector<16x512xf32> to vector<16x64xf32>
    %108 = arith.truncf %107 : vector<16x64xf32> to vector<16x64xbf16>
    %109 = vector.extract_strided_slice %10 {offsets = [0, 256], sizes = [16, 64], strides = [1, 1]} : vector<16x512xf32> to vector<16x64xf32>
    %110 = arith.truncf %109 : vector<16x64xf32> to vector<16x64xbf16>
    %111 = vector.extract_strided_slice %11 {offsets = [0, 256], sizes = [16, 64], strides = [1, 1]} : vector<16x512xf32> to vector<16x64xf32>
    %112 = arith.truncf %111 : vector<16x64xf32> to vector<16x64xbf16>
    %cst_33 = arith.constant dense<0.000000e+00> : vector<16x16xf32>
    %113 = tpu.matmul %108, %110, %cst_33 {dimension_numbers = #tpu.dot_dimension_numbers<[1], [1], [0], [0], [0, 0, 1, 0], [], []>} : vector<16x64xbf16>, vector<16x64xbf16>, vector<16x16xf32> -> vector<16x16xf32>
    %cst_34 = arith.constant dense<0xFF800000> : vector<16xf32>
    %114 = vector.multi_reduction <maximumf>, %113, %cst_34 [1] : vector<16x16xf32> to vector<16xf32>
    %115 = vector.shape_cast %114 : vector<16xf32> to vector<16x1xf32>
    %116 = vector.broadcast %115 : vector<16x1xf32> to vector<16x16xf32>
    %117 = arith.subf %113, %116 : vector<16x16xf32>
    %118 = math.exp %117 : vector<16x16xf32>
    %cst_35 = arith.constant dense<0.000000e+00> : vector<16xf32>
    %119 = vector.multi_reduction <add>, %118, %cst_35 [1] : vector<16x16xf32> to vector<16xf32>
    %120 = vector.shape_cast %119 : vector<16xf32> to vector<16x1xf32>
    %121 = tpu.reciprocal %120 {approx = true} : vector<16x1xf32> -> vector<16x1xf32>
    %122 = vector.broadcast %121 : vector<16x1xf32> to vector<16x16xf32>
    %123 = arith.mulf %118, %122 : vector<16x16xf32>
    %124 = arith.truncf %123 : vector<16x16xf32> to vector<16x16xbf16>
    %cst_36 = arith.constant dense<0.000000e+00> : vector<16x64xf32>
    %125 = tpu.matmul %124, %112, %cst_36 {dimension_numbers = #tpu.dot_dimension_numbers<[1], [0], [0], [1], [0, 0, 1, 1], [], []>} : vector<16x16xbf16>, vector<16x64xbf16>, vector<16x64xf32> -> vector<16x64xf32>
    %126 = arith.truncf %125 : vector<16x64xf32> to vector<16x64xbf16>
    %c256 = arith.constant 256 : index
    %c0_37 = arith.constant 0 : index
    %127 = vector.load %arg4[%c256, %c0_37] : memref<512x512xbf16, #tpu.memory_space<vmem>>, vector<64x512xbf16>
    %cst_38 = arith.constant dense<0.000000e+00> : vector<16x512xf32>
    %128 = tpu.matmul %126, %127, %cst_38 {dimension_numbers = #tpu.dot_dimension_numbers<[1], [0], [0], [1], [0, 0, 1, 1], [], []>} : vector<16x64xbf16>, vector<64x512xbf16>, vector<16x512xf32> -> vector<16x512xf32>
    %129 = arith.addf %106, %128 : vector<16x512xf32>
    %130 = vector.extract_strided_slice %9 {offsets = [0, 320], sizes = [16, 64], strides = [1, 1]} : vector<16x512xf32> to vector<16x64xf32>
    %131 = arith.truncf %130 : vector<16x64xf32> to vector<16x64xbf16>
    %132 = vector.extract_strided_slice %10 {offsets = [0, 320], sizes = [16, 64], strides = [1, 1]} : vector<16x512xf32> to vector<16x64xf32>
    %133 = arith.truncf %132 : vector<16x64xf32> to vector<16x64xbf16>
    %134 = vector.extract_strided_slice %11 {offsets = [0, 320], sizes = [16, 64], strides = [1, 1]} : vector<16x512xf32> to vector<16x64xf32>
    %135 = arith.truncf %134 : vector<16x64xf32> to vector<16x64xbf16>
    %cst_39 = arith.constant dense<0.000000e+00> : vector<16x16xf32>
    %136 = tpu.matmul %131, %133, %cst_39 {dimension_numbers = #tpu.dot_dimension_numbers<[1], [1], [0], [0], [0, 0, 1, 0], [], []>} : vector<16x64xbf16>, vector<16x64xbf16>, vector<16x16xf32> -> vector<16x16xf32>
    %cst_40 = arith.constant dense<0xFF800000> : vector<16xf32>
    %137 = vector.multi_reduction <maximumf>, %136, %cst_40 [1] : vector<16x16xf32> to vector<16xf32>
    %138 = vector.shape_cast %137 : vector<16xf32> to vector<16x1xf32>
    %139 = vector.broadcast %138 : vector<16x1xf32> to vector<16x16xf32>
    %140 = arith.subf %136, %139 : vector<16x16xf32>
    %141 = math.exp %140 : vector<16x16xf32>
    %cst_41 = arith.constant dense<0.000000e+00> : vector<16xf32>
    %142 = vector.multi_reduction <add>, %141, %cst_41 [1] : vector<16x16xf32> to vector<16xf32>
    %143 = vector.shape_cast %142 : vector<16xf32> to vector<16x1xf32>
    %144 = tpu.reciprocal %143 {approx = true} : vector<16x1xf32> -> vector<16x1xf32>
    %145 = vector.broadcast %144 : vector<16x1xf32> to vector<16x16xf32>
    %146 = arith.mulf %141, %145 : vector<16x16xf32>
    %147 = arith.truncf %146 : vector<16x16xf32> to vector<16x16xbf16>
    %cst_42 = arith.constant dense<0.000000e+00> : vector<16x64xf32>
    %148 = tpu.matmul %147, %135, %cst_42 {dimension_numbers = #tpu.dot_dimension_numbers<[1], [0], [0], [1], [0, 0, 1, 1], [], []>} : vector<16x16xbf16>, vector<16x64xbf16>, vector<16x64xf32> -> vector<16x64xf32>
    %149 = arith.truncf %148 : vector<16x64xf32> to vector<16x64xbf16>
    %c320 = arith.constant 320 : index
    %c0_43 = arith.constant 0 : index
    %150 = vector.load %arg4[%c320, %c0_43] : memref<512x512xbf16, #tpu.memory_space<vmem>>, vector<64x512xbf16>
    %cst_44 = arith.constant dense<0.000000e+00> : vector<16x512xf32>
    %151 = tpu.matmul %149, %150, %cst_44 {dimension_numbers = #tpu.dot_dimension_numbers<[1], [0], [0], [1], [0, 0, 1, 1], [], []>} : vector<16x64xbf16>, vector<64x512xbf16>, vector<16x512xf32> -> vector<16x512xf32>
    %152 = arith.addf %129, %151 : vector<16x512xf32>
    %153 = vector.extract_strided_slice %9 {offsets = [0, 384], sizes = [16, 64], strides = [1, 1]} : vector<16x512xf32> to vector<16x64xf32>
    %154 = arith.truncf %153 : vector<16x64xf32> to vector<16x64xbf16>
    %155 = vector.extract_strided_slice %10 {offsets = [0, 384], sizes = [16, 64], strides = [1, 1]} : vector<16x512xf32> to vector<16x64xf32>
    %156 = arith.truncf %155 : vector<16x64xf32> to vector<16x64xbf16>
    %157 = vector.extract_strided_slice %11 {offsets = [0, 384], sizes = [16, 64], strides = [1, 1]} : vector<16x512xf32> to vector<16x64xf32>
    %158 = arith.truncf %157 : vector<16x64xf32> to vector<16x64xbf16>
    %cst_45 = arith.constant dense<0.000000e+00> : vector<16x16xf32>
    %159 = tpu.matmul %154, %156, %cst_45 {dimension_numbers = #tpu.dot_dimension_numbers<[1], [1], [0], [0], [0, 0, 1, 0], [], []>} : vector<16x64xbf16>, vector<16x64xbf16>, vector<16x16xf32> -> vector<16x16xf32>
    %cst_46 = arith.constant dense<0xFF800000> : vector<16xf32>
    %160 = vector.multi_reduction <maximumf>, %159, %cst_46 [1] : vector<16x16xf32> to vector<16xf32>
    %161 = vector.shape_cast %160 : vector<16xf32> to vector<16x1xf32>
    %162 = vector.broadcast %161 : vector<16x1xf32> to vector<16x16xf32>
    %163 = arith.subf %159, %162 : vector<16x16xf32>
    %164 = math.exp %163 : vector<16x16xf32>
    %cst_47 = arith.constant dense<0.000000e+00> : vector<16xf32>
    %165 = vector.multi_reduction <add>, %164, %cst_47 [1] : vector<16x16xf32> to vector<16xf32>
    %166 = vector.shape_cast %165 : vector<16xf32> to vector<16x1xf32>
    %167 = tpu.reciprocal %166 {approx = true} : vector<16x1xf32> -> vector<16x1xf32>
    %168 = vector.broadcast %167 : vector<16x1xf32> to vector<16x16xf32>
    %169 = arith.mulf %164, %168 : vector<16x16xf32>
    %170 = arith.truncf %169 : vector<16x16xf32> to vector<16x16xbf16>
    %cst_48 = arith.constant dense<0.000000e+00> : vector<16x64xf32>
    %171 = tpu.matmul %170, %158, %cst_48 {dimension_numbers = #tpu.dot_dimension_numbers<[1], [0], [0], [1], [0, 0, 1, 1], [], []>} : vector<16x16xbf16>, vector<16x64xbf16>, vector<16x64xf32> -> vector<16x64xf32>
    %172 = arith.truncf %171 : vector<16x64xf32> to vector<16x64xbf16>
    %c384 = arith.constant 384 : index
    %c0_49 = arith.constant 0 : index
    %173 = vector.load %arg4[%c384, %c0_49] : memref<512x512xbf16, #tpu.memory_space<vmem>>, vector<64x512xbf16>
    %cst_50 = arith.constant dense<0.000000e+00> : vector<16x512xf32>
    %174 = tpu.matmul %172, %173, %cst_50 {dimension_numbers = #tpu.dot_dimension_numbers<[1], [0], [0], [1], [0, 0, 1, 1], [], []>} : vector<16x64xbf16>, vector<64x512xbf16>, vector<16x512xf32> -> vector<16x512xf32>
    %175 = arith.addf %152, %174 : vector<16x512xf32>
    %176 = vector.extract_strided_slice %9 {offsets = [0, 448], sizes = [16, 64], strides = [1, 1]} : vector<16x512xf32> to vector<16x64xf32>
    %177 = arith.truncf %176 : vector<16x64xf32> to vector<16x64xbf16>
    %178 = vector.extract_strided_slice %10 {offsets = [0, 448], sizes = [16, 64], strides = [1, 1]} : vector<16x512xf32> to vector<16x64xf32>
    %179 = arith.truncf %178 : vector<16x64xf32> to vector<16x64xbf16>
    %180 = vector.extract_strided_slice %11 {offsets = [0, 448], sizes = [16, 64], strides = [1, 1]} : vector<16x512xf32> to vector<16x64xf32>
    %181 = arith.truncf %180 : vector<16x64xf32> to vector<16x64xbf16>
    %cst_51 = arith.constant dense<0.000000e+00> : vector<16x16xf32>
    %182 = tpu.matmul %177, %179, %cst_51 {dimension_numbers = #tpu.dot_dimension_numbers<[1], [1], [0], [0], [0, 0, 1, 0], [], []>} : vector<16x64xbf16>, vector<16x64xbf16>, vector<16x16xf32> -> vector<16x16xf32>
    %cst_52 = arith.constant dense<0xFF800000> : vector<16xf32>
    %183 = vector.multi_reduction <maximumf>, %182, %cst_52 [1] : vector<16x16xf32> to vector<16xf32>
    %184 = vector.shape_cast %183 : vector<16xf32> to vector<16x1xf32>
    %185 = vector.broadcast %184 : vector<16x1xf32> to vector<16x16xf32>
    %186 = arith.subf %182, %185 : vector<16x16xf32>
    %187 = math.exp %186 : vector<16x16xf32>
    %cst_53 = arith.constant dense<0.000000e+00> : vector<16xf32>
    %188 = vector.multi_reduction <add>, %187, %cst_53 [1] : vector<16x16xf32> to vector<16xf32>
    %189 = vector.shape_cast %188 : vector<16xf32> to vector<16x1xf32>
    %190 = tpu.reciprocal %189 {approx = true} : vector<16x1xf32> -> vector<16x1xf32>
    %191 = vector.broadcast %190 : vector<16x1xf32> to vector<16x16xf32>
    %192 = arith.mulf %187, %191 : vector<16x16xf32>
    %193 = arith.truncf %192 : vector<16x16xf32> to vector<16x16xbf16>
    %cst_54 = arith.constant dense<0.000000e+00> : vector<16x64xf32>
    %194 = tpu.matmul %193, %181, %cst_54 {dimension_numbers = #tpu.dot_dimension_numbers<[1], [0], [0], [1], [0, 0, 1, 1], [], []>} : vector<16x16xbf16>, vector<16x64xbf16>, vector<16x64xf32> -> vector<16x64xf32>
    %195 = arith.truncf %194 : vector<16x64xf32> to vector<16x64xbf16>
    %c448 = arith.constant 448 : index
    %c0_55 = arith.constant 0 : index
    %196 = vector.load %arg4[%c448, %c0_55] : memref<512x512xbf16, #tpu.memory_space<vmem>>, vector<64x512xbf16>
    %cst_56 = arith.constant dense<0.000000e+00> : vector<16x512xf32>
    %197 = tpu.matmul %195, %196, %cst_56 {dimension_numbers = #tpu.dot_dimension_numbers<[1], [0], [0], [1], [0, 0, 1, 1], [], []>} : vector<16x64xbf16>, vector<64x512xbf16>, vector<16x512xf32> -> vector<16x512xf32>
    %198 = arith.addf %175, %197 : vector<16x512xf32>
    %cst_57 = arith.constant dense<0.000000e+00> : vector<16xf32>
    %199 = vector.multi_reduction <add>, %198, %cst_57 [1] : vector<16x512xf32> to vector<16xf32>
    %200 = vector.shape_cast %199 : vector<16xf32> to vector<16x1xf32>
    %cst_58 = arith.constant 5.120000e+02 : f32
    %201 = vector.broadcast %cst_58 : f32 to vector<16x1xf32>
    %202 = arith.divf %200, %201 : vector<16x1xf32>
    %203 = vector.broadcast %202 : vector<16x1xf32> to vector<16x512xf32>
    %204 = arith.subf %198, %203 : vector<16x512xf32>
    %205 = arith.mulf %204, %204 : vector<16x512xf32>
    %cst_59 = arith.constant dense<0.000000e+00> : vector<16xf32>
    %206 = vector.multi_reduction <add>, %205, %cst_59 [1] : vector<16x512xf32> to vector<16xf32>
    %207 = vector.shape_cast %206 : vector<16xf32> to vector<16x1xf32>
    %cst_60 = arith.constant 5.120000e+02 : f32
    %208 = vector.broadcast %cst_60 : f32 to vector<16x1xf32>
    %209 = arith.divf %207, %208 : vector<16x1xf32>
    %cst_61 = arith.constant 9.99999974E-6 : f32
    %210 = vector.broadcast %cst_61 : f32 to vector<16x1xf32>
    %211 = arith.addf %209, %210 : vector<16x1xf32>
    %212 = math.rsqrt %211 : vector<16x1xf32>
    %213 = vector.broadcast %212 : vector<16x1xf32> to vector<16x512xf32>
    %214 = arith.mulf %204, %213 : vector<16x512xf32>
    %c0_62 = arith.constant 0 : index
    %c0_63 = arith.constant 0 : index
    %215 = vector.load %arg6[%c0_62, %c0_63] : memref<1x512xf32, #tpu.memory_space<vmem>>, vector<1x512xf32>
    %216 = vector.broadcast %215 : vector<1x512xf32> to vector<16x512xf32>
    %217 = arith.mulf %214, %216 : vector<16x512xf32>
    %c0_64 = arith.constant 0 : index
    %c0_65 = arith.constant 0 : index
    %218 = vector.load %arg7[%c0_64, %c0_65] : memref<1x512xf32, #tpu.memory_space<vmem>>, vector<1x512xf32>
    %219 = vector.broadcast %218 : vector<1x512xf32> to vector<16x512xf32>
    %220 = arith.addf %217, %219 : vector<16x512xf32>
    %c0_66 = arith.constant 0 : index
    %c0_67 = arith.constant 0 : index
    %221 = vector.load %arg8[%c0_66, %c0_67] : memref<16x512xf32, #tpu.memory_space<vmem>>, vector<16x512xf32>
    tpu.vector_store %arg8[%c0_66, %c0_67], %220 {strides = array<i32>} : memref<16x512xf32, #tpu.memory_space<vmem>>, vector<16x512xf32>,
    return
  }
  func.func @transform_0(%arg0: i32) -> (i32, i32) {
    %c0_i32 = arith.constant 0 : i32
    %c0_i32_0 = arith.constant 0 : i32
    return %arg0, %c0_i32 : i32, i32
  }
  func.func @transform_1(%arg0: i32) -> (i32, i32) {
    %c0_i32 = arith.constant 0 : i32
    %c0_i32_0 = arith.constant 0 : i32
    %c0_i32_1 = arith.constant 0 : i32
    return %c0_i32, %c0_i32_0 : i32, i32
  }
  func.func @transform_2(%arg0: i32) -> (i32, i32) {
    %c0_i32 = arith.constant 0 : i32
    %c0_i32_0 = arith.constant 0 : i32
    %c0_i32_1 = arith.constant 0 : i32
    return %c0_i32, %c0_i32_0 : i32, i32
  }
  func.func @transform_3(%arg0: i32) -> (i32, i32) {
    %c0_i32 = arith.constant 0 : i32
    %c0_i32_0 = arith.constant 0 : i32
    %c0_i32_1 = arith.constant 0 : i32
    return %c0_i32, %c0_i32_0 : i32, i32
  }
  func.func @transform_4(%arg0: i32) -> (i32, i32) {
    %c0_i32 = arith.constant 0 : i32
    %c0_i32_0 = arith.constant 0 : i32
    %c0_i32_1 = arith.constant 0 : i32
    return %c0_i32, %c0_i32_0 : i32, i32
  }
  func.func @transform_5(%arg0: i32) -> (i32, i32) {
    %c0_i32 = arith.constant 0 : i32
    %c0_i32_0 = arith.constant 0 : i32
    %c0_i32_1 = arith.constant 0 : i32
    return %c0_i32, %c0_i32_0 : i32, i32
  }
  func.func @transform_6(%arg0: i32) -> (i32, i32) {
    %c0_i32 = arith.constant 0 : i32
    %c0_i32_0 = arith.constant 0 : i32
    %c0_i32_1 = arith.constant 0 : i32
    return %c0_i32, %c0_i32_0 : i32, i32
  }
  func.func @transform_7(%arg0: i32) -> (i32, i32) {
    %c0_i32 = arith.constant 0 : i32
    %c0_i32_0 = arith.constant 0 : i32
    return %arg0, %c0_i32 : i32, i32
  }
}

</mosaic_0001>

<bundles_post_ra>
// kernel: transformer_classifier_forward.13
= control target key start
LH: loop header
LB: loop body
LE: loop exit
PB: predicated region body
PF: predicated region fallthrough
CT: control target
= control target key end

     0   :  { %s7348_s1 = inlined_call_operand.vmem [shape: bf16[512,1024], index: 1, kind: input, shape index: {}]   ;;  %s7349_s0 = inlined_call_operand.vmem [shape: f32[32,512], index: 0, kind: input, shape index: {}]   ;;  %s7350_s3 = inlined_call_operand.vmem [shape: bf16[1024,512], index: 3, kind: input, shape index: {}]   ;;  %s7351_s2 = inlined_call_operand.vmem [shape: f32[1,1024], index: 2, kind: input, shape index: {}]   ;;  %s7352_s4 = inlined_call_operand.vmem [shape: f32[1,512], index: 4, kind: input, shape index: {}]   ;;  %s7353_s5 = inlined_call_operand.vmem [shape: f32[1,512], index: 5, kind: input, shape index: {}]   ;;  %s7354_s6 = inlined_call_operand.vmem [shape: f32[1,512], index: 6, kind: input, shape index: {}]   ;;  %s7355_s7 = inlined_call_operand.vmem [shape: f32[32,512], index: 7, kind: output, shape index: {}]  }
   0x1   :  { %v106_v0 = vld [vmem:[%s7348_s1 + $0x1c0] sm:$0xff]  ;;  %v27_v54 = vld [vmem:[%s7349_s0 + $0x8] sm:$0xff]  ;;  %v29_v59 = vld [vmem:[%s7349_s0 + $0x18] sm:$0xff] }
   0x2   :  { %v110_v1 = vld [vmem:[%s7348_s1 + $0x1e0] sm:$0xff]  ;;  %v31_v55 = vld [vmem:[%s7349_s0 + $0x28] sm:$0xff]  ;;  %v33_v60 = vld [vmem:[%s7349_s0 + $0x38] sm:$0xff] }
   0x3   :  { %v234_v2 = vld [vmem:[%s7348_s1 + $0x5c0] sm:$0xff]  ;;  %v4356_v3 = vcombine.high %v106_v0, %v110_v1  ;;  %v4355_v5 = vcombine.low %v106_v0, %v110_v1  ;;  %v5355_v58 = vpack.c.bf16 %v31_v55, %v27_v54  ;;  %v5369_v63 = vpack.c.bf16 %v33_v60, %v29_v59 }
   0x4   :  { %v238_v4 = vld [vmem:[%s7348_s1 + $0x5e0] sm:$0xff] }
   0x5   :  { %v98_v6 = vld [vmem:[%s7348_s1 + $0x180] sm:$0xff]  ;;  %v4484_v8 = vcombine.high %v234_v2, %v238_v4  ;;  %v4483_v9 = vcombine.low %v234_v2, %v238_v4  ;;  %1628 = vmatprep.subr.bf16.mxu0 %v4356_v3  ;;  %1660 = vmatprep.mubr.bf16.mxu0 %v5355_v58 }
   0x6   :  { %v102_v7 = vld [vmem:[%s7348_s1 + $0x1a0] sm:$0xff]  ;;  %1629 = vmatpush1.bf16.msra.mxu0 %v4355_v5  ;;  %1713 = vmatprep.mubr.bf16.mxu1 %v5369_v63 }
   0x7   :  { %v4348_v10 = vcombine.high %v98_v6, %v102_v7  ;;  %v226_v11 = vld [vmem:[%s7348_s1 + $0x580] sm:$0xff]  ;;  %1681 = vmatprep.subr.bf16.mxu1 %v4484_v8  ;;  %v4347_v18 = vcombine.low %v98_v6, %v102_v7 }
   0x8   :  { %v230_v12 = vld [vmem:[%s7348_s1 + $0x5a0] sm:$0xff]  ;;  %1682 = vmatpush1.bf16.msra.mxu1 %v4483_v9 }
   0x9   :  { %v90_v13 = vld [vmem:[%s7348_s1 + $0x140] sm:$0xff]  ;;  %v4476_v14 = vcombine.high %v226_v11, %v230_v12  ;;  %1630 = vmatprep.subr.bf16.mxu0 %v4348_v10  ;;  %v4475_v19 = vcombine.low %v226_v11, %v230_v12 }
   0xa   :  { %v94_v15 = vld [vmem:[%s7348_s1 + $0x160] sm:$0xff]  ;;  %1631 = vmatpush1.bf16.msra.mxu0 %v4347_v18 }
   0xb   :  { %v218_v16 = vld [vmem:[%s7348_s1 + $0x540] sm:$0xff]  ;;  %v4340_v20 = vcombine.high %v90_v13, %v94_v15  ;;  %1683 = vmatprep.subr.bf16.mxu1 %v4476_v14  ;;  %v4339_v26 = vcombine.low %v90_v13, %v94_v15 }
   0xc   :  { %v222_v17 = vld [vmem:[%s7348_s1 + $0x560] sm:$0xff]  ;;  %1684 = vmatpush1.bf16.msra.mxu1 %v4475_v19 }
   0xd   :  { %v4468_v21 = vcombine.high %v218_v16, %v222_v17  ;;  %v82_v22 = vld [vmem:[%s7348_s1 + $0x100] sm:$0xff]  ;;  %1632 = vmatprep.subr.bf16.mxu0 %v4340_v20  ;;  %v4467_v27 = vcombine.low %v218_v16, %v222_v17 }
   0xe   :  { %v86_v23 = vld [vmem:[%s7348_s1 + $0x120] sm:$0xff]  ;;  %1633 = vmatpush1.bf16.msra.mxu0 %v4339_v26 }
   0xf   :  { %v210_v24 = vld [vmem:[%s7348_s1 + $0x500] sm:$0xff]  ;;  %v4332_v28 = vcombine.high %v82_v22, %v86_v23  ;;  %1685 = vmatprep.subr.bf16.mxu1 %v4468_v21  ;;  %v4331_v34 = vcombine.low %v82_v22, %v86_v23 }
  0x10   :  { %v214_v25 = vld [vmem:[%s7348_s1 + $0x520] sm:$0xff]  ;;  %1686 = vmatpush1.bf16.msra.mxu1 %v4467_v27 }
  0x11   :  { %v4460_v29 = vcombine.high %v210_v24, %v214_v25  ;;  %v74_v30 = vld [vmem:[%s7348_s1 + $0xc0] sm:$0xff]  ;;  %1634 = vmatprep.subr.bf16.mxu0 %v4332_v28  ;;  %v4459_v35 = vcombine.low %v210_v24, %v214_v25 }
  0x12   :  { %v78_v31 = vld [vmem:[%s7348_s1 + $0xe0] sm:$0xff]  ;;  %1635 = vmatpush1.bf16.msra.mxu0 %v4331_v34 }
  0x13   :  { %v202_v32 = vld [vmem:[%s7348_s1 + $0x4c0] sm:$0xff]  ;;  %v4324_v36 = vcombine.high %v74_v30, %v78_v31  ;;  %1687 = vmatprep.subr.bf16.mxu1 %v4460_v29  ;;  %v4323_v42 = vcombine.low %v74_v30, %v78_v31 }
  0x14   :  { %v206_v33 = vld [vmem:[%s7348_s1 + $0x4e0] sm:$0xff]  ;;  %1688 = vmatpush1.bf16.msra.mxu1 %v4459_v35 }
  0x15   :  { %v4452_v37 = vcombine.high %v202_v32, %v206_v33  ;;  %v66_v38 = vld [vmem:[%s7348_s1 + $0x80] sm:$0xff]  ;;  %1636 = vmatprep.subr.bf16.mxu0 %v4324_v36  ;;  %v4451_v43 = vcombine.low %v202_v32, %v206_v33 }
  0x16   :  { %v70_v39 = vld [vmem:[%s7348_s1 + $0xa0] sm:$0xff]  ;;  %1637 = vmatpush1.bf16.msra.mxu0 %v4323_v42 }
  0x17   :  { %v194_v40 = vld [vmem:[%s7348_s1 + $0x480] sm:$0xff]  ;;  %v4316_v44 = vcombine.high %v66_v38, %v70_v39  ;;  %1689 = vmatprep.subr.bf16.mxu1 %v4452_v37  ;;  %v4315_v50 = vcombine.low %v66_v38, %v70_v39 }
  0x18   :  { %v198_v41 = vld [vmem:[%s7348_s1 + $0x4a0] sm:$0xff]  ;;  %1690 = vmatpush1.bf16.msra.mxu1 %v4451_v43 }
  0x19   :  { %v4444_v45 = vcombine.high %v194_v40, %v198_v41  ;;  %v58_v46 = vld [vmem:[%s7348_s1 + $0x40] sm:$0xff]  ;;  %1638 = vmatprep.subr.bf16.mxu0 %v4316_v44  ;;  %v4443_v51 = vcombine.low %v194_v40, %v198_v41 }
  0x1a   :  { %v62_v47 = vld [vmem:[%s7348_s1 + $0x60] sm:$0xff]  ;;  %1639 = vmatpush1.bf16.msra.mxu0 %v4315_v50 }
  0x1b   :  { %v186_v48 = vld [vmem:[%s7348_s1 + $0x440] sm:$0xff]  ;;  %v4308_v52 = vcombine.high %v58_v46, %v62_v47  ;;  %1691 = vmatprep.subr.bf16.mxu1 %v4444_v45  ;;  %v4307_v0 = vcombine.low %v58_v46, %v62_v47 }
  0x1c   :  { %v190_v49 = vld [vmem:[%s7348_s1 + $0x460] sm:$0xff]  ;;  %1692 = vmatpush1.bf16.msra.mxu1 %v4443_v51 }
  0x1d   :  { %v50_v53 = vld [vmem:[%s7348_s1] sm:$0xff]  ;;  %v4436_v56 = vcombine.high %v186_v48, %v190_v49  ;;  %1640 = vmatprep.subr.bf16.mxu0 %v4308_v52  ;;  %v4435_v1 = vcombine.low %v186_v48, %v190_v49 }
  0x1e   :  { %v54_v57 = vld [vmem:[%s7348_s1 + $0x20] sm:$0xff]  ;;  %1641 = vmatpush1.bf16.msra.mxu0 %v4307_v0 }
  0x1f   :  { %v178_v61 = vld [vmem:[%s7348_s1 + $0x400] sm:$0xff]  ;;  %v4300_v2 = vcombine.high %v50_v53, %v54_v57  ;;  %1693 = vmatprep.subr.bf16.mxu1 %v4436_v56  ;;  %v4299_v8 = vcombine.low %v50_v53, %v54_v57 }
  0x20   :  { %v182_v62 = vld [vmem:[%s7348_s1 + $0x420] sm:$0xff]  ;;  %1694 = vmatpush1.bf16.msra.mxu1 %v4435_v1 }
  0x21   :  { %v4428_v3 = vcombine.high %v178_v61, %v182_v62  ;;  %v170_v4 = vld [vmem:[%s7348_s1 + $0x3c0] sm:$0xff]  ;;  %1642 = vmatprep.subr.bf16.mxu0 %v4300_v2  ;;  %v4427_v9 = vcombine.low %v178_v61, %v182_v62 }
  0x22   :  { %v174_v5 = vld [vmem:[%s7348_s1 + $0x3e0] sm:$0xff]  ;;  %1643 = vmatpush1.bf16.msra.mxu0 %v4299_v8  ;;  %v235_v8 = vld [vmem:[%s7348_s1 + $0x5c8] sm:$0xff] }
  0x23   :  { %v298_v6 = vld [vmem:[%s7348_s1 + $0x7c0] sm:$0xff]  ;;  %v4420_v10 = vcombine.high %v170_v4, %v174_v5  ;;  %1695 = vmatprep.subr.bf16.mxu1 %v4428_v3  ;;  %v4419_v16 = vcombine.low %v170_v4, %v174_v5 }
  0x24   :  { %v302_v7 = vld [vmem:[%s7348_s1 + $0x7e0] sm:$0xff]  ;;  %1696 = vmatpush1.bf16.msra.mxu1 %v4427_v9  ;;  %v239_v9 = vld [vmem:[%s7348_s1 + $0x5e8] sm:$0xff] }
  0x25   :  { %v4548_v11 = vcombine.high %v298_v6, %v302_v7  ;;  %v162_v12 = vld [vmem:[%s7348_s1 + $0x380] sm:$0xff]  ;;  %1644 = vmatprep.subr.bf16.mxu0 %v4420_v10  ;;  %v4547_v17 = vcombine.low %v298_v6, %v302_v7  ;;  %v107_v6 = vld [vmem:[%s7348_s1 + $0x1c8] sm:$0xff] }
  0x26   :  { %v166_v13 = vld [vmem:[%s7348_s1 + $0x3a0] sm:$0xff]  ;;  %1645 = vmatpush2.bf16.msra.mxu0 %v4419_v16  ;;  %v111_v7 = vld [vmem:[%s7348_s1 + $0x1e8] sm:$0xff] }
  0x27   :  { %v290_v14 = vld [vmem:[%s7348_s1 + $0x780] sm:$0xff]  ;;  %v4412_v18 = vcombine.high %v162_v12, %v166_v13  ;;  %1697 = vmatprep.subr.bf16.mxu1 %v4548_v11  ;;  %v4411_v24 = vcombine.low %v162_v12, %v166_v13  ;;  %v4358_v16 = vcombine.high %v107_v6, %v111_v7 }
  0x28   :  { %v294_v15 = vld [vmem:[%s7348_s1 + $0x7a0] sm:$0xff]  ;;  %1698 = vmatpush2.bf16.msra.mxu1 %v4547_v17  ;;  %v4486_v17 = vcombine.high %v235_v8, %v239_v9 }
  0x29   :  { %v4540_v19 = vcombine.high %v290_v14, %v294_v15  ;;  %v154_v20 = vld [vmem:[%s7348_s1 + $0x340] sm:$0xff]  ;;  %1646 = vmatprep.subr.bf16.mxu0 %v4412_v18  ;;  %v4539_v25 = vcombine.low %v290_v14, %v294_v15  ;;  %v28_v14 = vld [vmem:[%s7349_s0 + $0x10] sm:$0xff]  ;;  %v99_v18 = vld [vmem:[%s7348_s1 + $0x188] sm:$0xff] }
  0x2a   :  { %v158_v21 = vld [vmem:[%s7348_s1 + $0x360] sm:$0xff]  ;;  %1647 = vmatpush2.bf16.msra.mxu0 %v4411_v24  ;;  %v32_v15 = vld [vmem:[%s7349_s0 + $0x30] sm:$0xff]  ;;  %v39_v24 = vld [vmem:[%s7349_s0 + $0x68] sm:$0xff] }
  0x2b   :  { %v282_v22 = vld [vmem:[%s7348_s1 + $0x740] sm:$0xff]  ;;  %v4404_v26 = vcombine.high %v154_v20, %v158_v21  ;;  %1699 = vmatprep.subr.bf16.mxu1 %v4540_v19  ;;  %v4403_v32 = vcombine.low %v154_v20, %v158_v21  ;;  %v103_v19 = vld [vmem:[%s7348_s1 + $0x1a8] sm:$0xff] }
  0x2c   :  { %v286_v23 = vld [vmem:[%s7348_s1 + $0x760] sm:$0xff]  ;;  %1700 = vmatpush2.bf16.msra.mxu1 %v4539_v25  ;;  %v227_v20 = vld [vmem:[%s7348_s1 + $0x588] sm:$0xff]  ;;  %v5513_v25 = vpack.c.bf16 %v32_v15, %v28_v14 }
  0x2d   :  { %v4532_v27 = vcombine.high %v282_v22, %v286_v23  ;;  %v146_v28 = vld [vmem:[%s7348_s1 + $0x300] sm:$0xff]  ;;  %1648 = vmatprep.subr.bf16.mxu0 %v4404_v26  ;;  %v4531_v33 = vcombine.low %v282_v22, %v286_v23  ;;  %v231_v22 = vld [vmem:[%s7348_s1 + $0x5a8] sm:$0xff]  ;;  %v4357_v26 = vcombine.low %v107_v6, %v111_v7 }
  0x2e   :  { %v150_v29 = vld [vmem:[%s7348_s1 + $0x320] sm:$0xff]  ;;  %1649 = vmatpush2.bf16.msra.mxu0 %v4403_v32  ;;  %v35_v23 = vld [vmem:[%s7349_s0 + $0x48] sm:$0xff] }
  0x2f   :  { %v274_v30 = vld [vmem:[%s7348_s1 + $0x700] sm:$0xff]  ;;  %v4396_v34 = vcombine.high %v146_v28, %v150_v29  ;;  %1701 = vmatprep.subr.bf16.mxu1 %v4532_v27  ;;  %v4395_v40 = vcombine.low %v146_v28, %v150_v29  ;;  %v37_v27 = vld [vmem:[%s7349_s0 + $0x58] sm:$0xff]  ;;  %v4485_v29 = vcombine.low %v235_v8, %v239_v9  ;;  %v91_v32 = vld [vmem:[%s7348_s1 + $0x148] sm:$0xff] }
  0x30   :  { %v278_v31 = vld [vmem:[%s7348_s1 + $0x720] sm:$0xff]  ;;  %1702 = vmatpush2.bf16.msra.mxu1 %v4531_v33  ;;  %v41_v28 = vld [vmem:[%s7349_s0 + $0x78] sm:$0xff]  ;;  %v95_v33 = vld [vmem:[%s7348_s1 + $0x168] sm:$0xff] }
  0x31   :  { %v4524_v35 = vcombine.high %v274_v30, %v278_v31  ;;  %v138_v36 = vld [vmem:[%s7348_s1 + $0x2c0] sm:$0xff]  ;;  %1650 = vmatprep.subr.bf16.mxu0 %v4396_v34  ;;  %v4523_v41 = vcombine.low %v274_v30, %v278_v31  ;;  %v4350_v30 = vcombine.high %v99_v18, %v103_v19  ;;  %v4478_v31 = vcombine.high %v227_v20, %v231_v22 }
  0x32   :  { %v142_v37 = vld [vmem:[%s7348_s1 + $0x2e0] sm:$0xff]  ;;  %1651 = vmatpush2.bf16.msra.mxu0 %v4395_v40  ;;  %v5527_v34 = vpack.c.bf16 %v39_v24, %v35_v23 }
  0x33   :  { %v266_v38 = vld [vmem:[%s7348_s1 + $0x6c0] sm:$0xff]  ;;  %v4388_v42 = vcombine.high %v138_v36, %v142_v37  ;;  %1703 = vmatprep.subr.bf16.mxu1 %v4524_v35  ;;  %v4387_v48 = vcombine.low %v138_v36, %v142_v37  ;;  %v219_v35 = vld [vmem:[%s7348_s1 + $0x548] sm:$0xff]  ;;  %v5536_v37 = vpack.c.bf16 %v41_v28, %v37_v27 }
  0x34   :  { %v270_v39 = vld [vmem:[%s7348_s1 + $0x6e0] sm:$0xff]  ;;  %1704 = vmatpush2.bf16.msra.mxu1 %v4523_v41  ;;  %v223_v36 = vld [vmem:[%s7348_s1 + $0x568] sm:$0xff]  ;;  %v4477_v41 = vcombine.low %v227_v20, %v231_v22 }
  0x35   :  { %v4516_v43 = vcombine.high %v266_v38, %v270_v39  ;;  %v130_v44 = vld [vmem:[%s7348_s1 + $0x280] sm:$0xff]  ;;  %1652 = vmatprep.subr.bf16.mxu0 %v4388_v42  ;;  %v4515_v49 = vcombine.low %v266_v38, %v270_v39  ;;  %v4349_v38 = vcombine.low %v99_v18, %v103_v19  ;;  %v4342_v42 = vcombine.high %v91_v32, %v95_v33  ;;  %v51_v18 = vld [vmem:[%s7348_s1 + $0x8] sm:$0xff] }
  0x36   :  { %v134_v45 = vld [vmem:[%s7348_s1 + $0x2a0] sm:$0xff]  ;;  %1653 = vmatpush2.bf16.msra.mxu0 %v4387_v48  ;;  %v211_v48 = vld [vmem:[%s7348_s1 + $0x508] sm:$0xff] }
  0x37   :  { %v258_v46 = vld [vmem:[%s7348_s1 + $0x680] sm:$0xff]  ;;  %v4380_v50 = vcombine.high %v130_v44, %v134_v45  ;;  %1705 = vmatprep.subr.bf16.mxu1 %v4516_v43  ;;  %v4379_v56 = vcombine.low %v130_v44, %v134_v45  ;;  %v36_v43 = vld [vmem:[%s7349_s0 + $0x50] sm:$0xff]  ;;  %v4470_v45 = vcombine.high %v219_v35, %v223_v36  ;;  %v55_v19 = vld [vmem:[%s7348_s1 + $0x28] sm:$0xff] }
  0x38   :  { %v262_v47 = vld [vmem:[%s7348_s1 + $0x6a0] sm:$0xff]  ;;  %1706 = vmatpush2.bf16.msra.mxu1 %v4515_v49  ;;  %v40_v44 = vld [vmem:[%s7349_s0 + $0x70] sm:$0xff]  ;;  %v215_v49 = vld [vmem:[%s7348_s1 + $0x528] sm:$0xff] }
  0x39   :  { %v4508_v51 = vcombine.high %v258_v46, %v262_v47  ;;  %v122_v52 = vld [vmem:[%s7348_s1 + $0x240] sm:$0xff]  ;;  %1654 = vmatprep.subr.bf16.mxu0 %v4380_v50  ;;  %v4507_v57 = vcombine.low %v258_v46, %v262_v47  ;;  %v83_v46 = vld [vmem:[%s7348_s1 + $0x108] sm:$0xff] }
  0x3a   :  { %v126_v53 = vld [vmem:[%s7348_s1 + $0x260] sm:$0xff]  ;;  %1655 = vmatpush2.bf16.msra.mxu0 %v4379_v56  ;;  %v87_v47 = vld [vmem:[%s7348_s1 + $0x128] sm:$0xff] }
  0x3b   :  { %v250_v54 = vld [vmem:[%s7348_s1 + $0x640] sm:$0xff]  ;;  %v4372_v59 = vcombine.high %v122_v52, %v126_v53  ;;  %1707 = vmatprep.subr.bf16.mxu1 %v4508_v51  ;;  %v4371_v2 = vcombine.low %v122_v52, %v126_v53  ;;  %v4341_v51 = vcombine.low %v91_v32, %v95_v33  ;;  %v5567_v52 = vpack.c.bf16 %v40_v44, %v36_v43  ;;  %v75_v56 = vld [vmem:[%s7348_s1 + $0xc8] sm:$0xff] }
  0x3c   :  { %v254_v55 = vld [vmem:[%s7348_s1 + $0x660] sm:$0xff]  ;;  %1708 = vmatpush2.bf16.msra.mxu1 %v4507_v57  ;;  %v4469_v53 = vcombine.low %v219_v35, %v223_v36  ;;  %v79_v57 = vld [vmem:[%s7348_s1 + $0xe8] sm:$0xff]  ;;  %v4301_v32 = vcombine.low %v51_v18, %v55_v19 }
  0x3d   :  { %v4500_v60 = vcombine.high %v250_v54, %v254_v55  ;;  %v114_v61 = vld [vmem:[%s7348_s1 + $0x200] sm:$0xff]  ;;  %1656 = vmatprep.subr.bf16.mxu0 %v4372_v59  ;;  %v4499_v3 = vcombine.low %v250_v54, %v254_v55  ;;  %v4334_v54 = vcombine.high %v83_v46, %v87_v47  ;;  %v4462_v55 = vcombine.high %v211_v48, %v215_v49  ;;  %v203_v59 = vld [vmem:[%s7348_s1 + $0x4c8] sm:$0xff] }
  0x3e   :  { %v118_v62 = vld [vmem:[%s7348_s1 + $0x220] sm:$0xff]  ;;  %1657 = vmatpush2.bf16.msra.mxu0 %v4371_v2  ;;  %v67_v2 = vld [vmem:[%s7348_s1 + $0x88] sm:$0xff]  ;;  %v4325_v6 = vcombine.low %v75_v56, %v79_v57 }
  0x3f   :  { %v242_v0 = vld [vmem:[%s7348_s1 + $0x600] sm:$0xff]  ;;  %v4364_v4 = vcombine.high %v114_v61, %v118_v62  ;;  %1709 = vmatprep.subr.bf16.mxu1 %v4500_v60  ;;  %v4363_v10 = vcombine.low %v114_v61, %v118_v62  ;;  %v207_v60 = vld [vmem:[%s7348_s1 + $0x4e8] sm:$0xff]  ;;  %v4333_v61 = vcombine.low %v83_v46, %v87_v47  ;;  %v4461_v62 = vcombine.low %v211_v48, %v215_v49 }
  0x40   :  { %v246_v1 = vld [vmem:[%s7348_s1 + $0x620] sm:$0xff]  ;;  %1710 = vmatpush2.bf16.msra.mxu1 %v4499_v3  ;;  %v71_v3 = vld [vmem:[%s7348_s1 + $0xa8] sm:$0xff]  ;;  %v4453_v7 = vcombine.low %v203_v59, %v207_v60 }
  0x41   :  { %v4492_v5 = vcombine.high %v242_v0, %v246_v1  ;;  %v26_v11 = vld [vmem:[%s7349_s0] sm:$0xff]  ;;  %1658 = vmatprep.subr.bf16.mxu0 %v4364_v4  ;;  %v4491_v13 = vcombine.low %v242_v0, %v246_v1  ;;  %v4326_v0 = vcombine.high %v75_v56, %v79_v57  ;;  %v4454_v1 = vcombine.high %v203_v59, %v207_v60  ;;  %v195_v4 = vld [vmem:[%s7348_s1 + $0x488] sm:$0xff] }
  0x42   :  { %v30_v12 = vld [vmem:[%s7349_s0 + $0x20] sm:$0xff]  ;;  %1659 = vmatpush2.bf16.msra.mxu0 %v4363_v10  ;;  %v4318_v8 = vcombine.high %v67_v2, %v71_v3  ;;  %v59_v10 = vld [vmem:[%s7348_s1 + $0x48] sm:$0xff]  ;;  %v4317_v14 = vcombine.low %v67_v2, %v71_v3 }
  0x43   :  { %1711 = vmatprep.subr.bf16.mxu1 %v4492_v5  ;;  %v5502_v21 = vpack.c.bf16 %v30_v12, %v26_v11  ;;  %1734 = vmatprep.subr.bf16.mxu0 %v4358_v16  ;;  %v34_v39 = vld [vmem:[%s7349_s0 + $0x40] sm:$0xff]  ;;  %v199_v5 = vld [vmem:[%s7348_s1 + $0x4a8] sm:$0xff] }
  0x44   :  { %1712 = vmatpush2.bf16.msra.mxu1 %v4491_v13  ;;  %v38_v40 = vld [vmem:[%s7349_s0 + $0x60] sm:$0xff]  ;;  %v4446_v9 = vcombine.high %v195_v4, %v199_v5  ;;  %v63_v11 = vld [vmem:[%s7348_s1 + $0x68] sm:$0xff]  ;;  %v4445_v15 = vcombine.low %v195_v4, %v199_v5 }
  0x45   :  { %1787 = vmatprep.subr.bf16.mxu1 %v4486_v17  ;;  %1661 = vmatmul.mubr.bf16.vlgmr.msra.gmra.mxu0 %v5502_v21  ;;  %v5564_v50 = vpack.c.bf16 %v38_v40, %v34_v39  ;;  %v187_v12 = vld [vmem:[%s7348_s1 + $0x448] sm:$0xff]  ;;  %v4310_v16 = vcombine.high %v59_v10, %v63_v11  ;;  %v4309_v23 = vcombine.low %v59_v10, %v63_v11 }
  0x46   :  { %1735 = vmatpush1.bf16.msra.mxu0 %v4357_v26  ;;  %1670 = vmatprep.mubr.bf16.mxu0 %v5527_v34  ;;  %v191_v13 = vld [vmem:[%s7348_s1 + $0x468] sm:$0xff]  ;;  %v4302_v26 = vcombine.high %v51_v18, %v55_v19 }
  0x47   :  { %1714 = vmatmul.mubr.bf16.vlgmr.msra.gmra.mxu1 %v5513_v25  ;;  %1736 = vmatprep.subr.bf16.mxu0 %v4350_v30  ;;  %v4438_v17 = vcombine.high %v187_v12, %v191_v13  ;;  %v179_v20 = vld [vmem:[%s7348_s1 + $0x408] sm:$0xff]  ;;  %v4437_v24 = vcombine.low %v187_v12, %v191_v13 }
  0x48   :  { %1788 = vmatpush1.bf16.msra.mxu1 %v4485_v29  ;;  %1723 = vmatprep.mubr.bf16.mxu1 %v5536_v37  ;;  %v183_v22 = vld [vmem:[%s7348_s1 + $0x428] sm:$0xff] }
  0x49   :  { %1789 = vmatprep.subr.bf16.mxu1 %v4478_v31  ;;  %v4430_v27 = vcombine.high %v179_v20, %v183_v22  ;;  %v171_v28 = vld [vmem:[%s7348_s1 + $0x3c8] sm:$0xff]  ;;  %v4429_v33 = vcombine.low %v179_v20, %v183_v22 }
  0x4a   :  { %1737 = vmatpush1.bf16.msra.mxu0 %v4349_v38  ;;  %v175_v29 = vld [vmem:[%s7348_s1 + $0x3e8] sm:$0xff] }
  0x4b   :  { %1738 = vmatprep.subr.bf16.mxu0 %v4342_v42  ;;  %v299_v30 = vld [vmem:[%s7348_s1 + $0x7c8] sm:$0xff]  ;;  %v4422_v35 = vcombine.high %v171_v28, %v175_v29  ;;  %v4421_v42 = vcombine.low %v171_v28, %v175_v29 }
  0x4c   :  { %1790 = vmatpush1.bf16.msra.mxu1 %v4477_v41  ;;  %v303_v31 = vld [vmem:[%s7348_s1 + $0x7e8] sm:$0xff] }
  0x4d   :  { %1791 = vmatprep.subr.bf16.mxu1 %v4470_v45  ;;  %1671 = vmatmul.mubr.bf16.gmra.mxu0 %v5564_v50  ;;  %v4550_v36 = vcombine.high %v299_v30, %v303_v31  ;;  %v163_v38 = vld [vmem:[%s7348_s1 + $0x388] sm:$0xff]  ;;  %v4549_v43 = vcombine.low %v299_v30, %v303_v31 }
  0x4e   :  { %1739 = vmatpush1.bf16.msra.mxu0 %v4341_v51  ;;  %1766 = vmatprep.mubr.bf16.mxu0 %v5355_v58  ;;  %v167_v39 = vld [vmem:[%s7348_s1 + $0x3a8] sm:$0xff] }
  0x4f   :  { %1724 = vmatmul.mubr.bf16.gmra.mxu1 %v5567_v52  ;;  %1740 = vmatprep.subr.bf16.mxu0 %v4334_v54  ;;  %v291_v40 = vld [vmem:[%s7348_s1 + $0x788] sm:$0xff]  ;;  %v4414_v44 = vcombine.high %v163_v38, %v167_v39  ;;  %v4413_v51 = vcombine.low %v163_v38, %v167_v39  ;;  %v108_v38 = vld [vmem:[%s7348_s1 + $0x1d0] sm:$0xff] }
  0x50   :  { %1792 = vmatpush1.bf16.msra.mxu1 %v4469_v53  ;;  %1819 = vmatprep.mubr.bf16.mxu1 %v5369_v63  ;;  %v295_v41 = vld [vmem:[%s7348_s1 + $0x7a8] sm:$0xff]  ;;  %v112_v39 = vld [vmem:[%s7348_s1 + $0x1f0] sm:$0xff] }
  0x51   :  { %1793 = vmatprep.subr.bf16.mxu1 %v4462_v55  ;;  %v4542_v45 = vcombine.high %v291_v40, %v295_v41  ;;  %v155_v46 = vld [vmem:[%s7348_s1 + $0x348] sm:$0xff]  ;;  %v4541_v53 = vcombine.low %v291_v40, %v295_v41  ;;  %v236_v40 = vld [vmem:[%s7348_s1 + $0x5d0] sm:$0xff] }
  0x52   :  { %1741 = vmatpush1.bf16.msra.mxu0 %v4333_v61  ;;  %v159_v47 = vld [vmem:[%s7348_s1 + $0x368] sm:$0xff]  ;;  %v240_v41 = vld [vmem:[%s7348_s1 + $0x5f0] sm:$0xff] }
  0x53   :  { %1742 = vmatprep.subr.bf16.mxu0 %v4326_v0  ;;  %v283_v48 = vld [vmem:[%s7348_s1 + $0x748] sm:$0xff]  ;;  %v4406_v54 = vcombine.high %v155_v46, %v159_v47  ;;  %v4405_v61 = vcombine.low %v155_v46, %v159_v47  ;;  %v100_v46 = vld [vmem:[%s7348_s1 + $0x190] sm:$0xff] }
  0x54   :  { %1794 = vmatpush1.bf16.msra.mxu1 %v4461_v62  ;;  %v287_v49 = vld [vmem:[%s7348_s1 + $0x768] sm:$0xff]  ;;  %v104_v47 = vld [vmem:[%s7348_s1 + $0x1b0] sm:$0xff] }
  0x55   :  { %1795 = vmatprep.subr.bf16.mxu1 %v4454_v1  ;;  %v4534_v55 = vcombine.high %v283_v48, %v287_v49  ;;  %v147_v56 = vld [vmem:[%s7348_s1 + $0x308] sm:$0xff]  ;;  %v4533_v62 = vcombine.low %v283_v48, %v287_v49  ;;  %v228_v48 = vld [vmem:[%s7348_s1 + $0x590] sm:$0xff] }
  0x56   :  { %1743 = vmatpush1.bf16.msra.mxu0 %v4325_v6  ;;  %v151_v57 = vld [vmem:[%s7348_s1 + $0x328] sm:$0xff]  ;;  %v232_v49 = vld [vmem:[%s7348_s1 + $0x5b0] sm:$0xff] }
  0x57   :  { %1744 = vmatprep.subr.bf16.mxu0 %v4318_v8  ;;  %v275_v59 = vld [vmem:[%s7348_s1 + $0x708] sm:$0xff]  ;;  %v4398_v0 = vcombine.high %v147_v56, %v151_v57  ;;  %v4397_v6 = vcombine.low %v147_v56, %v151_v57  ;;  %v4480_v56 = vcombine.high %v228_v48, %v232_v49  ;;  %v96_v57 = vld [vmem:[%s7348_s1 + $0x170] sm:$0xff] }
  0x58   :  { %1796 = vmatpush1.bf16.msra.mxu1 %v4453_v7  ;;  %v279_v60 = vld [vmem:[%s7348_s1 + $0x728] sm:$0xff] }
  0x59   :  { %1797 = vmatprep.subr.bf16.mxu1 %v4446_v9  ;;  %v4526_v1 = vcombine.high %v275_v59, %v279_v60  ;;  %v139_v2 = vld [vmem:[%s7348_s1 + $0x2c8] sm:$0xff]  ;;  %v4525_v7 = vcombine.low %v275_v59, %v279_v60  ;;  %v220_v59 = vld [vmem:[%s7348_s1 + $0x550] sm:$0xff] }
  0x5a   :  { %1745 = vmatpush1.bf16.msra.mxu0 %v4317_v14  ;;  %v143_v3 = vld [vmem:[%s7348_s1 + $0x2e8] sm:$0xff]  ;;  %v224_v60 = vld [vmem:[%s7348_s1 + $0x570] sm:$0xff] }
  0x5b   :  { %1746 = vmatprep.subr.bf16.mxu0 %v4310_v16  ;;  %v267_v4 = vld [vmem:[%s7348_s1 + $0x6c8] sm:$0xff]  ;;  %v4390_v8 = vcombine.high %v139_v2, %v143_v3  ;;  %v4389_v14 = vcombine.low %v139_v2, %v143_v3  ;;  %v4472_v3 = vcombine.high %v220_v59, %v224_v60 }
  0x5c   :  { %1798 = vmatpush1.bf16.msra.mxu1 %v4445_v15  ;;  %v271_v5 = vld [vmem:[%s7348_s1 + $0x6e8] sm:$0xff] }
  0x5d   :  { %1799 = vmatprep.subr.bf16.mxu1 %v4438_v17  ;;  %v4518_v9 = vcombine.high %v267_v4, %v271_v5  ;;  %v131_v10 = vld [vmem:[%s7348_s1 + $0x288] sm:$0xff]  ;;  %v4517_v15 = vcombine.low %v267_v4, %v271_v5  ;;  %v212_v4 = vld [vmem:[%s7348_s1 + $0x510] sm:$0xff] }
  0x5e   :  { %1747 = vmatpush1.bf16.msra.mxu0 %v4309_v23  ;;  %v135_v11 = vld [vmem:[%s7348_s1 + $0x2a8] sm:$0xff]  ;;  %v216_v5 = vld [vmem:[%s7348_s1 + $0x530] sm:$0xff] }
  0x5f   :  { %1748 = vmatprep.subr.bf16.mxu0 %v4302_v26  ;;  %v259_v12 = vld [vmem:[%s7348_s1 + $0x688] sm:$0xff]  ;;  %v4382_v16 = vcombine.high %v131_v10, %v135_v11  ;;  %v4381_v23 = vcombine.low %v131_v10, %v135_v11  ;;  %v4464_v11 = vcombine.high %v212_v4, %v216_v5 }
  0x60   :  { %1800 = vmatpush1.bf16.msra.mxu1 %v4437_v24  ;;  %v263_v13 = vld [vmem:[%s7348_s1 + $0x6a8] sm:$0xff] }
  0x61   :  { %1801 = vmatprep.subr.bf16.mxu1 %v4430_v27  ;;  %v4510_v17 = vcombine.high %v259_v12, %v263_v13  ;;  %v123_v18 = vld [vmem:[%s7348_s1 + $0x248] sm:$0xff]  ;;  %v4509_v24 = vcombine.low %v259_v12, %v263_v13  ;;  %v204_v12 = vld [vmem:[%s7348_s1 + $0x4d0] sm:$0xff] }
  0x62   :  { %1749 = vmatpush1.bf16.msra.mxu0 %v4301_v32  ;;  %v127_v19 = vld [vmem:[%s7348_s1 + $0x268] sm:$0xff]  ;;  %v208_v13 = vld [vmem:[%s7348_s1 + $0x4f0] sm:$0xff] }
  0x63   :  { %1750 = vmatprep.subr.bf16.mxu0 %v4422_v35  ;;  %v251_v20 = vld [vmem:[%s7348_s1 + $0x648] sm:$0xff]  ;;  %v4374_v26 = vcombine.high %v123_v18, %v127_v19  ;;  %v4373_v32 = vcombine.low %v123_v18, %v127_v19  ;;  %v4456_v19 = vcombine.high %v204_v12, %v208_v13 }
  0x64   :  { %1802 = vmatpush1.bf16.msra.mxu1 %v4429_v33  ;;  %v255_v22 = vld [vmem:[%s7348_s1 + $0x668] sm:$0xff] }
  0x65   :  { %1803 = vmatprep.subr.bf16.mxu1 %v4550_v36  ;;  %v4502_v27 = vcombine.high %v251_v20, %v255_v22  ;;  %v115_v28 = vld [vmem:[%s7348_s1 + $0x208] sm:$0xff]  ;;  %v4501_v33 = vcombine.low %v251_v20, %v255_v22  ;;  %v196_v20 = vld [vmem:[%s7348_s1 + $0x490] sm:$0xff] }
  0x66   :  { %1751 = vmatpush2.bf16.msra.mxu0 %v4421_v42  ;;  %v119_v29 = vld [vmem:[%s7348_s1 + $0x228] sm:$0xff]  ;;  %v200_v22 = vld [vmem:[%s7348_s1 + $0x4b0] sm:$0xff] }
  0x67   :  { %1752 = vmatprep.subr.bf16.mxu0 %v4414_v44  ;;  %v243_v30 = vld [vmem:[%s7348_s1 + $0x608] sm:$0xff]  ;;  %v4366_v35 = vcombine.high %v115_v28, %v119_v29  ;;  %v4365_v42 = vcombine.low %v115_v28, %v119_v29  ;;  %v4360_v44 = vcombine.high %v108_v38, %v112_v39  ;;  %v60_v28 = vld [vmem:[%s7348_s1 + $0x50] sm:$0xff] }
  0x68   :  { %1804 = vmatpush2.bf16.msra.mxu1 %v4549_v43  ;;  %v247_v31 = vld [vmem:[%s7348_s1 + $0x628] sm:$0xff]  ;;  %v64_v29 = vld [vmem:[%s7348_s1 + $0x70] sm:$0xff] }
  0x69   :  { %1805 = vmatprep.subr.bf16.mxu1 %v4542_v45  ;;  %v4494_v36 = vcombine.high %v243_v30, %v247_v31  ;;  %v4493_v43 = vcombine.low %v243_v30, %v247_v31  ;;  %v4488_v45 = vcombine.high %v236_v40, %v240_v41  ;;  %v188_v30 = vld [vmem:[%s7348_s1 + $0x450] sm:$0xff] }
  0x6a   :  { %1753 = vmatpush2.bf16.msra.mxu0 %v4413_v51  ;;  %v4359_v51 = vcombine.low %v108_v38, %v112_v39  ;;  %v192_v31 = vld [vmem:[%s7348_s1 + $0x470] sm:$0xff]  ;;  %v4312_v38 = vcombine.high %v60_v28, %v64_v29 }
  0x6b   :  { %1754 = vmatprep.subr.bf16.mxu0 %v4406_v54  ;;  %v4352_v54 = vcombine.high %v100_v46, %v104_v47  ;;  %v180_v39 = vld [vmem:[%s7348_s1 + $0x410] sm:$0xff] }
  0x6c   :  { %1806 = vmatpush2.bf16.msra.mxu1 %v4541_v53  ;;  %v4487_v53 = vcombine.low %v236_v40, %v240_v41  ;;  %v184_v40 = vld [vmem:[%s7348_s1 + $0x430] sm:$0xff]  ;;  %v4440_v41 = vcombine.high %v188_v30, %v192_v31 }
  0x6d   :  { %1807 = vmatprep.subr.bf16.mxu1 %v4534_v55  ;;  %v92_v55 = vld [vmem:[%s7348_s1 + $0x150] sm:$0xff] }
  0x6e   :  { %1755 = vmatpush2.bf16.msra.mxu0 %v4405_v61  ;;  %v4351_v61 = vcombine.low %v100_v46, %v104_v47  ;;  %v4344_v2 = vcombine.high %v92_v55, %v96_v57  ;;  %v300_v47 = vld [vmem:[%s7348_s1 + $0x7d0] sm:$0xff] }
  0x6f   :  { %1756 = vmatprep.subr.bf16.mxu0 %v4398_v0  ;;  %v88_v0 = vld [vmem:[%s7348_s1 + $0x130] sm:$0xff] }
  0x70   :  { %1808 = vmatpush2.bf16.msra.mxu1 %v4533_v62  ;;  %v84_v62 = vld [vmem:[%s7348_s1 + $0x110] sm:$0xff] }
  0x71   :  { %1809 = vmatprep.subr.bf16.mxu1 %v4526_v1  ;;  %v4479_v1 = vcombine.low %v228_v48, %v232_v49  ;;  %v4336_v10 = vcombine.high %v84_v62, %v88_v0  ;;  %v304_v48 = vld [vmem:[%s7348_s1 + $0x7f0] sm:$0xff]  ;;  %v4432_v49 = vcombine.high %v180_v39, %v184_v40 }
  0x72   :  { %1757 = vmatpush2.bf16.msra.mxu0 %v4397_v6  ;;  %v4343_v6 = vcombine.low %v92_v55, %v96_v57  ;;  %v4431_v55 = vcombine.low %v180_v39, %v184_v40  ;;  %v292_v57 = vld [vmem:[%s7348_s1 + $0x790] sm:$0xff] }
  0x73   :  { %1758 = vmatprep.subr.bf16.mxu0 %v4390_v8  ;;  %v80_v8 = vld [vmem:[%s7348_s1 + $0xf0] sm:$0xff] }
  0x74   :  { %1810 = vmatpush2.bf16.msra.mxu1 %v4525_v7  ;;  %v76_v7 = vld [vmem:[%s7348_s1 + $0xd0] sm:$0xff] }
  0x75   :  { %1811 = vmatprep.subr.bf16.mxu1 %v4518_v9  ;;  %v4471_v9 = vcombine.low %v220_v59, %v224_v60  ;;  %v4328_v18 = vcombine.high %v76_v7, %v80_v8  ;;  %v296_v59 = vld [vmem:[%s7348_s1 + $0x7b0] sm:$0xff]  ;;  %v4552_v60 = vcombine.high %v300_v47, %v304_v48 }
  0x76   :  { %1759 = vmatpush2.bf16.msra.mxu0 %v4389_v14  ;;  %v4335_v14 = vcombine.low %v84_v62, %v88_v0  ;;  %v156_v62 = vld [vmem:[%s7348_s1 + $0x350] sm:$0xff] }
  0x77   :  { %1760 = vmatprep.subr.bf16.mxu0 %v4382_v16  ;;  %v72_v16 = vld [vmem:[%s7348_s1 + $0xb0] sm:$0xff] }
  0x78   :  { %1812 = vmatpush2.bf16.msra.mxu1 %v4517_v15  ;;  %v68_v15 = vld [vmem:[%s7348_s1 + $0x90] sm:$0xff] }
  0x79   :  { %1813 = vmatprep.subr.bf16.mxu1 %v4510_v17  ;;  %v4463_v17 = vcombine.low %v212_v4, %v216_v5  ;;  %v160_v0 = vld [vmem:[%s7348_s1 + $0x370] sm:$0xff]  ;;  %v4544_v5 = vcombine.high %v292_v57, %v296_v59 }
  0x7a   :  { %1761 = vmatpush2.bf16.msra.mxu0 %v4381_v23  ;;  %v4327_v23 = vcombine.low %v76_v7, %v80_v8  ;;  %v288_v4 = vld [vmem:[%s7348_s1 + $0x770] sm:$0xff] }
  0x7b   :  { %1762 = vmatprep.subr.bf16.mxu0 %v4374_v26  ;;  %v4320_v26 = vcombine.high %v68_v15, %v72_v16  ;;  %v148_v7 = vld [vmem:[%s7348_s1 + $0x310] sm:$0xff] }
  0x7c   :  { %1814 = vmatpush2.bf16.msra.mxu1 %v4509_v24  ;;  %v4455_v24 = vcombine.low %v204_v12, %v208_v13  ;;  %v152_v8 = vld [vmem:[%s7348_s1 + $0x330] sm:$0xff] }
  0x7d   :  { %1815 = vmatprep.subr.bf16.mxu1 %v4502_v27  ;;  %v4448_v27 = vcombine.high %v196_v20, %v200_v22  ;;  %v280_v12 = vld [vmem:[%s7348_s1 + $0x730] sm:$0xff] }
  0x7e   :  { %1763 = vmatpush2.bf16.msra.mxu0 %v4373_v32  ;;  %v4319_v32 = vcombine.low %v68_v15, %v72_v16  ;;  %v140_v15 = vld [vmem:[%s7348_s1 + $0x2d0] sm:$0xff] }
  0x7f   :  { %1764 = vmatprep.subr.bf16.mxu0 %v4366_v35  ;;  %v56_v35 = vld [vmem:[%s7348_s1 + $0x30] sm:$0xff] }
  0x80   :  { %1816 = vmatpush2.bf16.msra.mxu1 %v4501_v33  ;;  %v52_v33 = vld [vmem:[%s7348_s1 + $0x10] sm:$0xff] }
  0x81   :  { %1817 = vmatprep.subr.bf16.mxu1 %v4494_v36  ;;  %v4447_v36 = vcombine.low %v196_v20, %v200_v22  ;;  %v4304_v46 = vcombine.high %v52_v33, %v56_v35  ;;  %v144_v16 = vld [vmem:[%s7348_s1 + $0x2f0] sm:$0xff] }
  0x82   :  { %1765 = vmatpush2.bf16.msra.mxu0 %v4365_v42  ;;  %v4311_v42 = vcombine.low %v60_v28, %v64_v29  ;;  %v272_v20 = vld [vmem:[%s7348_s1 + $0x6f0] sm:$0xff]  ;;  %v4392_v28 = vcombine.high %v140_v15, %v144_v16 }
  0x83   :  { %1840 = vmatprep.subr.bf16.mxu0 %v4360_v44  ;;  %v176_v44 = vld [vmem:[%s7348_s1 + $0x3f0] sm:$0xff] }
  0x84   :  { %1818 = vmatpush2.bf16.msra.mxu1 %v4493_v43  ;;  %v172_v43 = vld [vmem:[%s7348_s1 + $0x3d0] sm:$0xff] }
  0x85   :  { %1893 = vmatprep.subr.bf16.mxu1 %v4488_v45  ;;  %1767 = vmatmul.mubr.bf16.vlgmr.msra.gmra.mxu0 %v5502_v21  ;;  %v4439_v45 = vcombine.low %v188_v30, %v192_v31  ;;  %v260_v29 = vld [vmem:[%s7348_s1 + $0x690] sm:$0xff] }
  0x86   :  { %1841 = vmatpush1.bf16.msra.mxu0 %v4359_v51  ;;  %1776 = vmatprep.mubr.bf16.mxu0 %v5527_v34  ;;  %v4303_v51 = vcombine.low %v52_v33, %v56_v35  ;;  %v264_v30 = vld [vmem:[%s7348_s1 + $0x6b0] sm:$0xff] }
  0x87   :  { %1820 = vmatmul.mubr.bf16.vlgmr.msra.gmra.mxu1 %v5513_v25  ;;  %1842 = vmatprep.subr.bf16.mxu0 %v4352_v54  ;;  %v168_v54 = vld [vmem:[%s7348_s1 + $0x3b0] sm:$0xff] }
  0x88   :  { %1894 = vmatpush1.bf16.msra.mxu1 %v4487_v53  ;;  %1829 = vmatprep.mubr.bf16.mxu1 %v5536_v37  ;;  %v164_v53 = vld [vmem:[%s7348_s1 + $0x390] sm:$0xff] }
  0x89   :  { %1895 = vmatprep.subr.bf16.mxu1 %v4480_v56  ;;  %v4424_v56 = vcombine.high %v172_v43, %v176_v44  ;;  %v124_v33 = vld [vmem:[%s7348_s1 + $0x250] sm:$0xff] }
  0x8a   :  { %1843 = vmatpush1.bf16.msra.mxu0 %v4351_v61  ;;  %v4423_v61 = vcombine.low %v172_v43, %v176_v44  ;;  %v128_v35 = vld [vmem:[%s7348_s1 + $0x270] sm:$0xff] }
  0x8b   :  { %1844 = vmatprep.subr.bf16.mxu0 %v4344_v2  ;;  %v4416_v2 = vcombine.high %v164_v53, %v168_v54  ;;  %v252_v39 = vld [vmem:[%s7348_s1 + $0x650] sm:$0xff] }
  0x8c   :  { %1896 = vmatpush1.bf16.msra.mxu1 %v4479_v1  ;;  %v4551_v1 = vcombine.low %v300_v47, %v304_v48  ;;  %v256_v40 = vld [vmem:[%s7348_s1 + $0x670] sm:$0xff] }
  0x8d   :  { %1897 = vmatprep.subr.bf16.mxu1 %v4472_v3  ;;  %1777 = vmatmul.mubr.bf16.gmra.mxu0 %v5564_v50  ;;  %v284_v3 = vld [vmem:[%s7348_s1 + $0x750] sm:$0xff] }
  0x8e   :  { %1845 = vmatpush1.bf16.msra.mxu0 %v4343_v6  ;;  %1872 = vmatprep.mubr.bf16.mxu0 %v5355_v58  ;;  %v4415_v6 = vcombine.low %v164_v53, %v168_v54  ;;  %v4536_v13 = vcombine.high %v284_v3, %v288_v4  ;;  %v116_v43 = vld [vmem:[%s7348_s1 + $0x210] sm:$0xff]  ;;  %v109_v53 = vld [vmem:[%s7348_s1 + $0x1d8] sm:$0xff] }
  0x8f   :  { %1830 = vmatmul.mubr.bf16.gmra.mxu1 %v5567_v52  ;;  %1846 = vmatprep.subr.bf16.mxu0 %v4336_v10  ;;  %v4408_v10 = vcombine.high %v156_v62, %v160_v0  ;;  %v120_v44 = vld [vmem:[%s7348_s1 + $0x230] sm:$0xff]  ;;  %v113_v54 = vld [vmem:[%s7348_s1 + $0x1f8] sm:$0xff] }
  0x90   :  { %1898 = vmatpush1.bf16.msra.mxu1 %v4471_v9  ;;  %1925 = vmatprep.mubr.bf16.mxu1 %v5369_v63  ;;  %v4543_v9 = vcombine.low %v292_v57, %v296_v59  ;;  %v244_v47 = vld [vmem:[%s7348_s1 + $0x610] sm:$0xff]  ;;  %v237_v57 = vld [vmem:[%s7348_s1 + $0x5d8] sm:$0xff] }
  0x91   :  { %1899 = vmatprep.subr.bf16.mxu1 %v4464_v11  ;;  %v276_v11 = vld [vmem:[%s7348_s1 + $0x710] sm:$0xff]  ;;  %v241_v59 = vld [vmem:[%s7348_s1 + $0x5f8] sm:$0xff] }
  0x92   :  { %1847 = vmatpush1.bf16.msra.mxu0 %v4335_v14  ;;  %v4407_v14 = vcombine.low %v156_v62, %v160_v0  ;;  %v4528_v22 = vcombine.high %v276_v11, %v280_v12  ;;  %v248_v48 = vld [vmem:[%s7348_s1 + $0x630] sm:$0xff]  ;;  %v101_v62 = vld [vmem:[%s7348_s1 + $0x198] sm:$0xff] }
  0x93   :  { %1848 = vmatprep.subr.bf16.mxu0 %v4328_v18  ;;  %v4400_v18 = vcombine.high %v148_v7, %v152_v8  ;;  %v105_v0 = vld [vmem:[%s7348_s1 + $0x1b8] sm:$0xff] }
  0x94   :  { %1900 = vmatpush1.bf16.msra.mxu1 %v4463_v17  ;;  %v4535_v17 = vcombine.low %v284_v3, %v288_v4  ;;  %v229_v3 = vld [vmem:[%s7348_s1 + $0x598] sm:$0xff] }
  0x95   :  { %1901 = vmatprep.subr.bf16.mxu1 %v4456_v19  ;;  %v268_v19 = vld [vmem:[%s7348_s1 + $0x6d0] sm:$0xff]  ;;  %v233_v4 = vld [vmem:[%s7348_s1 + $0x5b8] sm:$0xff] }
  0x96   :  { %1849 = vmatpush1.bf16.msra.mxu0 %v4327_v23  ;;  %v4399_v23 = vcombine.low %v148_v7, %v152_v8  ;;  %v4520_v31 = vcombine.high %v268_v19, %v272_v20  ;;  %v93_v7 = vld [vmem:[%s7348_s1 + $0x158] sm:$0xff] }
  0x97   :  { %1850 = vmatprep.subr.bf16.mxu0 %v4320_v26  ;;  %v136_v26 = vld [vmem:[%s7348_s1 + $0x2b0] sm:$0xff]  ;;  %v97_v8 = vld [vmem:[%s7348_s1 + $0x178] sm:$0xff] }
  0x98   :  { %1902 = vmatpush1.bf16.msra.mxu1 %v4455_v24  ;;  %v132_v24 = vld [vmem:[%s7348_s1 + $0x290] sm:$0xff] }
  0x99   :  { %1903 = vmatprep.subr.bf16.mxu1 %v4448_v27  ;;  %v4527_v27 = vcombine.low %v276_v11, %v280_v12  ;;  %v4482_v11 = vcombine.high %v229_v3, %v233_v4  ;;  %v221_v12 = vld [vmem:[%s7348_s1 + $0x558] sm:$0xff] }
  0x9a   :  { %1851 = vmatpush1.bf16.msra.mxu0 %v4319_v32  ;;  %v4391_v32 = vcombine.low %v140_v15, %v144_v16  ;;  %v85_v15 = vld [vmem:[%s7348_s1 + $0x118] sm:$0xff] }
  0x9b   :  { %1852 = vmatprep.subr.bf16.mxu0 %v4312_v38  ;;  %v4384_v38 = vcombine.high %v132_v24, %v136_v26  ;;  %v89_v16 = vld [vmem:[%s7348_s1 + $0x138] sm:$0xff] }
  0x9c   :  { %1904 = vmatpush1.bf16.msra.mxu1 %v4447_v36  ;;  %v4519_v36 = vcombine.low %v268_v19, %v272_v20  ;;  %v213_v20 = vld [vmem:[%s7348_s1 + $0x518] sm:$0xff] }
  0x9d   :  { %1905 = vmatprep.subr.bf16.mxu1 %v4440_v41  ;;  %v4512_v41 = vcombine.high %v260_v29, %v264_v30 }
  0x9e   :  { %1853 = vmatpush1.bf16.msra.mxu0 %v4311_v42  ;;  %v4383_v42 = vcombine.low %v132_v24, %v136_v26  ;;  %v77_v24 = vld [vmem:[%s7348_s1 + $0xd8] sm:$0xff] }
  0x9f   :  { %1854 = vmatprep.subr.bf16.mxu0 %v4304_v46  ;;  %v4376_v46 = vcombine.high %v124_v33, %v128_v35  ;;  %v81_v26 = vld [vmem:[%s7348_s1 + $0xf8] sm:$0xff] }
  0xa0   :  { %1906 = vmatpush1.bf16.msra.mxu1 %v4439_v45  ;;  %v4511_v45 = vcombine.low %v260_v29, %v264_v30  ;;  %v205_v30 = vld [vmem:[%s7348_s1 + $0x4d8] sm:$0xff] }
  0xa1   :  { %1907 = vmatprep.subr.bf16.mxu1 %v4432_v49  ;;  %v4504_v49 = vcombine.high %v252_v39, %v256_v40 }
  0xa2   :  { %1855 = vmatpush1.bf16.msra.mxu0 %v4303_v51  ;;  %v4375_v51 = vcombine.low %v124_v33, %v128_v35  ;;  %v69_v33 = vld [vmem:[%s7348_s1 + $0x98] sm:$0xff] }
  0xa3   :  { %1856 = vmatprep.subr.bf16.mxu0 %v4424_v56  ;;  %v4368_v56 = vcombine.high %v116_v43, %v120_v44  ;;  %v73_v35 = vld [vmem:[%s7348_s1 + $0xb8] sm:$0xff] }
  0xa4   :  { %1908 = vmatpush1.bf16.msra.mxu1 %v4431_v55  ;;  %v4503_v55 = vcombine.low %v252_v39, %v256_v40  ;;  %v197_v40 = vld [vmem:[%s7348_s1 + $0x498] sm:$0xff] }
  0xa5   :  { %1909 = vmatprep.subr.bf16.mxu1 %v4552_v60  ;;  %v4496_v60 = vcombine.high %v244_v47, %v248_v48 }
  0xa6   :  { %1857 = vmatpush2.bf16.msra.mxu0 %v4423_v61  ;;  %v4367_v61 = vcombine.low %v116_v43, %v120_v44  ;;  %v61_v43 = vld [vmem:[%s7348_s1 + $0x58] sm:$0xff] }
  0xa7   :  { %1858 = vmatprep.subr.bf16.mxu0 %v4416_v2  ;;  %v4362_v2 = vcombine.high %v109_v53, %v113_v54  ;;  %v65_v44 = vld [vmem:[%s7348_s1 + $0x78] sm:$0xff] }
  0xa8   :  { %1910 = vmatpush2.bf16.msra.mxu1 %v4551_v1  ;;  %v4495_v1 = vcombine.low %v244_v47, %v248_v48  ;;  %v193_v47 = vld [vmem:[%s7348_s1 + $0x478] sm:$0xff]  ;;  %v4321_v48 = vcombine.low %v69_v33, %v73_v35 }
  0xa9   :  { %1911 = vmatprep.subr.bf16.mxu1 %v4544_v5  ;;  %v4490_v5 = vcombine.high %v237_v57, %v241_v59 }
  0xaa   :  { %1859 = vmatpush2.bf16.msra.mxu0 %v4415_v6  ;;  %v4361_v6 = vcombine.low %v109_v53, %v113_v54  ;;  %v4314_v54 = vcombine.high %v61_v43, %v65_v44 }
  0xab   :  { %1860 = vmatprep.subr.bf16.mxu0 %v4408_v10  ;;  %v4354_v10 = vcombine.high %v101_v62, %v105_v0 }
  0xac   :  { %1912 = vmatpush2.bf16.msra.mxu1 %v4543_v9  ;;  %v4489_v9 = vcombine.low %v237_v57, %v241_v59  ;;  %v185_v57 = vld [vmem:[%s7348_s1 + $0x438] sm:$0xff]  ;;  %v4313_v59 = vcombine.low %v61_v43, %v65_v44 }
  0xad   :  { %1913 = vmatprep.subr.bf16.mxu1 %v4536_v13  ;;  %v225_v13 = vld [vmem:[%s7348_s1 + $0x578] sm:$0xff] }
  0xae   :  { %1861 = vmatpush2.bf16.msra.mxu0 %v4407_v14  ;;  %v4353_v14 = vcombine.low %v101_v62, %v105_v0  ;;  %v4474_v19 = vcombine.high %v221_v12, %v225_v13  ;;  %v173_v62 = vld [vmem:[%s7348_s1 + $0x3d8] sm:$0xff] }
  0xaf   :  { %1862 = vmatprep.subr.bf16.mxu0 %v4400_v18  ;;  %v4346_v18 = vcombine.high %v93_v7, %v97_v8 }
  0xb0   :  { %1914 = vmatpush2.bf16.msra.mxu1 %v4535_v17  ;;  %v4481_v17 = vcombine.low %v229_v3, %v233_v4  ;;  %v305_v3 = vld [vmem:[%s7348_s1 + $0x7f8] sm:$0xff] }
  0xb1   :  { %1915 = vmatprep.subr.bf16.mxu1 %v4528_v22  ;;  %v217_v22 = vld [vmem:[%s7348_s1 + $0x538] sm:$0xff] }
  0xb2   :  { %1863 = vmatpush2.bf16.msra.mxu0 %v4399_v23  ;;  %v4345_v23 = vcombine.low %v93_v7, %v97_v8  ;;  %v4466_v29 = vcombine.high %v213_v20, %v217_v22  ;;  %v165_v7 = vld [vmem:[%s7348_s1 + $0x398] sm:$0xff] }
  0xb3   :  { %1864 = vmatprep.subr.bf16.mxu0 %v4392_v28  ;;  %v4338_v28 = vcombine.high %v85_v15, %v89_v16  ;;  %v169_v8 = vld [vmem:[%s7348_s1 + $0x3b8] sm:$0xff] }
  0xb4   :  { %1916 = vmatpush2.bf16.msra.mxu1 %v4527_v27  ;;  %v4473_v27 = vcombine.low %v221_v12, %v225_v13  ;;  %v157_v13 = vld [vmem:[%s7348_s1 + $0x358] sm:$0xff] }
  0xb5   :  { %1917 = vmatprep.subr.bf16.mxu1 %v4520_v31  ;;  %v209_v31 = vld [vmem:[%s7348_s1 + $0x4f8] sm:$0xff] }
  0xb6   :  { %1865 = vmatpush2.bf16.msra.mxu0 %v4391_v32  ;;  %v4337_v32 = vcombine.low %v85_v15, %v89_v16  ;;  %v4458_v39 = vcombine.high %v205_v30, %v209_v31  ;;  %v4418_v16 = vcombine.high %v165_v7, %v169_v8 }
  0xb7   :  { %1866 = vmatprep.subr.bf16.mxu0 %v4384_v38  ;;  %v4330_v38 = vcombine.high %v77_v24, %v81_v26 }
  0xb8   :  { %1918 = vmatpush2.bf16.msra.mxu1 %v4519_v36  ;;  %v4465_v36 = vcombine.low %v213_v20, %v217_v22  ;;  %v4417_v20 = vcombine.low %v165_v7, %v169_v8  ;;  %v149_v22 = vld [vmem:[%s7348_s1 + $0x318] sm:$0xff] }
  0xb9   :  { %1919 = vmatprep.subr.bf16.mxu1 %v4512_v41  ;;  %v201_v41 = vld [vmem:[%s7348_s1 + $0x4b8] sm:$0xff] }
  0xba   :  { %1867 = vmatpush2.bf16.msra.mxu0 %v4383_v42  ;;  %v4329_v42 = vcombine.low %v77_v24, %v81_v26  ;;  %v4449_v53 = vcombine.low %v197_v40, %v201_v41 }
  0xbb   :  { %1868 = vmatprep.subr.bf16.mxu0 %v4376_v46  ;;  %v189_v46 = vld [vmem:[%s7348_s1 + $0x458] sm:$0xff] }
  0xbc   :  { %1920 = vmatpush2.bf16.msra.mxu1 %v4511_v45  ;;  %v4457_v45 = vcombine.low %v205_v30, %v209_v31  ;;  %v141_v31 = vld [vmem:[%s7348_s1 + $0x2d8] sm:$0xff] }
  0xbd   :  { %1921 = vmatprep.subr.bf16.mxu1 %v4504_v49  ;;  %v53_v49 = vld [vmem:[%s7348_s1 + $0x18] sm:$0xff] }
  0xbe   :  { %1869 = vmatpush2.bf16.msra.mxu0 %v4375_v51  ;;  %v57_v51 = vld [vmem:[%s7348_s1 + $0x38] sm:$0xff] }
  0xbf   :  { %1870 = vmatprep.subr.bf16.mxu0 %v4368_v56  ;;  %v4442_v56 = vcombine.high %v189_v46, %v193_v47  ;;  %v4305_v4 = vcombine.low %v53_v49, %v57_v51 }
  0xc0   :  { %1922 = vmatpush2.bf16.msra.mxu1 %v4503_v55  ;;  %v181_v55 = vld [vmem:[%s7348_s1 + $0x418] sm:$0xff] }
  0xc1   :  { %1923 = vmatprep.subr.bf16.mxu1 %v4496_v60  ;;  %v4441_v60 = vcombine.low %v189_v46, %v193_v47  ;;  %v4434_v0 = vcombine.high %v181_v55, %v185_v57  ;;  %v125_v47 = vld [vmem:[%s7348_s1 + $0x258] sm:$0xff] }
  0xc2   :  { %1871 = vmatpush2.bf16.msra.mxu0 %v4367_v61  ;;  %v4306_v61 = vcombine.high %v53_v49, %v57_v51 }
  0xc3   :  { %1946 = vmatprep.subr.bf16.mxu0 %v4362_v2  ;;  %v301_v2 = vld [vmem:[%s7348_s1 + $0x7d8] sm:$0xff] }
  0xc4   :  { %1924 = vmatpush2.bf16.msra.mxu1 %v4495_v1  ;;  %v177_v1 = vld [vmem:[%s7348_s1 + $0x3f8] sm:$0xff]  ;;  %v4553_v15 = vcombine.low %v301_v2, %v305_v3 }
  0xc5   :  { %1999 = vmatprep.subr.bf16.mxu1 %v4490_v5  ;;  %1873 = vmatmul.mubr.bf16.vlgmr.msra.gmra.mxu0 %v5502_v21  ;;  %v4433_v5 = vcombine.low %v181_v55, %v185_v57  ;;  %v4425_v12 = vcombine.low %v173_v62, %v177_v1 }
  0xc6   :  { %1947 = vmatpush1.bf16.msra.mxu0 %v4361_v6  ;;  %1882 = vmatprep.mubr.bf16.mxu0 %v5527_v34  ;;  %v4426_v6 = vcombine.high %v173_v62, %v177_v1  ;;  %v121_v62 = vld [vmem:[%s7348_s1 + $0x238] sm:$0xff] }
  0xc7   :  { %1926 = vmatmul.mubr.bf16.vlgmr.msra.gmra.mxu1 %v5513_v25  ;;  %1948 = vmatprep.subr.bf16.mxu0 %v4354_v10  ;;  %v4554_v10 = vcombine.high %v301_v2, %v305_v3  ;;  %v245_v1 = vld [vmem:[%s7348_s1 + $0x618] sm:$0xff] }
  0xc8   :  { %2000 = vmatpush1.bf16.msra.mxu1 %v4489_v9  ;;  %1935 = vmatprep.mubr.bf16.mxu1 %v5536_v37  ;;  %v293_v9 = vld [vmem:[%s7348_s1 + $0x798] sm:$0xff] }
  0xc9   :  { %2001 = vmatprep.subr.bf16.mxu1 %v4482_v11  ;;  %v297_v11 = vld [vmem:[%s7348_s1 + $0x7b8] sm:$0xff] }
  0xca   :  { %1949 = vmatpush1.bf16.msra.mxu0 %v4353_v14  ;;  %v161_v14 = vld [vmem:[%s7348_s1 + $0x378] sm:$0xff]  ;;  %v4545_v24 = vcombine.low %v293_v9, %v297_v11 }
  0xcb   :  { %1950 = vmatprep.subr.bf16.mxu0 %v4346_v18  ;;  %v289_v18 = vld [vmem:[%s7348_s1 + $0x778] sm:$0xff]  ;;  %v4410_v26 = vcombine.high %v157_v13, %v161_v14  ;;  %v4409_v30 = vcombine.low %v157_v13, %v161_v14  ;;  %v6131_v13 = vld [vmem:[%s7351_s2] sm:$0xff] }
  0xcc   :  { %2002 = vmatpush1.bf16.msra.mxu1 %v4481_v17  ;;  %v285_v17 = vld [vmem:[%s7348_s1 + $0x758] sm:$0xff]  ;;  %v4811_v14 = vld [vmem:[%s7350_s3 + $0xe0] ss:$16 sps:$4 sm:$0xff]  }
  0xcd   :  { %2003 = vmatprep.subr.bf16.mxu1 %v4474_v19  ;;  %1883 = vmatmul.mubr.bf16.gmra.mxu0 %v5564_v50  ;;  %v4546_v19 = vcombine.high %v293_v9, %v297_v11  ;;  %v249_v2 = vld [vmem:[%s7348_s1 + $0x638] sm:$0xff] }
  0xce   :  { %1951 = vmatpush1.bf16.msra.mxu0 %v4345_v23  ;;  %1978 = vmatprep.mubr.bf16.mxu0 %v5355_v58  ;;  %v4322_v58 = vcombine.high %v69_v33, %v73_v35  ;;  %v153_v23 = vld [vmem:[%s7348_s1 + $0x338] sm:$0xff]  ;;  %v4537_v33 = vcombine.low %v285_v17, %v289_v18  ;;  %v4497_v9 = vcombine.low %v245_v1, %v249_v2 }
  0xcf   :  { %1936 = vmatmul.mubr.bf16.gmra.mxu1 %v5567_v52  ;;  %1952 = vmatprep.subr.bf16.mxu0 %v4338_v28  ;;  %v281_v28 = vld [vmem:[%s7348_s1 + $0x738] sm:$0xff]  ;;  %v4402_v35 = vcombine.high %v149_v22, %v153_v23 }
  0xd0   :  { %2004 = vmatpush1.bf16.msra.mxu1 %v4473_v27  ;;  %2031 = vmatprep.mubr.bf16.mxu1 %v5369_v63  ;;  %v4450_v63 = vcombine.high %v197_v40, %v201_v41  ;;  %v277_v27 = vld [vmem:[%s7348_s1 + $0x718] sm:$0xff]  ;;  %v4401_v40 = vcombine.low %v149_v22, %v153_v23  ;;  %v4814_v22 = vld [vmem:[%s7350_s3 + $0xc0] ss:$16 sps:$4 sm:$0xff]  }
  0xd1   :  { %2005 = vmatprep.subr.bf16.mxu1 %v4466_v29  ;;  %v4538_v29 = vcombine.high %v285_v17, %v289_v18  ;;  %v133_v41 = vld [vmem:[%s7348_s1 + $0x298] sm:$0xff]  ;;  %v4529_v43 = vcombine.low %v277_v27, %v281_v28  ;;  %v4826_v17 = vld [vmem:[%s7350_s3 + $0x2e0] ss:$16 sps:$4 sm:$0xff]  }
  0xd2   :  { %1953 = vmatpush1.bf16.msra.mxu0 %v4337_v32  ;;  %v145_v32 = vld [vmem:[%s7348_s1 + $0x2f8] sm:$0xff] }
  0xd3   :  { %1954 = vmatprep.subr.bf16.mxu0 %v4330_v38  ;;  %v273_v38 = vld [vmem:[%s7348_s1 + $0x6f8] sm:$0xff]  ;;  %v4394_v44 = vcombine.high %v141_v31, %v145_v32 }
  0xd4   :  { %2006 = vmatpush1.bf16.msra.mxu1 %v4465_v36  ;;  %v269_v36 = vld [vmem:[%s7348_s1 + $0x6d8] sm:$0xff] }
  0xd5   :  { %2007 = vmatprep.subr.bf16.mxu1 %v4458_v39  ;;  %v4530_v39 = vcombine.high %v277_v27, %v281_v28  ;;  %v4522_v46 = vcombine.high %v269_v36, %v273_v38  ;;  %v4521_v49 = vcombine.low %v269_v36, %v273_v38  ;;  %v4846_v36 = vld [vmem:[%s7350_s3 + $0x284] ss:$16 sps:$4 sm:$0xff]  }
  0xd6   :  { %1955 = vmatpush1.bf16.msra.mxu0 %v4329_v42  ;;  %v137_v42 = vld [vmem:[%s7348_s1 + $0x2b8] sm:$0xff] }
  0xd7   :  { %1956 = vmatprep.subr.bf16.mxu0 %v4322_v58  ;;  %v265_v58 = vld [vmem:[%s7348_s1 + $0x6b8] sm:$0xff]  ;;  %v4386_v51 = vcombine.high %v133_v41, %v137_v42 }
  0xd8   :  { %2008 = vmatpush1.bf16.msra.mxu1 %v4457_v45  ;;  %v261_v45 = vld [vmem:[%s7348_s1 + $0x698] sm:$0xff] }
  0xd9   :  { %2009 = vmatprep.subr.bf16.mxu1 %v4450_v63  ;;  %v4393_v63 = vcombine.low %v141_v31, %v145_v32  ;;  %v4514_v55 = vcombine.high %v261_v45, %v265_v58  ;;  %v4513_v57 = vcombine.low %v261_v45, %v265_v58  ;;  %v4831_v45 = vld [vmem:[%s7350_s3 + $0x44] ss:$16 sps:$4 sm:$0xff]   ;;  %v4850_v58 = vld [vmem:[%s7350_s3 + $0x260] ss:$16 sps:$4 sm:$0xff]  }
  0xda   :  { %1957 = vmatpush1.bf16.msra.mxu0 %v4321_v48  ;;  %v129_v48 = vld [vmem:[%s7348_s1 + $0x278] sm:$0xff] }
  0xdb   :  { %1958 = vmatprep.subr.bf16.mxu0 %v4314_v54  ;;  %v257_v54 = vld [vmem:[%s7348_s1 + $0x678] sm:$0xff]  ;;  %v4377_v3 = vcombine.low %v125_v47, %v129_v48 }
  0xdc   :  { %2010 = vmatpush1.bf16.msra.mxu1 %v4449_v53  ;;  %v253_v53 = vld [vmem:[%s7348_s1 + $0x658] sm:$0xff] }
  0xdd   :  { %2011 = vmatprep.subr.bf16.mxu1 %v4442_v56  ;;  %v4385_v56 = vcombine.low %v133_v41, %v137_v42  ;;  %v4844_v42 = vld [vmem:[%s7350_s3 + $0x280] ss:$16 sps:$4 sm:$0xff]  }
  0xde   :  { %1959 = vmatpush1.bf16.msra.mxu0 %v4313_v59  ;;  %v4378_v59 = vcombine.high %v125_v47, %v129_v48  ;;  %v4837_v47 = vld [vmem:[%s7350_s3 + $0x24] ss:$16 sps:$4 sm:$0xff]   ;;  %v4856_v48 = vld [vmem:[%s7350_s3 + $0x240] ss:$16 sps:$4 sm:$0xff]  }
  0xdf   :  { %1960 = vmatprep.subr.bf16.mxu0 %v4306_v61  ;;  %v117_v61 = vld [vmem:[%s7348_s1 + $0x218] sm:$0xff] }
  0xe0   :  { %2012 = vmatpush1.bf16.msra.mxu1 %v4441_v60  ;;  %v4506_v60 = vcombine.high %v253_v53, %v257_v54  ;;  %v4369_v8 = vcombine.low %v117_v61, %v121_v62 }
  0xe1   :  { %2013 = vmatprep.subr.bf16.mxu1 %v4434_v0  ;;  %v308_v0 = vlaneseq }
  0xe2   :  { %1961 = vmatpush1.bf16.msra.mxu0 %v4305_v4  ;;  %v4505_v4 = vcombine.low %v253_v53, %v257_v54  ;;  %v4843_v53 = vld [vmem:[%s7350_s3 + $0x4] ss:$16 sps:$4 sm:$0xff]   ;;  %v4862_v54 = vld [vmem:[%s7350_s3 + $0x220] ss:$16 sps:$4 sm:$0xff]  }
  0xe3   :  { %1962 = vmatprep.subr.bf16.mxu0 %v4426_v6  ;;  %v4498_v6 = vcombine.high %v245_v1, %v249_v2  ;;  %v6117_v7 = vshrl.u32 %v308_v0, 7  ;;  %v4874_v0 = vld [vmem:[%s7350_s3 + $0x3e0] ss:$16 sps:$4 sm:$0xff]   ;;  %v4882_v1 = vld [vmem:[%s7350_s3 + $0x3c4] ss:$16 sps:$4 sm:$0xff]  }
  0xe4   :  { %2014 = vmatpush1.bf16.msra.mxu1 %v4433_v5  ;;  %v4370_v5 = vcombine.high %v117_v61, %v121_v62  ;;  %v4847_v61 = vld [vmem:[%s7350_s3 + $0x1e0] ss:$16 sps:$4 sm:$0xff]   ;;  %v4855_v62 = vld [vmem:[%s7350_s3 + $0x1c4] ss:$16 sps:$4 sm:$0xff]  }
  0xe5   :  { %2015 = vmatprep.subr.bf16.mxu1 %v4554_v10  ;;  %v4813_v10 = vld [vmem:[%s7350_s3 + $0xe4] ss:$16 sps:$4 sm:$0xff]   ;;  %v6123_v11 = vsub.s32 1, %v6117_v7  ;;  %v4853_v2 = vld [vmem:[%s7350_s3 + $0x1c0] ss:$16 sps:$4 sm:$0xff]  }
  0xe6   :  { %1963 = vmatpush2.bf16.msra.mxu0 %v4425_v12  ;;  %v4828_v12 = vld [vmem:[%s7350_s3 + $0x2e4] ss:$16 sps:$4 sm:$0xff]  }
  0xe7   :  { %1964 = vmatprep.subr.bf16.mxu0 %v4418_v16  ;;  %7362 = vst [vmem:[#allocation2_spill] sm:$0xff] %v6123_v11  ;;  %v6141_v16 = vrot.slane %v6131_v13, %v6123_v11 }
  0xe8   :  { %2016 = vmatpush2.bf16.msra.mxu1 %v4553_v15  ;;  %v4816_v15 = vld [vmem:[%s7350_s3 + $0xc4] ss:$16 sps:$4 sm:$0xff]  }
  0xe9   :  { %2017 = vmatprep.subr.bf16.mxu1 %v4546_v19  ;;  %v4834_v19 = vld [vmem:[%s7350_s3 + $0x2c4] ss:$16 sps:$4 sm:$0xff]  }
  0xea   :  { %1965 = vmatpush2.bf16.msra.mxu0 %v4417_v20 }
  0xeb   :  { %1966 = vmatprep.subr.bf16.mxu0 %v4410_v26 }
  0xec   :  { %2018 = vmatpush2.bf16.msra.mxu1 %v4545_v24 }
  0xed   :  { %2019 = vmatprep.subr.bf16.mxu1 %v4538_v29  ;;  %v4817_v29 = vld [vmem:[%s7350_s3 + $0xa0] ss:$16 sps:$4 sm:$0xff]  }
  0xee   :  { %1967 = vmatpush2.bf16.msra.mxu0 %v4409_v30  ;;  %v4822_v30 = vld [vmem:[%s7350_s3 + $0x84] ss:$16 sps:$4 sm:$0xff]  }
  0xef   :  { %1968 = vmatprep.subr.bf16.mxu0 %v4402_v35 }
  0xf0   :  { %2020 = vmatpush2.bf16.msra.mxu1 %v4537_v33  ;;  %v4838_v33 = vld [vmem:[%s7350_s3 + $0x2a0] ss:$16 sps:$4 sm:$0xff]  }
  0xf1   :  { %2021 = vmatprep.subr.bf16.mxu1 %v4530_v39  ;;  %v4820_v39 = vld [vmem:[%s7350_s3 + $0x80] ss:$16 sps:$4 sm:$0xff]  }
  0xf2   :  { %1969 = vmatpush2.bf16.msra.mxu0 %v4401_v40  ;;  %v4825_v40 = vld [vmem:[%s7350_s3 + $0x64] ss:$16 sps:$4 sm:$0xff]  }
  0xf3   :  { %1970 = vmatprep.subr.bf16.mxu0 %v4394_v44  ;;  %v4823_v44 = vld [vmem:[%s7350_s3 + $0x60] ss:$16 sps:$4 sm:$0xff]  }
  0xf4   :  { %2022 = vmatpush2.bf16.msra.mxu1 %v4529_v43 }
  0xf5   :  { %2023 = vmatprep.subr.bf16.mxu1 %v4522_v46  ;;  %v4858_v46 = vld [vmem:[%s7350_s3 + $0x244] ss:$16 sps:$4 sm:$0xff]  }
  0xf6   :  { %1971 = vmatpush2.bf16.msra.mxu0 %v4393_v63  ;;  %v4829_v63 = vld [vmem:[%s7350_s3 + $0x40] ss:$16 sps:$4 sm:$0xff]  }
  0xf7   :  { %1972 = vmatprep.subr.bf16.mxu0 %v4386_v51  ;;  %v4835_v51 = vld [vmem:[%s7350_s3 + $0x20] ss:$16 sps:$4 sm:$0xff]  }
  0xf8   :  { %2024 = vmatpush2.bf16.msra.mxu1 %v4521_v49  ;;  %v4864_v49 = vld [vmem:[%s7350_s3 + $0x224] ss:$16 sps:$4 sm:$0xff]  }
  0xf9   :  { %2025 = vmatprep.subr.bf16.mxu1 %v4514_v55  ;;  %v4870_v55 = vld [vmem:[%s7350_s3 + $0x204] ss:$16 sps:$4 sm:$0xff]  }
  0xfa   :  { %1973 = vmatpush2.bf16.msra.mxu0 %v4385_v56  ;;  %v4841_v56 = vld [vmem:[%s7350_s3] ss:$16 sps:$4 sm:$0xff]  }
  0xfb   :  { %1974 = vmatprep.subr.bf16.mxu0 %v4378_v59  ;;  %v4868_v59 = vld [vmem:[%s7350_s3 + $0x200] ss:$16 sps:$4 sm:$0xff]  }
  0xfc   :  { %2026 = vmatpush2.bf16.msra.mxu1 %v4513_v57  ;;  %v4849_v57 = vld [vmem:[%s7350_s3 + $0x1e4] ss:$16 sps:$4 sm:$0xff]  }
  0xfd   :  { %2027 = vmatprep.subr.bf16.mxu1 %v4506_v60  ;;  %v4876_v60 = vld [vmem:[%s7350_s3 + $0x3e4] ss:$16 sps:$4 sm:$0xff]  }
  0xfe   :  { %1975 = vmatpush2.bf16.msra.mxu0 %v4377_v3  ;;  %v4861_v3 = vld [vmem:[%s7350_s3 + $0x1a4] ss:$16 sps:$4 sm:$0xff]  }
  0xff   :  { %1976 = vmatprep.subr.bf16.mxu0 %v4370_v5  ;;  %v4880_v5 = vld [vmem:[%s7350_s3 + $0x3c0] ss:$16 sps:$4 sm:$0xff]  }
 0x100   :  { %2028 = vmatpush2.bf16.msra.mxu1 %v4505_v4 }
 0x101   :  { %2029 = vmatprep.subr.bf16.mxu1 %v4498_v6  ;;  %v4888_v6 = vld [vmem:[%s7350_s3 + $0x3a4] ss:$16 sps:$4 sm:$0xff]  }
 0x102   :  { %1977 = vmatpush2.bf16.msra.mxu0 %v4369_v8  ;;  %v4859_v8 = vld [vmem:[%s7350_s3 + $0x1a0] ss:$16 sps:$4 sm:$0xff]  }
 0x103   :  { %3658 = vmatprep.subr.bf16.mxu0 %v4813_v10 }
 0x104   :  { %2030 = vmatpush2.bf16.msra.mxu1 %v4497_v9  ;;  %v4867_v9 = vld [vmem:[%s7350_s3 + $0x184] ss:$16 sps:$4 sm:$0xff]  }
 0x105   :  { %3711 = vmatprep.subr.bf16.mxu1 %v4828_v12  ;;  %v6146_v18 = vpop.f32.mrf.mxu0  ;;  %1979 = vmatmul.mubr.bf16.vlgmr.msra.gmra.mxu0 %v5502_v21  ;;  %v4819_v21 = vld [vmem:[%s7350_s3 + $0xa4] ss:$16 sps:$4 sm:$0xff]  }
 0x106   :  { %3659 = vmatpush1.bf16.msra.mxu0 %v4811_v14  ;;  %1988 = vmatprep.mubr.bf16.mxu0 %v5527_v34  ;;  %v4840_v34 = vld [vmem:[%s7350_s3 + $0x2a4] ss:$16 sps:$4 sm:$0xff]   ;;  %v4886_v14 = vld [vmem:[%s7350_s3 + $0x3a0] ss:$16 sps:$4 sm:$0xff]  }
 0x107   :  { %v6152_v20 = vpop.f32.mrf.mxu1  ;;  %2032 = vmatmul.mubr.bf16.vlgmr.msra.gmra.mxu1 %v5513_v25  ;;  %v1664_v23 = vpop.f32.mrf.mxu0  ;;  %3660 = vmatprep.subr.bf16.mxu0 %v4816_v15  ;;  %v4832_v25 = vld [vmem:[%s7350_s3 + $0x2c0] ss:$16 sps:$4 sm:$0xff]   ;;  %v4894_v15 = vld [vmem:[%s7350_s3 + $0x384] ss:$16 sps:$4 sm:$0xff]  }
 0x108   :  { %v1665_v24 = vadd.f32 %v1664_v23, %v6141_v16  ;;  %2041 = vmatprep.mubr.bf16.mxu1 %v5536_v37  ;;  %3712 = vmatpush1.bf16.msra.mxu1 %v4826_v17  ;;  %v4865_v17 = vld [vmem:[%s7350_s3 + $0x180] ss:$16 sps:$4 sm:$0xff]  }
 0x109   :  { %v1717_v26 = vpop.f32.mrf.mxu1  ;;  %v6167_v27 = vpop.f32.mrf.mxu0  ;;  %3713 = vmatprep.subr.bf16.mxu1 %v4834_v19  ;;  %v4873_v19 = vld [vmem:[%s7350_s3 + $0x164] ss:$16 sps:$4 sm:$0xff]  }
 0x10a   :  { %3661 = vmatpush1.bf16.msra.mxu0 %v4814_v22  ;;  %v1718_v31 = vadd.f32 %v1717_v26, %v1665_v24  ;;  %v6302_v24 = vsub.s32 0, %v6117_v7  ;;  %v4897_v26 = vld [vmem:[%s7350_s3 + $0x364] ss:$16 sps:$4 sm:$0xff]  }
 0x10b   :  { %v6172_v28 = vpop.f32.mrf.mxu1  ;;  %v1668_v37 = vpop.f32.mrf.mxu0  ;;  %3662 = vmatprep.subr.bf16.mxu0 %v4819_v21  ;;  %v4892_v21 = vld [vmem:[%s7350_s3 + $0x380] ss:$16 sps:$4 sm:$0xff]  }
 0x10c   :  { %v1669_v32 = vadd.f32 %v1668_v37, %v6141_v16  ;;  %3714 = vmatpush1.bf16.msra.mxu1 %v4832_v25  ;;  %v2053_v41 = vmax.f32 %v1718_v31, 0.0  ;;  %7363 = vst [vmem:[#allocation3_spill] sm:$0xff] %v6302_v24  ;;  %v4871_v25 = vld [vmem:[%s7350_s3 + $0x160] ss:$16 sps:$4 sm:$0xff]   ;;  %v311_v31 = vrot.slane %v6131_v13, %v6302_v24 }
 0x10d   :  { %v1721_v35 = vpop.f32.mrf.mxu1  ;;  %1989 = vmatmul.mubr.bf16.gmra.mxu0 %v5564_v50  ;;  %3715 = vmatprep.subr.bf16.mxu1 %v4840_v34  ;;  %v6270_v4 = vpop.f32.mrf.mxu0  ;;  %v4879_v34 = vld [vmem:[%s7350_s3 + $0x144] ss:$16 sps:$4 sm:$0xff]  }
 0x10e   :  { %v1722_v38 = vadd.f32 %v1721_v35, %v1669_v32  ;;  %3663 = vmatpush1.bf16.msra.mxu0 %v4817_v29  ;;  %v4900_v32 = vld [vmem:[%s7350_s3 + $0x344] ss:$16 sps:$4 sm:$0xff]  }
 0x10f   :  { %2042 = vmatmul.mubr.bf16.gmra.mxu1 %v5567_v52  ;;  %3664 = vmatprep.subr.bf16.mxu0 %v4822_v30  ;;  %v4852_v52 = vld [vmem:[%s7350_s3 + $0x264] ss:$16 sps:$4 sm:$0xff]   ;;  %v1674_v10 = vpop.f32.mrf.mxu0  ;;  %v6284_v12 = vpop.f32.mrf.mxu1  ;;  %v4895_v30 = vld [vmem:[%s7350_s3 + $0x360] ss:$16 sps:$4 sm:$0xff]  }
 0x110   :  { %v2061_v50 = vmax.f32 %v1722_v38, 0.0  ;;  %3716 = vmatpush1.bf16.msra.mxu1 %v4838_v33  ;;  %v4877_v33 = vld [vmem:[%s7350_s3 + $0x140] ss:$16 sps:$4 sm:$0xff]   ;;  %v1675_v35 = vadd.f32 %v1674_v10, %v6141_v16  ;;  %v1667_v38 = vadd.f32 %v6167_v27, %v311_v31 }
 0x111   :  { %3717 = vmatprep.subr.bf16.mxu1 %v4846_v36  ;;  %v1676_v22 = vpop.f32.mrf.mxu0  ;;  %v1727_v23 = vpop.f32.mrf.mxu1 }
 0x112   :  { %v6201_v43 = vpack.c.bf16 %v2061_v50, %v2053_v41  ;;  %3665 = vmatpush1.bf16.msra.mxu0 %v4820_v39  ;;  %v4885_v39 = vld [vmem:[%s7350_s3 + $0x124] ss:$16 sps:$4 sm:$0xff]   ;;  %v4898_v41 = vld [vmem:[%s7350_s3 + $0x340] ss:$16 sps:$4 sm:$0xff]   ;;  %v1663_v50 = vadd.f32 %v6146_v18, %v311_v31  ;;  %v1728_v27 = vadd.f32 %v1727_v23, %v1675_v35 }
 0x113   :  { %3666 = vmatprep.subr.bf16.mxu0 %v4825_v40  ;;  %v1678_v29 = vpop.f32.mrf.mxu0  ;;  %v1729_v37 = vpop.f32.mrf.mxu1  ;;  %v4901_v18 = vld [vmem:[%s7350_s3 + $0x320] ss:$16 sps:$4 sm:$0xff]  }
 0x114   :  { %3690 = vmatprep.mubr.bf16.mxu0 %v6201_v43  ;;  %3718 = vmatpush1.bf16.msra.mxu1 %v4844_v42  ;;  %v1679_v36 = vadd.f32 %v1678_v29, %v6141_v16  ;;  %v4903_v16 = vld [vmem:[%s7350_s3 + $0x324] ss:$16 sps:$4 sm:$0xff]   ;;  %v4883_v42 = vld [vmem:[%s7350_s3 + $0x120] ss:$16 sps:$4 sm:$0xff]  }
 0x115   :  { %3719 = vmatprep.subr.bf16.mxu1 %v4852_v52  ;;  %v1731_v40 = vpop.f32.mrf.mxu1 }
 0x116   :  { %3667 = vmatpush1.bf16.msra.mxu0 %v4823_v44  ;;  %v1732_v52 = vadd.f32 %v1731_v40, %v1679_v36  ;;  %v1720_v44 = vadd.f32 %v6172_v28, %v1667_v38 }
 0x117   :  { %3668 = vmatprep.subr.bf16.mxu0 %v4831_v45  ;;  %v4891_v45 = vld [vmem:[%s7350_s3 + $0x104] ss:$16 sps:$4 sm:$0xff]  }
 0x118   :  { %3720 = vmatpush1.bf16.msra.mxu1 %v4850_v58  ;;  %v1716_v58 = vadd.f32 %v6152_v20, %v1663_v50  ;;  %v2077_v28 = vmax.f32 %v1732_v52, 0.0  ;;  %v4909_v20 = vld [vmem:[%s7350_s3 + $0x4e4] ss:$16 sps:$4 sm:$0xff]  }
 0x119   :  { %3721 = vmatprep.subr.bf16.mxu1 %v4858_v46  ;;  %v4906_v46 = vld [vmem:[%s7350_s3 + $0x304] ss:$16 sps:$4 sm:$0xff]  }
 0x11a   :  { %3669 = vmatpush1.bf16.msra.mxu0 %v4829_v63  ;;  %v2069_v63 = vmax.f32 %v1728_v27, 0.0  ;;  %v4921_v50 = vld [vmem:[%s7350_s3 + $0x464] ss:$16 sps:$4 sm:$0xff]  }
 0x11b   :  { %3670 = vmatprep.subr.bf16.mxu0 %v4837_v47  ;;  %v4889_v47 = vld [vmem:[%s7350_s3 + $0x100] ss:$16 sps:$4 sm:$0xff]  }
 0x11c   :  { %3722 = vmatpush1.bf16.msra.mxu1 %v4856_v48  ;;  %v2060_v48 = vmax.f32 %v1720_v44, 0.0 }
 0x11d   :  { %3723 = vmatprep.subr.bf16.mxu1 %v4864_v49  ;;  %v1673_v49 = vadd.f32 %v6270_v4, %v311_v31 }
 0x11e   :  { %3671 = vmatpush1.bf16.msra.mxu0 %v4835_v51  ;;  %v1677_v51 = vadd.f32 %v1676_v22, %v311_v31 }
 0x11f   :  { %3672 = vmatprep.subr.bf16.mxu0 %v4843_v53  ;;  %v6359_v53 = vsub.s32 3, %v6117_v7 }
 0x120   :  { %3724 = vmatpush1.bf16.msra.mxu1 %v4862_v54  ;;  %v4904_v54 = vld [vmem:[%s7350_s3 + $0x300] ss:$16 sps:$4 sm:$0xff]  }
 0x121   :  { %3725 = vmatprep.subr.bf16.mxu1 %v4870_v55  ;;  %v2052_v55 = vmax.f32 %v1716_v58, 0.0 }
 0x122   :  { %3673 = vmatpush1.bf16.msra.mxu0 %v4841_v56  ;;  %v6365_v56 = vsub.s32 2, %v6117_v7 }
 0x123   :  { %3674 = vmatprep.subr.bf16.mxu0 %v4849_v57  ;;  %v4957_v57 = vld [vmem:[%s7350_s3 + $0x6e4] ss:$16 sps:$4 sm:$0xff]  }
 0x124   :  { %3726 = vmatpush1.bf16.msra.mxu1 %v4868_v59  ;;  %7364 = vst [vmem:[#allocation4_spill] sm:$0xff] %v6365_v56  ;;  %v6370_v59 = vpack.c.bf16 %v2077_v28, %v2069_v63 }
 0x125   :  { %3727 = vmatprep.subr.bf16.mxu1 %v4876_v60  ;;  %v4907_v60 = vld [vmem:[%s7350_s3 + $0x4e0] ss:$16 sps:$4 sm:$0xff]  }
 0x126   :  { %3675 = vmatpush2.bf16.msra.mxu0 %v4847_v61  ;;  %v6375_v61 = vpack.c.bf16 %v2060_v48, %v2052_v55  ;;  %v4955_v48 = vld [vmem:[%s7350_s3 + $0x6e0] ss:$16 sps:$4 sm:$0xff]  }
 0x127   :  { %3676 = vmatprep.subr.bf16.mxu0 %v4855_v62  ;;  %v1726_v62 = vadd.f32 %v6284_v12, %v1673_v49  ;;  %v4915_v12 = vld [vmem:[%s7350_s3 + $0x4a4] ss:$16 sps:$4 sm:$0xff]  }
 0x128   :  { %3728 = vmatpush2.bf16.msra.mxu1 %v4874_v0  ;;  %v1730_v0 = vadd.f32 %v1729_v37, %v1677_v51 }
 0x129   :  { %3729 = vmatprep.subr.bf16.mxu1 %v4882_v1  ;;  %v4912_v1 = vld [vmem:[%s7350_s3 + $0x4c4] ss:$16 sps:$4 sm:$0xff]  }
 0x12a   :  { %3677 = vmatpush2.bf16.msra.mxu0 %v4853_v2  ;;  %v323_v2 = vrot.slane %v6131_v13, %v6359_v53 }
 0x12b   :  { %3678 = vmatprep.subr.bf16.mxu0 %v4861_v3  ;;  %v319_v3 = vrot.slane %v6131_v13, %v6365_v56 }
 0x12c   :  { %3730 = vmatpush2.bf16.msra.mxu1 %v4880_v5 }
 0x12d   :  { %3731 = vmatprep.subr.bf16.mxu1 %v4888_v6  ;;  %v4910_v6 = vld [vmem:[%s7350_s3 + $0x4c0] ss:$16 sps:$4 sm:$0xff]  }
 0x12e   :  { %3679 = vmatpush2.bf16.msra.mxu0 %v4859_v8  ;;  %v2068_v8 = vmax.f32 %v1726_v62, 0.0 }
 0x12f   :  { %3680 = vmatprep.subr.bf16.mxu0 %v4867_v9  ;;  %v2076_v9 = vmax.f32 %v1730_v0, 0.0 }
 0x130   :  { %3732 = vmatpush2.bf16.msra.mxu1 %v4886_v14 }
 0x131   :  { %3733 = vmatprep.subr.bf16.mxu1 %v4894_v15 }
 0x132   :  { %3681 = vmatpush2.bf16.msra.mxu0 %v4865_v17 }
 0x133   :  { %3682 = vmatprep.subr.bf16.mxu0 %v4873_v19 }
 0x134   :  { %3734 = vmatpush2.bf16.msra.mxu1 %v4892_v21  ;;  %v4913_v21 = vld [vmem:[%s7350_s3 + $0x4a0] ss:$16 sps:$4 sm:$0xff]  }
 0x135   :  { %3735 = vmatprep.subr.bf16.mxu1 %v4897_v26  ;;  %v6396_v26 = vpack.c.bf16 %v2076_v9, %v2068_v8 }
 0x136   :  { %3683 = vmatpush2.bf16.msra.mxu0 %v4871_v25 }
 0x137   :  { %3684 = vmatprep.subr.bf16.mxu0 %v4879_v34  ;;  %v4918_v34 = vld [vmem:[%s7350_s3 + $0x484] ss:$16 sps:$4 sm:$0xff]  }
 0x138   :  { %3736 = vmatpush2.bf16.msra.mxu1 %v4895_v30 }
 0x139   :  { %3737 = vmatprep.subr.bf16.mxu1 %v4900_v32 }
 0x13a   :  { %3685 = vmatpush2.bf16.msra.mxu0 %v4877_v33 }
 0x13b   :  { %3686 = vmatprep.subr.bf16.mxu0 %v4885_v39  ;;  %v4916_v39 = vld [vmem:[%s7350_s3 + $0x480] ss:$16 sps:$4 sm:$0xff]  }
 0x13c   :  { %3738 = vmatpush2.bf16.msra.mxu1 %v4898_v41 }
 0x13d   :  { %3739 = vmatprep.subr.bf16.mxu1 %v4903_v16 }
 0x13e   :  { %3687 = vmatpush2.bf16.msra.mxu0 %v4883_v42 }
 0x13f   :  { %3688 = vmatprep.subr.bf16.mxu0 %v4891_v45 }
 0x140   :  { %3740 = vmatpush2.bf16.msra.mxu1 %v4901_v18 }
 0x141   :  { %3741 = vmatprep.subr.bf16.mxu1 %v4906_v46 }
 0x142   :  { %3689 = vmatpush2.bf16.msra.mxu0 %v4889_v47  ;;  %v4919_v47 = vld [vmem:[%s7350_s3 + $0x460] ss:$16 sps:$4 sm:$0xff]  }
 0x143   :  { %3764 = vmatprep.subr.bf16.mxu0 %v4909_v20  ;;  %v4924_v20 = vld [vmem:[%s7350_s3 + $0x444] ss:$16 sps:$4 sm:$0xff]  }
 0x144   :  { %3742 = vmatpush2.bf16.msra.mxu1 %v4904_v54  ;;  %v4963_v54 = vld [vmem:[%s7350_s3 + $0x6c4] ss:$16 sps:$4 sm:$0xff]  }
 0x145   :  { %v1768_v4 = vpop.f32.mrf.mxu0  ;;  %3691 = vmatmul.mubr.bf16.vlgmr.msra.gmra.mxu0 %v6375_v61  ;;  %3817 = vmatprep.subr.bf16.mxu1 %v4957_v57 }
 0x146   :  { %3700 = vmatprep.mubr.bf16.mxu0 %v6370_v59  ;;  %3765 = vmatpush1.bf16.msra.mxu0 %v4907_v60  ;;  %v1769_v17 = vadd.f32 %v1768_v4, %v319_v3  ;;  %v4922_v4 = vld [vmem:[%s7350_s3 + $0x440] ss:$16 sps:$4 sm:$0xff]  }
 0x147   :  { %v1821_v5 = vpop.f32.mrf.mxu1  ;;  %v1770_v10 = vpop.f32.mrf.mxu0  ;;  %3766 = vmatprep.subr.bf16.mxu0 %v4912_v1 }
 0x148   :  { %v1771_v14 = vadd.f32 %v1770_v10, %v323_v2  ;;  %v1822_v32 = vadd.f32 %v1821_v5, %v1769_v17  ;;  %v4927_v5 = vld [vmem:[%s7350_s3 + $0x424] ss:$16 sps:$4 sm:$0xff]  }
 0x149   :  { %v1823_v15 = vpop.f32.mrf.mxu1  ;;  %v1772_v19 = vpop.f32.mrf.mxu0  ;;  %v4975_v17 = vld [vmem:[%s7350_s3 + $0x684] ss:$16 sps:$4 sm:$0xff]  }
 0x14a   :  { %v1773_v22 = vadd.f32 %v1772_v19, %v319_v3  ;;  %3767 = vmatpush1.bf16.msra.mxu0 %v4910_v6  ;;  %v1824_v29 = vadd.f32 %v1823_v15, %v1771_v14  ;;  %v2054_v44 = vmax.f32 %v1822_v32, 0.0  ;;  %v4969_v6 = vld [vmem:[%s7350_s3 + $0x6a4] ss:$16 sps:$4 sm:$0xff]   ;;  %v4967_v14 = vld [vmem:[%s7350_s3 + $0x6a0] ss:$16 sps:$4 sm:$0xff]  }
 0x14b   :  { %v1825_v23 = vpop.f32.mrf.mxu1  ;;  %v1774_v25 = vpop.f32.mrf.mxu0  ;;  %3768 = vmatprep.subr.bf16.mxu0 %v4915_v12  ;;  %v4925_v12 = vld [vmem:[%s7350_s3 + $0x420] ss:$16 sps:$4 sm:$0xff]   ;;  %v4930_v15 = vld [vmem:[%s7350_s3 + $0x404] ss:$16 sps:$4 sm:$0xff]  }
 0x14c   :  { %v1826_v37 = vadd.f32 %v1825_v23, %v1773_v22  ;;  %v1775_v30 = vadd.f32 %v1774_v25, %v323_v2  ;;  %v2055_v16 = vmax.f32 %v1824_v29, 0.0  ;;  %v4928_v19 = vld [vmem:[%s7350_s3 + $0x400] ss:$16 sps:$4 sm:$0xff]   ;;  %v4933_v23 = vld [vmem:[%s7350_s3 + $0x5e4] ss:$16 sps:$4 sm:$0xff]  }
 0x14d   :  { %v1827_v31 = vpop.f32.mrf.mxu1  ;;  %v1778_v33 = vpop.f32.mrf.mxu0  ;;  %3701 = vmatmul.mubr.bf16.gmra.mxu0 %v6396_v26  ;;  %v4973_v22 = vld [vmem:[%s7350_s3 + $0x680] ss:$16 sps:$4 sm:$0xff]   ;;  %v4936_v29 = vld [vmem:[%s7350_s3 + $0x5c4] ss:$16 sps:$4 sm:$0xff]  }
 0x14e   :  { %v1828_v35 = vadd.f32 %v1827_v31, %v1775_v30  ;;  %v1779_v36 = vadd.f32 %v1778_v33, %v319_v3  ;;  %3769 = vmatpush1.bf16.msra.mxu0 %v4913_v21  ;;  %v2062_v40 = vmax.f32 %v1826_v37, 0.0  ;;  %v4981_v21 = vld [vmem:[%s7350_s3 + $0x664] ss:$16 sps:$4 sm:$0xff]   ;;  %v4931_v25 = vld [vmem:[%s7350_s3 + $0x5e0] ss:$16 sps:$4 sm:$0xff]  }
 0x14f   :  { %v1831_v38 = vpop.f32.mrf.mxu1  ;;  %v1780_v41 = vpop.f32.mrf.mxu0  ;;  %3770 = vmatprep.subr.bf16.mxu0 %v4918_v34  ;;  %v4979_v34 = vld [vmem:[%s7350_s3 + $0x660] ss:$16 sps:$4 sm:$0xff]   ;;  %v4987_v37 = vld [vmem:[%s7350_s3 + $0x644] ss:$16 sps:$4 sm:$0xff]  }
 0x150   :  { %v2063_v27 = vmax.f32 %v1828_v35, 0.0  ;;  %v1781_v42 = vadd.f32 %v1780_v41, %v323_v2  ;;  %v1832_v45 = vadd.f32 %v1831_v38, %v1779_v36  ;;  %v6416_v49 = vpack.c.bf16 %v2062_v40, %v2054_v44  ;;  %v4934_v30 = vld [vmem:[%s7350_s3 + $0x5c0] ss:$16 sps:$4 sm:$0xff]   ;;  %v4939_v32 = vld [vmem:[%s7350_s3 + $0x5a4] ss:$16 sps:$4 sm:$0xff]  }
 0x151   :  { %v1833_v52 = vpop.f32.mrf.mxu1  ;;  %v1782_v18 = vpop.f32.mrf.mxu0  ;;  %v4985_v31 = vld [vmem:[%s7350_s3 + $0x640] ss:$16 sps:$4 sm:$0xff]   ;;  %v4993_v33 = vld [vmem:[%s7350_s3 + $0x624] ss:$16 sps:$4 sm:$0xff]  }
 0x152   :  { %v6408_v58 = vpack.c.bf16 %v2063_v27, %v2055_v16  ;;  %v1783_v46 = vadd.f32 %v1782_v18, %v319_v3  ;;  %v1834_v63 = vadd.f32 %v1833_v52, %v1781_v42  ;;  %3771 = vmatpush1.bf16.msra.mxu0 %v4916_v39  ;;  %v2070_v62 = vmax.f32 %v1832_v45, 0.0  ;;  %v4937_v35 = vld [vmem:[%s7350_s3 + $0x5a0] ss:$16 sps:$4 sm:$0xff]   ;;  %v4942_v38 = vld [vmem:[%s7350_s3 + $0x584] ss:$16 sps:$4 sm:$0xff]  }
 0x153   :  { %v1835_v28 = vpop.f32.mrf.mxu1  ;;  %v1784_v51 = vpop.f32.mrf.mxu0  ;;  %3772 = vmatprep.subr.bf16.mxu0 %v4921_v50  ;;  %v4991_v36 = vld [vmem:[%s7350_s3 + $0x620] ss:$16 sps:$4 sm:$0xff]   ;;  %v4999_v39 = vld [vmem:[%s7350_s3 + $0x604] ss:$16 sps:$4 sm:$0xff]  }
 0x154   :  { %v1785_v55 = vadd.f32 %v1784_v51, %v323_v2  ;;  %v1836_v57 = vadd.f32 %v1835_v28, %v1783_v46  ;;  %3743 = vmatprep.mubr.bf16.mxu1 %v6408_v58  ;;  %v2071_v0 = vmax.f32 %v1834_v63, 0.0  ;;  %v4961_v2 = vld [vmem:[%s7350_s3 + $0x6c0] ss:$16 sps:$4 sm:$0xff]   ;;  %v4945_v50 = vld [vmem:[%s7350_s3 + $0x564] ss:$16 sps:$4 sm:$0xff]  }
 0x155   :  { %v1837_v60 = vpop.f32.mrf.mxu1  ;;  %3744 = vmatmul.mubr.bf16.vlgmr.msra.gmra.mxu1 %v6416_v49  ;;  %v4940_v40 = vld [vmem:[%s7350_s3 + $0x580] ss:$16 sps:$4 sm:$0xff]   ;;  %v5005_v16 = vld [vmem:[%s7350_s3 + $0x7e4] ss:$16 sps:$4 sm:$0xff]  }
 0x156   :  { %v2078_v1 = vmax.f32 %v1836_v57, 0.0  ;;  %v1838_v3 = vadd.f32 %v1837_v60, %v1785_v55  ;;  %3773 = vmatpush1.bf16.msra.mxu0 %v4919_v47  ;;  %3818 = vmatpush1.bf16.msra.mxu1 %v4955_v48  ;;  %v4997_v41 = vld [vmem:[%s7350_s3 + $0x600] ss:$16 sps:$4 sm:$0xff]   ;;  %v4948_v52 = vld [vmem:[%s7350_s3 + $0x544] ss:$16 sps:$4 sm:$0xff]   ;;  %v330_v60 = vsub.s32 5, %v6117_v7 }
 0x157   :  { %3774 = vmatprep.subr.bf16.mxu0 %v4924_v20  ;;  %3819 = vmatprep.subr.bf16.mxu1 %v4963_v54  ;;  %v4943_v27 = vld [vmem:[%s7350_s3 + $0x560] ss:$16 sps:$4 sm:$0xff]   ;;  %v5011_v44 = vld [vmem:[%s7350_s3 + $0x7c4] ss:$16 sps:$4 sm:$0xff]   ;;  %v4960_v55 = vld [vmem:[%s7350_s3 + $0xec] ss:$16 sps:$4 sm:$0xff]  }
 0x158   :  { %v2079_v8 = vmax.f32 %v1838_v3, 0.0  ;;  %v6438_v9 = vpack.c.bf16 %v2078_v1, %v2070_v62  ;;  %v5003_v42 = vld [vmem:[%s7350_s3 + $0x7e0] ss:$16 sps:$4 sm:$0xff]   ;;  %v4951_v46 = vld [vmem:[%s7350_s3 + $0x524] ss:$16 sps:$4 sm:$0xff]   ;;  %v326_v62 = vsub.s32 4, %v6117_v7  ;;  %v331_v3 = vrot.slane %v6131_v13, %v330_v60 }
 0x159   :  { %v4946_v45 = vld [vmem:[%s7350_s3 + $0x540] ss:$16 sps:$4 sm:$0xff]   ;;  %v5017_v63 = vld [vmem:[%s7350_s3 + $0x7a4] ss:$16 sps:$4 sm:$0xff]  }
 0x15a   :  { %v6440_v10 = vpack.c.bf16 %v2079_v8, %v2071_v0  ;;  %3775 = vmatpush1.bf16.msra.mxu0 %v4922_v4  ;;  %3820 = vmatpush1.bf16.msra.mxu1 %v4961_v2  ;;  %v5009_v18 = vld [vmem:[%s7350_s3 + $0x7c0] ss:$16 sps:$4 sm:$0xff]   ;;  %v4954_v48 = vld [vmem:[%s7350_s3 + $0x504] ss:$16 sps:$4 sm:$0xff]   ;;  %v327_v4 = vrot.slane %v6131_v13, %v326_v62 }
 0x15b   :  { %3776 = vmatprep.subr.bf16.mxu0 %v4927_v5  ;;  %3821 = vmatprep.subr.bf16.mxu1 %v4969_v6  ;;  %v4949_v28 = vld [vmem:[%s7350_s3 + $0x520] ss:$16 sps:$4 sm:$0xff]   ;;  %v5023_v51 = vld [vmem:[%s7350_s3 + $0x784] ss:$16 sps:$4 sm:$0xff]  }
 0x15c   :  { %3753 = vmatprep.mubr.bf16.mxu1 %v6440_v10  ;;  %v5015_v47 = vld [vmem:[%s7350_s3 + $0x7a0] ss:$16 sps:$4 sm:$0xff]   ;;  %v5029_v57 = vld [vmem:[%s7350_s3 + $0x764] ss:$16 sps:$4 sm:$0xff]  }
 0x15d   :  { %3754 = vmatmul.mubr.bf16.gmra.mxu1 %v6438_v9  ;;  %v4952_v20 = vld [vmem:[%s7350_s3 + $0x500] ss:$16 sps:$4 sm:$0xff]   ;;  %v5035_v1 = vld [vmem:[%s7350_s3 + $0x744] ss:$16 sps:$4 sm:$0xff]  }
 0x15e   :  { %3777 = vmatpush1.bf16.msra.mxu0 %v4925_v12  ;;  %3822 = vmatpush1.bf16.msra.mxu1 %v4967_v14  ;;  %v5021_v54 = vld [vmem:[%s7350_s3 + $0x780] ss:$16 sps:$4 sm:$0xff]   ;;  %v5041_v12 = vld [vmem:[%s7350_s3 + $0x724] ss:$16 sps:$4 sm:$0xff]  }
 0x15f   :  { %3778 = vmatprep.subr.bf16.mxu0 %v4930_v15  ;;  %3823 = vmatprep.subr.bf16.mxu1 %v4975_v17  ;;  %v5027_v0 = vld [vmem:[%s7350_s3 + $0x760] ss:$16 sps:$4 sm:$0xff]  }
 0x160   :  { %v5033_v6 = vld [vmem:[%s7350_s3 + $0x740] ss:$16 sps:$4 sm:$0xff]  }
 0x162   :  { %3779 = vmatpush1.bf16.msra.mxu0 %v4928_v19  ;;  %3824 = vmatpush1.bf16.msra.mxu1 %v4973_v22 }
 0x163   :  { %3780 = vmatprep.subr.bf16.mxu0 %v4933_v23  ;;  %3825 = vmatprep.subr.bf16.mxu1 %v4981_v21  ;;  %v5039_v21 = vld [vmem:[%s7350_s3 + $0x720] ss:$16 sps:$4 sm:$0xff]  }
 0x166   :  { %3781 = vmatpush2.bf16.msra.mxu0 %v4931_v25  ;;  %3826 = vmatpush1.bf16.msra.mxu1 %v4979_v34  ;;  %v5047_v34 = vld [vmem:[%s7350_s3 + $0x704] ss:$16 sps:$4 sm:$0xff]  }
 0x167   :  { %3782 = vmatprep.subr.bf16.mxu0 %v4936_v29  ;;  %3827 = vmatprep.subr.bf16.mxu1 %v4987_v37 }
 0x16a   :  { %3783 = vmatpush2.bf16.msra.mxu0 %v4934_v30  ;;  %3828 = vmatpush1.bf16.msra.mxu1 %v4985_v31 }
 0x16b   :  { %3784 = vmatprep.subr.bf16.mxu0 %v4939_v32  ;;  %3829 = vmatprep.subr.bf16.mxu1 %v4993_v33 }
 0x16e   :  { %3785 = vmatpush2.bf16.msra.mxu0 %v4937_v35  ;;  %3830 = vmatpush1.bf16.msra.mxu1 %v4991_v36 }
 0x16f   :  { %3786 = vmatprep.subr.bf16.mxu0 %v4942_v38  ;;  %3831 = vmatprep.subr.bf16.mxu1 %v4999_v39  ;;  %v5045_v39 = vld [vmem:[%s7350_s3 + $0x700] ss:$16 sps:$4 sm:$0xff]  }
 0x172   :  { %3787 = vmatpush2.bf16.msra.mxu0 %v4940_v40  ;;  %3832 = vmatpush1.bf16.msra.mxu1 %v4997_v41 }
 0x173   :  { %3788 = vmatprep.subr.bf16.mxu0 %v4945_v50  ;;  %3833 = vmatprep.subr.bf16.mxu1 %v5005_v16  ;;  %v5053_v50 = vld [vmem:[%s7350_s3 + $0x2ec] ss:$16 sps:$4 sm:$0xff]  }
 0x176   :  { %3789 = vmatpush2.bf16.msra.mxu0 %v4943_v27  ;;  %3834 = vmatpush2.bf16.msra.mxu1 %v5003_v42 }
 0x177   :  { %3790 = vmatprep.subr.bf16.mxu0 %v4948_v52  ;;  %3835 = vmatprep.subr.bf16.mxu1 %v5011_v44 }
 0x17a   :  { %3791 = vmatpush2.bf16.msra.mxu0 %v4946_v45  ;;  %3836 = vmatpush2.bf16.msra.mxu1 %v5009_v18 }
 0x17b   :  { %3792 = vmatprep.subr.bf16.mxu0 %v4951_v46  ;;  %3837 = vmatprep.subr.bf16.mxu1 %v5017_v63 }
 0x17e   :  { %3793 = vmatpush2.bf16.msra.mxu0 %v4949_v28  ;;  %3838 = vmatpush2.bf16.msra.mxu1 %v5015_v47 }
 0x17f   :  { %3794 = vmatprep.subr.bf16.mxu0 %v4954_v48  ;;  %3839 = vmatprep.subr.bf16.mxu1 %v5023_v51  ;;  %v4958_v48 = vld [vmem:[%s7350_s3 + $0xe8] ss:$16 sps:$4 sm:$0xff]  }
 0x182   :  { %3795 = vmatpush2.bf16.msra.mxu0 %v4952_v20  ;;  %3840 = vmatpush2.bf16.msra.mxu1 %v5021_v54  ;;  %v4966_v54 = vld [vmem:[%s7350_s3 + $0xcc] ss:$16 sps:$4 sm:$0xff]  }
 0x183   :  { %3870 = vmatprep.subr.bf16.mxu0 %v4960_v55  ;;  %3841 = vmatprep.subr.bf16.mxu1 %v5029_v57 }
 0x185   :  { %v1874_v2 = vpop.f32.mrf.mxu0 }
 0x186   :  { %3842 = vmatpush2.bf16.msra.mxu1 %v5027_v0  ;;  %v1875_v17 = vadd.f32 %v1874_v2, %v327_v4  ;;  %v4964_v2 = vld [vmem:[%s7350_s3 + $0xc8] ss:$16 sps:$4 sm:$0xff]  }
 0x187   :  { %v1927_v5 = vpop.f32.mrf.mxu1  ;;  %v1876_v8 = vpop.f32.mrf.mxu0  ;;  %3843 = vmatprep.subr.bf16.mxu1 %v5035_v1 }
 0x188   :  { %v1877_v14 = vadd.f32 %v1876_v8, %v331_v3  ;;  %v1928_v32 = vadd.f32 %v1927_v5, %v1875_v17  ;;  %v4984_v17 = vld [vmem:[%s7350_s3 + $0x6c] ss:$16 sps:$4 sm:$0xff]  }
 0x189   :  { %v1929_v15 = vpop.f32.mrf.mxu1  ;;  %v1878_v19 = vpop.f32.mrf.mxu0 }
 0x18a   :  { %v1879_v22 = vadd.f32 %v1878_v19, %v327_v4  ;;  %3844 = vmatpush2.bf16.msra.mxu1 %v5033_v6  ;;  %v1930_v29 = vadd.f32 %v1929_v15, %v1877_v14  ;;  %v2056_v44 = vmax.f32 %v1928_v32, 0.0  ;;  %v4978_v14 = vld [vmem:[%s7350_s3 + $0x8c] ss:$16 sps:$4 sm:$0xff]   ;;  %v4976_v15 = vld [vmem:[%s7350_s3 + $0x88] ss:$16 sps:$4 sm:$0xff]  }
 0x18b   :  { %v1931_v23 = vpop.f32.mrf.mxu1  ;;  %v1880_v25 = vpop.f32.mrf.mxu0  ;;  %3845 = vmatprep.subr.bf16.mxu1 %v5041_v12  ;;  %v4970_v12 = vld [vmem:[%s7350_s3 + $0xa8] ss:$16 sps:$4 sm:$0xff]   ;;  %v5020_v32 = vld [vmem:[%s7350_s3 + $0x1ac] ss:$16 sps:$4 sm:$0xff]  }
 0x18c   :  { %v1932_v37 = vadd.f32 %v1931_v23, %v1879_v22  ;;  %v1881_v30 = vadd.f32 %v1880_v25, %v331_v3  ;;  %v2057_v16 = vmax.f32 %v1930_v29, 0.0  ;;  %v4982_v19 = vld [vmem:[%s7350_s3 + $0x68] ss:$16 sps:$4 sm:$0xff]   ;;  %v4990_v22 = vld [vmem:[%s7350_s3 + $0x4c] ss:$16 sps:$4 sm:$0xff]  }
 0x18d   :  { %v1933_v31 = vpop.f32.mrf.mxu1  ;;  %v1884_v33 = vpop.f32.mrf.mxu0  ;;  %v4996_v23 = vld [vmem:[%s7350_s3 + $0x2c] ss:$16 sps:$4 sm:$0xff]  }
 0x18e   :  { %v1934_v35 = vadd.f32 %v1933_v31, %v1881_v30  ;;  %v1885_v36 = vadd.f32 %v1884_v33, %v327_v4  ;;  %3846 = vmatpush2.bf16.msra.mxu1 %v5039_v21  ;;  %v2064_v40 = vmax.f32 %v1932_v37, 0.0  ;;  %v4994_v21 = vld [vmem:[%s7350_s3 + $0x28] ss:$16 sps:$4 sm:$0xff]   ;;  %v5002_v25 = vld [vmem:[%s7350_s3 + $0xc] ss:$16 sps:$4 sm:$0xff]  }
 0x18f   :  { %v1937_v38 = vpop.f32.mrf.mxu1  ;;  %v1886_v41 = vpop.f32.mrf.mxu0  ;;  %3847 = vmatprep.subr.bf16.mxu1 %v5047_v34  ;;  %v5000_v34 = vld [vmem:[%s7350_s3 + $0x8] ss:$16 sps:$4 sm:$0xff]   ;;  %v5008_v29 = vld [vmem:[%s7350_s3 + $0x1ec] ss:$16 sps:$4 sm:$0xff]  }
 0x190   :  { %v2065_v27 = vmax.f32 %v1934_v35, 0.0  ;;  %v1887_v42 = vadd.f32 %v1886_v41, %v331_v3  ;;  %v1938_v45 = vadd.f32 %v1937_v38, %v1885_v36  ;;  %v6597_v51 = vpack.c.bf16 %v2064_v40, %v2056_v44  ;;  %v5006_v37 = vld [vmem:[%s7350_s3 + $0x1e8] ss:$16 sps:$4 sm:$0xff]   ;;  %v5014_v30 = vld [vmem:[%s7350_s3 + $0x1cc] ss:$16 sps:$4 sm:$0xff]  }
 0x191   :  { %v1939_v52 = vpop.f32.mrf.mxu1  ;;  %v1888_v18 = vpop.f32.mrf.mxu0  ;;  %v5012_v31 = vld [vmem:[%s7350_s3 + $0x1c8] ss:$16 sps:$4 sm:$0xff]   ;;  %v5026_v35 = vld [vmem:[%s7350_s3 + $0x18c] ss:$16 sps:$4 sm:$0xff]   ;;  %v334_v40 = vsub.s32 6, %v6117_v7 }
 0x192   :  { %v6592_v46 = vpack.c.bf16 %v2065_v27, %v2057_v16  ;;  %v1889_v63 = vadd.f32 %v1888_v18, %v327_v4  ;;  %v1940_v28 = vadd.f32 %v1939_v52, %v1887_v42  ;;  %3848 = vmatpush2.bf16.msra.mxu1 %v5045_v39  ;;  %v2072_v62 = vmax.f32 %v1938_v45, 0.0  ;;  %v5018_v33 = vld [vmem:[%s7350_s3 + $0x1a8] ss:$16 sps:$4 sm:$0xff]   ;;  %v5032_v38 = vld [vmem:[%s7350_s3 + $0x16c] ss:$16 sps:$4 sm:$0xff]  }
 0x193   :  { %v1941_v47 = vpop.f32.mrf.mxu1  ;;  %v1890_v20 = vpop.f32.mrf.mxu0  ;;  %3923 = vmatprep.subr.bf16.mxu1 %v5053_v50  ;;  %v5024_v36 = vld [vmem:[%s7350_s3 + $0x188] ss:$16 sps:$4 sm:$0xff]   ;;  %v338_v39 = vsub.s32 7, %v6117_v7  ;;  %v5038_v50 = vld [vmem:[%s7350_s3 + $0x14c] ss:$16 sps:$4 sm:$0xff]   ;;  %v335_v27 = vrot.slane %v6131_v13, %v334_v40 }
 0x194   :  { %v1891_v55 = vadd.f32 %v1890_v20, %v331_v3  ;;  %v1942_v57 = vadd.f32 %v1941_v47, %v1889_v63  ;;  %3796 = vmatprep.mubr.bf16.mxu0 %v6592_v46  ;;  %v2073_v0 = vmax.f32 %v1940_v28, 0.0  ;;  %v4972_v3 = vld [vmem:[%s7350_s3 + $0xac] ss:$16 sps:$4 sm:$0xff]   ;;  %v5030_v41 = vld [vmem:[%s7350_s3 + $0x168] ss:$16 sps:$4 sm:$0xff]  }
 0x195   :  { %v1943_v60 = vpop.f32.mrf.mxu1  ;;  %3797 = vmatmul.mubr.bf16.vlgmr.msra.gmra.mxu0 %v6597_v51  ;;  %v339_v16 = vrot.slane %v6131_v13, %v338_v39  ;;  %v5036_v7 = vld [vmem:[%s7350_s3 + $0x148] ss:$16 sps:$4 sm:$0xff]   ;;  %v5044_v45 = vld [vmem:[%s7350_s3 + $0x12c] ss:$16 sps:$4 sm:$0xff]  }
 0x196   :  { %v2080_v1 = vmax.f32 %v1942_v57, 0.0  ;;  %v1944_v4 = vadd.f32 %v1943_v60, %v1891_v55  ;;  %3871 = vmatpush1.bf16.msra.mxu0 %v4958_v48  ;;  %v5042_v13 = vld [vmem:[%s7350_s3 + $0x128] ss:$16 sps:$4 sm:$0xff]   ;;  %v5050_v55 = vld [vmem:[%s7350_s3 + $0x10c] ss:$16 sps:$4 sm:$0xff]  }
 0x197   :  { %3872 = vmatprep.subr.bf16.mxu0 %v4966_v54 }
 0x198   :  { %v2081_v5 = vmax.f32 %v1944_v4, 0.0  ;;  %v6610_v6 = vpack.c.bf16 %v2080_v1, %v2072_v62 }
 0x19a   :  { %v6612_v8 = vpack.c.bf16 %v2081_v5, %v2073_v0  ;;  %3873 = vmatpush1.bf16.msra.mxu0 %v4964_v2 }
 0x19b   :  { %3874 = vmatprep.subr.bf16.mxu0 %v4972_v3 }
 0x19c   :  { %3806 = vmatprep.mubr.bf16.mxu0 %v6612_v8 }
 0x19d   :  { %3807 = vmatmul.mubr.bf16.gmra.mxu0 %v6610_v6 }
 0x19e   :  { %3875 = vmatpush1.bf16.msra.mxu0 %v4970_v12  ;;  %3902 = vmatprep.mubr.bf16.mxu0 %v6201_v43  ;;  %v4988_v43 = vld [vmem:[%s7350_s3 + $0x48] ss:$16 sps:$4 sm:$0xff]  }
 0x19f   :  { %3876 = vmatprep.subr.bf16.mxu0 %v4978_v14  ;;  %v5048_v12 = vld [vmem:[%s7350_s3 + $0x108] ss:$16 sps:$4 sm:$0xff]  }
 0x1a2   :  { %3877 = vmatpush1.bf16.msra.mxu0 %v4976_v15 }
 0x1a3   :  { %3878 = vmatprep.subr.bf16.mxu0 %v4984_v17  ;;  %v5056_v17 = vld [vmem:[%s7350_s3 + $0x4ec] ss:$16 sps:$4 sm:$0xff]  }
 0x1a6   :  { %3879 = vmatpush1.bf16.msra.mxu0 %v4982_v19 }
 0x1a7   :  { %3880 = vmatprep.subr.bf16.mxu0 %v4990_v22 }
 0x1aa   :  { %3881 = vmatpush1.bf16.msra.mxu0 %v4988_v43 }
 0x1ab   :  { %3882 = vmatprep.subr.bf16.mxu0 %v4996_v23 }
 0x1ae   :  { %3883 = vmatpush1.bf16.msra.mxu0 %v4994_v21 }
 0x1af   :  { %3884 = vmatprep.subr.bf16.mxu0 %v5002_v25 }
 0x1b2   :  { %3885 = vmatpush1.bf16.msra.mxu0 %v5000_v34 }
 0x1b3   :  { %3886 = vmatprep.subr.bf16.mxu0 %v5008_v29 }
 0x1b6   :  { %3887 = vmatpush2.bf16.msra.mxu0 %v5006_v37 }
 0x1b7   :  { %3888 = vmatprep.subr.bf16.mxu0 %v5014_v30 }
 0x1ba   :  { %3889 = vmatpush2.bf16.msra.mxu0 %v5012_v31 }
 0x1bb   :  { %3890 = vmatprep.subr.bf16.mxu0 %v5020_v32  ;;  %v5051_v32 = vld [vmem:[%s7350_s3 + $0x2e8] ss:$16 sps:$4 sm:$0xff]  }
 0x1be   :  { %3891 = vmatpush2.bf16.msra.mxu0 %v5018_v33 }
 0x1bf   :  { %3892 = vmatprep.subr.bf16.mxu0 %v5026_v35 }
 0x1c2   :  { %3893 = vmatpush2.bf16.msra.mxu0 %v5024_v36  ;;  %v5054_v36 = vld [vmem:[%s7350_s3 + $0x4e8] ss:$16 sps:$4 sm:$0xff]  }
 0x1c3   :  { %3894 = vmatprep.subr.bf16.mxu0 %v5032_v38  ;;  %v5059_v38 = vld [vmem:[%s7350_s3 + $0x2cc] ss:$16 sps:$4 sm:$0xff]  }
 0x1c5   :  { %v1980_v42 = vpop.f32.mrf.mxu0 }
 0x1c6   :  { %3895 = vmatpush2.bf16.msra.mxu0 %v5030_v41  ;;  %v1981_v28 = vadd.f32 %v1980_v42, %v335_v27 }
 0x1c7   :  { %v2033_v52 = vpop.f32.mrf.mxu1  ;;  %v1982_v44 = vpop.f32.mrf.mxu0  ;;  %3896 = vmatprep.subr.bf16.mxu0 %v5038_v50  ;;  %v5062_v50 = vld [vmem:[%s7350_s3 + $0x4cc] ss:$16 sps:$4 sm:$0xff]  }
 0x1c8   :  { %v1983_v18 = vadd.f32 %v1982_v44, %v339_v16  ;;  %v2034_v1 = vadd.f32 %v2033_v52, %v1981_v28  ;;  %v5060_v44 = vld [vmem:[%s7350_s3 + $0x4c8] ss:$16 sps:$4 sm:$0xff]  }
 0x1c9   :  { %v2035_v63 = vpop.f32.mrf.mxu1  ;;  %v1984_v47 = vpop.f32.mrf.mxu0  ;;  %v5063_v28 = vld [vmem:[%s7350_s3 + $0x2a8] ss:$16 sps:$4 sm:$0xff]  }
 0x1ca   :  { %v1985_v48 = vadd.f32 %v1984_v47, %v335_v27  ;;  %3897 = vmatpush2.bf16.msra.mxu0 %v5036_v7  ;;  %v2036_v57 = vadd.f32 %v2035_v63, %v1983_v18  ;;  %v2058_v21 = vmax.f32 %v2034_v1, 0.0  ;;  %v5066_v47 = vld [vmem:[%s7350_s3 + $0x4a8] ss:$16 sps:$4 sm:$0xff]   ;;  %v5089_v1 = vld [vmem:[%s7350_s3 + $0x22c] ss:$16 sps:$4 sm:$0xff]  }
 0x1cb   :  { %v2037_v20 = vpop.f32.mrf.mxu1  ;;  %v1986_v54 = vpop.f32.mrf.mxu0  ;;  %3898 = vmatprep.subr.bf16.mxu0 %v5044_v45 }
 0x1cc   :  { %v2038_v60 = vadd.f32 %v2037_v20, %v1985_v48  ;;  %v1987_v62 = vadd.f32 %v1986_v54, %v339_v16  ;;  %v2059_v19 = vmax.f32 %v2036_v57, 0.0  ;;  %v5071_v48 = vld [vmem:[%s7350_s3 + $0x28c] ss:$16 sps:$4 sm:$0xff]   ;;  %v5072_v54 = vld [vmem:[%s7350_s3 + $0x488] ss:$16 sps:$4 sm:$0xff]  }
 0x1cd   :  { %v2039_v0 = vpop.f32.mrf.mxu1  ;;  %v1990_v4 = vpop.f32.mrf.mxu0  ;;  %v5074_v20 = vld [vmem:[%s7350_s3 + $0x48c] ss:$16 sps:$4 sm:$0xff]  }
 0x1ce   :  { %v2040_v2 = vadd.f32 %v2039_v0, %v1987_v62  ;;  %v1991_v3 = vadd.f32 %v1990_v4, %v335_v27  ;;  %3899 = vmatpush2.bf16.msra.mxu0 %v5042_v13  ;;  %v2066_v14 = vmax.f32 %v2038_v60, 0.0  ;;  %v5069_v13 = vld [vmem:[%s7350_s3 + $0x288] ss:$16 sps:$4 sm:$0xff]   ;;  %v5083_v57 = vld [vmem:[%s7350_s3 + $0x24c] ss:$16 sps:$4 sm:$0xff]  }
 0x1cf   :  { %v2043_v5 = vpop.f32.mrf.mxu1  ;;  %v1992_v15 = vpop.f32.mrf.mxu0  ;;  %3900 = vmatprep.subr.bf16.mxu0 %v5050_v55  ;;  %v5075_v55 = vld [vmem:[%s7350_s3 + $0x268] ss:$16 sps:$4 sm:$0xff]   ;;  %v5086_v60 = vld [vmem:[%s7350_s3 + $0x44c] ss:$16 sps:$4 sm:$0xff]  }
 0x1d0   :  { %v2067_v22 = vmax.f32 %v2040_v2, 0.0  ;;  %v1993_v43 = vadd.f32 %v1992_v15, %v339_v16  ;;  %v2044_v25 = vadd.f32 %v2043_v5, %v1991_v3  ;;  %v6710_v33 = vpack.c.bf16 %v2066_v14, %v2058_v21  ;;  %v5081_v62 = vld [vmem:[%s7350_s3 + $0x248] ss:$16 sps:$4 sm:$0xff]   ;;  %v5092_v4 = vld [vmem:[%s7350_s3 + $0x42c] ss:$16 sps:$4 sm:$0xff]  }
 0x1d1   :  { %v2045_v23 = vpop.f32.mrf.mxu1  ;;  %v1994_v34 = vpop.f32.mrf.mxu0  ;;  %v5084_v0 = vld [vmem:[%s7350_s3 + $0x448] ss:$16 sps:$4 sm:$0xff]   ;;  %v5095_v5 = vld [vmem:[%s7350_s3 + $0x20c] ss:$16 sps:$4 sm:$0xff]  }
 0x1d2   :  { %v6705_v29 = vpack.c.bf16 %v2067_v22, %v2059_v19  ;;  %v1995_v37 = vadd.f32 %v1994_v34, %v335_v27  ;;  %v2046_v30 = vadd.f32 %v2045_v23, %v1993_v43  ;;  %3901 = vmatpush2.bf16.msra.mxu0 %v5048_v12  ;;  %v2074_v27 = vmax.f32 %v2044_v25, 0.0  ;;  %v5087_v2 = vld [vmem:[%s7350_s3 + $0x228] ss:$16 sps:$4 sm:$0xff]   ;;  %v5098_v12 = vld [vmem:[%s7350_s3 + $0x40c] ss:$16 sps:$4 sm:$0xff]  }
 0x1d3   :  { %v2047_v31 = vpop.f32.mrf.mxu1  ;;  %v1996_v35 = vpop.f32.mrf.mxu0  ;;  %3976 = vmatprep.subr.bf16.mxu0 %v5056_v17  ;;  %v5090_v3 = vld [vmem:[%s7350_s3 + $0x428] ss:$16 sps:$4 sm:$0xff]   ;;  %v5101_v17 = vld [vmem:[%s7350_s3 + $0x3ec] ss:$16 sps:$4 sm:$0xff]  }
 0x1d4   :  { %v1997_v39 = vadd.f32 %v1996_v35, %v339_v16  ;;  %v2048_v40 = vadd.f32 %v2047_v31, %v1995_v37  ;;  %3849 = vmatprep.mubr.bf16.mxu1 %v6705_v29  ;;  %v2075_v42 = vmax.f32 %v2046_v30, 0.0  ;;  %v5057_v16 = vld [vmem:[%s7350_s3 + $0x2c8] ss:$16 sps:$4 sm:$0xff]   ;;  %v5104_v19 = vld [vmem:[%s7350_s3 + $0x5ec] ss:$16 sps:$4 sm:$0xff]  }
 0x1d5   :  { %v2049_v41 = vpop.f32.mrf.mxu1  ;;  %3903 = vmatmul.mubr.bf16.vlgmr.msra.gmra.mxu0 %v6375_v61  ;;  %3850 = vmatmul.mubr.bf16.vlgmr.msra.gmra.mxu1 %v6710_v33  ;;  %v5065_v61 = vld [vmem:[%s7350_s3 + $0x2ac] ss:$16 sps:$4 sm:$0xff]   ;;  %v5093_v14 = vld [vmem:[%s7350_s3 + $0x208] ss:$16 sps:$4 sm:$0xff]  }
 0x1d6   :  { %v2082_v52 = vmax.f32 %v2048_v40, 0.0  ;;  %v2050_v7 = vadd.f32 %v2049_v41, %v1997_v39  ;;  %3912 = vmatprep.mubr.bf16.mxu0 %v6370_v59  ;;  %3924 = vmatpush1.bf16.msra.mxu1 %v5051_v32  ;;  %v5068_v59 = vld [vmem:[%s7350_s3 + $0x4ac] ss:$16 sps:$4 sm:$0xff]   ;;  %v5096_v15 = vld [vmem:[%s7350_s3 + $0x408] ss:$16 sps:$4 sm:$0xff]  }
 0x1d7   :  { %3977 = vmatpush1.bf16.msra.mxu0 %v5054_v36  ;;  %3925 = vmatprep.subr.bf16.mxu1 %v5059_v38  ;;  %v5099_v22 = vld [vmem:[%s7350_s3 + $0x3e8] ss:$16 sps:$4 sm:$0xff]   ;;  %v5107_v23 = vld [vmem:[%s7350_s3 + $0x3cc] ss:$16 sps:$4 sm:$0xff]  }
 0x1d8   :  { %v2083_v45 = vmax.f32 %v2050_v7, 0.0  ;;  %3978 = vmatprep.subr.bf16.mxu0 %v5062_v50  ;;  %v6737_v18 = vpack.c.bf16 %v2082_v52, %v2074_v27  ;;  %v5102_v43 = vld [vmem:[%s7350_s3 + $0x5e8] ss:$16 sps:$4 sm:$0xff]   ;;  %v5110_v21 = vld [vmem:[%s7350_s3 + $0x5cc] ss:$16 sps:$4 sm:$0xff]  }
 0x1d9   :  { %v5105_v25 = vld [vmem:[%s7350_s3 + $0x3c8] ss:$16 sps:$4 sm:$0xff]   ;;  %v5113_v37 = vld [vmem:[%s7350_s3 + $0x3ac] ss:$16 sps:$4 sm:$0xff]  }
 0x1da   :  { %v6739_v63 = vpack.c.bf16 %v2083_v45, %v2075_v42  ;;  %3926 = vmatpush1.bf16.msra.mxu1 %v5057_v16  ;;  %v5108_v34 = vld [vmem:[%s7350_s3 + $0x5c8] ss:$16 sps:$4 sm:$0xff]   ;;  %v5116_v30 = vld [vmem:[%s7350_s3 + $0x5ac] ss:$16 sps:$4 sm:$0xff]  }
 0x1db   :  { %3979 = vmatpush1.bf16.msra.mxu0 %v5060_v44  ;;  %3927 = vmatprep.subr.bf16.mxu1 %v5065_v61  ;;  %v5111_v31 = vld [vmem:[%s7350_s3 + $0x3a8] ss:$16 sps:$4 sm:$0xff]   ;;  %v5119_v35 = vld [vmem:[%s7350_s3 + $0x38c] ss:$16 sps:$4 sm:$0xff]  }
 0x1dc   :  { %3859 = vmatprep.mubr.bf16.mxu1 %v6739_v63  ;;  %3980 = vmatprep.subr.bf16.mxu0 %v5068_v59  ;;  %v5114_v32 = vld [vmem:[%s7350_s3 + $0x5a8] ss:$16 sps:$4 sm:$0xff]   ;;  %v5122_v36 = vld [vmem:[%s7350_s3 + $0x58c] ss:$16 sps:$4 sm:$0xff]  }
 0x1dd   :  { %3913 = vmatmul.mubr.bf16.gmra.mxu0 %v6396_v26  ;;  %3860 = vmatmul.mubr.bf16.gmra.mxu1 %v6737_v18  ;;  %v5077_v26 = vld [vmem:[%s7350_s3 + $0x26c] ss:$16 sps:$4 sm:$0xff]   ;;  %v5117_v38 = vld [vmem:[%s7350_s3 + $0x388] ss:$16 sps:$4 sm:$0xff]  }
 0x1de   :  { %3928 = vmatpush1.bf16.msra.mxu1 %v5063_v28  ;;  %4008 = vmatprep.mubr.bf16.mxu0 %v6592_v46  ;;  %v5080_v46 = vld [vmem:[%s7350_s3 + $0x46c] ss:$16 sps:$4 sm:$0xff]   ;;  %v5120_v39 = vld [vmem:[%s7350_s3 + $0x588] ss:$16 sps:$4 sm:$0xff]  }
 0x1df   :  { %3981 = vmatpush1.bf16.msra.mxu0 %v5066_v47  ;;  %3955 = vmatprep.mubr.bf16.mxu1 %v6408_v58  ;;  %v5078_v58 = vld [vmem:[%s7350_s3 + $0x468] ss:$16 sps:$4 sm:$0xff]   ;;  %v5125_v40 = vld [vmem:[%s7350_s3 + $0x36c] ss:$16 sps:$4 sm:$0xff]  }
 0x1e0   :  { %3929 = vmatprep.subr.bf16.mxu1 %v5071_v48  ;;  %3982 = vmatprep.subr.bf16.mxu0 %v5074_v20  ;;  %v5128_v41 = vld [vmem:[%s7350_s3 + $0x56c] ss:$16 sps:$4 sm:$0xff]   ;;  %v5123_v50 = vld [vmem:[%s7350_s3 + $0x368] ss:$16 sps:$4 sm:$0xff]  }
 0x1e1   :  { %v5126_v27 = vld [vmem:[%s7350_s3 + $0x568] ss:$16 sps:$4 sm:$0xff]   ;;  %v5131_v42 = vld [vmem:[%s7350_s3 + $0x34c] ss:$16 sps:$4 sm:$0xff]  }
 0x1e2   :  { %3930 = vmatpush1.bf16.msra.mxu1 %v5069_v13  ;;  %v5134_v52 = vld [vmem:[%s7350_s3 + $0x54c] ss:$16 sps:$4 sm:$0xff]   ;;  %v5129_v7 = vld [vmem:[%s7350_s3 + $0x348] ss:$16 sps:$4 sm:$0xff]  }
 0x1e3   :  { %3983 = vmatpush1.bf16.msra.mxu0 %v5072_v54  ;;  %3931 = vmatprep.subr.bf16.mxu1 %v5077_v26  ;;  %v5132_v16 = vld [vmem:[%s7350_s3 + $0x548] ss:$16 sps:$4 sm:$0xff]   ;;  %v5137_v44 = vld [vmem:[%s7350_s3 + $0x32c] ss:$16 sps:$4 sm:$0xff]  }
 0x1e4   :  { %3984 = vmatprep.subr.bf16.mxu0 %v5080_v46  ;;  %v5140_v61 = vld [vmem:[%s7350_s3 + $0x52c] ss:$16 sps:$4 sm:$0xff]   ;;  %v5135_v45 = vld [vmem:[%s7350_s3 + $0x328] ss:$16 sps:$4 sm:$0xff]  }
 0x1e5   :  { %v5138_v59 = vld [vmem:[%s7350_s3 + $0x528] ss:$16 sps:$4 sm:$0xff]   ;;  %v5143_v28 = vld [vmem:[%s7350_s3 + $0x30c] ss:$16 sps:$4 sm:$0xff]  }
 0x1e6   :  { %3932 = vmatpush1.bf16.msra.mxu1 %v5075_v55  ;;  %v5146_v47 = vld [vmem:[%s7350_s3 + $0x50c] ss:$16 sps:$4 sm:$0xff]   ;;  %v5141_v48 = vld [vmem:[%s7350_s3 + $0x308] ss:$16 sps:$4 sm:$0xff]  }
 0x1e7   :  { %3985 = vmatpush1.bf16.msra.mxu0 %v5078_v58  ;;  %3933 = vmatprep.subr.bf16.mxu1 %v5083_v57  ;;  %v5144_v20 = vld [vmem:[%s7350_s3 + $0x508] ss:$16 sps:$4 sm:$0xff]   ;;  %v5149_v13 = vld [vmem:[%s7350_s3 + $0x6ec] ss:$16 sps:$4 sm:$0xff]  }
 0x1e8   :  { %3986 = vmatprep.subr.bf16.mxu0 %v5086_v60  ;;  %v5147_v54 = vld [vmem:[%s7350_s3 + $0x6e8] ss:$16 sps:$4 sm:$0xff]   ;;  %v5152_v26 = vld [vmem:[%s7350_s3 + $0x6cc] ss:$16 sps:$4 sm:$0xff]  }
 0x1e9   :  { %v5150_v46 = vld [vmem:[%s7350_s3 + $0x6c8] ss:$16 sps:$4 sm:$0xff]   ;;  %v5155_v55 = vld [vmem:[%s7350_s3 + $0x6ac] ss:$16 sps:$4 sm:$0xff]  }
 0x1ea   :  { %3934 = vmatpush1.bf16.msra.mxu1 %v5081_v62  ;;  %v5159_v58 = vld [vmem:[%s7350_s3 + $0x668] ss:$16 sps:$4 sm:$0xff]   ;;  %v5170_v60 = vld [vmem:[%s7350_s3 + $0x60c] ss:$16 sps:$4 sm:$0xff]  }
 0x1eb   :  { %3987 = vmatpush1.bf16.msra.mxu0 %v5084_v0  ;;  %3935 = vmatprep.subr.bf16.mxu1 %v5089_v1  ;;  %v5165_v57 = vld [vmem:[%s7350_s3 + $0x628] ss:$16 sps:$4 sm:$0xff]   ;;  %v5173_v0 = vld [vmem:[%s7350_s3 + $0x7ec] ss:$16 sps:$4 sm:$0xff]  }
 0x1ec   :  { %3988 = vmatprep.subr.bf16.mxu0 %v5092_v4  ;;  %v5168_v62 = vld [vmem:[%s7350_s3 + $0x608] ss:$16 sps:$4 sm:$0xff]   ;;  %v5176_v4 = vld [vmem:[%s7350_s3 + $0x7cc] ss:$16 sps:$4 sm:$0xff]  }
 0x1ed   :  { %v5171_v1 = vld [vmem:[%s7350_s3 + $0x7e8] ss:$16 sps:$4 sm:$0xff]  }
 0x1ee   :  { %3936 = vmatpush1.bf16.msra.mxu1 %v5087_v2  ;;  %v5174_v2 = vld [vmem:[%s7350_s3 + $0x7c8] ss:$16 sps:$4 sm:$0xff]  }
 0x1ef   :  { %3989 = vmatpush1.bf16.msra.mxu0 %v5090_v3  ;;  %3937 = vmatprep.subr.bf16.mxu1 %v5095_v5  ;;  %v5179_v3 = vld [vmem:[%s7350_s3 + $0x7ac] ss:$16 sps:$4 sm:$0xff]   ;;  %v5177_v5 = vld [vmem:[%s7350_s3 + $0x7a8] ss:$16 sps:$4 sm:$0xff]  }
 0x1f0   :  { %3990 = vmatprep.subr.bf16.mxu0 %v5098_v12  ;;  %v5182_v12 = vld [vmem:[%s7350_s3 + $0x78c] ss:$16 sps:$4 sm:$0xff]  }
 0x1f2   :  { %3938 = vmatpush1.bf16.msra.mxu1 %v5093_v14  ;;  %v5180_v14 = vld [vmem:[%s7350_s3 + $0x788] ss:$16 sps:$4 sm:$0xff]  }
 0x1f3   :  { %3991 = vmatpush1.bf16.msra.mxu0 %v5096_v15  ;;  %3939 = vmatprep.subr.bf16.mxu1 %v5101_v17  ;;  %v5185_v15 = vld [vmem:[%s7350_s3 + $0x76c] ss:$16 sps:$4 sm:$0xff]   ;;  %v5183_v17 = vld [vmem:[%s7350_s3 + $0x768] ss:$16 sps:$4 sm:$0xff]  }
 0x1f4   :  { %3992 = vmatprep.subr.bf16.mxu0 %v5104_v19  ;;  %v5188_v19 = vld [vmem:[%s7350_s3 + $0x74c] ss:$16 sps:$4 sm:$0xff]  }
 0x1f6   :  { %3940 = vmatpush2.bf16.msra.mxu1 %v5099_v22  ;;  %v5186_v22 = vld [vmem:[%s7350_s3 + $0x748] ss:$16 sps:$4 sm:$0xff]  }
 0x1f7   :  { %3993 = vmatpush2.bf16.msra.mxu0 %v5102_v43  ;;  %3941 = vmatprep.subr.bf16.mxu1 %v5107_v23  ;;  %v5191_v43 = vld [vmem:[%s7350_s3 + $0x72c] ss:$16 sps:$4 sm:$0xff]   ;;  %v5189_v23 = vld [vmem:[%s7350_s3 + $0x728] ss:$16 sps:$4 sm:$0xff]  }
 0x1f8   :  { %3994 = vmatprep.subr.bf16.mxu0 %v5110_v21  ;;  %v5194_v21 = vld [vmem:[%s7350_s3 + $0x70c] ss:$16 sps:$4 sm:$0xff]  }
 0x1fa   :  { %3942 = vmatpush2.bf16.msra.mxu1 %v5105_v25  ;;  %v5192_v25 = vld [vmem:[%s7350_s3 + $0x708] ss:$16 sps:$4 sm:$0xff]  }
 0x1fb   :  { %3995 = vmatpush2.bf16.msra.mxu0 %v5108_v34  ;;  %3943 = vmatprep.subr.bf16.mxu1 %v5113_v37 }
 0x1fc   :  { %3996 = vmatprep.subr.bf16.mxu0 %v5116_v30 }
 0x1fe   :  { %3944 = vmatpush2.bf16.msra.mxu1 %v5111_v31 }
 0x1ff   :  { %3997 = vmatpush2.bf16.msra.mxu0 %v5114_v32  ;;  %3945 = vmatprep.subr.bf16.mxu1 %v5119_v35 }
 0x200   :  { %3998 = vmatprep.subr.bf16.mxu0 %v5122_v36 }
 0x202   :  { %3946 = vmatpush2.bf16.msra.mxu1 %v5117_v38 }
 0x203   :  { %3999 = vmatpush2.bf16.msra.mxu0 %v5120_v39  ;;  %3947 = vmatprep.subr.bf16.mxu1 %v5125_v40 }
 0x204   :  { %4000 = vmatprep.subr.bf16.mxu0 %v5128_v41 }
 0x205   :  { %v3692_v34 = vpop.f32.mrf.mxu0 }
 0x206   :  { %3948 = vmatpush2.bf16.msra.mxu1 %v5123_v50 }
 0x207   :  { %4001 = vmatpush2.bf16.msra.mxu0 %v5126_v27  ;;  %3949 = vmatprep.subr.bf16.mxu1 %v5131_v42  ;;  %v3694_v37 = vpop.f32.mrf.mxu0 }
 0x208   :  { %4002 = vmatprep.subr.bf16.mxu0 %v5134_v52 }
 0x209   :  { %v3696_v30 = vpop.f32.mrf.mxu0 }
 0x20a   :  { %3950 = vmatpush2.bf16.msra.mxu1 %v5129_v7 }
 0x20b   :  { %4003 = vmatpush2.bf16.msra.mxu0 %v5132_v16  ;;  %3951 = vmatprep.subr.bf16.mxu1 %v5137_v44  ;;  %v3698_v31 = vpop.f32.mrf.mxu0 }
 0x20c   :  { %4004 = vmatprep.subr.bf16.mxu0 %v5140_v61 }
 0x20d   :  { %v3702_v32 = vpop.f32.mrf.mxu0 }
 0x20e   :  { %3952 = vmatpush2.bf16.msra.mxu1 %v5135_v45 }
 0x20f   :  { %4005 = vmatpush2.bf16.msra.mxu0 %v5138_v59  ;;  %3953 = vmatprep.subr.bf16.mxu1 %v5143_v28  ;;  %v3704_v36 = vpop.f32.mrf.mxu0 }
 0x210   :  { %4006 = vmatprep.subr.bf16.mxu0 %v5146_v47 }
 0x211   :  { %v3706_v39 = vpop.f32.mrf.mxu0 }
 0x212   :  { %3954 = vmatpush2.bf16.msra.mxu1 %v5141_v48 }
 0x213   :  { %4007 = vmatpush2.bf16.msra.mxu0 %v5144_v20  ;;  %4029 = vmatprep.subr.bf16.mxu1 %v5149_v13  ;;  %v3708_v41 = vpop.f32.mrf.mxu0 }
 0x215   :  { %3956 = vmatmul.mubr.bf16.vlgmr.msra.gmra.mxu1 %v6416_v49  ;;  %v5153_v49 = vld [vmem:[%s7350_s3 + $0x6a8] ss:$16 sps:$4 sm:$0xff]   ;;  %v3745_v35 = vpop.f32.mrf.mxu1 }
 0x216   :  { %4009 = vmatmul.mubr.bf16.vlgmr.msra.gmra.mxu0 %v6597_v51  ;;  %3965 = vmatprep.mubr.bf16.mxu1 %v6440_v10  ;;  %v5158_v10 = vld [vmem:[%s7350_s3 + $0x68c] ss:$16 sps:$4 sm:$0xff]   ;;  %v5156_v51 = vld [vmem:[%s7350_s3 + $0x688] ss:$16 sps:$4 sm:$0xff]  }
 0x217   :  { %4018 = vmatprep.mubr.bf16.mxu0 %v6612_v8  ;;  %4030 = vmatpush1.bf16.msra.mxu1 %v5147_v54  ;;  %v5161_v8 = vld [vmem:[%s7350_s3 + $0x66c] ss:$16 sps:$4 sm:$0xff]   ;;  %v3747_v38 = vpop.f32.mrf.mxu1 }
 0x218   :  { %4031 = vmatprep.subr.bf16.mxu1 %v5152_v26 }
 0x219   :  { %v3749_v40 = vpop.f32.mrf.mxu1 }
 0x21b   :  { %4032 = vmatpush1.bf16.msra.mxu1 %v5150_v46  ;;  %v3751_v50 = vpop.f32.mrf.mxu1 }
 0x21c   :  { %4033 = vmatprep.subr.bf16.mxu1 %v5155_v55 }
 0x21d   :  { %3966 = vmatmul.mubr.bf16.gmra.mxu1 %v6438_v9  ;;  %v5164_v9 = vld [vmem:[%s7350_s3 + $0x64c] ss:$16 sps:$4 sm:$0xff]   ;;  %v3755_v42 = vpop.f32.mrf.mxu1 }
 0x21e   :  { %4019 = vmatmul.mubr.bf16.gmra.mxu0 %v6610_v6  ;;  %4061 = vmatprep.mubr.bf16.mxu1 %v6705_v29  ;;  %v5162_v6 = vld [vmem:[%s7350_s3 + $0x648] ss:$16 sps:$4 sm:$0xff]   ;;  %v5167_v29 = vld [vmem:[%s7350_s3 + $0x62c] ss:$16 sps:$4 sm:$0xff]  }
 0x21f   :  { %4034 = vmatpush1.bf16.msra.mxu1 %v5153_v49 }
 0x220   :  { %4035 = vmatprep.subr.bf16.mxu1 %v5158_v10 }
 0x223   :  { %4036 = vmatpush1.bf16.msra.mxu1 %v5156_v51 }
 0x224   :  { %4037 = vmatprep.subr.bf16.mxu1 %v5161_v8 }
 0x227   :  { %4038 = vmatpush1.bf16.msra.mxu1 %v5159_v58 }
 0x228   :  { %4039 = vmatprep.subr.bf16.mxu1 %v5164_v9 }
 0x22b   :  { %4040 = vmatpush1.bf16.msra.mxu1 %v5162_v6 }
 0x22c   :  { %4041 = vmatprep.subr.bf16.mxu1 %v5167_v29 }
 0x22f   :  { %4042 = vmatpush1.bf16.msra.mxu1 %v5165_v57 }
 0x230   :  { %4043 = vmatprep.subr.bf16.mxu1 %v5170_v60 }
 0x233   :  { %4044 = vmatpush1.bf16.msra.mxu1 %v5168_v62 }
 0x234   :  { %4045 = vmatprep.subr.bf16.mxu1 %v5173_v0  ;;  %v2356_v0 = vld [vmem:[%s7352_s4] sm:$0xf] }
 0x237   :  { %4046 = vmatpush2.bf16.msra.mxu1 %v5171_v1 }
 0x238   :  { %4047 = vmatprep.subr.bf16.mxu1 %v5176_v4  ;;  %v2365_v4 = vrot.slane %v2356_v0, %v6123_v11 }
 0x23b   :  { %4048 = vmatpush2.bf16.msra.mxu1 %v5174_v2 }
 0x23c   :  { %4049 = vmatprep.subr.bf16.mxu1 %v5179_v3  ;;  %v2361_v3 = vrot.slane %v2356_v0, %v6302_v24 }
 0x23f   :  { %4050 = vmatpush2.bf16.msra.mxu1 %v5177_v5 }
 0x240   :  { %4051 = vmatprep.subr.bf16.mxu1 %v5182_v12  ;;  %v3695_v12 = vadd.f32 %v3694_v37, %v2365_v4 }
 0x243   :  { %4052 = vmatpush2.bf16.msra.mxu1 %v5180_v14  ;;  %v7046_v14 = vrot.slane %v2356_v0, %v6365_v56  ;;  %v3709_v56 = vadd.f32 %v3708_v41, %v2365_v4 }
 0x244   :  { %4053 = vmatprep.subr.bf16.mxu1 %v5185_v15  ;;  %v3699_v15 = vadd.f32 %v3698_v31, %v2365_v4 }
 0x247   :  { %4054 = vmatpush2.bf16.msra.mxu1 %v5183_v17 }
 0x248   :  { %4055 = vmatprep.subr.bf16.mxu1 %v5188_v19  ;;  %v3693_v19 = vadd.f32 %v3692_v34, %v2361_v3 }
 0x24b   :  { %4056 = vmatpush2.bf16.msra.mxu1 %v5186_v22  ;;  %v3748_v22 = vadd.f32 %v3747_v38, %v3695_v12 }
 0x24c   :  { %4057 = vmatprep.subr.bf16.mxu1 %v5191_v43  ;;  %v7051_v43 = vrot.slane %v2356_v0, %v6359_v53 }
 0x24f   :  { %4058 = vmatpush2.bf16.msra.mxu1 %v5189_v23  ;;  %v3697_v23 = vadd.f32 %v3696_v30, %v2361_v3 }
 0x250   :  { %4059 = vmatprep.subr.bf16.mxu1 %v5194_v21  ;;  %v3703_v21 = vadd.f32 %v3702_v32, %v2361_v3 }
 0x252   :  { %v3756_v30 = vadd.f32 %v3755_v42, %v3703_v21  ;;  %v5203_v42 = vld [vmem:[%s7349_s0 + $0x8] sm:$0xff] }
 0x253   :  { %4060 = vmatpush2.bf16.msra.mxu1 %v5192_v25  ;;  %v3752_v25 = vadd.f32 %v3751_v50, %v3699_v15 }
 0x255   :  { %v3798_v27 = vpop.f32.mrf.mxu0 }
 0x256   :  { %4062 = vmatmul.mubr.bf16.vlgmr.msra.gmra.mxu1 %v6710_v33  ;;  %v3757_v33 = vpop.f32.mrf.mxu1 }
 0x257   :  { %4071 = vmatprep.mubr.bf16.mxu1 %v6739_v63  ;;  %v3800_v52 = vpop.f32.mrf.mxu0 }
 0x258   :  { %v7014_v63 = vpop.f32.mrf.mxu1  ;;  %v3801_v24 = vadd.f32 %v3800_v52, %v3748_v22 }
 0x259   :  { %v3802_v7 = vpop.f32.mrf.mxu0 }
 0x25a   :  { %v7016_v16 = vpop.f32.mrf.mxu1 }
 0x25e   :  { %4072 = vmatmul.mubr.bf16.gmra.mxu1 %v6737_v18  ;;  %v3804_v18 = vpop.f32.mrf.mxu0 }
 0x25f   :  { %v3805_v31 = vadd.f32 %v3804_v18, %v3752_v25  ;;  %v5208_v25 = vld [vmem:[%s7349_s0 + $0x18] sm:$0xff] }
 0x260   :  { %v7018_v44 = vpop.f32.mrf.mxu0 }
 0x261   :  { %v3809_v18 = vadd.f32 %v7018_v44, %v3756_v30 }
 0x262   :  { %v7020_v45 = vpop.f32.mrf.mxu0 }
 0x264   :  { %v7022_v28 = vpop.f32.mrf.mxu0 }
 0x266   :  { %v7024_v48 = vpop.f32.mrf.mxu0 }
 0x295   :  { %v3851_v61 = vpop.f32.mrf.mxu1  ;;  %v3904_v13 = vpop.f32.mrf.mxu0 }
 0x296   :  { %v3905_v37 = vadd.f32 %v3904_v13, %v7046_v14 }
 0x297   :  { %v3853_v59 = vpop.f32.mrf.mxu1  ;;  %v3906_v26 = vpop.f32.mrf.mxu0 }
 0x298   :  { %v3907_v38 = vadd.f32 %v3906_v26, %v7051_v43  ;;  %v3854_v0 = vadd.f32 %v3853_v59, %v3801_v24  ;;  %v5205_v26 = vld [vmem:[%s7349_s0] sm:$0xff] }
 0x299   :  { %v3855_v47 = vpop.f32.mrf.mxu1  ;;  %v3908_v55 = vpop.f32.mrf.mxu0 }
 0x29b   :  { %v3857_v20 = vpop.f32.mrf.mxu1  ;;  %v3910_v10 = vpop.f32.mrf.mxu0 }
 0x29c   :  { %v3858_v15 = vadd.f32 %v3857_v20, %v3805_v31 }
 0x29d   :  { %v7026_v54 = vpop.f32.mrf.mxu1  ;;  %v3914_v8 = vpop.f32.mrf.mxu0 }
 0x29e   :  { %7365 = vst [vmem:[#allocation5_spill] sm:$0xff] %v7026_v54 }
 0x29f   :  { %v7028_v46 = vpop.f32.mrf.mxu1  ;;  %v7034_v9 = vpop.f32.mrf.mxu0 }
 0x2a1   :  { %v7030_v49 = vpop.f32.mrf.mxu1  ;;  %v7036_v29 = vpop.f32.mrf.mxu0 }
 0x2a2   :  { %7366 = vst [vmem:[#allocation6_spill] sm:$0xff] %v7030_v49  ;;  %7368 = vst [vmem:[#allocation8_spill] sm:$0xff] %v7036_v29  ;;  %v3705_v49 = vadd.f32 %v3704_v36, %v2365_v4  ;;  %v3750_v29 = vadd.f32 %v3749_v40, %v3697_v23  ;;  %v3762_v40 = vadd.f32 %v7016_v16, %v3709_v56  ;;  %v5204_v16 = vld [vmem:[%s7349_s0 + $0x28] sm:$0xff] }
 0x2a3   :  { %v7032_v51 = vpop.f32.mrf.mxu1  ;;  %v7038_v60 = vpop.f32.mrf.mxu0  ;;  %v7073_v44 = vadd.f32 %v5204_v16, %v3858_v15  ;;  %v5210_v15 = vld [vmem:[%s7349_s0 + $0x30] sm:$0xff] }
 0x2a4   :  { %7367 = vst [vmem:[#allocation7_spill] sm:$0xff] %v7032_v51  ;;  %7369 = vst [vmem:[#allocation9_spill] sm:$0xff] %v7038_v60  ;;  %v3746_v51 = vadd.f32 %v3745_v35, %v3693_v19  ;;  %v3707_v60 = vadd.f32 %v3706_v39, %v2361_v3  ;;  %v3758_v32 = vadd.f32 %v3757_v33, %v3705_v49 }
 0x2a5   :  { %v3803_v50 = vadd.f32 %v3802_v7, %v3750_v29  ;;  %v3909_v39 = vadd.f32 %v3908_v55, %v7046_v14  ;;  %v7065_v33 = vadd.f32 %v5203_v42, %v3854_v0  ;;  %v3911_v7 = vadd.f32 %v3910_v10, %v7051_v43 }
 0x2a6   :  { %v3799_v34 = vadd.f32 %v3798_v27, %v3746_v51  ;;  %v3760_v35 = vadd.f32 %v7014_v63, %v3707_v60  ;;  %v3811_v27 = vadd.f32 %v7020_v45, %v3758_v32  ;;  %v3815_v56 = vadd.f32 %v7024_v48, %v3762_v40  ;;  %v5206_v48 = vld [vmem:[%s7349_s0 + $0x20] sm:$0xff]  ;;  %v5207_v60 = vld [vmem:[%s7349_s0 + $0x10] sm:$0xff] }
 0x2a7   :  { %v3856_v13 = vadd.f32 %v3855_v47, %v3803_v50  ;;  %v3915_v45 = vadd.f32 %v3914_v8, %v7046_v14  ;;  %v3917_v8 = vadd.f32 %v7034_v9, %v7051_v43 }
 0x2a8   :  { %v3852_v52 = vadd.f32 %v3851_v61, %v3799_v34  ;;  %v3813_v59 = vadd.f32 %v7022_v28, %v3760_v35  ;;  %v5209_v34 = vld [vmem:[%s7349_s0 + $0x48] sm:$0xff] }
 0x2a9   :  { %v7084_v51 = vadd.f32 %v5206_v48, %v3856_v13 }
 0x2aa   :  { %v7079_v55 = vadd.f32 %v5205_v26, %v3852_v52 }
 0x2ab   :  { %v4103_v3 = vadd.f32 %v7073_v44, %v7084_v51  ;;  %v7373_v0 = vld [vmem:[#allocation7_spill] sm:$0xff] }
 0x2ac   :  { %v4098_v4 = vadd.f32 %v7065_v33, %v7079_v55 }
 0x2d5   :  { %v3957_v58 = vpop.f32.mrf.mxu1 }
 0x2d6   :  { %v4010_v1 = vpop.f32.mrf.mxu0  ;;  %v3958_v12 = vadd.f32 %v3957_v58, %v3905_v37  ;;  %v3864_v58 = vadd.f32 %v7028_v46, %v3811_v27  ;;  %v7371_v46 = vld [vmem:[#allocation8_spill] sm:$0xff] }
 0x2d7   :  { %v3959_v6 = vpop.f32.mrf.mxu1 }
 0x2d8   :  { %v4012_v5 = vpop.f32.mrf.mxu0  ;;  %v3960_v41 = vadd.f32 %v3959_v6, %v3907_v38  ;;  %v4011_v63 = vadd.f32 %v4010_v1, %v3958_v12  ;;  %v7109_v38 = vadd.f32 %v5209_v34, %v3864_v58  ;;  %v3868_v12 = vadd.f32 %v7373_v0, %v3815_v56  ;;  %v5213_v56 = vld [vmem:[%s7349_s0 + $0x68] sm:$0xff] }
 0x2d9   :  { %v3961_v57 = vpop.f32.mrf.mxu1 }
 0x2da   :  { %v4014_v11 = vpop.f32.mrf.mxu0  ;;  %v3962_v61 = vadd.f32 %v3961_v57, %v3909_v39  ;;  %v4013_v49 = vadd.f32 %v4012_v5, %v3960_v41  ;;  %v7370_v5 = vld [vmem:[#allocation5_spill] sm:$0xff]  ;;  %v5211_v39 = vld [vmem:[%s7349_s0 + $0x40] sm:$0xff]  ;;  %v7130_v16 = vadd.f32 %v5213_v56, %v3868_v12 }
 0x2db   :  { %v3963_v62 = vpop.f32.mrf.mxu1  ;;  %v3862_v9 = vadd.f32 %v7370_v5, %v3809_v18 }
 0x2dc   :  { %v4016_v36 = vpop.f32.mrf.mxu0  ;;  %v3964_v28 = vadd.f32 %v3963_v62, %v3911_v7  ;;  %v4015_v57 = vadd.f32 %v4014_v11, %v3962_v61 }
 0x2dd   :  { %v3967_v2 = vpop.f32.mrf.mxu1  ;;  %v7121_v41 = vadd.f32 %v5211_v39, %v3862_v9 }
 0x2de   :  { %v4020_v47 = vpop.f32.mrf.mxu0  ;;  %v3968_v6 = vadd.f32 %v3967_v2, %v3915_v45  ;;  %v3919_v2 = vadd.f32 %v7371_v46, %v7046_v14  ;;  %v4017_v23 = vadd.f32 %v4016_v36, %v3964_v28  ;;  %v7372_v14 = vld [vmem:[#allocation9_spill] sm:$0xff]  ;;  %v5215_v28 = vld [vmem:[%s7349_s0 + $0x60] sm:$0xff] }
 0x2df   :  { %v7048_v17 = vpop.f32.mrf.mxu1 }
 0x2e0   :  { %v3970_v11 = vadd.f32 %v7048_v17, %v3917_v8  ;;  %v4022_v19 = vpop.f32.mrf.mxu0  ;;  %v3921_v17 = vadd.f32 %v7372_v14, %v7051_v43  ;;  %v4021_v30 = vadd.f32 %v4020_v47, %v3968_v6  ;;  %v7374_v43 = vld [vmem:[#allocation6_spill] sm:$0xff] }
 0x2e1   :  { %v7054_v54 = vpop.f32.mrf.mxu1  ;;  %v3866_v40 = vadd.f32 %v7374_v43, %v3813_v59  ;;  %v4108_v59 = vadd.f32 %v7109_v38, %v7121_v41 }
 0x2e2   :  { %v3972_v50 = vadd.f32 %v7054_v54, %v3919_v2  ;;  %v4023_v18 = vadd.f32 %v4022_v19, %v3970_v11  ;;  %v4024_v27 = vpop.f32.mrf.mxu0  ;;  %v5212_v54 = vld [vmem:[%s7349_s0 + $0x38] sm:$0xff] }
 0x2e3   :  { %v3973_v24 = vpop.f32.mrf.mxu1  ;;  %v5218_v2 = vld [vmem:[%s7349_s0 + $0x78] sm:$0xff] }
 0x2e4   :  { %v3974_v42 = vadd.f32 %v3973_v24, %v3921_v17  ;;  %v4025_v47 = vadd.f32 %v4024_v27, %v3972_v50  ;;  %v5214_v24 = vld [vmem:[%s7349_s0 + $0x50] sm:$0xff]  ;;  %v4026_v48 = vpop.f32.mrf.mxu0 }
 0x2e6   :  { %v4027_v58 = vadd.f32 %v4026_v48, %v3974_v42 }
 0x316   :  { %v4063_v20 = vpop.f32.mrf.mxu1 }
 0x317   :  { %v4064_v10 = vadd.f32 %v4063_v20, %v4011_v63 }
 0x318   :  { %v4065_v29 = vpop.f32.mrf.mxu1 }
 0x319   :  { %v7092_v62 = vadd.f32 %v5207_v60, %v4064_v10  ;;  %v4066_v1 = vadd.f32 %v4065_v29, %v4013_v49  ;;  %v4094_v10 = vadd.f32 %v5215_v28, %v3866_v40  ;;  %v5216_v29 = vld [vmem:[%s7349_s0 + $0x58] sm:$0xff] }
 0x31a   :  { %v4067_v22 = vpop.f32.mrf.mxu1 }
 0x31b   :  { %v4068_v21 = vadd.f32 %v4067_v22, %v4015_v57  ;;  %v4085_v37 = vadd.f32 %v5208_v25, %v4066_v1  ;;  %v4099_v31 = vadd.f32 %v4098_v4, %v7092_v62  ;;  %v4113_v4 = vadd.f32 %v7130_v16, %v4094_v10 }
 0x31c   :  { %v4069_v32 = vpop.f32.mrf.mxu1 }
 0x31d   :  { %v4088_v36 = vadd.f32 %v5210_v15, %v4068_v21  ;;  %v4070_v35 = vadd.f32 %v4069_v32, %v4017_v23  ;;  %v4100_v52 = vadd.f32 %v4099_v31, %v4085_v37 }
 0x31e   :  { %v4073_v13 = vpop.f32.mrf.mxu1 }
 0x31f   :  { %v4089_v7 = vadd.f32 %v5212_v54, %v4070_v35  ;;  %v4074_v63 = vadd.f32 %v4073_v13, %v4021_v30  ;;  %4101 = vadd.xlane.f32.xlu0 %v4100_v52  ;;  %v4104_v61 = vadd.f32 %v4103_v3, %v4088_v36  ;;  %v5217_v3 = vld [vmem:[%s7349_s0 + $0x70] sm:$0xff] }
 0x320   :  { %v4075_v45 = vpop.f32.mrf.mxu1 }
 0x321   :  { %v4092_v20 = vadd.f32 %v5214_v24, %v4074_v63  ;;  %v4076_v26 = vadd.f32 %v4075_v45, %v4023_v18  ;;  %v4105_v49 = vadd.f32 %v4104_v61, %v4089_v7 }
 0x322   :  { %v4077_v8 = vpop.f32.mrf.mxu1 }
 0x323   :  { %v4078_v6 = vadd.f32 %v4077_v8, %v4025_v47  ;;  %4106 = vadd.xlane.f32.xlu0 %v4105_v49  ;;  %v4093_v57 = vadd.f32 %v5216_v29, %v4076_v26  ;;  %v4109_v60 = vadd.f32 %v4108_v59, %v4092_v20 }
 0x324   :  { %v4079_v1 = vpop.f32.mrf.mxu1 }
 0x325   :  { %v4096_v5 = vadd.f32 %v5217_v3, %v4078_v6  ;;  %v4080_v9 = vadd.f32 %v4079_v1, %v4027_v58  ;;  %v4110_v46 = vadd.f32 %v4109_v60, %v4093_v57 }
 0x327   :  { %v4097_v11 = vadd.f32 %v5218_v2, %v4080_v9  ;;  %4111 = vadd.xlane.f32.xlu1 %v4110_v46  ;;  %v4114_v19 = vadd.f32 %v4113_v4, %v4096_v5 }
 0x329   :  { %v4115_v22 = vadd.f32 %v4114_v19, %v4097_v11 }
 0x32b   :  { %4116 = vadd.xlane.f32.xlu1 %v4115_v22  ;;  %v4203_v22 = vld [vmem:[%s7353_s5] sm:$0xf] }
 0x3a8   :  { %v4102_v23 = vpop.xlane.xlu0 %4101 }
 0x3a9   :  { %v4119_v21 = vmul.f32 0.001953125, %v4102_v23 }
 0x3ab   :  { %v7151_v25 = vsub.f32 %v7079_v55, %v4119_v21  ;;  %v7154_v31 = vsub.f32 %v7065_v33, %v4119_v21  ;;  %v7157_v34 = vsub.f32 %v7092_v62, %v4119_v21  ;;  %v7159_v17 = vsub.f32 %v4085_v37, %v4119_v21  ;;  %v4241_v21 = vld [vmem:[%s7354_s6] sm:$0xf] }
 0x3ac   :  { %v4107_v14 = vpop.xlane.xlu0 %4106 }
 0x3ad   :  { %v4120_v0 = vmul.f32 0.001953125, %v4107_v14  ;;  %v4139_v12 = vmul.f32 %v7151_v25, %v7151_v25  ;;  %v4140_v30 = vmul.f32 %v7154_v31, %v7154_v31  ;;  %v4141_v55 = vmul.f32 %v7157_v34, %v7157_v34 }
 0x3ae   :  { %v4142_v15 = vmul.f32 %v7159_v17, %v7159_v17 }
 0x3af   :  { %v7168_v32 = vsub.f32 %v7084_v51, %v4120_v0  ;;  %v7171_v33 = vsub.f32 %v7073_v44, %v4120_v0  ;;  %v4155_v62 = vadd.f32 %v4140_v30, %v4139_v12  ;;  %v7173_v50 = vsub.f32 %v4088_v36, %v4120_v0  ;;  %v7376_v30 = vld [vmem:[#allocation2_spill] sm:$0xff] }
 0x3b0   :  { %v4112_v37 = vpop.xlane.xlu1 %4111  ;;  %v7177_v35 = vsub.f32 %v4089_v7, %v4120_v0  ;;  %v7375_v0 = vld [vmem:[#allocation3_spill] sm:$0xff] }
 0x3b1   :  { %v4121_v52 = vmul.f32 0.001953125, %v4112_v37  ;;  %v4156_v39 = vadd.f32 %v4155_v62, %v4141_v55  ;;  %v4143_v43 = vmul.f32 %v7168_v32, %v7168_v32  ;;  %v4144_v51 = vmul.f32 %v7171_v33, %v7171_v33  ;;  %v7377_v62 = vld [vmem:[#allocation4_spill] sm:$0xff] }
 0x3b2   :  { %v4145_v44 = vmul.f32 %v7173_v50, %v7173_v50  ;;  %v4146_v42 = vmul.f32 %v7177_v35, %v7177_v35  ;;  %v7229_v12 = vrot.slane %v4203_v22, %v7375_v0  ;;  %v7232_v55 = vrot.slane %v4203_v22, %v7376_v30 }
 0x3b3   :  { %v7186_v36 = vsub.f32 %v7121_v41, %v4121_v52  ;;  %v7189_v40 = vsub.f32 %v7109_v38, %v4121_v52  ;;  %v4157_v18 = vadd.f32 %v4156_v39, %v4142_v15  ;;  %v4160_v27 = vadd.f32 %v4144_v51, %v4143_v43 }
 0x3b4   :  { %v4117_v13 = vpop.xlane.xlu1 %4116  ;;  %v7193_v54 = vsub.f32 %v4092_v20, %v4121_v52  ;;  %v7195_v7 = vsub.f32 %v4093_v57, %v4121_v52  ;;  %v7235_v37 = vrot.slane %v4203_v22, %v7377_v62  ;;  %v7238_v15 = vrot.slane %v4203_v22, %v6359_v53 }
 0x3b5   :  { %v4122_v63 = vmul.f32 0.001953125, %v4117_v13  ;;  %4158 = vadd.xlane.f32.xlu0 %v4157_v18  ;;  %v4161_v61 = vadd.f32 %v4160_v27, %v4145_v44  ;;  %v4147_v41 = vmul.f32 %v7186_v36, %v7186_v36  ;;  %v4148_v38 = vmul.f32 %v7189_v40, %v7189_v40 }
 0x3b6   :  { %v4149_v56 = vmul.f32 %v7193_v54, %v7193_v54  ;;  %v4150_v20 = vmul.f32 %v7195_v7, %v7195_v7  ;;  %v7241_v39 = vrot.slane %v4241_v21, %v7375_v0  ;;  %v7244_v43 = vrot.slane %v4241_v21, %v7376_v30 }
 0x3b7   :  { %v7203_v45 = vsub.f32 %v4094_v10, %v4122_v63  ;;  %v7206_v59 = vsub.f32 %v7130_v16, %v4122_v63  ;;  %v4162_v47 = vadd.f32 %v4161_v61, %v4146_v42  ;;  %v4165_v24 = vadd.f32 %v4148_v38, %v4147_v41 }
 0x3b8   :  { %v7210_v26 = vsub.f32 %v4096_v5, %v4122_v63  ;;  %v7212_v28 = vsub.f32 %v4097_v11, %v4122_v63  ;;  %v7247_v51 = vrot.slane %v4241_v21, %v7377_v62  ;;  %v7250_v44 = vrot.slane %v4241_v21, %v6359_v53 }
 0x3b9   :  { %4163 = vadd.xlane.f32.xlu1 %v4162_v47  ;;  %v4166_v49 = vadd.f32 %v4165_v24, %v4149_v56  ;;  %v4151_v48 = vmul.f32 %v7203_v45, %v7203_v45  ;;  %v4152_v10 = vmul.f32 %v7206_v59, %v7206_v59 }
 0x3ba   :  { %v4153_v16 = vmul.f32 %v7210_v26, %v7210_v26  ;;  %v4154_v6 = vmul.f32 %v7212_v28, %v7212_v28 }
 0x3bb   :  { %v4167_v8 = vadd.f32 %v4166_v49, %v4150_v20  ;;  %v4170_v58 = vadd.f32 %v4152_v10, %v4151_v48 }
 0x3bd   :  { %4168 = vadd.xlane.f32.xlu0 %v4167_v8  ;;  %v4171_v29 = vadd.f32 %v4170_v58, %v4153_v16 }
 0x3bf   :  { %v4172_v57 = vadd.f32 %v4171_v29, %v4154_v6 }
 0x3c1   :  { %4173 = vadd.xlane.f32.xlu1 %v4172_v57 }
 0x43e   :  { %v4159_v60 = vpop.xlane.xlu0 %4158 }
 0x43f   :  { %v4175_v1 = vmul.f32 0.001953125, %v4159_v60 }
 0x441   :  { %v4179_v4 = vadd.f32 1e-05, %v4175_v1 }
 0x442   :  { %v4164_v3 = vpop.xlane.xlu1 %4163 }
 0x443   :  { %5195 = vrsqrt.f32 %v4179_v4  ;;  %v4176_v5 = vmul.f32 0.001953125, %v4164_v3 }
 0x445   :  { %v4180_v9 = vadd.f32 1e-05, %v4176_v5 }
 0x446   :  { %v4169_v46 = vpop.xlane.xlu0 %4168 }
 0x447   :  { %5197 = vrsqrt.f32 %v4180_v9  ;;  %v4177_v2 = vmul.f32 0.001953125, %v4169_v46 }
 0x449   :  { %v4181_v11 = vadd.f32 1e-05, %v4177_v2 }
 0x44a   :  { %v4174_v19 = vpop.xlane.xlu1 %4173 }
 0x44b   :  { %5199 = vrsqrt.f32 %v4181_v11  ;;  %v4178_v23 = vmul.f32 0.001953125, %v4174_v19 }
 0x44d   :  { %v4182_v14 = vadd.f32 1e-05, %v4178_v23 }
 0x44f   :  { %5201 = vrsqrt.f32 %v4182_v14 }
 0x450   :  { %v5196_v52 = vpop.eup %5195 }
 0x451   :  { %v4187_v18 = vmul.f32 %v5196_v52, %v7151_v25  ;;  %v4188_v27 = vmul.f32 %v5196_v52, %v7154_v31  ;;  %v4189_v13 = vmul.f32 %v5196_v52, %v7157_v34  ;;  %v4190_v42 = vmul.f32 %v5196_v52, %v7159_v17 }
 0x453   :  { %v4225_v63 = vmul.f32 %v7229_v12, %v4187_v18  ;;  %v4226_v61 = vmul.f32 %v7232_v55, %v4188_v27  ;;  %v4227_v41 = vmul.f32 %v7235_v37, %v4189_v13  ;;  %v4228_v38 = vmul.f32 %v7238_v15, %v4190_v42 }
 0x454   :  { %v5198_v56 = vpop.eup %5197 }
 0x455   :  { %v4263_v53 = vadd.f32 %v7241_v39, %v4225_v63  ;;  %v4264_v47 = vadd.f32 %v7244_v43, %v4226_v61  ;;  %v4265_v25 = vadd.f32 %v7247_v51, %v4227_v41  ;;  %v4266_v31 = vadd.f32 %v7250_v44, %v4228_v38 }
 0x456   :  { %v4191_v34 = vmul.f32 %v5198_v56, %v7168_v32  ;;  %v4192_v17 = vmul.f32 %v5198_v56, %v7171_v33  ;;  %v4193_v24 = vmul.f32 %v5198_v56, %v7173_v50  ;;  %v4194_v20 = vmul.f32 %v5198_v56, %v7177_v35 }
 0x457   :  { %4279 = vst [vmem:[%s7355_s7] sm:$0xff] %v4263_v53  ;;  %4280 = vst [vmem:[%s7355_s7 + $0x8] sm:$0xff] %v4264_v47 }
 0x458   :  { %4281 = vst [vmem:[%s7355_s7 + $0x10] sm:$0xff] %v4265_v25  ;;  %4282 = vst [vmem:[%s7355_s7 + $0x18] sm:$0xff] %v4266_v31  ;;  %v5200_v32 = vpop.eup %5199  ;;  %v4229_v33 = vmul.f32 %v7229_v12, %v4191_v34  ;;  %v4230_v50 = vmul.f32 %v7232_v55, %v4192_v17  ;;  %v4231_v35 = vmul.f32 %v7235_v37, %v4193_v24 }
 0x459   :  { %v4232_v49 = vmul.f32 %v7238_v15, %v4194_v20  ;;  %v4195_v48 = vmul.f32 %v5200_v32, %v7186_v36  ;;  %v4196_v10 = vmul.f32 %v5200_v32, %v7189_v40  ;;  %v4197_v8 = vmul.f32 %v5200_v32, %v7193_v54 }
 0x45a   :  { %v4198_v16 = vmul.f32 %v5200_v32, %v7195_v7  ;;  %v4267_v58 = vadd.f32 %v7241_v39, %v4229_v33  ;;  %v4268_v6 = vadd.f32 %v7244_v43, %v4230_v50  ;;  %v4269_v29 = vadd.f32 %v7247_v51, %v4231_v35 }
 0x45b   :  { %v4270_v57 = vadd.f32 %v7250_v44, %v4232_v49  ;;  %v4233_v60 = vmul.f32 %v7229_v12, %v4195_v48  ;;  %v4234_v1 = vmul.f32 %v7232_v55, %v4196_v10  ;;  %v4235_v36 = vmul.f32 %v7235_v37, %v4197_v8 }
 0x45c   :  { %v4236_v40 = vmul.f32 %v7238_v15, %v4198_v16  ;;  %v5202_v4 = vpop.eup %5201  ;;  %4283 = vst [vmem:[%s7355_s7 + $0x20] sm:$0xff] %v4267_v58  ;;  %4284 = vst [vmem:[%s7355_s7 + $0x28] sm:$0xff] %v4268_v6 }
 0x45d   :  { %4285 = vst [vmem:[%s7355_s7 + $0x30] sm:$0xff] %v4269_v29  ;;  %4286 = vst [vmem:[%s7355_s7 + $0x38] sm:$0xff] %v4270_v57  ;;  %v4271_v54 = vadd.f32 %v7241_v39, %v4233_v60  ;;  %v4272_v7 = vadd.f32 %v7244_v43, %v4234_v1  ;;  %v4273_v3 = vadd.f32 %v7247_v51, %v4235_v36 }
 0x45e   :  { %v4274_v5 = vadd.f32 %v7250_v44, %v4236_v40  ;;  %v4199_v9 = vmul.f32 %v5202_v4, %v7203_v45  ;;  %v4200_v46 = vmul.f32 %v5202_v4, %v7206_v59  ;;  %v4201_v2 = vmul.f32 %v5202_v4, %v7210_v26 }
 0x45f   :  { %v4202_v11 = vmul.f32 %v5202_v4, %v7212_v28  ;;  %4287 = vst [vmem:[%s7355_s7 + $0x40] sm:$0xff] %v4271_v54  ;;  %4288 = vst [vmem:[%s7355_s7 + $0x48] sm:$0xff] %v4272_v7 }
 0x460   :  { %4289 = vst [vmem:[%s7355_s7 + $0x50] sm:$0xff] %v4273_v3  ;;  %4290 = vst [vmem:[%s7355_s7 + $0x58] sm:$0xff] %v4274_v5  ;;  %v4237_v45 = vmul.f32 %v7229_v12, %v4199_v9  ;;  %v4238_v59 = vmul.f32 %v7232_v55, %v4200_v46  ;;  %v4239_v26 = vmul.f32 %v7235_v37, %v4201_v2 }
 0x461   :  { %v4240_v28 = vmul.f32 %v7238_v15, %v4202_v11 }
 0x462   :  { %v4275_v19 = vadd.f32 %v7241_v39, %v4237_v45  ;;  %v4276_v22 = vadd.f32 %v7244_v43, %v4238_v59  ;;  %v4277_v23 = vadd.f32 %v7247_v51, %v4239_v26 }
 0x463   :  { %v4278_v21 = vadd.f32 %v7250_v44, %v4240_v28 }
 0x464   :  { %4291 = vst [vmem:[%s7355_s7 + $0x60] sm:$0xff] %v4275_v19  ;;  %4292 = vst [vmem:[%s7355_s7 + $0x68] sm:$0xff] %v4276_v22 }
 0x465   :  { %4293 = vst [vmem:[%s7355_s7 + $0x70] sm:$0xff] %v4277_v23  ;;  %4294 = vst [vmem:[%s7355_s7 + $0x78] sm:$0xff] %v4278_v21 }

// kernel: transformer_classifier_forward.14
= control target key start
LH: loop header
LB: loop body
LE: loop exit
PB: predicated region body
PF: predicated region fallthrough
CT: control target
= control target key end

     0   :  { %s7514_s24 = smov 0   ;;  %s9557_s0 = inlined_call_operand.vmem [shape: f32[32,512], index: 0, kind: input, shape index: {}]   ;;  %s9558_s1 = inlined_call_operand.vmem [shape: bf16[512,1536], index: 1, kind: input, shape index: {}]   ;;  %s9559_s2 = inlined_call_operand.vmem [shape: f32[1,1536], index: 2, kind: input, shape index: {}]   ;;  %s9560_s3 = inlined_call_operand.vmem [shape: bf16[512,512], index: 3, kind: input, shape index: {}]   ;;  %s9561_s4 = inlined_call_operand.vmem [shape: f32[1,512], index: 4, kind: input, shape index: {}]   ;;  %s9562_s5 = inlined_call_operand.vmem [shape: f32[1,512], index: 5, kind: input, shape index: {}]   ;;  %s9563_s6 = inlined_call_operand.vmem [shape: f32[1,512], index: 6, kind: input, shape index: {}]   ;;  %s9564_s7 = inlined_call_operand.vmem [shape: f32[32,512], index: 7, kind: output, shape index: {}]  }
   0x1 LB: > { %s5919_s25 = sadd.s32 4294967295, %s7468_s24   ;;  %p5923_p0 = scmp.ge.s32.totalorder %s7468_s24, 1  ;;  %s7468_s24 = sphi %s7514_s24, %s17_s24  }
   0x2   : > { %p239_p1 = scmp.lt.s32.totalorder %s7468_s24, 3 }
   0x4   : > { %p240_p2 = pnand %p5923_p0, %p239_p1 }
   0x5   : > { %s5924_s21 = sshll.u32 (!%p240_p2), %s5919_s25, 1  ;;  %s7472_s11 = smov (!%p240_p2), 64  }
   0x6   : > { %243 = sbr.rel (%p240_p2) target bundleno = 6673 (0x1a11), region = 48  ;;  %p274_p3 = scmp.lt.s32.totalorder (!%p240_p2), %s5924_s21, 3 }
   0xb   : > { %v6618_v0 = vld [vmem:[%s9558_s1 + $0x2a4] ss:$48 sps:$4 sm:$0xff]   ;;  %v6622_v2 = vld [vmem:[%s9558_s1 + $0x2a0] ss:$48 sps:$4 sm:$0xff]   ;;  %s9566_s21 = smov (!%p274_p3, %s5924_s21), 3  ;;  %vm7471_vm0 = vmmov 0  }
   0xc   : > { %v6620_v1 = vld [vmem:[%s9558_s1 + $0x8a4] ss:$48 sps:$4 sm:$0xff]   ;;  %2668 = vmatprep.subr.bf16.mxu0 %v6618_v0  ;;  %v6623_v3 = vld [vmem:[%s9558_s1 + $0x8a0] ss:$48 sps:$4 sm:$0xff]   ;;  %s6476_s23 = sshll.u32 %s9566_s21, 5  ;;  %vm3225_vm1 = vcmask 523264  }
   0xd   : > { %2711 = vmatprep.subr.bf16.mxu1 %v6620_v1  ;;  %v6624_v4 = vld [vmem:[%s9558_s1 + $0x244] ss:$48 sps:$4 sm:$0xff]   ;;  %2669 = vmatpush1.bf16.msra.mxu0 %v6622_v2  ;;  %v6628_v6 = vld [vmem:[%s9558_s1 + $0x240] ss:$48 sps:$4 sm:$0xff]   ;;  %s7664_s10 = scalar_lea.vmem %s9557_s0, %s6476_s23  ;;  %vm3273_vm2 = vcmask 130048   ;;  %s285_s22 = scalar_lea.vmem %s9564_s7, %s6476_s23 }
   0xe   : > { %2712 = vmatpush1.bf16.msra.mxu1 %v6623_v3  ;;  %v6626_v5 = vld [vmem:[%s9558_s1 + $0x844] ss:$48 sps:$4 sm:$0xff]   ;;  %2670 = vmatprep.subr.bf16.mxu0 %v6624_v4  ;;  %v6629_v7 = vld [vmem:[%s9558_s1 + $0x840] ss:$48 sps:$4 sm:$0xff]   ;;  %v289_v46 = vld [vmem:[%s7664_s10 + $0x8] sm:$0xff] }
   0xf   : > { %2713 = vmatprep.subr.bf16.mxu1 %v6626_v5  ;;  %v6630_v8 = vld [vmem:[%s9558_s1 + $0x1e4] ss:$48 sps:$4 sm:$0xff]   ;;  %v6634_v10 = vld [vmem:[%s9558_s1 + $0x1e0] ss:$48 sps:$4 sm:$0xff]   ;;  %v293_v47 = vld [vmem:[%s7664_s10 + $0x28] sm:$0xff] }
  0x10   : > { %v6632_v9 = vld [vmem:[%s9558_s1 + $0x7e4] ss:$48 sps:$4 sm:$0xff]   ;;  %v6635_v11 = vld [vmem:[%s9558_s1 + $0x7e0] ss:$48 sps:$4 sm:$0xff]   ;;  %v291_v48 = vld [vmem:[%s7664_s10 + $0x18] sm:$0xff]  ;;  %v7685_v53 = vpack.c.bf16 %v293_v47, %v289_v46 }
  0x11   : > { %2671 = vmatpush1.bf16.msra.mxu0 %v6628_v6  ;;  %v6636_v12 = vld [vmem:[%s9558_s1 + $0x184] ss:$48 sps:$4 sm:$0xff]   ;;  %v6640_v14 = vld [vmem:[%s9558_s1 + $0x180] ss:$48 sps:$4 sm:$0xff]   ;;  %v295_v49 = vld [vmem:[%s7664_s10 + $0x38] sm:$0xff] }
  0x12   : > { %2714 = vmatpush1.bf16.msra.mxu1 %v6629_v7  ;;  %2672 = vmatprep.subr.bf16.mxu0 %v6630_v8  ;;  %v6638_v13 = vld [vmem:[%s9558_s1 + $0x784] ss:$48 sps:$4 sm:$0xff]   ;;  %v6641_v15 = vld [vmem:[%s9558_s1 + $0x780] ss:$48 sps:$4 sm:$0xff]   ;;  %v7687_v54 = vpack.c.bf16 %v295_v49, %v291_v48  ;;  %v6762_v46 = vld [vmem:[%s9558_s1 + $0x5a8] ss:$48 sps:$4 sm:$0xff]  }
  0x13   : > { %2715 = vmatprep.subr.bf16.mxu1 %v6632_v9  ;;  %v6642_v16 = vld [vmem:[%s9558_s1 + $0x124] ss:$48 sps:$4 sm:$0xff]   ;;  %v6646_v18 = vld [vmem:[%s9558_s1 + $0x120] ss:$48 sps:$4 sm:$0xff]   ;;  %2700 = vmatprep.mubr.bf16.mxu0 %v7685_v53  ;;  %v6765_v47 = vld [vmem:[%s9558_s1 + $0xba8] ss:$48 sps:$4 sm:$0xff]  }
  0x14   : > { %v6644_v17 = vld [vmem:[%s9558_s1 + $0x724] ss:$48 sps:$4 sm:$0xff]   ;;  %v6647_v19 = vld [vmem:[%s9558_s1 + $0x720] ss:$48 sps:$4 sm:$0xff]   ;;  %2743 = vmatprep.mubr.bf16.mxu1 %v7687_v54  ;;  %v6770_v48 = vld [vmem:[%s9558_s1 + $0x54c] ss:$48 sps:$4 sm:$0xff]  }
  0x15   : > { %2673 = vmatpush1.bf16.msra.mxu0 %v6634_v10  ;;  %v6648_v20 = vld [vmem:[%s9558_s1 + $0xc4] ss:$48 sps:$4 sm:$0xff]   ;;  %v6652_v22 = vld [vmem:[%s9558_s1 + $0xc0] ss:$48 sps:$4 sm:$0xff]   ;;  %v6716_v10 = vld [vmem:[%s9558_s1 + $0x2ac] ss:$48 sps:$4 sm:$0xff]  }
  0x16   : > { %2716 = vmatpush1.bf16.msra.mxu1 %v6635_v11  ;;  %2674 = vmatprep.subr.bf16.mxu0 %v6636_v12  ;;  %v6650_v21 = vld [vmem:[%s9558_s1 + $0x6c4] ss:$48 sps:$4 sm:$0xff]   ;;  %v6653_v23 = vld [vmem:[%s9558_s1 + $0x6c0] ss:$48 sps:$4 sm:$0xff]   ;;  %v6719_v11 = vld [vmem:[%s9558_s1 + $0x8ac] ss:$48 sps:$4 sm:$0xff]  }
  0x17   : > { %2717 = vmatprep.subr.bf16.mxu1 %v6638_v13  ;;  %v6654_v24 = vld [vmem:[%s9558_s1 + $0x64] ss:$48 sps:$4 sm:$0xff]   ;;  %v6658_v26 = vld [vmem:[%s9558_s1 + $0x60] ss:$48 sps:$4 sm:$0xff]   ;;  %v6773_v49 = vld [vmem:[%s9558_s1 + $0xb4c] ss:$48 sps:$4 sm:$0xff]  }
  0x18   : > { %v6656_v25 = vld [vmem:[%s9558_s1 + $0x664] ss:$48 sps:$4 sm:$0xff]   ;;  %v6659_v27 = vld [vmem:[%s9558_s1 + $0x660] ss:$48 sps:$4 sm:$0xff]  }
  0x19   : > { %2675 = vmatpush1.bf16.msra.mxu0 %v6640_v14  ;;  %v6660_v28 = vld [vmem:[%s9558_s1 + $0x4] ss:$48 sps:$4 sm:$0xff]   ;;  %v6664_v30 = vld [vmem:[%s9558_s1] ss:$48 sps:$4 sm:$0xff]   ;;  %v6714_v14 = vld [vmem:[%s9558_s1 + $0x2a8] ss:$48 sps:$4 sm:$0xff]  }
  0x1a   : > { %2718 = vmatpush1.bf16.msra.mxu1 %v6641_v15  ;;  %2676 = vmatprep.subr.bf16.mxu0 %v6642_v16  ;;  %v6662_v29 = vld [vmem:[%s9558_s1 + $0x604] ss:$48 sps:$4 sm:$0xff]   ;;  %v6665_v31 = vld [vmem:[%s9558_s1 + $0x600] ss:$48 sps:$4 sm:$0xff]   ;;  %v6717_v15 = vld [vmem:[%s9558_s1 + $0x8a8] ss:$48 sps:$4 sm:$0xff]  }
  0x1b   : > { %2719 = vmatprep.subr.bf16.mxu1 %v6644_v17  ;;  %v6666_v32 = vld [vmem:[%s9558_s1 + $0x5a4] ss:$48 sps:$4 sm:$0xff]   ;;  %v6670_v34 = vld [vmem:[%s9558_s1 + $0x5a0] ss:$48 sps:$4 sm:$0xff]   ;;  %v6722_v16 = vld [vmem:[%s9558_s1 + $0x24c] ss:$48 sps:$4 sm:$0xff]  }
  0x1c   : > { %v6668_v33 = vld [vmem:[%s9558_s1 + $0xba4] ss:$48 sps:$4 sm:$0xff]   ;;  %v6671_v35 = vld [vmem:[%s9558_s1 + $0xba0] ss:$48 sps:$4 sm:$0xff]   ;;  %v6725_v17 = vld [vmem:[%s9558_s1 + $0x84c] ss:$48 sps:$4 sm:$0xff]  }
  0x1d   : > { %2677 = vmatpush1.bf16.msra.mxu0 %v6646_v18  ;;  %v6672_v36 = vld [vmem:[%s9558_s1 + $0x544] ss:$48 sps:$4 sm:$0xff]   ;;  %v6676_v38 = vld [vmem:[%s9558_s1 + $0x540] ss:$48 sps:$4 sm:$0xff]   ;;  %v6720_v18 = vld [vmem:[%s9558_s1 + $0x248] ss:$48 sps:$4 sm:$0xff]  }
  0x1e   : > { %2720 = vmatpush1.bf16.msra.mxu1 %v6647_v19  ;;  %2678 = vmatprep.subr.bf16.mxu0 %v6648_v20  ;;  %v6674_v37 = vld [vmem:[%s9558_s1 + $0xb44] ss:$48 sps:$4 sm:$0xff]   ;;  %v6677_v39 = vld [vmem:[%s9558_s1 + $0xb40] ss:$48 sps:$4 sm:$0xff]   ;;  %v6723_v19 = vld [vmem:[%s9558_s1 + $0x848] ss:$48 sps:$4 sm:$0xff]  }
  0x1f   : > { %2721 = vmatprep.subr.bf16.mxu1 %v6650_v21  ;;  %v6678_v40 = vld [vmem:[%s9558_s1 + $0x4e4] ss:$48 sps:$4 sm:$0xff]   ;;  %v6682_v42 = vld [vmem:[%s9558_s1 + $0x4e0] ss:$48 sps:$4 sm:$0xff]   ;;  %v6728_v20 = vld [vmem:[%s9558_s1 + $0x1ec] ss:$48 sps:$4 sm:$0xff]  }
  0x20   : > { %v6680_v41 = vld [vmem:[%s9558_s1 + $0xae4] ss:$48 sps:$4 sm:$0xff]   ;;  %v6683_v43 = vld [vmem:[%s9558_s1 + $0xae0] ss:$48 sps:$4 sm:$0xff]   ;;  %v6731_v21 = vld [vmem:[%s9558_s1 + $0x7ec] ss:$48 sps:$4 sm:$0xff]  }
  0x21   : > { %2679 = vmatpush1.bf16.msra.mxu0 %v6652_v22  ;;  %v6684_v44 = vld [vmem:[%s9558_s1 + $0x484] ss:$48 sps:$4 sm:$0xff]   ;;  %v6688_v50 = vld [vmem:[%s9558_s1 + $0x480] ss:$48 sps:$4 sm:$0xff]   ;;  %v6726_v22 = vld [vmem:[%s9558_s1 + $0x1e8] ss:$48 sps:$4 sm:$0xff]  }
  0x22   : > { %2722 = vmatpush1.bf16.msra.mxu1 %v6653_v23  ;;  %2680 = vmatprep.subr.bf16.mxu0 %v6654_v24  ;;  %v6686_v45 = vld [vmem:[%s9558_s1 + $0xa84] ss:$48 sps:$4 sm:$0xff]   ;;  %v6689_v51 = vld [vmem:[%s9558_s1 + $0xa80] ss:$48 sps:$4 sm:$0xff]   ;;  %v6729_v23 = vld [vmem:[%s9558_s1 + $0x7e8] ss:$48 sps:$4 sm:$0xff]  }
  0x23   : > { %2723 = vmatprep.subr.bf16.mxu1 %v6656_v25  ;;  %v6690_v52 = vld [vmem:[%s9558_s1 + $0x424] ss:$48 sps:$4 sm:$0xff]   ;;  %v6694_v56 = vld [vmem:[%s9558_s1 + $0x420] ss:$48 sps:$4 sm:$0xff]   ;;  %v6734_v24 = vld [vmem:[%s9558_s1 + $0x18c] ss:$48 sps:$4 sm:$0xff]  }
  0x24   : > { %v6692_v55 = vld [vmem:[%s9558_s1 + $0xa24] ss:$48 sps:$4 sm:$0xff]   ;;  %v6695_v57 = vld [vmem:[%s9558_s1 + $0xa20] ss:$48 sps:$4 sm:$0xff]   ;;  %v6737_v25 = vld [vmem:[%s9558_s1 + $0x78c] ss:$48 sps:$4 sm:$0xff]  }
  0x25   : > { %2681 = vmatpush1.bf16.msra.mxu0 %v6658_v26  ;;  %v6696_v58 = vld [vmem:[%s9558_s1 + $0x3c4] ss:$48 sps:$4 sm:$0xff]   ;;  %v6700_v60 = vld [vmem:[%s9558_s1 + $0x3c0] ss:$48 sps:$4 sm:$0xff]   ;;  %v6732_v26 = vld [vmem:[%s9558_s1 + $0x188] ss:$48 sps:$4 sm:$0xff]  }
  0x26   : > { %2724 = vmatpush1.bf16.msra.mxu1 %v6659_v27  ;;  %2682 = vmatprep.subr.bf16.mxu0 %v6660_v28  ;;  %v6698_v59 = vld [vmem:[%s9558_s1 + $0x9c4] ss:$48 sps:$4 sm:$0xff]   ;;  %v6701_v61 = vld [vmem:[%s9558_s1 + $0x9c0] ss:$48 sps:$4 sm:$0xff]   ;;  %v6735_v27 = vld [vmem:[%s9558_s1 + $0x788] ss:$48 sps:$4 sm:$0xff]  }
  0x27   : > { %2725 = vmatprep.subr.bf16.mxu1 %v6662_v29  ;;  %v6702_v62 = vld [vmem:[%s9558_s1 + $0x364] ss:$48 sps:$4 sm:$0xff]   ;;  %v6706_v0 = vld [vmem:[%s9558_s1 + $0x360] ss:$48 sps:$4 sm:$0xff]   ;;  %v6740_v28 = vld [vmem:[%s9558_s1 + $0x12c] ss:$48 sps:$4 sm:$0xff]  }
  0x28   : > { %v6704_v63 = vld [vmem:[%s9558_s1 + $0x964] ss:$48 sps:$4 sm:$0xff]   ;;  %v6707_v1 = vld [vmem:[%s9558_s1 + $0x960] ss:$48 sps:$4 sm:$0xff]   ;;  %v6743_v29 = vld [vmem:[%s9558_s1 + $0x72c] ss:$48 sps:$4 sm:$0xff]  }
  0x29   : > { %2683 = vmatpush1.bf16.msra.mxu0 %v6664_v30  ;;  %v6708_v2 = vld [vmem:[%s9558_s1 + $0x304] ss:$48 sps:$4 sm:$0xff]   ;;  %v6712_v4 = vld [vmem:[%s9558_s1 + $0x300] ss:$48 sps:$4 sm:$0xff]   ;;  %v6738_v30 = vld [vmem:[%s9558_s1 + $0x128] ss:$48 sps:$4 sm:$0xff]  }
  0x2a   : > { %2726 = vmatpush1.bf16.msra.mxu1 %v6665_v31  ;;  %2684 = vmatprep.subr.bf16.mxu0 %v6666_v32  ;;  %v6710_v3 = vld [vmem:[%s9558_s1 + $0x904] ss:$48 sps:$4 sm:$0xff]   ;;  %v6713_v5 = vld [vmem:[%s9558_s1 + $0x900] ss:$48 sps:$4 sm:$0xff]   ;;  %v6741_v31 = vld [vmem:[%s9558_s1 + $0x728] ss:$48 sps:$4 sm:$0xff]  }
  0x2b   : > { %2727 = vmatprep.subr.bf16.mxu1 %v6668_v33  ;;  %v288_v6 = vld [vmem:[%s7664_s10] sm:$0xff]  ;;  %v290_v8 = vld [vmem:[%s7664_s10 + $0x10] sm:$0xff]  ;;  %v6746_v32 = vld [vmem:[%s9558_s1 + $0xcc] ss:$48 sps:$4 sm:$0xff]  }
  0x2c   : > { %v292_v7 = vld [vmem:[%s7664_s10 + $0x20] sm:$0xff]  ;;  %v294_v9 = vld [vmem:[%s7664_s10 + $0x30] sm:$0xff]  ;;  %v6749_v33 = vld [vmem:[%s9558_s1 + $0x6cc] ss:$48 sps:$4 sm:$0xff]  }
  0x2d   : > { %2685 = vmatpush2.bf16.msra.mxu0 %v6670_v34  ;;  %v7746_v12 = vpack.c.bf16 %v292_v7, %v288_v6  ;;  %v7748_v13 = vpack.c.bf16 %v294_v9, %v290_v8  ;;  %v6744_v34 = vld [vmem:[%s9558_s1 + $0xc8] ss:$48 sps:$4 sm:$0xff]   ;;  %v6800_v6 = vld [vmem:[%s9558_s1 + $0x36c] ss:$48 sps:$4 sm:$0xff]  }
  0x2e   : > { %2728 = vmatpush2.bf16.msra.mxu1 %v6671_v35  ;;  %2686 = vmatprep.subr.bf16.mxu0 %v6672_v36  ;;  %v6747_v35 = vld [vmem:[%s9558_s1 + $0x6c8] ss:$48 sps:$4 sm:$0xff]   ;;  %v6752_v36 = vld [vmem:[%s9558_s1 + $0x6c] ss:$48 sps:$4 sm:$0xff]  }
  0x2f   : > { %2729 = vmatprep.subr.bf16.mxu1 %v6674_v37  ;;  %v6755_v37 = vld [vmem:[%s9558_s1 + $0x66c] ss:$48 sps:$4 sm:$0xff]   ;;  %v6798_v8 = vld [vmem:[%s9558_s1 + $0x368] ss:$48 sps:$4 sm:$0xff]  }
  0x30   : > { %v6803_v7 = vld [vmem:[%s9558_s1 + $0x96c] ss:$48 sps:$4 sm:$0xff]   ;;  %v6801_v9 = vld [vmem:[%s9558_s1 + $0x968] ss:$48 sps:$4 sm:$0xff]  }
  0x31   : > { %2687 = vmatpush2.bf16.msra.mxu0 %v6676_v38  ;;  %v6750_v38 = vld [vmem:[%s9558_s1 + $0x68] ss:$48 sps:$4 sm:$0xff]  }
  0x32   : > { %2730 = vmatpush2.bf16.msra.mxu1 %v6677_v39  ;;  %2688 = vmatprep.subr.bf16.mxu0 %v6678_v40  ;;  %v6753_v39 = vld [vmem:[%s9558_s1 + $0x668] ss:$48 sps:$4 sm:$0xff]   ;;  %v6758_v40 = vld [vmem:[%s9558_s1 + $0xc] ss:$48 sps:$4 sm:$0xff]  }
  0x33   : > { %2731 = vmatprep.subr.bf16.mxu1 %v6680_v41  ;;  %v6761_v41 = vld [vmem:[%s9558_s1 + $0x60c] ss:$48 sps:$4 sm:$0xff]  }
  0x35   : > { %2689 = vmatpush2.bf16.msra.mxu0 %v6682_v42  ;;  %v6756_v42 = vld [vmem:[%s9558_s1 + $0x8] ss:$48 sps:$4 sm:$0xff]  }
  0x36   : > { %2732 = vmatpush2.bf16.msra.mxu1 %v6683_v43  ;;  %2690 = vmatprep.subr.bf16.mxu0 %v6684_v44  ;;  %v6759_v43 = vld [vmem:[%s9558_s1 + $0x608] ss:$48 sps:$4 sm:$0xff]   ;;  %v6764_v44 = vld [vmem:[%s9558_s1 + $0x5ac] ss:$48 sps:$4 sm:$0xff]  }
  0x37   : > { %2733 = vmatprep.subr.bf16.mxu1 %v6686_v45  ;;  %v6767_v45 = vld [vmem:[%s9558_s1 + $0xbac] ss:$48 sps:$4 sm:$0xff]  }
  0x39   : > { %2691 = vmatpush2.bf16.msra.mxu0 %v6688_v50  ;;  %v6768_v50 = vld [vmem:[%s9558_s1 + $0x548] ss:$48 sps:$4 sm:$0xff]  }
  0x3a   : > { %2734 = vmatpush2.bf16.msra.mxu1 %v6689_v51  ;;  %2692 = vmatprep.subr.bf16.mxu0 %v6690_v52  ;;  %v6771_v51 = vld [vmem:[%s9558_s1 + $0xb48] ss:$48 sps:$4 sm:$0xff]   ;;  %v6776_v52 = vld [vmem:[%s9558_s1 + $0x4ec] ss:$48 sps:$4 sm:$0xff]  }
  0x3b   : > { %2735 = vmatprep.subr.bf16.mxu1 %v6692_v55  ;;  %v6779_v55 = vld [vmem:[%s9558_s1 + $0xaec] ss:$48 sps:$4 sm:$0xff]  }
  0x3d   : > { %2693 = vmatpush2.bf16.msra.mxu0 %v6694_v56  ;;  %v6774_v56 = vld [vmem:[%s9558_s1 + $0x4e8] ss:$48 sps:$4 sm:$0xff]  }
  0x3e   : > { %2736 = vmatpush2.bf16.msra.mxu1 %v6695_v57  ;;  %2694 = vmatprep.subr.bf16.mxu0 %v6696_v58  ;;  %v6777_v57 = vld [vmem:[%s9558_s1 + $0xae8] ss:$48 sps:$4 sm:$0xff]   ;;  %v6782_v58 = vld [vmem:[%s9558_s1 + $0x48c] ss:$48 sps:$4 sm:$0xff]  }
  0x3f   : > { %2737 = vmatprep.subr.bf16.mxu1 %v6698_v59  ;;  %v6785_v59 = vld [vmem:[%s9558_s1 + $0xa8c] ss:$48 sps:$4 sm:$0xff]  }
  0x41   : > { %2695 = vmatpush2.bf16.msra.mxu0 %v6700_v60  ;;  %v6780_v60 = vld [vmem:[%s9558_s1 + $0x488] ss:$48 sps:$4 sm:$0xff]  }
  0x42   : > { %2738 = vmatpush2.bf16.msra.mxu1 %v6701_v61  ;;  %2696 = vmatprep.subr.bf16.mxu0 %v6702_v62  ;;  %v6783_v61 = vld [vmem:[%s9558_s1 + $0xa88] ss:$48 sps:$4 sm:$0xff]   ;;  %v6788_v62 = vld [vmem:[%s9558_s1 + $0x42c] ss:$48 sps:$4 sm:$0xff]  }
  0x43   : > { %2739 = vmatprep.subr.bf16.mxu1 %v6704_v63  ;;  %v6791_v63 = vld [vmem:[%s9558_s1 + $0xa2c] ss:$48 sps:$4 sm:$0xff]  }
  0x45   : > { %2697 = vmatpush2.bf16.msra.mxu0 %v6706_v0  ;;  %v6786_v0 = vld [vmem:[%s9558_s1 + $0x428] ss:$48 sps:$4 sm:$0xff]  }
  0x46   : > { %2740 = vmatpush2.bf16.msra.mxu1 %v6707_v1  ;;  %2698 = vmatprep.subr.bf16.mxu0 %v6708_v2  ;;  %v6789_v1 = vld [vmem:[%s9558_s1 + $0xa28] ss:$48 sps:$4 sm:$0xff]   ;;  %v6794_v2 = vld [vmem:[%s9558_s1 + $0x3cc] ss:$48 sps:$4 sm:$0xff]  }
  0x47   : > { %2741 = vmatprep.subr.bf16.mxu1 %v6710_v3  ;;  %v6797_v3 = vld [vmem:[%s9558_s1 + $0x9cc] ss:$48 sps:$4 sm:$0xff]  }
  0x49   : > { %2699 = vmatpush2.bf16.msra.mxu0 %v6712_v4  ;;  %v6792_v4 = vld [vmem:[%s9558_s1 + $0x3c8] ss:$48 sps:$4 sm:$0xff]  }
  0x4a   : > { %2742 = vmatpush2.bf16.msra.mxu1 %v6713_v5  ;;  %2754 = vmatprep.subr.bf16.mxu0 %v6716_v10  ;;  %v6795_v5 = vld [vmem:[%s9558_s1 + $0x9c8] ss:$48 sps:$4 sm:$0xff]   ;;  %v6806_v10 = vld [vmem:[%s9558_s1 + $0x30c] ss:$48 sps:$4 sm:$0xff]  }
  0x4b   : > { %2797 = vmatprep.subr.bf16.mxu1 %v6719_v11  ;;  %v6809_v11 = vld [vmem:[%s9558_s1 + $0x90c] ss:$48 sps:$4 sm:$0xff]  }
  0x4c   : > { %2701 = vmatmul.mubr.bf16.vlgmr.msra.gmra.mxu0 %v7746_v12 }
  0x4d   : > { %2744 = vmatmul.mubr.bf16.vlgmr.msra.gmra.mxu1 %v7748_v13  ;;  %2755 = vmatpush1.bf16.msra.mxu0 %v6714_v14  ;;  %v6804_v14 = vld [vmem:[%s9558_s1 + $0x308] ss:$48 sps:$4 sm:$0xff]  }
  0x4e   : > { %2798 = vmatpush1.bf16.msra.mxu1 %v6717_v15  ;;  %2756 = vmatprep.subr.bf16.mxu0 %v6722_v16  ;;  %v6807_v15 = vld [vmem:[%s9558_s1 + $0x908] ss:$48 sps:$4 sm:$0xff]   ;;  %v6812_v16 = vld [vmem:[%s9558_s1 + $0x2b4] ss:$48 sps:$4 sm:$0xff]  }
  0x4f   : > { %2799 = vmatprep.subr.bf16.mxu1 %v6725_v17  ;;  %2786 = vmatprep.mubr.bf16.mxu0 %v7685_v53  ;;  %v6815_v17 = vld [vmem:[%s9558_s1 + $0x8b4] ss:$48 sps:$4 sm:$0xff]  }
  0x50   : > { %2829 = vmatprep.mubr.bf16.mxu1 %v7687_v54 }
  0x51   : > { %2757 = vmatpush1.bf16.msra.mxu0 %v6720_v18  ;;  %v6810_v18 = vld [vmem:[%s9558_s1 + $0x2b0] ss:$48 sps:$4 sm:$0xff]  }
  0x52   : > { %2800 = vmatpush1.bf16.msra.mxu1 %v6723_v19  ;;  %2758 = vmatprep.subr.bf16.mxu0 %v6728_v20  ;;  %v6813_v19 = vld [vmem:[%s9558_s1 + $0x8b0] ss:$48 sps:$4 sm:$0xff]   ;;  %v6818_v20 = vld [vmem:[%s9558_s1 + $0x254] ss:$48 sps:$4 sm:$0xff]  }
  0x53   : > { %2801 = vmatprep.subr.bf16.mxu1 %v6731_v21  ;;  %v6821_v21 = vld [vmem:[%s9558_s1 + $0x854] ss:$48 sps:$4 sm:$0xff]  }
  0x55   : > { %2759 = vmatpush1.bf16.msra.mxu0 %v6726_v22  ;;  %v6816_v22 = vld [vmem:[%s9558_s1 + $0x250] ss:$48 sps:$4 sm:$0xff]  }
  0x56   : > { %2802 = vmatpush1.bf16.msra.mxu1 %v6729_v23  ;;  %2760 = vmatprep.subr.bf16.mxu0 %v6734_v24  ;;  %v6819_v23 = vld [vmem:[%s9558_s1 + $0x850] ss:$48 sps:$4 sm:$0xff]   ;;  %v6824_v24 = vld [vmem:[%s9558_s1 + $0x1f4] ss:$48 sps:$4 sm:$0xff]  }
  0x57   : > { %2803 = vmatprep.subr.bf16.mxu1 %v6737_v25  ;;  %v6827_v25 = vld [vmem:[%s9558_s1 + $0x7f4] ss:$48 sps:$4 sm:$0xff]  }
  0x59   : > { %2761 = vmatpush1.bf16.msra.mxu0 %v6732_v26  ;;  %v6822_v26 = vld [vmem:[%s9558_s1 + $0x1f0] ss:$48 sps:$4 sm:$0xff]  }
  0x5a   : > { %2804 = vmatpush1.bf16.msra.mxu1 %v6735_v27  ;;  %2762 = vmatprep.subr.bf16.mxu0 %v6740_v28  ;;  %v6825_v27 = vld [vmem:[%s9558_s1 + $0x7f0] ss:$48 sps:$4 sm:$0xff]   ;;  %v6830_v28 = vld [vmem:[%s9558_s1 + $0x194] ss:$48 sps:$4 sm:$0xff]  }
  0x5b   : > { %2805 = vmatprep.subr.bf16.mxu1 %v6743_v29  ;;  %v6833_v29 = vld [vmem:[%s9558_s1 + $0x794] ss:$48 sps:$4 sm:$0xff]  }
  0x5d   : > { %2763 = vmatpush1.bf16.msra.mxu0 %v6738_v30  ;;  %v6828_v30 = vld [vmem:[%s9558_s1 + $0x190] ss:$48 sps:$4 sm:$0xff]  }
  0x5e   : > { %2806 = vmatpush1.bf16.msra.mxu1 %v6741_v31  ;;  %2764 = vmatprep.subr.bf16.mxu0 %v6746_v32  ;;  %v6831_v31 = vld [vmem:[%s9558_s1 + $0x790] ss:$48 sps:$4 sm:$0xff]   ;;  %v6836_v32 = vld [vmem:[%s9558_s1 + $0x134] ss:$48 sps:$4 sm:$0xff]  }
  0x5f   : > { %2807 = vmatprep.subr.bf16.mxu1 %v6749_v33  ;;  %v6839_v33 = vld [vmem:[%s9558_s1 + $0x734] ss:$48 sps:$4 sm:$0xff]  }
  0x61   : > { %2765 = vmatpush1.bf16.msra.mxu0 %v6744_v34  ;;  %v6834_v34 = vld [vmem:[%s9558_s1 + $0x130] ss:$48 sps:$4 sm:$0xff]  }
  0x62   : > { %2808 = vmatpush1.bf16.msra.mxu1 %v6747_v35  ;;  %2766 = vmatprep.subr.bf16.mxu0 %v6752_v36  ;;  %v6837_v35 = vld [vmem:[%s9558_s1 + $0x730] ss:$48 sps:$4 sm:$0xff]   ;;  %v6842_v36 = vld [vmem:[%s9558_s1 + $0xd4] ss:$48 sps:$4 sm:$0xff]  }
  0x63   : > { %2809 = vmatprep.subr.bf16.mxu1 %v6755_v37  ;;  %v6845_v37 = vld [vmem:[%s9558_s1 + $0x6d4] ss:$48 sps:$4 sm:$0xff]  }
  0x65   : > { %2767 = vmatpush1.bf16.msra.mxu0 %v6750_v38  ;;  %v6840_v38 = vld [vmem:[%s9558_s1 + $0xd0] ss:$48 sps:$4 sm:$0xff]  }
  0x66   : > { %2810 = vmatpush1.bf16.msra.mxu1 %v6753_v39  ;;  %2768 = vmatprep.subr.bf16.mxu0 %v6758_v40  ;;  %v6843_v39 = vld [vmem:[%s9558_s1 + $0x6d0] ss:$48 sps:$4 sm:$0xff]   ;;  %v6848_v40 = vld [vmem:[%s9558_s1 + $0x74] ss:$48 sps:$4 sm:$0xff]  }
  0x67   : > { %2811 = vmatprep.subr.bf16.mxu1 %v6761_v41  ;;  %v6851_v41 = vld [vmem:[%s9558_s1 + $0x674] ss:$48 sps:$4 sm:$0xff]  }
  0x69   : > { %2769 = vmatpush1.bf16.msra.mxu0 %v6756_v42  ;;  %v6846_v42 = vld [vmem:[%s9558_s1 + $0x70] ss:$48 sps:$4 sm:$0xff]  }
  0x6a   : > { %2812 = vmatpush1.bf16.msra.mxu1 %v6759_v43  ;;  %2770 = vmatprep.subr.bf16.mxu0 %v6764_v44  ;;  %v6849_v43 = vld [vmem:[%s9558_s1 + $0x670] ss:$48 sps:$4 sm:$0xff]   ;;  %v6854_v44 = vld [vmem:[%s9558_s1 + $0x14] ss:$48 sps:$4 sm:$0xff]  }
  0x6b   : > { %2813 = vmatprep.subr.bf16.mxu1 %v6767_v45  ;;  %v6857_v45 = vld [vmem:[%s9558_s1 + $0x614] ss:$48 sps:$4 sm:$0xff]  }
  0x6d   : > { %2771 = vmatpush2.bf16.msra.mxu0 %v6762_v46  ;;  %v6852_v46 = vld [vmem:[%s9558_s1 + $0x10] ss:$48 sps:$4 sm:$0xff]  }
  0x6e   : > { %2814 = vmatpush2.bf16.msra.mxu1 %v6765_v47  ;;  %2772 = vmatprep.subr.bf16.mxu0 %v6770_v48  ;;  %v6855_v47 = vld [vmem:[%s9558_s1 + $0x610] ss:$48 sps:$4 sm:$0xff]   ;;  %v6860_v48 = vld [vmem:[%s9558_s1 + $0x5b4] ss:$48 sps:$4 sm:$0xff]  }
  0x6f   : > { %2815 = vmatprep.subr.bf16.mxu1 %v6773_v49  ;;  %v6863_v49 = vld [vmem:[%s9558_s1 + $0xbb4] ss:$48 sps:$4 sm:$0xff]  }
  0x71   : > { %2773 = vmatpush2.bf16.msra.mxu0 %v6768_v50  ;;  %v6858_v50 = vld [vmem:[%s9558_s1 + $0x5b0] ss:$48 sps:$4 sm:$0xff]  }
  0x72   : > { %2816 = vmatpush2.bf16.msra.mxu1 %v6771_v51  ;;  %2774 = vmatprep.subr.bf16.mxu0 %v6776_v52  ;;  %v6861_v51 = vld [vmem:[%s9558_s1 + $0xbb0] ss:$48 sps:$4 sm:$0xff]   ;;  %v6866_v52 = vld [vmem:[%s9558_s1 + $0x554] ss:$48 sps:$4 sm:$0xff]  }
  0x73   : > { %2817 = vmatprep.subr.bf16.mxu1 %v6779_v55  ;;  %v6869_v55 = vld [vmem:[%s9558_s1 + $0xb54] ss:$48 sps:$4 sm:$0xff]  }
  0x75   : > { %2775 = vmatpush2.bf16.msra.mxu0 %v6774_v56  ;;  %v6864_v56 = vld [vmem:[%s9558_s1 + $0x550] ss:$48 sps:$4 sm:$0xff]  }
  0x76   : > { %2818 = vmatpush2.bf16.msra.mxu1 %v6777_v57  ;;  %2776 = vmatprep.subr.bf16.mxu0 %v6782_v58  ;;  %v6867_v57 = vld [vmem:[%s9558_s1 + $0xb50] ss:$48 sps:$4 sm:$0xff]   ;;  %v6872_v58 = vld [vmem:[%s9558_s1 + $0x4f4] ss:$48 sps:$4 sm:$0xff]  }
  0x77   : > { %2819 = vmatprep.subr.bf16.mxu1 %v6785_v59  ;;  %v6875_v59 = vld [vmem:[%s9558_s1 + $0xaf4] ss:$48 sps:$4 sm:$0xff]  }
  0x79   : > { %2777 = vmatpush2.bf16.msra.mxu0 %v6780_v60  ;;  %v6870_v60 = vld [vmem:[%s9558_s1 + $0x4f0] ss:$48 sps:$4 sm:$0xff]  }
  0x7a   : > { %2820 = vmatpush2.bf16.msra.mxu1 %v6783_v61  ;;  %2778 = vmatprep.subr.bf16.mxu0 %v6788_v62  ;;  %v6873_v61 = vld [vmem:[%s9558_s1 + $0xaf0] ss:$48 sps:$4 sm:$0xff]   ;;  %v6878_v62 = vld [vmem:[%s9558_s1 + $0x494] ss:$48 sps:$4 sm:$0xff]  }
  0x7b   : > { %2821 = vmatprep.subr.bf16.mxu1 %v6791_v63  ;;  %v6881_v63 = vld [vmem:[%s9558_s1 + $0xa94] ss:$48 sps:$4 sm:$0xff]  }
  0x7d   : > { %2779 = vmatpush2.bf16.msra.mxu0 %v6786_v0  ;;  %v6876_v0 = vld [vmem:[%s9558_s1 + $0x490] ss:$48 sps:$4 sm:$0xff]  }
  0x7e   : > { %2822 = vmatpush2.bf16.msra.mxu1 %v6789_v1  ;;  %2780 = vmatprep.subr.bf16.mxu0 %v6794_v2  ;;  %v6879_v1 = vld [vmem:[%s9558_s1 + $0xa90] ss:$48 sps:$4 sm:$0xff]   ;;  %v6884_v2 = vld [vmem:[%s9558_s1 + $0x434] ss:$48 sps:$4 sm:$0xff]  }
  0x7f   : > { %2823 = vmatprep.subr.bf16.mxu1 %v6797_v3  ;;  %v6887_v3 = vld [vmem:[%s9558_s1 + $0xa34] ss:$48 sps:$4 sm:$0xff]  }
  0x81   : > { %2781 = vmatpush2.bf16.msra.mxu0 %v6792_v4  ;;  %v6882_v4 = vld [vmem:[%s9558_s1 + $0x430] ss:$48 sps:$4 sm:$0xff]  }
  0x82   : > { %2824 = vmatpush2.bf16.msra.mxu1 %v6795_v5  ;;  %2782 = vmatprep.subr.bf16.mxu0 %v6800_v6  ;;  %v6885_v5 = vld [vmem:[%s9558_s1 + $0xa30] ss:$48 sps:$4 sm:$0xff]   ;;  %v6890_v6 = vld [vmem:[%s9558_s1 + $0x3d4] ss:$48 sps:$4 sm:$0xff]  }
  0x83   : > { %2825 = vmatprep.subr.bf16.mxu1 %v6803_v7  ;;  %v6893_v7 = vld [vmem:[%s9558_s1 + $0x9d4] ss:$48 sps:$4 sm:$0xff]  }
  0x85   : > { %2783 = vmatpush2.bf16.msra.mxu0 %v6798_v8  ;;  %v6888_v8 = vld [vmem:[%s9558_s1 + $0x3d0] ss:$48 sps:$4 sm:$0xff]  }
  0x86   : > { %2826 = vmatpush2.bf16.msra.mxu1 %v6801_v9  ;;  %2784 = vmatprep.subr.bf16.mxu0 %v6806_v10  ;;  %v6891_v9 = vld [vmem:[%s9558_s1 + $0x9d0] ss:$48 sps:$4 sm:$0xff]   ;;  %v6896_v10 = vld [vmem:[%s9558_s1 + $0x374] ss:$48 sps:$4 sm:$0xff]  }
  0x87   : > { %2827 = vmatprep.subr.bf16.mxu1 %v6809_v11  ;;  %v6899_v11 = vld [vmem:[%s9558_s1 + $0x974] ss:$48 sps:$4 sm:$0xff]  }
  0x89   : > { %2785 = vmatpush2.bf16.msra.mxu0 %v6804_v14  ;;  %v6894_v14 = vld [vmem:[%s9558_s1 + $0x370] ss:$48 sps:$4 sm:$0xff]  }
  0x8a   : > { %2828 = vmatpush2.bf16.msra.mxu1 %v6807_v15  ;;  %2840 = vmatprep.subr.bf16.mxu0 %v6812_v16  ;;  %v6897_v15 = vld [vmem:[%s9558_s1 + $0x970] ss:$48 sps:$4 sm:$0xff]   ;;  %v6902_v16 = vld [vmem:[%s9558_s1 + $0x314] ss:$48 sps:$4 sm:$0xff]  }
  0x8b   : > { %2883 = vmatprep.subr.bf16.mxu1 %v6815_v17  ;;  %v6905_v17 = vld [vmem:[%s9558_s1 + $0x914] ss:$48 sps:$4 sm:$0xff]  }
  0x8c   : > { %2787 = vmatmul.mubr.bf16.vlgmr.msra.gmra.mxu0 %v7746_v12 }
  0x8d   : > { %2830 = vmatmul.mubr.bf16.vlgmr.msra.gmra.mxu1 %v7748_v13  ;;  %2841 = vmatpush1.bf16.msra.mxu0 %v6810_v18  ;;  %v6900_v18 = vld [vmem:[%s9558_s1 + $0x310] ss:$48 sps:$4 sm:$0xff]  }
  0x8e   : > { %2884 = vmatpush1.bf16.msra.mxu1 %v6813_v19  ;;  %2842 = vmatprep.subr.bf16.mxu0 %v6818_v20  ;;  %v6903_v19 = vld [vmem:[%s9558_s1 + $0x910] ss:$48 sps:$4 sm:$0xff]   ;;  %v6908_v20 = vld [vmem:[%s9558_s1 + $0x2bc] ss:$48 sps:$4 sm:$0xff]  }
  0x8f   : > { %2885 = vmatprep.subr.bf16.mxu1 %v6821_v21  ;;  %2872 = vmatprep.mubr.bf16.mxu0 %v7685_v53  ;;  %v6911_v21 = vld [vmem:[%s9558_s1 + $0x8bc] ss:$48 sps:$4 sm:$0xff]  }
  0x90   : > { %2915 = vmatprep.mubr.bf16.mxu1 %v7687_v54 }
  0x91   : > { %2843 = vmatpush1.bf16.msra.mxu0 %v6816_v22  ;;  %v6906_v22 = vld [vmem:[%s9558_s1 + $0x2b8] ss:$48 sps:$4 sm:$0xff]  }
  0x92   : > { %2886 = vmatpush1.bf16.msra.mxu1 %v6819_v23  ;;  %2844 = vmatprep.subr.bf16.mxu0 %v6824_v24  ;;  %v6909_v23 = vld [vmem:[%s9558_s1 + $0x8b8] ss:$48 sps:$4 sm:$0xff]   ;;  %v6914_v24 = vld [vmem:[%s9558_s1 + $0x25c] ss:$48 sps:$4 sm:$0xff]  }
  0x93   : > { %2887 = vmatprep.subr.bf16.mxu1 %v6827_v25  ;;  %v6917_v25 = vld [vmem:[%s9558_s1 + $0x85c] ss:$48 sps:$4 sm:$0xff]  }
  0x95   : > { %2845 = vmatpush1.bf16.msra.mxu0 %v6822_v26  ;;  %v6912_v26 = vld [vmem:[%s9558_s1 + $0x258] ss:$48 sps:$4 sm:$0xff]  }
  0x96   : > { %2888 = vmatpush1.bf16.msra.mxu1 %v6825_v27  ;;  %2846 = vmatprep.subr.bf16.mxu0 %v6830_v28  ;;  %v6915_v27 = vld [vmem:[%s9558_s1 + $0x858] ss:$48 sps:$4 sm:$0xff]   ;;  %v6920_v28 = vld [vmem:[%s9558_s1 + $0x1fc] ss:$48 sps:$4 sm:$0xff]  }
  0x97   : > { %2889 = vmatprep.subr.bf16.mxu1 %v6833_v29  ;;  %v6923_v29 = vld [vmem:[%s9558_s1 + $0x7fc] ss:$48 sps:$4 sm:$0xff]  }
  0x99   : > { %2847 = vmatpush1.bf16.msra.mxu0 %v6828_v30  ;;  %v6918_v30 = vld [vmem:[%s9558_s1 + $0x1f8] ss:$48 sps:$4 sm:$0xff]  }
  0x9a   : > { %2890 = vmatpush1.bf16.msra.mxu1 %v6831_v31  ;;  %2848 = vmatprep.subr.bf16.mxu0 %v6836_v32  ;;  %v6921_v31 = vld [vmem:[%s9558_s1 + $0x7f8] ss:$48 sps:$4 sm:$0xff]   ;;  %v6926_v32 = vld [vmem:[%s9558_s1 + $0x19c] ss:$48 sps:$4 sm:$0xff]  }
  0x9b   : > { %2891 = vmatprep.subr.bf16.mxu1 %v6839_v33  ;;  %v6929_v33 = vld [vmem:[%s9558_s1 + $0x79c] ss:$48 sps:$4 sm:$0xff]  }
  0x9d   : > { %2849 = vmatpush1.bf16.msra.mxu0 %v6834_v34  ;;  %v6924_v34 = vld [vmem:[%s9558_s1 + $0x198] ss:$48 sps:$4 sm:$0xff]  }
  0x9e   : > { %2892 = vmatpush1.bf16.msra.mxu1 %v6837_v35  ;;  %2850 = vmatprep.subr.bf16.mxu0 %v6842_v36  ;;  %v6927_v35 = vld [vmem:[%s9558_s1 + $0x798] ss:$48 sps:$4 sm:$0xff]   ;;  %v6932_v36 = vld [vmem:[%s9558_s1 + $0x13c] ss:$48 sps:$4 sm:$0xff]  }
  0x9f   : > { %2893 = vmatprep.subr.bf16.mxu1 %v6845_v37  ;;  %v6935_v37 = vld [vmem:[%s9558_s1 + $0x73c] ss:$48 sps:$4 sm:$0xff]  }
  0xa1   : > { %2851 = vmatpush1.bf16.msra.mxu0 %v6840_v38  ;;  %v6930_v38 = vld [vmem:[%s9558_s1 + $0x138] ss:$48 sps:$4 sm:$0xff]  }
  0xa2   : > { %2894 = vmatpush1.bf16.msra.mxu1 %v6843_v39  ;;  %2852 = vmatprep.subr.bf16.mxu0 %v6848_v40  ;;  %v6933_v39 = vld [vmem:[%s9558_s1 + $0x738] ss:$48 sps:$4 sm:$0xff]   ;;  %v6938_v40 = vld [vmem:[%s9558_s1 + $0xdc] ss:$48 sps:$4 sm:$0xff]  }
  0xa3   : > { %2895 = vmatprep.subr.bf16.mxu1 %v6851_v41  ;;  %v6941_v41 = vld [vmem:[%s9558_s1 + $0x6dc] ss:$48 sps:$4 sm:$0xff]  }
  0xa5   : > { %2853 = vmatpush1.bf16.msra.mxu0 %v6846_v42  ;;  %v6936_v42 = vld [vmem:[%s9558_s1 + $0xd8] ss:$48 sps:$4 sm:$0xff]  }
  0xa6   : > { %2896 = vmatpush1.bf16.msra.mxu1 %v6849_v43  ;;  %2854 = vmatprep.subr.bf16.mxu0 %v6854_v44  ;;  %v6939_v43 = vld [vmem:[%s9558_s1 + $0x6d8] ss:$48 sps:$4 sm:$0xff]   ;;  %v6944_v44 = vld [vmem:[%s9558_s1 + $0x7c] ss:$48 sps:$4 sm:$0xff]  }
  0xa7   : > { %2897 = vmatprep.subr.bf16.mxu1 %v6857_v45  ;;  %v6947_v45 = vld [vmem:[%s9558_s1 + $0x67c] ss:$48 sps:$4 sm:$0xff]  }
  0xa9   : > { %2855 = vmatpush1.bf16.msra.mxu0 %v6852_v46  ;;  %v6942_v46 = vld [vmem:[%s9558_s1 + $0x78] ss:$48 sps:$4 sm:$0xff]  }
  0xaa   : > { %2898 = vmatpush1.bf16.msra.mxu1 %v6855_v47  ;;  %2856 = vmatprep.subr.bf16.mxu0 %v6860_v48  ;;  %v6945_v47 = vld [vmem:[%s9558_s1 + $0x678] ss:$48 sps:$4 sm:$0xff]   ;;  %v6950_v48 = vld [vmem:[%s9558_s1 + $0x1c] ss:$48 sps:$4 sm:$0xff]  }
  0xab   : > { %2899 = vmatprep.subr.bf16.mxu1 %v6863_v49  ;;  %v6953_v49 = vld [vmem:[%s9558_s1 + $0x61c] ss:$48 sps:$4 sm:$0xff]  }
  0xad   : > { %2857 = vmatpush2.bf16.msra.mxu0 %v6858_v50  ;;  %v6948_v50 = vld [vmem:[%s9558_s1 + $0x18] ss:$48 sps:$4 sm:$0xff]  }
  0xae   : > { %2900 = vmatpush2.bf16.msra.mxu1 %v6861_v51  ;;  %2858 = vmatprep.subr.bf16.mxu0 %v6866_v52  ;;  %v6951_v51 = vld [vmem:[%s9558_s1 + $0x618] ss:$48 sps:$4 sm:$0xff]   ;;  %v6956_v52 = vld [vmem:[%s9558_s1 + $0x5bc] ss:$48 sps:$4 sm:$0xff]  }
  0xaf   : > { %2901 = vmatprep.subr.bf16.mxu1 %v6869_v55  ;;  %v6959_v55 = vld [vmem:[%s9558_s1 + $0xbbc] ss:$48 sps:$4 sm:$0xff]  }
  0xb1   : > { %2859 = vmatpush2.bf16.msra.mxu0 %v6864_v56  ;;  %v6954_v56 = vld [vmem:[%s9558_s1 + $0x5b8] ss:$48 sps:$4 sm:$0xff]  }
  0xb2   : > { %2902 = vmatpush2.bf16.msra.mxu1 %v6867_v57  ;;  %2860 = vmatprep.subr.bf16.mxu0 %v6872_v58  ;;  %v6957_v57 = vld [vmem:[%s9558_s1 + $0xbb8] ss:$48 sps:$4 sm:$0xff]   ;;  %v6962_v58 = vld [vmem:[%s9558_s1 + $0x55c] ss:$48 sps:$4 sm:$0xff]  }
  0xb3   : > { %2903 = vmatprep.subr.bf16.mxu1 %v6875_v59  ;;  %v6965_v59 = vld [vmem:[%s9558_s1 + $0xb5c] ss:$48 sps:$4 sm:$0xff]  }
  0xb5   : > { %2861 = vmatpush2.bf16.msra.mxu0 %v6870_v60  ;;  %v6960_v60 = vld [vmem:[%s9558_s1 + $0x558] ss:$48 sps:$4 sm:$0xff]  }
  0xb6   : > { %2904 = vmatpush2.bf16.msra.mxu1 %v6873_v61  ;;  %2862 = vmatprep.subr.bf16.mxu0 %v6878_v62  ;;  %v6963_v61 = vld [vmem:[%s9558_s1 + $0xb58] ss:$48 sps:$4 sm:$0xff]   ;;  %v6968_v62 = vld [vmem:[%s9558_s1 + $0x4fc] ss:$48 sps:$4 sm:$0xff]  }
  0xb7   : > { %2905 = vmatprep.subr.bf16.mxu1 %v6881_v63  ;;  %v6971_v63 = vld [vmem:[%s9558_s1 + $0xafc] ss:$48 sps:$4 sm:$0xff]  }
  0xb9   : > { %2863 = vmatpush2.bf16.msra.mxu0 %v6876_v0  ;;  %v6966_v0 = vld [vmem:[%s9558_s1 + $0x4f8] ss:$48 sps:$4 sm:$0xff]  }
  0xba   : > { %2906 = vmatpush2.bf16.msra.mxu1 %v6879_v1  ;;  %2864 = vmatprep.subr.bf16.mxu0 %v6884_v2  ;;  %v6969_v1 = vld [vmem:[%s9558_s1 + $0xaf8] ss:$48 sps:$4 sm:$0xff]   ;;  %v6974_v2 = vld [vmem:[%s9558_s1 + $0x49c] ss:$48 sps:$4 sm:$0xff]  }
  0xbb   : > { %2907 = vmatprep.subr.bf16.mxu1 %v6887_v3  ;;  %v6977_v3 = vld [vmem:[%s9558_s1 + $0xa9c] ss:$48 sps:$4 sm:$0xff]  }
  0xbd   : > { %2865 = vmatpush2.bf16.msra.mxu0 %v6882_v4  ;;  %v6972_v4 = vld [vmem:[%s9558_s1 + $0x498] ss:$48 sps:$4 sm:$0xff]  }
  0xbe   : > { %2908 = vmatpush2.bf16.msra.mxu1 %v6885_v5  ;;  %2866 = vmatprep.subr.bf16.mxu0 %v6890_v6  ;;  %v6975_v5 = vld [vmem:[%s9558_s1 + $0xa98] ss:$48 sps:$4 sm:$0xff]   ;;  %v6980_v6 = vld [vmem:[%s9558_s1 + $0x43c] ss:$48 sps:$4 sm:$0xff]  }
  0xbf   : > { %2909 = vmatprep.subr.bf16.mxu1 %v6893_v7  ;;  %v6983_v7 = vld [vmem:[%s9558_s1 + $0xa3c] ss:$48 sps:$4 sm:$0xff]  }
  0xc1   : > { %2867 = vmatpush2.bf16.msra.mxu0 %v6888_v8  ;;  %v6978_v8 = vld [vmem:[%s9558_s1 + $0x438] ss:$48 sps:$4 sm:$0xff]  }
  0xc2   : > { %2910 = vmatpush2.bf16.msra.mxu1 %v6891_v9  ;;  %2868 = vmatprep.subr.bf16.mxu0 %v6896_v10  ;;  %v6981_v9 = vld [vmem:[%s9558_s1 + $0xa38] ss:$48 sps:$4 sm:$0xff]   ;;  %v6986_v10 = vld [vmem:[%s9558_s1 + $0x3dc] ss:$48 sps:$4 sm:$0xff]  }
  0xc3   : > { %2911 = vmatprep.subr.bf16.mxu1 %v6899_v11  ;;  %v6989_v11 = vld [vmem:[%s9558_s1 + $0x9dc] ss:$48 sps:$4 sm:$0xff]  }
  0xc5   : > { %2869 = vmatpush2.bf16.msra.mxu0 %v6894_v14  ;;  %v6984_v14 = vld [vmem:[%s9558_s1 + $0x3d8] ss:$48 sps:$4 sm:$0xff]  }
  0xc6   : > { %2912 = vmatpush2.bf16.msra.mxu1 %v6897_v15  ;;  %2870 = vmatprep.subr.bf16.mxu0 %v6902_v16  ;;  %v6987_v15 = vld [vmem:[%s9558_s1 + $0x9d8] ss:$48 sps:$4 sm:$0xff]   ;;  %v6992_v16 = vld [vmem:[%s9558_s1 + $0x37c] ss:$48 sps:$4 sm:$0xff]  }
  0xc7   : > { %2913 = vmatprep.subr.bf16.mxu1 %v6905_v17  ;;  %v6995_v17 = vld [vmem:[%s9558_s1 + $0x97c] ss:$48 sps:$4 sm:$0xff]  }
  0xc9   : > { %2871 = vmatpush2.bf16.msra.mxu0 %v6900_v18  ;;  %v688_v18 = vlaneseq }
  0xca   : > { %2914 = vmatpush2.bf16.msra.mxu1 %v6903_v19  ;;  %2926 = vmatprep.subr.bf16.mxu0 %v6908_v20  ;;  %v6990_v19 = vld [vmem:[%s9558_s1 + $0x378] ss:$48 sps:$4 sm:$0xff]  }
  0xcb   : > { %2969 = vmatprep.subr.bf16.mxu1 %v6911_v21  ;;  %v6993_v20 = vld [vmem:[%s9558_s1 + $0x978] ss:$48 sps:$4 sm:$0xff]   ;;  %v6998_v21 = vld [vmem:[%s9558_s1 + $0x31c] ss:$48 sps:$4 sm:$0xff]  }
  0xcc   : > { %2873 = vmatmul.mubr.bf16.vlgmr.msra.gmra.mxu0 %v7746_v12 }
  0xcd   : > { %2916 = vmatmul.mubr.bf16.vlgmr.msra.gmra.mxu1 %v7748_v13  ;;  %2927 = vmatpush1.bf16.msra.mxu0 %v6906_v22  ;;  %v7001_v22 = vld [vmem:[%s9558_s1 + $0x91c] ss:$48 sps:$4 sm:$0xff]  }
  0xce   : > { %2970 = vmatpush1.bf16.msra.mxu1 %v6909_v23  ;;  %2928 = vmatprep.subr.bf16.mxu0 %v6914_v24  ;;  %v8326_v23 = vshrl.u32 %v688_v18, 7  ;;  %v6996_v24 = vld [vmem:[%s9558_s1 + $0x318] ss:$48 sps:$4 sm:$0xff]   ;;  %v7050_v18 = vld [vmem:[%s9558_s1 + $0x5c0] ss:$48 sps:$4 sm:$0xff]  }
  0xcf   : > { %2971 = vmatprep.subr.bf16.mxu1 %v6917_v25  ;;  %2958 = vmatprep.mubr.bf16.mxu0 %v7685_v53  ;;  %v6999_v25 = vld [vmem:[%s9558_s1 + $0x918] ss:$48 sps:$4 sm:$0xff]  }
  0xd0   : > { %3001 = vmatprep.mubr.bf16.mxu1 %v7687_v54 }
  0xd1   : > { %2929 = vmatpush1.bf16.msra.mxu0 %v6912_v26  ;;  %v7004_v26 = vld [vmem:[%s9558_s1 + $0x2c4] ss:$48 sps:$4 sm:$0xff]  }
  0xd2   : > { %2972 = vmatpush1.bf16.msra.mxu1 %v6915_v27  ;;  %2930 = vmatprep.subr.bf16.mxu0 %v6920_v28  ;;  %v7007_v27 = vld [vmem:[%s9558_s1 + $0x8c4] ss:$48 sps:$4 sm:$0xff]  }
  0xd3   : > { %2973 = vmatprep.subr.bf16.mxu1 %v6923_v29  ;;  %v8343_v28 = vld [vmem:[%s9559_s2] sm:$0xff]  ;;  %v8346_v29 = vsub.s32 1, %v8326_v23 }
  0xd5   : > { %2931 = vmatpush1.bf16.msra.mxu0 %v6918_v30  ;;  %v7002_v30 = vld [vmem:[%s9558_s1 + $0x2c0] ss:$48 sps:$4 sm:$0xff]  }
  0xd6   : > { %2974 = vmatpush1.bf16.msra.mxu1 %v6921_v31  ;;  %2932 = vmatprep.subr.bf16.mxu0 %v6926_v32  ;;  %v7005_v31 = vld [vmem:[%s9558_s1 + $0x8c0] ss:$48 sps:$4 sm:$0xff]   ;;  %v7010_v32 = vld [vmem:[%s9558_s1 + $0x264] ss:$48 sps:$4 sm:$0xff]  }
  0xd7   : > { %2975 = vmatprep.subr.bf16.mxu1 %v6929_v33  ;;  %v7013_v33 = vld [vmem:[%s9558_s1 + $0x864] ss:$48 sps:$4 sm:$0xff]  }
  0xd9   : > { %2933 = vmatpush1.bf16.msra.mxu0 %v6924_v34  ;;  %v695_v34 = vrot.slane %v8343_v28, %v8346_v29 }
  0xda   : > { %2976 = vmatpush1.bf16.msra.mxu1 %v6927_v35  ;;  %2934 = vmatprep.subr.bf16.mxu0 %v6932_v36  ;;  %v7008_v35 = vld [vmem:[%s9558_s1 + $0x260] ss:$48 sps:$4 sm:$0xff]  }
  0xdb   : > { %2977 = vmatprep.subr.bf16.mxu1 %v6935_v37 }
  0xdd   : > { %2935 = vmatpush1.bf16.msra.mxu0 %v6930_v38  ;;  %v7011_v38 = vld [vmem:[%s9558_s1 + $0x860] ss:$48 sps:$4 sm:$0xff]  }
  0xde   : > { %2978 = vmatpush1.bf16.msra.mxu1 %v6933_v39  ;;  %2936 = vmatprep.subr.bf16.mxu0 %v6938_v40  ;;  %v7016_v39 = vld [vmem:[%s9558_s1 + $0x204] ss:$48 sps:$4 sm:$0xff]  }
  0xdf   : > { %2979 = vmatprep.subr.bf16.mxu1 %v6941_v41 }
  0xe1   : > { %2937 = vmatpush1.bf16.msra.mxu0 %v6936_v42  ;;  %v7019_v42 = vld [vmem:[%s9558_s1 + $0x804] ss:$48 sps:$4 sm:$0xff]  }
  0xe2   : > { %2980 = vmatpush1.bf16.msra.mxu1 %v6939_v43  ;;  %2938 = vmatprep.subr.bf16.mxu0 %v6944_v44  ;;  %v7014_v44 = vld [vmem:[%s9558_s1 + $0x200] ss:$48 sps:$4 sm:$0xff]  }
  0xe3   : > { %2981 = vmatprep.subr.bf16.mxu1 %v6947_v45  ;;  %v7017_v45 = vld [vmem:[%s9558_s1 + $0x800] ss:$48 sps:$4 sm:$0xff]  }
  0xe5   : > { %2939 = vmatpush1.bf16.msra.mxu0 %v6942_v46 }
  0xe6   : > { %2982 = vmatpush1.bf16.msra.mxu1 %v6945_v47  ;;  %2940 = vmatprep.subr.bf16.mxu0 %v6950_v48  ;;  %v7022_v48 = vld [vmem:[%s9558_s1 + $0x1a4] ss:$48 sps:$4 sm:$0xff]  }
  0xe7   : > { %2983 = vmatprep.subr.bf16.mxu1 %v6953_v49  ;;  %v7025_v49 = vld [vmem:[%s9558_s1 + $0x7a4] ss:$48 sps:$4 sm:$0xff]  }
  0xe9   : > { %2941 = vmatpush1.bf16.msra.mxu0 %v6948_v50 }
  0xea   : > { %2984 = vmatpush1.bf16.msra.mxu1 %v6951_v51  ;;  %2942 = vmatprep.subr.bf16.mxu0 %v6956_v52 }
  0xeb   : > { %2985 = vmatprep.subr.bf16.mxu1 %v6959_v55  ;;  %v7020_v55 = vld [vmem:[%s9558_s1 + $0x1a0] ss:$48 sps:$4 sm:$0xff]  }
  0xed   : > { %2943 = vmatpush2.bf16.msra.mxu0 %v6954_v56  ;;  %v7023_v56 = vld [vmem:[%s9558_s1 + $0x7a0] ss:$48 sps:$4 sm:$0xff]  }
  0xee   : > { %2986 = vmatpush2.bf16.msra.mxu1 %v6957_v57  ;;  %2944 = vmatprep.subr.bf16.mxu0 %v6962_v58  ;;  %v7028_v58 = vld [vmem:[%s9558_s1 + $0x144] ss:$48 sps:$4 sm:$0xff]  }
  0xef   : > { %2987 = vmatprep.subr.bf16.mxu1 %v6965_v59  ;;  %v7031_v59 = vld [vmem:[%s9558_s1 + $0x744] ss:$48 sps:$4 sm:$0xff]  }
  0xf1   : > { %2945 = vmatpush2.bf16.msra.mxu0 %v6960_v60 }
  0xf2   : > { %2988 = vmatpush2.bf16.msra.mxu1 %v6963_v61  ;;  %2946 = vmatprep.subr.bf16.mxu0 %v6968_v62 }
  0xf3   : > { %2989 = vmatprep.subr.bf16.mxu1 %v6971_v63  ;;  %v7026_v63 = vld [vmem:[%s9558_s1 + $0x140] ss:$48 sps:$4 sm:$0xff]  }
  0xf5   : > { %2947 = vmatpush2.bf16.msra.mxu0 %v6966_v0  ;;  %v7029_v0 = vld [vmem:[%s9558_s1 + $0x740] ss:$48 sps:$4 sm:$0xff]  }
  0xf6   : > { %2990 = vmatpush2.bf16.msra.mxu1 %v6969_v1  ;;  %2948 = vmatprep.subr.bf16.mxu0 %v6974_v2  ;;  %v7034_v1 = vld [vmem:[%s9558_s1 + $0xe4] ss:$48 sps:$4 sm:$0xff]  }
  0xf7   : > { %2991 = vmatprep.subr.bf16.mxu1 %v6977_v3  ;;  %v7037_v2 = vld [vmem:[%s9558_s1 + $0x6e4] ss:$48 sps:$4 sm:$0xff]  }
  0xf9   : > { %2949 = vmatpush2.bf16.msra.mxu0 %v6972_v4  ;;  %v7032_v4 = vld [vmem:[%s9558_s1 + $0xe0] ss:$48 sps:$4 sm:$0xff]  }
  0xfa   : > { %2992 = vmatpush2.bf16.msra.mxu1 %v6975_v5  ;;  %2950 = vmatprep.subr.bf16.mxu0 %v6980_v6  ;;  %v7035_v5 = vld [vmem:[%s9558_s1 + $0x6e0] ss:$48 sps:$4 sm:$0xff]   ;;  %v7040_v6 = vld [vmem:[%s9558_s1 + $0x84] ss:$48 sps:$4 sm:$0xff]  }
  0xfb   : > { %2993 = vmatprep.subr.bf16.mxu1 %v6983_v7  ;;  %v7043_v7 = vld [vmem:[%s9558_s1 + $0x684] ss:$48 sps:$4 sm:$0xff]  }
  0xfd   : > { %2951 = vmatpush2.bf16.msra.mxu0 %v6978_v8  ;;  %v7038_v8 = vld [vmem:[%s9558_s1 + $0x80] ss:$48 sps:$4 sm:$0xff]  }
  0xfe   : > { %2994 = vmatpush2.bf16.msra.mxu1 %v6981_v9  ;;  %2952 = vmatprep.subr.bf16.mxu0 %v6986_v10  ;;  %v7041_v9 = vld [vmem:[%s9558_s1 + $0x680] ss:$48 sps:$4 sm:$0xff]   ;;  %v7046_v10 = vld [vmem:[%s9558_s1 + $0x24] ss:$48 sps:$4 sm:$0xff]  }
  0xff   : > { %2995 = vmatprep.subr.bf16.mxu1 %v6989_v11  ;;  %v7049_v11 = vld [vmem:[%s9558_s1 + $0x624] ss:$48 sps:$4 sm:$0xff]  }
 0x101   : > { %2953 = vmatpush2.bf16.msra.mxu0 %v6984_v14  ;;  %v7044_v14 = vld [vmem:[%s9558_s1 + $0x20] ss:$48 sps:$4 sm:$0xff]  }
 0x102   : > { %2996 = vmatpush2.bf16.msra.mxu1 %v6987_v15  ;;  %2954 = vmatprep.subr.bf16.mxu0 %v6992_v16  ;;  %v7047_v15 = vld [vmem:[%s9558_s1 + $0x620] ss:$48 sps:$4 sm:$0xff]   ;;  %v7052_v16 = vld [vmem:[%s9558_s1 + $0x5c4] ss:$48 sps:$4 sm:$0xff]  }
 0x103   : > { %2997 = vmatprep.subr.bf16.mxu1 %v6995_v17  ;;  %v7055_v17 = vld [vmem:[%s9558_s1 + $0xbc4] ss:$48 sps:$4 sm:$0xff]  }
 0x105   : > { %2955 = vmatpush2.bf16.msra.mxu0 %v6990_v19  ;;  %v7053_v19 = vld [vmem:[%s9558_s1 + $0xbc0] ss:$48 sps:$4 sm:$0xff]  }
 0x106   : > { %2998 = vmatpush2.bf16.msra.mxu1 %v6993_v20  ;;  %2956 = vmatprep.subr.bf16.mxu0 %v6998_v21  ;;  %v7058_v20 = vld [vmem:[%s9558_s1 + $0x564] ss:$48 sps:$4 sm:$0xff]  }
 0x107   : > { %2999 = vmatprep.subr.bf16.mxu1 %v7001_v22  ;;  %v7061_v21 = vld [vmem:[%s9558_s1 + $0xb64] ss:$48 sps:$4 sm:$0xff]   ;;  %v7056_v22 = vld [vmem:[%s9558_s1 + $0x560] ss:$48 sps:$4 sm:$0xff]  }
 0x109   : > { %2957 = vmatpush2.bf16.msra.mxu0 %v6996_v24  ;;  %v7059_v24 = vld [vmem:[%s9558_s1 + $0xb60] ss:$48 sps:$4 sm:$0xff]  }
 0x10a   : > { %3000 = vmatpush2.bf16.msra.mxu1 %v6999_v25  ;;  %3012 = vmatprep.subr.bf16.mxu0 %v7004_v26  ;;  %v7064_v25 = vld [vmem:[%s9558_s1 + $0x504] ss:$48 sps:$4 sm:$0xff]  }
 0x10b   : > { %3055 = vmatprep.subr.bf16.mxu1 %v7007_v27  ;;  %v7067_v26 = vld [vmem:[%s9558_s1 + $0xb04] ss:$48 sps:$4 sm:$0xff]   ;;  %v7062_v27 = vld [vmem:[%s9558_s1 + $0x500] ss:$48 sps:$4 sm:$0xff]  }
 0x10c   : > { %v8365_v36 = vpop.f32.mrf.mxu0  ;;  %2959 = vmatmul.mubr.bf16.vlgmr.msra.gmra.mxu0 %v7746_v12 }
 0x10d   : > { %v8367_v37 = vpop.f32.mrf.mxu1  ;;  %3002 = vmatmul.mubr.bf16.vlgmr.msra.gmra.mxu1 %v7748_v13  ;;  %3013 = vmatpush1.bf16.msra.mxu0 %v7002_v30  ;;  %v7065_v30 = vld [vmem:[%s9558_s1 + $0xb00] ss:$48 sps:$4 sm:$0xff]  }
 0x10e   : > { %3056 = vmatpush1.bf16.msra.mxu1 %v7005_v31  ;;  %v2704_v40 = vpop.f32.mrf.mxu0  ;;  %3014 = vmatprep.subr.bf16.mxu0 %v7010_v32  ;;  %v7070_v31 = vld [vmem:[%s9558_s1 + $0x4a4] ss:$48 sps:$4 sm:$0xff]  }
 0x10f   : > { %v2747_v41 = vpop.f32.mrf.mxu1  ;;  %3057 = vmatprep.subr.bf16.mxu1 %v7013_v33  ;;  %v2705_v43 = vadd.f32 %v2704_v40, %v695_v34  ;;  %3044 = vmatprep.mubr.bf16.mxu0 %v7685_v53  ;;  %v7073_v32 = vld [vmem:[%s9558_s1 + $0xaa4] ss:$48 sps:$4 sm:$0xff]   ;;  %v7068_v33 = vld [vmem:[%s9558_s1 + $0x4a0] ss:$48 sps:$4 sm:$0xff]  }
 0x110   : > { %3087 = vmatprep.mubr.bf16.mxu1 %v7687_v54  ;;  %v8388_v46 = vpop.f32.mrf.mxu0  ;;  %v7077_v40 = vld [vmem:[%s9558_s1 + $0xa40] ss:$48 sps:$4 sm:$0xff]  }
 0x111   : > { %v8390_v47 = vpop.f32.mrf.mxu1  ;;  %v2748_v50 = vadd.f32 %v2747_v41, %v2705_v43  ;;  %3015 = vmatpush1.bf16.msra.mxu0 %v7008_v35  ;;  %v7076_v35 = vld [vmem:[%s9558_s1 + $0x444] ss:$48 sps:$4 sm:$0xff]   ;;  %v7080_v43 = vld [vmem:[%s9558_s1 + $0x3e0] ss:$48 sps:$4 sm:$0xff]  }
 0x112   : > { %3058 = vmatpush1.bf16.msra.mxu1 %v7011_v38  ;;  %v2708_v51 = vpop.f32.mrf.mxu0  ;;  %3016 = vmatprep.subr.bf16.mxu0 %v7016_v39  ;;  %v7079_v38 = vld [vmem:[%s9558_s1 + $0xa44] ss:$48 sps:$4 sm:$0xff]   ;;  %v7074_v39 = vld [vmem:[%s9558_s1 + $0x440] ss:$48 sps:$4 sm:$0xff]  }
 0x113   : > { %3059 = vmatprep.subr.bf16.mxu1 %v7019_v42  ;;  %v2709_v52 = vadd.f32 %v2708_v51, %v695_v34  ;;  %v2751_v57 = vpop.f32.mrf.mxu1  ;;  %v3185_v61 = vmul.f32 0.125, %v2748_v50  ;;  %v7071_v34 = vld [vmem:[%s9558_s1 + $0xaa0] ss:$48 sps:$4 sm:$0xff]   ;;  %v7082_v41 = vld [vmem:[%s9558_s1 + $0x3e4] ss:$48 sps:$4 sm:$0xff]  }
 0x114   : > { %v7085_v42 = vld [vmem:[%s9558_s1 + $0x9e4] ss:$48 sps:$4 sm:$0xff]   ;;  %v7089_v50 = vld [vmem:[%s9558_s1 + $0x980] ss:$48 sps:$4 sm:$0xff]  }
 0x115   : > { %v2752_v60 = vadd.f32 %v2751_v57, %v2709_v52  ;;  %3017 = vmatpush1.bf16.msra.mxu0 %v7014_v44  ;;  %v7083_v44 = vld [vmem:[%s9558_s1 + $0x9e0] ss:$48 sps:$4 sm:$0xff]   ;;  %v7094_v51 = vld [vmem:[%s9558_s1 + $0x324] ss:$48 sps:$4 sm:$0xff]  }
 0x116   : > { %3060 = vmatpush1.bf16.msra.mxu1 %v7017_v45  ;;  %3018 = vmatprep.subr.bf16.mxu0 %v7022_v48  ;;  %v7088_v45 = vld [vmem:[%s9558_s1 + $0x384] ss:$48 sps:$4 sm:$0xff]   ;;  %v7095_v57 = vld [vmem:[%s9558_s1 + $0x920] ss:$48 sps:$4 sm:$0xff]  }
 0x117   : > { %3061 = vmatprep.subr.bf16.mxu1 %v7025_v49  ;;  %v3189_v62 = vmul.f32 0.125, %v2752_v60  ;;  %v7091_v48 = vld [vmem:[%s9558_s1 + $0x984] ss:$48 sps:$4 sm:$0xff]   ;;  %v7086_v49 = vld [vmem:[%s9558_s1 + $0x380] ss:$48 sps:$4 sm:$0xff]   ;;  %v8560_v60 = vsub.s32 3, %v8326_v23 }
 0x118   : > { %v7097_v52 = vld [vmem:[%s9558_s1 + $0x924] ss:$48 sps:$4 sm:$0xff]  }
 0x119   : > { %v8422_v3 = vpack.c.bf16 %v3189_v62, %v3185_v61  ;;  %3019 = vmatpush1.bf16.msra.mxu0 %v7020_v55  ;;  %v8545_v55 = vsub.s32 2, %v8326_v23  ;;  %v7098_v62 = vld [vmem:[%s9558_s1 + $0x2c8] ss:$48 sps:$4 sm:$0xff]  }
 0x11a   : > { %3062 = vmatpush1.bf16.msra.mxu1 %v7023_v56  ;;  %3020 = vmatprep.subr.bf16.mxu0 %v7028_v58  ;;  %v7092_v56 = vld [vmem:[%s9558_s1 + $0x320] ss:$48 sps:$4 sm:$0xff]   ;;  %v7100_v58 = vld [vmem:[%s9558_s1 + $0x2cc] ss:$48 sps:$4 sm:$0xff]  }
 0x11b   : > { %3063 = vmatprep.subr.bf16.mxu1 %v7031_v59  ;;  %v7103_v59 = vld [vmem:[%s9558_s1 + $0x8cc] ss:$48 sps:$4 sm:$0xff]   ;;  %v699_v61 = vrot.slane %v8343_v28, %v8545_v55 }
 0x11d   : > { %3021 = vmatpush1.bf16.msra.mxu0 %v7026_v63  ;;  %v7101_v63 = vld [vmem:[%s9558_s1 + $0x8c8] ss:$48 sps:$4 sm:$0xff]  }
 0x11e   : > { %3064 = vmatpush1.bf16.msra.mxu1 %v7029_v0  ;;  %3022 = vmatprep.subr.bf16.mxu0 %v7034_v1  ;;  %v7106_v0 = vld [vmem:[%s9558_s1 + $0x26c] ss:$48 sps:$4 sm:$0xff]  }
 0x11f   : > { %3065 = vmatprep.subr.bf16.mxu1 %v7037_v2  ;;  %v7109_v1 = vld [vmem:[%s9558_s1 + $0x86c] ss:$48 sps:$4 sm:$0xff]   ;;  %v703_v2 = vrot.slane %v8343_v28, %v8560_v60 }
 0x121   : > { %3023 = vmatpush1.bf16.msra.mxu0 %v7032_v4 }
 0x122   : > { %3066 = vmatpush1.bf16.msra.mxu1 %v7035_v5  ;;  %3024 = vmatprep.subr.bf16.mxu0 %v7040_v6 }
 0x123   : > { %3067 = vmatprep.subr.bf16.mxu1 %v7043_v7  ;;  %v7104_v7 = vld [vmem:[%s9558_s1 + $0x268] ss:$48 sps:$4 sm:$0xff]  }
 0x125   : > { %3025 = vmatpush1.bf16.msra.mxu0 %v7038_v8  ;;  %v7107_v8 = vld [vmem:[%s9558_s1 + $0x868] ss:$48 sps:$4 sm:$0xff]  }
 0x126   : > { %3068 = vmatpush1.bf16.msra.mxu1 %v7041_v9  ;;  %3026 = vmatprep.subr.bf16.mxu0 %v7046_v10 }
 0x127   : > { %3069 = vmatprep.subr.bf16.mxu1 %v7049_v11  ;;  %v7112_v11 = vld [vmem:[%s9558_s1 + $0x20c] ss:$48 sps:$4 sm:$0xff]  }
 0x129   : > { %3027 = vmatpush1.bf16.msra.mxu0 %v7044_v14  ;;  %v7115_v14 = vld [vmem:[%s9558_s1 + $0x80c] ss:$48 sps:$4 sm:$0xff]  }
 0x12a   : > { %3070 = vmatpush1.bf16.msra.mxu1 %v7047_v15  ;;  %3028 = vmatprep.subr.bf16.mxu0 %v7052_v16 }
 0x12b   : > { %3071 = vmatprep.subr.bf16.mxu1 %v7055_v17 }
 0x12d   : > { %3029 = vmatpush2.bf16.msra.mxu0 %v7050_v18 }
 0x12e   : > { %3072 = vmatpush2.bf16.msra.mxu1 %v7053_v19  ;;  %3030 = vmatprep.subr.bf16.mxu0 %v7058_v20 }
 0x12f   : > { %3073 = vmatprep.subr.bf16.mxu1 %v7061_v21  ;;  %v7110_v21 = vld [vmem:[%s9558_s1 + $0x208] ss:$48 sps:$4 sm:$0xff]  }
 0x131   : > { %3031 = vmatpush2.bf16.msra.mxu0 %v7056_v22  ;;  %v7113_v22 = vld [vmem:[%s9558_s1 + $0x808] ss:$48 sps:$4 sm:$0xff]  }
 0x132   : > { %3074 = vmatpush2.bf16.msra.mxu1 %v7059_v24  ;;  %3032 = vmatprep.subr.bf16.mxu0 %v7064_v25 }
 0x133   : > { %3075 = vmatprep.subr.bf16.mxu1 %v7067_v26 }
 0x135   : > { %3033 = vmatpush2.bf16.msra.mxu0 %v7062_v27 }
 0x136   : > { %3076 = vmatpush2.bf16.msra.mxu1 %v7065_v30  ;;  %3034 = vmatprep.subr.bf16.mxu0 %v7070_v31 }
 0x137   : > { %3077 = vmatprep.subr.bf16.mxu1 %v7073_v32 }
 0x139   : > { %3035 = vmatpush2.bf16.msra.mxu0 %v7068_v33  ;;  %v7116_v33 = vld [vmem:[%s9558_s1 + $0x1a8] ss:$48 sps:$4 sm:$0xff]  }
 0x13a   : > { %3078 = vmatpush2.bf16.msra.mxu1 %v7071_v34  ;;  %3036 = vmatprep.subr.bf16.mxu0 %v7076_v35  ;;  %v7119_v34 = vld [vmem:[%s9558_s1 + $0x7a8] ss:$48 sps:$4 sm:$0xff]   ;;  %v7124_v35 = vld [vmem:[%s9558_s1 + $0x14c] ss:$48 sps:$4 sm:$0xff]  }
 0x13b   : > { %3079 = vmatprep.subr.bf16.mxu1 %v7079_v38  ;;  %v7127_v38 = vld [vmem:[%s9558_s1 + $0x74c] ss:$48 sps:$4 sm:$0xff]  }
 0x13d   : > { %3037 = vmatpush2.bf16.msra.mxu0 %v7074_v39 }
 0x13e   : > { %3080 = vmatpush2.bf16.msra.mxu1 %v7077_v40  ;;  %3038 = vmatprep.subr.bf16.mxu0 %v7082_v41 }
 0x13f   : > { %3081 = vmatprep.subr.bf16.mxu1 %v7085_v42 }
 0x141   : > { %3039 = vmatpush2.bf16.msra.mxu0 %v7080_v43  ;;  %v7122_v43 = vld [vmem:[%s9558_s1 + $0x148] ss:$48 sps:$4 sm:$0xff]  }
 0x142   : > { %3082 = vmatpush2.bf16.msra.mxu1 %v7083_v44  ;;  %3040 = vmatprep.subr.bf16.mxu0 %v7088_v45  ;;  %v7125_v44 = vld [vmem:[%s9558_s1 + $0x748] ss:$48 sps:$4 sm:$0xff]   ;;  %v7130_v45 = vld [vmem:[%s9558_s1 + $0xec] ss:$48 sps:$4 sm:$0xff]  }
 0x143   : > { %3083 = vmatprep.subr.bf16.mxu1 %v7091_v48  ;;  %v7133_v48 = vld [vmem:[%s9558_s1 + $0x6ec] ss:$48 sps:$4 sm:$0xff]  }
 0x145   : > { %3041 = vmatpush2.bf16.msra.mxu0 %v7086_v49  ;;  %v7128_v49 = vld [vmem:[%s9558_s1 + $0xe8] ss:$48 sps:$4 sm:$0xff]  }
 0x146   : > { %3084 = vmatpush2.bf16.msra.mxu1 %v7089_v50  ;;  %3042 = vmatprep.subr.bf16.mxu0 %v7094_v51  ;;  %v7131_v50 = vld [vmem:[%s9558_s1 + $0x6e8] ss:$48 sps:$4 sm:$0xff]   ;;  %v7136_v51 = vld [vmem:[%s9558_s1 + $0x8c] ss:$48 sps:$4 sm:$0xff]  }
 0x147   : > { %3085 = vmatprep.subr.bf16.mxu1 %v7097_v52  ;;  %v7139_v52 = vld [vmem:[%s9558_s1 + $0x68c] ss:$48 sps:$4 sm:$0xff]  }
 0x149   : > { %3043 = vmatpush2.bf16.msra.mxu0 %v7092_v56  ;;  %v7134_v56 = vld [vmem:[%s9558_s1 + $0x88] ss:$48 sps:$4 sm:$0xff]  }
 0x14a   : > { %3086 = vmatpush2.bf16.msra.mxu1 %v7095_v57  ;;  %3098 = vmatprep.subr.bf16.mxu0 %v7100_v58  ;;  %v7137_v57 = vld [vmem:[%s9558_s1 + $0x688] ss:$48 sps:$4 sm:$0xff]   ;;  %v7142_v58 = vld [vmem:[%s9558_s1 + $0x2c] ss:$48 sps:$4 sm:$0xff]  }
 0x14b   : > { %3141 = vmatprep.subr.bf16.mxu1 %v7103_v59  ;;  %v7145_v59 = vld [vmem:[%s9558_s1 + $0x62c] ss:$48 sps:$4 sm:$0xff]  }
 0x14c   : > { %v2788_v4 = vpop.f32.mrf.mxu0  ;;  %3045 = vmatmul.mubr.bf16.vlgmr.msra.gmra.mxu0 %v7746_v12 }
 0x14d   : > { %v2831_v5 = vpop.f32.mrf.mxu1  ;;  %3088 = vmatmul.mubr.bf16.vlgmr.msra.gmra.mxu1 %v7748_v13  ;;  %v2789_v6 = vadd.f32 %v2788_v4, %v699_v61  ;;  %3099 = vmatpush1.bf16.msra.mxu0 %v7098_v62  ;;  %v7143_v62 = vld [vmem:[%s9558_s1 + $0x628] ss:$48 sps:$4 sm:$0xff]   ;;  %v7154_v4 = vld [vmem:[%s9558_s1 + $0x56c] ss:$48 sps:$4 sm:$0xff]  }
 0x14e   : > { %3142 = vmatpush1.bf16.msra.mxu1 %v7101_v63  ;;  %v2790_v9 = vpop.f32.mrf.mxu0  ;;  %3100 = vmatprep.subr.bf16.mxu0 %v7106_v0  ;;  %v7148_v63 = vld [vmem:[%s9558_s1 + $0x5cc] ss:$48 sps:$4 sm:$0xff]  }
 0x14f   : > { %v2833_v10 = vpop.f32.mrf.mxu1  ;;  %3143 = vmatprep.subr.bf16.mxu1 %v7109_v1  ;;  %v2832_v15 = vadd.f32 %v2831_v5, %v2789_v6  ;;  %v2791_v16 = vadd.f32 %v2790_v9, %v703_v2  ;;  %3130 = vmatprep.mubr.bf16.mxu0 %v7685_v53  ;;  %v7118_v53 = vld [vmem:[%s9558_s1 + $0x1ac] ss:$48 sps:$4 sm:$0xff]   ;;  %v7146_v1 = vld [vmem:[%s9558_s1 + $0x5c8] ss:$48 sps:$4 sm:$0xff]  }
 0x150   : > { %3173 = vmatprep.mubr.bf16.mxu1 %v7687_v54  ;;  %v2792_v17 = vpop.f32.mrf.mxu0  ;;  %v7121_v54 = vld [vmem:[%s9558_s1 + $0x7ac] ss:$48 sps:$4 sm:$0xff]   ;;  %v7152_v6 = vld [vmem:[%s9558_s1 + $0x568] ss:$48 sps:$4 sm:$0xff]  }
 0x151   : > { %v2835_v18 = vpop.f32.mrf.mxu1  ;;  %v2834_v19 = vadd.f32 %v2833_v10, %v2791_v16  ;;  %v2793_v20 = vadd.f32 %v2792_v17, %v699_v61  ;;  %3101 = vmatpush1.bf16.msra.mxu0 %v7104_v7  ;;  %v3186_v30 = vmul.f32 0.125, %v2832_v15  ;;  %v7140_v61 = vld [vmem:[%s9558_s1 + $0x28] ss:$48 sps:$4 sm:$0xff]   ;;  %v7151_v0 = vld [vmem:[%s9558_s1 + $0xbcc] ss:$48 sps:$4 sm:$0xff]  }
 0x152   : > { %3144 = vmatpush1.bf16.msra.mxu1 %v7107_v8  ;;  %v2794_v24 = vpop.f32.mrf.mxu0  ;;  %3102 = vmatprep.subr.bf16.mxu0 %v7112_v11  ;;  %v7157_v5 = vld [vmem:[%s9558_s1 + $0xb6c] ss:$48 sps:$4 sm:$0xff]   ;;  %v7155_v7 = vld [vmem:[%s9558_s1 + $0xb68] ss:$48 sps:$4 sm:$0xff]  }
 0x153   : > { %3145 = vmatprep.subr.bf16.mxu1 %v7115_v14  ;;  %v2836_v25 = vadd.f32 %v2835_v18, %v2793_v20  ;;  %v2795_v26 = vadd.f32 %v2794_v24, %v703_v2  ;;  %v2837_v27 = vpop.f32.mrf.mxu1  ;;  %v3187_v39 = vmul.f32 0.125, %v2834_v19  ;;  %v7149_v2 = vld [vmem:[%s9558_s1 + $0xbc8] ss:$48 sps:$4 sm:$0xff]   ;;  %v7160_v8 = vld [vmem:[%s9558_s1 + $0x50c] ss:$48 sps:$4 sm:$0xff]  }
 0x154   : > { %v7163_v9 = vld [vmem:[%s9558_s1 + $0xb0c] ss:$48 sps:$4 sm:$0xff]   ;;  %v7158_v10 = vld [vmem:[%s9558_s1 + $0x508] ss:$48 sps:$4 sm:$0xff]  }
 0x155   : > { %v3190_v31 = vmul.f32 0.125, %v2836_v25  ;;  %v2838_v32 = vadd.f32 %v2837_v27, %v2795_v26  ;;  %3103 = vmatpush1.bf16.msra.mxu0 %v7110_v21  ;;  %v7161_v11 = vld [vmem:[%s9558_s1 + $0xb08] ss:$48 sps:$4 sm:$0xff]   ;;  %v7166_v14 = vld [vmem:[%s9558_s1 + $0x4ac] ss:$48 sps:$4 sm:$0xff]  }
 0x156   : > { %3146 = vmatpush1.bf16.msra.mxu1 %v7113_v22  ;;  %3104 = vmatprep.subr.bf16.mxu0 %v7118_v53  ;;  %v7169_v15 = vld [vmem:[%s9558_s1 + $0xaac] ss:$48 sps:$4 sm:$0xff]   ;;  %v7164_v16 = vld [vmem:[%s9558_s1 + $0x4a8] ss:$48 sps:$4 sm:$0xff]  }
 0x157   : > { %3147 = vmatprep.subr.bf16.mxu1 %v7121_v54  ;;  %v8618_v40 = vpack.c.bf16 %v3190_v31, %v3186_v30  ;;  %v3191_v41 = vmul.f32 0.125, %v2838_v32  ;;  %v7167_v17 = vld [vmem:[%s9558_s1 + $0xaa8] ss:$48 sps:$4 sm:$0xff]   ;;  %v7172_v18 = vld [vmem:[%s9558_s1 + $0x44c] ss:$48 sps:$4 sm:$0xff]  }
 0x158   : > { %v7175_v19 = vld [vmem:[%s9558_s1 + $0xa4c] ss:$48 sps:$4 sm:$0xff]   ;;  %v7170_v20 = vld [vmem:[%s9558_s1 + $0x448] ss:$48 sps:$4 sm:$0xff]  }
 0x159   : > { %v8620_v42 = vpack.c.bf16 %v3191_v41, %v3187_v39  ;;  %3105 = vmatpush1.bf16.msra.mxu0 %v7116_v33  ;;  %v7173_v21 = vld [vmem:[%s9558_s1 + $0xa48] ss:$48 sps:$4 sm:$0xff]   ;;  %v7178_v22 = vld [vmem:[%s9558_s1 + $0x3ec] ss:$48 sps:$4 sm:$0xff]   ;;  %v7470_v39 = vmov 0.0   ;;  %v8765_v41 = vsub.s32 0, %v8326_v23 }
 0x15a   : > { %3148 = vmatpush1.bf16.msra.mxu1 %v7119_v34  ;;  %3106 = vmatprep.subr.bf16.mxu0 %v7124_v35  ;;  %v7181_v24 = vld [vmem:[%s9558_s1 + $0x9ec] ss:$48 sps:$4 sm:$0xff]   ;;  %v7176_v53 = vld [vmem:[%s9558_s1 + $0x3e8] ss:$48 sps:$4 sm:$0xff]   ;;  %v706_v35 = vsub.s32 4, %v8326_v23 }
 0x15b   : > { %3149 = vmatprep.subr.bf16.mxu1 %v7127_v38  ;;  %v7179_v54 = vld [vmem:[%s9558_s1 + $0x9e8] ss:$48 sps:$4 sm:$0xff]   ;;  %v7184_v25 = vld [vmem:[%s9558_s1 + $0x38c] ss:$48 sps:$4 sm:$0xff]   ;;  %v710_v38 = vsub.s32 5, %v8326_v23 }
 0x15c   : > { %v7187_v26 = vld [vmem:[%s9558_s1 + $0x98c] ss:$48 sps:$4 sm:$0xff]   ;;  %v7182_v27 = vld [vmem:[%s9558_s1 + $0x388] ss:$48 sps:$4 sm:$0xff]  }
 0x15d   : > { %3107 = vmatpush1.bf16.msra.mxu0 %v7122_v43  ;;  %v7185_v30 = vld [vmem:[%s9558_s1 + $0x988] ss:$48 sps:$4 sm:$0xff]   ;;  %v7190_v31 = vld [vmem:[%s9558_s1 + $0x32c] ss:$48 sps:$4 sm:$0xff]   ;;  %v707_v43 = vrot.slane %v8343_v28, %v706_v35 }
 0x15e   : > { %3150 = vmatpush1.bf16.msra.mxu1 %v7125_v44  ;;  %3108 = vmatprep.subr.bf16.mxu0 %v7130_v45  ;;  %v7193_v32 = vld [vmem:[%s9558_s1 + $0x92c] ss:$48 sps:$4 sm:$0xff]   ;;  %v7188_v33 = vld [vmem:[%s9558_s1 + $0x328] ss:$48 sps:$4 sm:$0xff]   ;;  %v711_v44 = vrot.slane %v8343_v28, %v710_v38 }
 0x15f   : > { %3151 = vmatprep.subr.bf16.mxu1 %v7133_v48  ;;  %v7191_v34 = vld [vmem:[%s9558_s1 + $0x928] ss:$48 sps:$4 sm:$0xff]  }
 0x161   : > { %3109 = vmatpush1.bf16.msra.mxu0 %v7128_v49 }
 0x162   : > { %3152 = vmatpush1.bf16.msra.mxu1 %v7131_v50  ;;  %3110 = vmatprep.subr.bf16.mxu0 %v7136_v51  ;;  %v691_v51 = vrot.slane %v8343_v28, %v8765_v41 }
 0x163   : > { %3153 = vmatprep.subr.bf16.mxu1 %v7139_v52 }
 0x165   : > { %3111 = vmatpush1.bf16.msra.mxu0 %v7134_v56 }
 0x166   : > { %3154 = vmatpush1.bf16.msra.mxu1 %v7137_v57  ;;  %3112 = vmatprep.subr.bf16.mxu0 %v7142_v58 }
 0x167   : > { %3155 = vmatprep.subr.bf16.mxu1 %v7145_v59 }
 0x169   : > { %3113 = vmatpush1.bf16.msra.mxu0 %v7140_v61 }
 0x16a   : > { %3156 = vmatpush1.bf16.msra.mxu1 %v7143_v62  ;;  %3114 = vmatprep.subr.bf16.mxu0 %v7148_v63  ;;  %v2703_v62 = vadd.f32 %v8365_v36, %v691_v51 }
 0x16b   : > { %3157 = vmatprep.subr.bf16.mxu1 %v7151_v0 }
 0x16d   : > { %3115 = vmatpush2.bf16.msra.mxu0 %v7146_v1 }
 0x16e   : > { %3158 = vmatpush2.bf16.msra.mxu1 %v7149_v2  ;;  %3116 = vmatprep.subr.bf16.mxu0 %v7154_v4 }
 0x16f   : > { %3159 = vmatprep.subr.bf16.mxu1 %v7157_v5 }
 0x171   : > { %3117 = vmatpush2.bf16.msra.mxu0 %v7152_v6 }
 0x172   : > { %3160 = vmatpush2.bf16.msra.mxu1 %v7155_v7  ;;  %3118 = vmatprep.subr.bf16.mxu0 %v7160_v8  ;;  %v2746_v7 = vadd.f32 %v8367_v37, %v2703_v62 }
 0x173   : > { %3161 = vmatprep.subr.bf16.mxu1 %v7163_v9 }
 0x174   : > { %v3184_v36 = vmul.f32 0.125, %v2746_v7 }
 0x175   : > { %3119 = vmatpush2.bf16.msra.mxu0 %v7158_v10 }
 0x176   : > { %3162 = vmatpush2.bf16.msra.mxu1 %v7161_v11  ;;  %3120 = vmatprep.subr.bf16.mxu0 %v7166_v14  ;;  %v718_v11 = vsub.s32 7, %v8326_v23 }
 0x177   : > { %3163 = vmatprep.subr.bf16.mxu1 %v7169_v15 }
 0x178   : > { %v719_v37 = vrot.slane %v8343_v28, %v718_v11 }
 0x179   : > { %3121 = vmatpush2.bf16.msra.mxu0 %v7164_v16 }
 0x17a   : > { %3164 = vmatpush2.bf16.msra.mxu1 %v7167_v17  ;;  %3122 = vmatprep.subr.bf16.mxu0 %v7172_v18 }
 0x17b   : > { %3165 = vmatprep.subr.bf16.mxu1 %v7175_v19 }
 0x17d   : > { %3123 = vmatpush2.bf16.msra.mxu0 %v7170_v20 }
 0x17e   : > { %3166 = vmatpush2.bf16.msra.mxu1 %v7173_v21  ;;  %3124 = vmatprep.subr.bf16.mxu0 %v7178_v22 }
 0x17f   : > { %3167 = vmatprep.subr.bf16.mxu1 %v7181_v24 }
 0x181   : > { %3125 = vmatpush2.bf16.msra.mxu0 %v7176_v53 }
 0x182   : > { %3168 = vmatpush2.bf16.msra.mxu1 %v7179_v54  ;;  %3126 = vmatprep.subr.bf16.mxu0 %v7184_v25 }
 0x183   : > { %3169 = vmatprep.subr.bf16.mxu1 %v7187_v26 }
 0x185   : > { %3127 = vmatpush2.bf16.msra.mxu0 %v7182_v27 }
 0x186   : > { %3170 = vmatpush2.bf16.msra.mxu1 %v7185_v30  ;;  %3128 = vmatprep.subr.bf16.mxu0 %v7190_v31 }
 0x187   : > { %3171 = vmatprep.subr.bf16.mxu1 %v7193_v32 }
 0x189   : > { %3129 = vmatpush2.bf16.msra.mxu0 %v7188_v33 }
 0x18a   : > { %3172 = vmatpush2.bf16.msra.mxu1 %v7191_v34  ;;  %6510 = vmatprep.subr.bf16.mxu0 %v7470_v39 }
 0x18b   : > { %6516 = vmatprep.subr.bf16.mxu1 %v7470_v39 }
 0x18c   : > { %v2874_v45 = vpop.f32.mrf.mxu0  ;;  %3131 = vmatmul.mubr.bf16.vlgmr.msra.gmra.mxu0 %v7746_v12  ;;  %v2707_v12 = vadd.f32 %v8388_v46, %v691_v51 }
 0x18d   : > { %v2917_v48 = vpop.f32.mrf.mxu1  ;;  %3174 = vmatmul.mubr.bf16.vlgmr.msra.gmra.mxu1 %v7748_v13  ;;  %6512 = vmatprep.mubr.msk.bf16.mxu0 %vm7471_vm0, %v7470_v39  ;;  %v2875_v52 = vadd.f32 %v2874_v45, %v707_v43 }
 0x18e   : > { %6518 = vmatprep.mubr.msk.bf16.mxu1 %vm7471_vm0, %v7470_v39  ;;  %v2876_v49 = vpop.f32.mrf.mxu0  ;;  %v2750_v4 = vadd.f32 %v8390_v47, %v2707_v12  ;;  %v714_v47 = vsub.s32 6, %v8326_v23 }
 0x18f   : > { %v2919_v50 = vpop.f32.mrf.mxu1  ;;  %v2877_v56 = vadd.f32 %v2876_v49, %v711_v44  ;;  %v2918_v63 = vadd.f32 %v2917_v48, %v2875_v52 }
 0x190   : > { %v2878_v57 = vpop.f32.mrf.mxu0  ;;  %v3188_v9 = vmul.f32 0.125, %v2750_v4  ;;  %v715_v14 = vrot.slane %v8343_v28, %v714_v47  ;;  %v685_v28 = vld [vmem:[%s9559_s2 + $0x8] sm:$0xf] }
 0x191   : > { %v2921_v58 = vpop.f32.mrf.mxu1  ;;  %v2920_v59 = vadd.f32 %v2919_v50, %v2877_v56  ;;  %v2879_v13 = vadd.f32 %v2878_v57, %v707_v43  ;;  %v723_v33 = vrot.slane %v685_v28, %v8765_v41  ;;  %v727_v34 = vrot.slane %v685_v28, %v8346_v29 }
 0x192   : > { %v2880_v61 = vpop.f32.mrf.mxu0  ;;  %v8787_v10 = vpack.c.bf16 %v3188_v9, %v3184_v36 }
 0x193   : > { %v2922_v0 = vadd.f32 %v2921_v58, %v2879_v13  ;;  %v2881_v1 = vadd.f32 %v2880_v61, %v711_v44  ;;  %v2923_v2 = vpop.f32.mrf.mxu1 }
 0x195   : > { %v8780_v5 = vpack.c.bf16 %v2922_v0, %v2918_v63  ;;  %v2924_v6 = vadd.f32 %v2923_v2, %v2881_v1  ;;  %v731_v63 = vrot.slane %v685_v28, %v8545_v55  ;;  %v735_v0 = vrot.slane %v685_v28, %v8560_v60 }
 0x197   : > { %v8783_v8 = vpack.c.bf16 %v2924_v6, %v2920_v59  ;;  %v3230_v46 = vsel %vm3225_vm1, %v8780_v5, 0 }
 0x198   : > { %6511 = vmatpush3.bf16.xpose.msra.mxu0 %v3230_v46 }
 0x19f   : > { %6513 = vmatmul.mubr.msk.bf16.vlgmr.msra.gmra.mxu0 %vm3225_vm1, %v8787_v10 }
 0x1cc   : > { %v2960_v15 = vpop.f32.mrf.mxu0 }
 0x1cd   : > { %v3003_v16 = vpop.f32.mrf.mxu1  ;;  %v2961_v17 = vadd.f32 %v2960_v15, %v715_v14 }
 0x1ce   : > { %v2962_v18 = vpop.f32.mrf.mxu0 }
 0x1cf   : > { %v3005_v19 = vpop.f32.mrf.mxu1  ;;  %v2963_v20 = vadd.f32 %v2962_v18, %v719_v37  ;;  %v3004_v21 = vadd.f32 %v3003_v16, %v2961_v17 }
 0x1d0   : > { %v2964_v22 = vpop.f32.mrf.mxu0 }
 0x1d1   : > { %v3007_v24 = vpop.f32.mrf.mxu1  ;;  %v2965_v53 = vadd.f32 %v2964_v22, %v715_v14  ;;  %v3006_v54 = vadd.f32 %v3005_v19, %v2963_v20 }
 0x1d2   : > { %v2966_v25 = vpop.f32.mrf.mxu0 }
 0x1d3   : > { %v3009_v26 = vpop.f32.mrf.mxu1  ;;  %v2967_v27 = vadd.f32 %v2966_v25, %v719_v37  ;;  %v3008_v30 = vadd.f32 %v3007_v24, %v2965_v53 }
 0x1d5   : > { %v8795_v23 = vpack.c.bf16 %v3008_v30, %v3004_v21  ;;  %v3010_v31 = vadd.f32 %v3009_v26, %v2967_v27 }
 0x1d7   : > { %v8797_v32 = vpack.c.bf16 %v3010_v31, %v3006_v54 }
 0x20c   : > { %v3046_v35 = vpop.f32.mrf.mxu0 }
 0x20d   : > { %v3089_v38 = vpop.f32.mrf.mxu1  ;;  %v3047_v43 = vadd.f32 %v3046_v35, %v723_v33 }
 0x20e   : > { %v3048_v44 = vpop.f32.mrf.mxu0 }
 0x20f   : > { %v3091_v45 = vpop.f32.mrf.mxu1  ;;  %v3049_v48 = vadd.f32 %v3048_v44, %v727_v34  ;;  %v3090_v51 = vadd.f32 %v3089_v38, %v3047_v43  ;;  %v7196_v44 = vld [vmem:[%s9560_s3 + $0x64] ss:$16 sps:$4 sm:$0xff]  }
 0x210   : > { %v3050_v49 = vpop.f32.mrf.mxu0  ;;  %3449 = vmatprep.subr.bf16.mxu0 %v7196_v44 }
 0x211   : > { %v3093_v50 = vpop.f32.mrf.mxu1  ;;  %v3051_v52 = vadd.f32 %v3050_v49, %v723_v33  ;;  %v3092_v56 = vadd.f32 %v3091_v45, %v3049_v48  ;;  %v7199_v45 = vld [vmem:[%s9560_s3 + $0x6c] ss:$16 sps:$4 sm:$0xff]   ;;  %v7202_v48 = vld [vmem:[%s9560_s3 + $0x44] ss:$16 sps:$4 sm:$0xff]  }
 0x212   : > { %v3052_v57 = vpop.f32.mrf.mxu0  ;;  %v7208_v49 = vld [vmem:[%s9560_s3 + $0x24] ss:$16 sps:$4 sm:$0xff]  }
 0x213   : > { %v3095_v58 = vpop.f32.mrf.mxu1  ;;  %v3053_v12 = vadd.f32 %v3052_v57, %v727_v34  ;;  %v3094_v59 = vadd.f32 %v3093_v50, %v3051_v52  ;;  %v7206_v50 = vld [vmem:[%s9560_s3 + $0x20] ss:$16 sps:$4 sm:$0xff]  }
 0x215   : > { %v8804_v13 = vpack.c.bf16 %v3094_v59, %v3090_v51  ;;  %v3096_v61 = vadd.f32 %v3095_v58, %v3053_v12  ;;  %v7197_v59 = vld [vmem:[%s9560_s3 + $0x68] ss:$16 sps:$4 sm:$0xff]  }
 0x217   : > { %v8806_v62 = vpack.c.bf16 %v3096_v61, %v3092_v56  ;;  %6517 = vmatpush3.bf16.msra.mxu1 %v8804_v13 }
 0x218   : > { %3492 = vmatprep.subr.bf16.mxu1 %v7199_v45 }
 0x24c   : > { %v3132_v1 = vpop.f32.mrf.mxu0 }
 0x24d   : > { %v3175_v2 = vpop.f32.mrf.mxu1  ;;  %v3133_v4 = vadd.f32 %v3132_v1, %v731_v63  ;;  %v7211_v1 = vld [vmem:[%s9560_s3 + $0x2c] ss:$16 sps:$4 sm:$0xff]  }
 0x24e   : > { %v3134_v6 = vpop.f32.mrf.mxu0 }
 0x24f   : > { %v3177_v7 = vpop.f32.mrf.mxu1  ;;  %v3135_v46 = vadd.f32 %v3134_v6, %v735_v0  ;;  %v3176_v9 = vadd.f32 %v3175_v2, %v3133_v4  ;;  %v7209_v2 = vld [vmem:[%s9560_s3 + $0x28] ss:$16 sps:$4 sm:$0xff]   ;;  %v7214_v4 = vld [vmem:[%s9560_s3 + $0x4] ss:$16 sps:$4 sm:$0xff]   ;;  %v7212_v6 = vld [vmem:[%s9560_s3] ss:$16 sps:$4 sm:$0xff]  }
 0x250   : > { %v3136_v36 = vpop.f32.mrf.mxu0 }
 0x251   : > { %v3179_v47 = vpop.f32.mrf.mxu1  ;;  %v3137_v11 = vadd.f32 %v3136_v36, %v731_v63  ;;  %v3178_v14 = vadd.f32 %v3177_v7, %v3135_v46  ;;  %v7205_v63 = vld [vmem:[%s9560_s3 + $0x4c] ss:$16 sps:$4 sm:$0xff]   ;;  %v7215_v46 = vld [vmem:[%s9560_s3 + $0x8] ss:$16 sps:$4 sm:$0xff]  }
 0x252   : > { %v3138_v37 = vpop.f32.mrf.mxu0  ;;  %v7217_v7 = vld [vmem:[%s9560_s3 + $0xc] ss:$16 sps:$4 sm:$0xff]  }
 0x253   : > { %v3181_v15 = vpop.f32.mrf.mxu1  ;;  %v3139_v16 = vadd.f32 %v3138_v37, %v735_v0  ;;  %v3180_v17 = vadd.f32 %v3179_v47, %v3137_v11  ;;  %v7203_v0 = vld [vmem:[%s9560_s3 + $0x48] ss:$16 sps:$4 sm:$0xff]  }
 0x255   : > { %v8811_v18 = vpack.c.bf16 %v3180_v17, %v3176_v9  ;;  %v3182_v19 = vadd.f32 %v3181_v15, %v3139_v16  ;;  %v7473_v9 = vmov 0  }
 0x256   : > { %3473 = vmatprep.mubr.bf16.mxu0 %v7473_v9 }
 0x257   : > { %v8813_v20 = vpack.c.bf16 %v3182_v19, %v3178_v14 }
 0x25f   : > { %v3266_v21 = vpop.f32.mrf.mxu0 }
 0x260   : > { %v3274_v22 = vsel %vm3273_vm2, %v3266_v21, -inf }
 0x261   : > { %3275 = vmax.xlane.f32.xlu0 %v3274_v22  ;;  %v6514_v24 = vpop.f32.mrf.mxu0 }
 0x263   : > { %v3269_v53 = vpop.f32.mrf.mxu0 }
 0x264   : > { %v3277_v54 = vsel %vm3273_vm2, %v3269_v53, -inf }
 0x265   : > { %3278 = vmax.xlane.f32.xlu0 %v3277_v54  ;;  %v6515_v25 = vpop.f32.mrf.mxu0 }
 0x27b   : > { %3539 = vrot.lane.b32.xlu0 %v8780_v5, %s7472_s11  ;;  %v7194_v5 = vld [vmem:[%s9560_s3 + $0x60] ss:$16 sps:$4 sm:$0xff]  }
 0x27c   : > { %3450 = vmatpush1.bf16.msra.mxu0 %v7194_v5 }
 0x27d   : > { %3451 = vmatprep.subr.bf16.mxu0 %v7202_v48  ;;  %v7218_v48 = vld [vmem:[%s9560_s3 + $0xe0] ss:$16 sps:$4 sm:$0xff]  }
 0x2ea   : > { %v3276_v26 = vpop.xlane.xlu0 %3275 }
 0x2eb   : > { %v3280_v27 = vsub.f32 %v3266_v21, %v3276_v26 }
 0x2ed   : > { %v3282_v30 = vmul.f32 1.442695, %v3280_v27 }
 0x2ee   : > { %v3279_v31 = vpop.xlane.xlu0 %3278 }
 0x2ef   : > { %7386 = vpow2.f32 %v3282_v30  ;;  %v3281_v28 = vsub.f32 %v3269_v53, %v3279_v31 }
 0x2f1   : > { %v3284_v33 = vmul.f32 1.442695, %v3281_v28 }
 0x2f2   : > { %v3540_v11 = vpop.permute.xlu0 %3539 }
 0x2f3   : > { %7388 = vpow2.f32 %v3284_v33  ;;  %v3545_v16 = vsel %vm3225_vm1, %v3540_v11, 0  ;;  %v7239_v11 = vld [vmem:[%s9560_s3 + $0x88] ss:$16 sps:$4 sm:$0xff]  }
 0x2fc   : > { %v7387_v34 = vpop.eup %7386 }
 0x2fd   : > { %v3286_v35 = vsel %vm3273_vm2, %v7387_v34, 0.0 }
 0x2fe   : > { %3287 = vadd.xlane.f32.xlu1 %v3286_v35 }
 0x300   : > { %v7389_v38 = vpop.eup %7388 }
 0x301   : > { %v3289_v43 = vsel %vm3273_vm2, %v7389_v38, 0.0 }
 0x302   : > { %3290 = vadd.xlane.f32.xlu1 %v3289_v43 }
 0x313   : > { %3536 = vrot.lane.b32.xlu1 %v8787_v10, %s7472_s11  ;;  %v7200_v10 = vld [vmem:[%s9560_s3 + $0x40] ss:$16 sps:$4 sm:$0xff]  }
 0x314   : > { %3452 = vmatpush1.bf16.msra.mxu0 %v7200_v10  ;;  %v7220_v10 = vld [vmem:[%s9560_s3 + $0xe4] ss:$16 sps:$4 sm:$0xff]  }
 0x315   : > { %3453 = vmatprep.subr.bf16.mxu0 %v7208_v49  ;;  %v7226_v49 = vld [vmem:[%s9560_s3 + $0xc4] ss:$16 sps:$4 sm:$0xff]  }
 0x318   : > { %3454 = vmatpush1.bf16.msra.mxu0 %v7206_v50  ;;  %v7232_v50 = vld [vmem:[%s9560_s3 + $0xa4] ss:$16 sps:$4 sm:$0xff]  }
 0x319   : > { %3455 = vmatprep.subr.bf16.mxu0 %v7214_v4  ;;  %v7227_v4 = vld [vmem:[%s9560_s3 + $0xc8] ss:$16 sps:$4 sm:$0xff]  }
 0x31c   : > { %3456 = vmatpush1.bf16.msra.mxu0 %v7212_v6  ;;  %v7235_v6 = vld [vmem:[%s9560_s3 + $0xac] ss:$16 sps:$4 sm:$0xff]  }
 0x31d   : > { %6522 = vmatprep.subr.bf16.mxu0 %v7470_v39 }
 0x387   : > { %v3288_v51 = vpop.xlane.xlu1 %3287 }
 0x388   : > { %7390 = vrcp.f32 %v3288_v51  ;;  %v7230_v51 = vld [vmem:[%s9560_s3 + $0xa0] ss:$16 sps:$4 sm:$0xff]  }
 0x38b   : > { %v3291_v52 = vpop.xlane.xlu1 %3290 }
 0x38c   : > { %7392 = vrcp.f32 %v3291_v52 }
 0x38f   : > { %v3537_v17 = vpop.permute.xlu1 %3536 }
 0x395   : > { %v7391_v56 = vpop.eup %7390 }
 0x396   : > { %v3294_v58 = vmul.f32 %v7391_v56, %v7387_v34  ;;  %v7223_v56 = vld [vmem:[%s9560_s3 + $0xec] ss:$16 sps:$4 sm:$0xff]  }
 0x399   : > { %v7393_v57 = vpop.eup %7392 }
 0x39a   : > { %v3295_v12 = vmul.f32 %v7393_v57, %v7389_v38 }
 0x39c   : > { %v3296_v61 = vpack.c.bf16 %v3295_v12, %v3294_v58 }
 0x39e   : > { %6519 = vmatmul.mubr.msk.bf16.vlgmr.msra.gmra.mxu1 %vm3273_vm2, %v3296_v61 }
 0x39f   : > { %3493 = vmatpush1.bf16.msra.mxu1 %v7197_v59  ;;  %3516 = vmatprep.mubr.bf16.mxu1 %v7473_v9 }
 0x3a0   : > { %3494 = vmatprep.subr.bf16.mxu1 %v7205_v63 }
 0x3a3   : > { %3495 = vmatpush1.bf16.msra.mxu1 %v7203_v0  ;;  %v7221_v0 = vld [vmem:[%s9560_s3 + $0xe8] ss:$16 sps:$4 sm:$0xff]  }
 0x3a4   : > { %3496 = vmatprep.subr.bf16.mxu1 %v7211_v1 }
 0x3a7   : > { %3497 = vmatpush1.bf16.msra.mxu1 %v7209_v2  ;;  %v7229_v2 = vld [vmem:[%s9560_s3 + $0xcc] ss:$16 sps:$4 sm:$0xff]  }
 0x3a8   : > { %3498 = vmatprep.subr.bf16.mxu1 %v7217_v7  ;;  %v7233_v7 = vld [vmem:[%s9560_s3 + $0xa8] ss:$16 sps:$4 sm:$0xff]  }
 0x3ab   : > { %3499 = vmatpush1.bf16.msra.mxu1 %v7215_v46  ;;  %v7238_v46 = vld [vmem:[%s9560_s3 + $0x84] ss:$16 sps:$4 sm:$0xff]  }
 0x3ac   : > { %6528 = vmatprep.subr.bf16.mxu1 %v7470_v39 }
 0x45e   : > { %v3334_v36 = vpop.f32.mrf.mxu1 }
 0x460   : > { %v6520_v47 = vpop.f32.mrf.mxu1 }
 0x461   : > { %v7236_v47 = vld [vmem:[%s9560_s3 + $0x80] ss:$16 sps:$4 sm:$0xff]  }
 0x462   : > { %v3337_v14 = vpop.f32.mrf.mxu1 }
 0x463   : > { %v3341_v37 = vpack.c.bf16 %v3337_v14, %v3334_v36  ;;  %v7241_v36 = vld [vmem:[%s9560_s3 + $0x8c] ss:$16 sps:$4 sm:$0xff]  }
 0x464   : > { %v6521_v15 = vpop.f32.mrf.mxu1 }
 0x465   : > { %6332 = vmatmul.mubr.msk.bf16.vlgmr.msra.gmra.mxu0 %vm3225_vm1, %v3341_v37  ;;  %6333 = vmatmul.mubr.msk.bf16.vlgmr.msra.gmra.mxu1 %vm3225_vm1, %v3341_v37 }
 0x466   : > { %6523 = vmatpush3.bf16.xpose.msra.mxu0 %v3545_v16  ;;  %6524 = vmatprep.mubr.msk.bf16.mxu0 %vm7471_vm0, %v7470_v39 }
 0x467   : > { %6530 = vmatprep.mubr.msk.bf16.mxu1 %vm7471_vm0, %v7470_v39  ;;  %3767 = vmatprep.subr.bf16.mxu0 %v7220_v10 }
 0x46d   : > { %6525 = vmatmul.mubr.msk.bf16.vlgmr.msra.gmra.mxu0 %vm3225_vm1, %v3537_v17 }
 0x46e   : > { %3791 = vmatprep.mubr.bf16.mxu0 %v7473_v9  ;;  %3768 = vmatpush1.bf16.msra.mxu0 %v7218_v48 }
 0x46f   : > { %3769 = vmatprep.subr.bf16.mxu0 %v7226_v49 }
 0x525   : > { %v8885_v19 = vpop.f32.mrf.mxu0  ;;  %v3518_v14 = vpop.f32.mrf.mxu1 }
 0x527   : > { %v8887_v21 = vpop.f32.mrf.mxu0  ;;  %v3520_v37 = vpop.f32.mrf.mxu1 }
 0x529   : > { %v8889_v22 = vpop.f32.mrf.mxu0  ;;  %v3522_v15 = vpop.f32.mrf.mxu1 }
 0x52b   : > { %v8891_v24 = vpop.f32.mrf.mxu0  ;;  %v8953_v16 = vpop.f32.mrf.mxu1 }
 0x52d   : > { %v3581_v53 = vpop.f32.mrf.mxu0 }
 0x52e   : > { %v3588_v54 = vsel %vm3273_vm2, %v3581_v53, -inf }
 0x52f   : > { %3589 = vmax.xlane.f32.xlu1 %v3588_v54  ;;  %v6526_v25 = vpop.f32.mrf.mxu0 }
 0x531   : > { %v3584_v26 = vpop.f32.mrf.mxu0 }
 0x532   : > { %v3591_v27 = vsel %vm3273_vm2, %v3584_v26, -inf }
 0x533   : > { %3592 = vmax.xlane.f32.xlu0 %v3591_v27  ;;  %v6527_v30 = vpop.f32.mrf.mxu0  ;;  %v3860_v27 = vsel %vm3225_vm1, %v8783_v8, 0 }
 0x534   : > { %v3192_v30 = vld [vmem:[%s9561_s4] sm:$0xf] }
 0x5b8   : > { %v3590_v31 = vpop.xlane.xlu1 %3589 }
 0x5b9   : > { %v3594_v28 = vsub.f32 %v3581_v53, %v3590_v31  ;;  %v3197_v31 = vrot.slane %v3192_v30, %v8765_v41 }
 0x5bb   : > { %v3596_v33 = vmul.f32 1.442695, %v3594_v28  ;;  %v3205_v28 = vrot.slane %v3192_v30, %v8545_v55 }
 0x5bc   : > { %v3593_v34 = vpop.xlane.xlu0 %3592 }
 0x5bd   : > { %7394 = vpow2.f32 %v3596_v33  ;;  %v3595_v35 = vsub.f32 %v3584_v26, %v3593_v34  ;;  %v3201_v33 = vrot.slane %v3192_v30, %v8346_v29  ;;  %v8974_v34 = vrot.slane %v3192_v30, %v8560_v60 }
 0x5bf   : > { %v3598_v38 = vmul.f32 1.442695, %v3595_v35  ;;  %v7454_v35 = vld [vmem:[%s7664_s10] sm:$0xff] }
 0x5c1   : > { %7396 = vpow2.f32 %v3598_v38  ;;  %v7455_v38 = vld [vmem:[%s7664_s10 + $0x10] sm:$0xff] }
 0x5ca   : > { %v7395_v43 = vpop.eup %7394 }
 0x5cb   : > { %v3600_v5 = vsel %vm3273_vm2, %v7395_v43, 0.0 }
 0x5cc   : > { %3601 = vadd.xlane.f32.xlu0 %v3600_v5  ;;  %v7456_v5 = vld [vmem:[%s7664_s10 + $0x8] sm:$0xff] }
 0x5ce   : > { %v7397_v44 = vpop.eup %7396 }
 0x5cf   : > { %v3603_v45 = vsel %vm3273_vm2, %v7397_v44, 0.0 }
 0x5d0   : > { %3604 = vadd.xlane.f32.xlu1 %v3603_v45  ;;  %v7457_v45 = vld [vmem:[%s7664_s10 + $0x18] sm:$0xff] }
 0x5d1   : > { %v3217_v48 = vadd.f32 %v7457_v45, %v8974_v34  ;;  %v7250_v45 = vld [vmem:[%s9560_s3 + $0x144] ss:$16 sps:$4 sm:$0xff]  }
 0x5e2   : > { %3612 = vrot.lane.b32.xlu0 %v8804_v13, %s7472_s11  ;;  %v7224_v13 = vld [vmem:[%s9560_s3 + $0xc0] ss:$16 sps:$4 sm:$0xff]  }
 0x5e3   : > { %3770 = vmatpush1.bf16.msra.mxu0 %v7224_v13  ;;  %v7458_v13 = vld [vmem:[%s7664_s10 + $0x20] sm:$0xff] }
 0x5e4   : > { %3771 = vmatprep.subr.bf16.mxu0 %v7232_v50  ;;  %v3218_v50 = vadd.f32 %v7458_v13, %v3197_v31 }
 0x5e6   : > { %4165 = vrot.lane.b32.xlu0 %v8422_v3, %s7472_s11 }
 0x5e7   : > { %3772 = vmatpush1.bf16.msra.mxu0 %v7230_v51  ;;  %v7459_v51 = vld [vmem:[%s7664_s10 + $0x30] sm:$0xff] }
 0x5e8   : > { %3773 = vmatprep.subr.bf16.mxu0 %v7238_v46 }
 0x5eb   : > { %3774 = vmatpush1.bf16.msra.mxu0 %v7236_v47 }
 0x5ec   : > { %6534 = vmatprep.subr.bf16.mxu0 %v7470_v39 }
 0x655   : > { %v3602_v52 = vpop.xlane.xlu0 %3601 }
 0x656   : > { %7398 = vrcp.f32 %v3602_v52  ;;  %v3220_v52 = vadd.f32 %v7459_v51, %v3205_v28 }
 0x659   : > { %v3605_v57 = vpop.xlane.xlu1 %3604  ;;  %v3613_v58 = vpop.permute.xlu0 %3612 }
 0x65a   : > { %7400 = vrcp.f32 %v3605_v57  ;;  %6529 = vmatpush3.bf16.msra.mxu1 %v3613_v58 }
 0x65b   : > { %3810 = vmatprep.subr.bf16.mxu1 %v7223_v56  ;;  %v7460_v56 = vld [vmem:[%s7664_s10 + $0x28] sm:$0xff] }
 0x65c   : > { %v3219_v57 = vadd.f32 %v7460_v56, %v3201_v33 }
 0x65e   : > { %v3532_v47 = vadd.f32 %v8891_v24, %v3219_v57  ;;  %v7245_v57 = vld [vmem:[%s9560_s3 + $0x168] ss:$16 sps:$4 sm:$0xff]  }
 0x663   : > { %v7399_v12 = vpop.eup %7398 }
 0x664   : > { %v3608_v61 = vmul.f32 %v7399_v12, %v7395_v43  ;;  %v3216_v43 = vadd.f32 %v7455_v38, %v3205_v28 }
 0x666   : > { %v3529_v49 = vadd.f32 %v3518_v14, %v3216_v43  ;;  %v7242_v43 = vld [vmem:[%s9560_s3 + $0x160] ss:$16 sps:$4 sm:$0xff]  }
 0x667   : > { %v7401_v59 = vpop.eup %7400 }
 0x668   : > { %v3609_v63 = vmul.f32 %v7401_v59, %v7397_v44  ;;  %v3215_v44 = vadd.f32 %v7456_v5, %v3201_v33  ;;  %v7244_v5 = vld [vmem:[%s9560_s3 + $0x164] ss:$16 sps:$4 sm:$0xff]  }
 0x66a   : > { %v3610_v1 = vpack.c.bf16 %v3609_v63, %v3608_v61  ;;  %v3528_v59 = vadd.f32 %v8887_v21, %v3215_v44  ;;  %v3530_v61 = vadd.f32 %v3520_v37, %v3217_v48  ;;  %v7247_v44 = vld [vmem:[%s9560_s3 + $0x16c] ss:$16 sps:$4 sm:$0xff]   ;;  %v7256_v48 = vld [vmem:[%s9560_s3 + $0x124] ss:$16 sps:$4 sm:$0xff]  }
 0x66c   : > { %6531 = vmatmul.mubr.msk.bf16.vlgmr.msra.gmra.mxu1 %vm3273_vm2, %v3610_v1 }
 0x66d   : > { %3811 = vmatpush1.bf16.msra.mxu1 %v7221_v0  ;;  %3834 = vmatprep.mubr.bf16.mxu1 %v7473_v9 }
 0x66e   : > { %3812 = vmatprep.subr.bf16.mxu1 %v7229_v2 }
 0x671   : > { %3813 = vmatpush1.bf16.msra.mxu1 %v7227_v4  ;;  %v3533_v4 = vadd.f32 %v3522_v15, %v3220_v52 }
 0x672   : > { %3814 = vmatprep.subr.bf16.mxu1 %v7235_v6 }
 0x675   : > { %3815 = vmatpush1.bf16.msra.mxu1 %v7233_v7 }
 0x676   : > { %3816 = vmatprep.subr.bf16.mxu1 %v7241_v36 }
 0x679   : > { %3817 = vmatpush1.bf16.msra.mxu1 %v7239_v11 }
 0x67a   : > { %6540 = vmatprep.subr.bf16.mxu1 %v7470_v39 }
 0x72c   : > { %v3652_v17 = vpop.f32.mrf.mxu1 }
 0x72e   : > { %v6532_v53 = vpop.f32.mrf.mxu1 }
 0x730   : > { %v3655_v54 = vpop.f32.mrf.mxu1 }
 0x731   : > { %v3659_v25 = vpack.c.bf16 %v3655_v54, %v3652_v17 }
 0x732   : > { %v6533_v26 = vpop.f32.mrf.mxu1 }
 0x733   : > { %6352 = vmatmul.mubr.msk.bf16.vlgmr.msra.gmra.mxu0 %vm3225_vm1, %v3659_v25  ;;  %6353 = vmatmul.mubr.msk.bf16.vlgmr.msra.gmra.mxu1 %vm3225_vm1, %v3659_v25 }
 0x734   : > { %6535 = vmatpush3.bf16.xpose.msra.mxu0 %v3860_v27  ;;  %6541 = vmatpush3.bf16.msra.mxu1 %v8806_v62 }
 0x735   : > { %6536 = vmatprep.mubr.msk.bf16.mxu0 %vm7471_vm0, %v7470_v39  ;;  %6542 = vmatprep.mubr.msk.bf16.mxu1 %vm7471_vm0, %v7470_v39 }
 0x736   : > { %4078 = vmatprep.subr.bf16.mxu0 %v7244_v5  ;;  %4121 = vmatprep.subr.bf16.mxu1 %v7247_v44 }
 0x73b   : > { %6537 = vmatmul.mubr.msk.bf16.vlgmr.msra.gmra.mxu0 %vm3225_vm1, %v8422_v3  ;;  %v3214_v3 = vadd.f32 %v7454_v35, %v3197_v31 }
 0x73c   : > { %4102 = vmatprep.mubr.bf16.mxu0 %v7473_v9  ;;  %4079 = vmatpush1.bf16.msra.mxu0 %v7242_v43 }
 0x73d   : > { %v3527_v10 = vadd.f32 %v8885_v19, %v3214_v3  ;;  %v3531_v19 = vadd.f32 %v8889_v22, %v3218_v50  ;;  %4080 = vmatprep.subr.bf16.mxu0 %v7250_v45 }
 0x7f3   : > { %v3793_v58 = vpop.f32.mrf.mxu0  ;;  %v3836_v12 = vpop.f32.mrf.mxu1 }
 0x7f4   : > { %v8986_v63 = vadd.f32 %v3793_v58, %v3527_v10  ;;  %v8988_v0 = vadd.f32 %v3836_v12, %v3529_v49  ;;  %v7254_v10 = vld [vmem:[%s9560_s3 + $0x120] ss:$16 sps:$4 sm:$0xff]   ;;  %v7253_v12 = vld [vmem:[%s9560_s3 + $0x14c] ss:$16 sps:$4 sm:$0xff]  }
 0x7f5   : > { %v3795_v1 = vpop.f32.mrf.mxu0  ;;  %v3838_v2 = vpop.f32.mrf.mxu1 }
 0x7f6   : > { %v8991_v6 = vadd.f32 %v3795_v1, %v3528_v59  ;;  %v8993_v7 = vadd.f32 %v3838_v2, %v3530_v61  ;;  %v7251_v59 = vld [vmem:[%s9560_s3 + $0x148] ss:$16 sps:$4 sm:$0xff]   ;;  %v7259_v61 = vld [vmem:[%s9560_s3 + $0x12c] ss:$16 sps:$4 sm:$0xff]   ;;  %v7262_v2 = vld [vmem:[%s9560_s3 + $0x104] ss:$16 sps:$4 sm:$0xff]  }
 0x7f7   : > { %v3797_v46 = vpop.f32.mrf.mxu0  ;;  %v3840_v36 = vpop.f32.mrf.mxu1  ;;  %v7257_v1 = vld [vmem:[%s9560_s3 + $0x128] ss:$16 sps:$4 sm:$0xff]  }
 0x7f8   : > { %v8996_v11 = vadd.f32 %v3797_v46, %v3531_v19  ;;  %v8998_v21 = vadd.f32 %v3840_v36, %v3533_v4  ;;  %v7260_v19 = vld [vmem:[%s9560_s3 + $0x100] ss:$16 sps:$4 sm:$0xff]   ;;  %v7263_v4 = vld [vmem:[%s9560_s3 + $0x108] ss:$16 sps:$4 sm:$0xff]   ;;  %v7265_v46 = vld [vmem:[%s9560_s3 + $0x10c] ss:$16 sps:$4 sm:$0xff]  }
 0x7f9   : > { %v3799_v14 = vpop.f32.mrf.mxu0  ;;  %v9060_v36 = vpop.f32.mrf.mxu1 }
 0x7fa   : > { %v9000_v37 = vadd.f32 %v3799_v14, %v3532_v47 }
 0x7fb   : > { %v3896_v17 = vpop.f32.mrf.mxu0 }
 0x7fc   : > { %v3903_v53 = vsel %vm3273_vm2, %v3896_v17, -inf }
 0x7fd   : > { %3904 = vmax.xlane.f32.xlu1 %v3903_v53  ;;  %v6538_v22 = vpop.f32.mrf.mxu0 }
 0x7ff   : > { %v3899_v15 = vpop.f32.mrf.mxu0 }
 0x800   : > { %v3906_v54 = vsel %vm3273_vm2, %v3899_v15, -inf }
 0x801   : > { %3907 = vmax.xlane.f32.xlu1 %v3906_v54  ;;  %v6539_v25 = vpop.f32.mrf.mxu0 }
 0x802   : > { %v4166_v25 = vpop.permute.xlu0 %4165 }
 0x886   : > { %v3905_v26 = vpop.xlane.xlu1 %3904 }
 0x887   : > { %v3909_v27 = vsub.f32 %v3896_v17, %v3905_v26 }
 0x889   : > { %v3911_v24 = vmul.f32 1.442695, %v3909_v27 }
 0x88a   : > { %v3908_v30 = vpop.xlane.xlu1 %3907 }
 0x88b   : > { %7402 = vpow2.f32 %v3911_v24  ;;  %v3910_v31 = vsub.f32 %v3899_v15, %v3908_v30 }
 0x88d   : > { %v3913_v28 = vmul.f32 1.442695, %v3910_v31 }
 0x88f   : > { %7404 = vpow2.f32 %v3913_v28 }
 0x898   : > { %v7403_v33 = vpop.eup %7402 }
 0x899   : > { %v3915_v35 = vsel %vm3273_vm2, %v7403_v33, 0.0 }
 0x89a   : > { %3916 = vadd.xlane.f32.xlu1 %v3915_v35 }
 0x89c   : > { %v7405_v3 = vpop.eup %7404 }
 0x89d   : > { %v3918_v38 = vsel %vm3273_vm2, %v7405_v3, 0.0 }
 0x89e   : > { %3919 = vadd.xlane.f32.xlu1 %v3918_v38 }
 0x8af   : > { %4168 = vrot.lane.b32.xlu1 %v8783_v8, %s7472_s11  ;;  %v7248_v8 = vld [vmem:[%s9560_s3 + $0x140] ss:$16 sps:$4 sm:$0xff]  }
 0x8b0   : > { %4081 = vmatpush1.bf16.msra.mxu0 %v7248_v8 }
 0x8b1   : > { %4082 = vmatprep.subr.bf16.mxu0 %v7256_v48 }
 0x8b4   : > { %4083 = vmatpush1.bf16.msra.mxu0 %v7254_v10 }
 0x8b5   : > { %4084 = vmatprep.subr.bf16.mxu0 %v7262_v2 }
 0x8b8   : > { %4085 = vmatpush1.bf16.msra.mxu0 %v7260_v19  ;;  %v7271_v19 = vld [vmem:[%s9560_s3 + $0x1ec] ss:$16 sps:$4 sm:$0xff]  }
 0x8b9   : > { %6546 = vmatprep.subr.bf16.mxu0 %v7470_v39 }
 0x923   : > { %v3917_v49 = vpop.xlane.xlu1 %3916 }
 0x924   : > { %7406 = vrcp.f32 %v3917_v49 }
 0x927   : > { %v3920_v13 = vpop.xlane.xlu1 %3919 }
 0x928   : > { %7408 = vrcp.f32 %v3920_v13 }
 0x92b   : > { %v4169_v17 = vpop.permute.xlu1 %4168 }
 0x92c   : > { %v4174_v54 = vsel %vm3225_vm1, %v4169_v17, 0 }
 0x931   : > { %v7407_v50 = vpop.eup %7406 }
 0x932   : > { %v3923_v52 = vmul.f32 %v7407_v50, %v7403_v33 }
 0x935   : > { %v7409_v51 = vpop.eup %7408 }
 0x936   : > { %v3924_v56 = vmul.f32 %v7409_v51, %v7405_v3 }
 0x938   : > { %v3925_v58 = vpack.c.bf16 %v3924_v56, %v3923_v52 }
 0x93a   : > { %6543 = vmatmul.mubr.msk.bf16.vlgmr.msra.gmra.mxu1 %vm3273_vm2, %v3925_v58  ;;  %v7268_v58 = vld [vmem:[%s9560_s3 + $0x1e4] ss:$16 sps:$4 sm:$0xff]  }
 0x93b   : > { %4122 = vmatpush1.bf16.msra.mxu1 %v7245_v57  ;;  %4145 = vmatprep.mubr.bf16.mxu1 %v7473_v9  ;;  %v7266_v57 = vld [vmem:[%s9560_s3 + $0x1e0] ss:$16 sps:$4 sm:$0xff]  }
 0x93c   : > { %4123 = vmatprep.subr.bf16.mxu1 %v7253_v12  ;;  %v7274_v12 = vld [vmem:[%s9560_s3 + $0x1c4] ss:$16 sps:$4 sm:$0xff]  }
 0x93f   : > { %4124 = vmatpush1.bf16.msra.mxu1 %v7251_v59  ;;  %v7280_v59 = vld [vmem:[%s9560_s3 + $0x1a4] ss:$16 sps:$4 sm:$0xff]  }
 0x940   : > { %4125 = vmatprep.subr.bf16.mxu1 %v7259_v61  ;;  %v7278_v61 = vld [vmem:[%s9560_s3 + $0x1a0] ss:$16 sps:$4 sm:$0xff]  }
 0x943   : > { %4126 = vmatpush1.bf16.msra.mxu1 %v7257_v1 }
 0x944   : > { %4127 = vmatprep.subr.bf16.mxu1 %v7265_v46 }
 0x947   : > { %4128 = vmatpush1.bf16.msra.mxu1 %v7263_v4 }
 0x948   : > { %6552 = vmatprep.subr.bf16.mxu1 %v7470_v39 }
 0x9fa   : > { %v3963_v47 = vpop.f32.mrf.mxu1 }
 0x9fc   : > { %v6544_v14 = vpop.f32.mrf.mxu1 }
 0x9fe   : > { %v3966_v53 = vpop.f32.mrf.mxu1 }
 0x9ff   : > { %v3970_v22 = vpack.c.bf16 %v3966_v53, %v3963_v47  ;;  %v7269_v53 = vld [vmem:[%s9560_s3 + $0x1e8] ss:$16 sps:$4 sm:$0xff]  }
 0xa00   : > { %v6545_v15 = vpop.f32.mrf.mxu1 }
 0xa01   : > { %6372 = vmatmul.mubr.msk.bf16.vlgmr.msra.gmra.mxu0 %vm3225_vm1, %v3970_v22  ;;  %6373 = vmatmul.mubr.msk.bf16.vlgmr.msra.gmra.mxu1 %vm3225_vm1, %v3970_v22  ;;  %v7277_v15 = vld [vmem:[%s9560_s3 + $0x1cc] ss:$16 sps:$4 sm:$0xff]  }
 0xa02   : > { %6547 = vmatpush3.bf16.xpose.msra.mxu0 %v4174_v54  ;;  %6548 = vmatprep.mubr.msk.bf16.mxu0 %vm7471_vm0, %v7470_v39  ;;  %v7275_v54 = vld [vmem:[%s9560_s3 + $0x1c8] ss:$16 sps:$4 sm:$0xff]  }
 0xa03   : > { %6554 = vmatprep.mubr.msk.bf16.mxu1 %vm7471_vm0, %v7470_v39  ;;  %4396 = vmatprep.subr.bf16.mxu0 %v7268_v58 }
 0xa09   : > { %6549 = vmatmul.mubr.msk.bf16.vlgmr.msra.gmra.mxu0 %vm3225_vm1, %v4166_v25  ;;  %v7283_v25 = vld [vmem:[%s9560_s3 + $0x1ac] ss:$16 sps:$4 sm:$0xff]  }
 0xa0a   : > { %4420 = vmatprep.mubr.bf16.mxu0 %v7473_v9  ;;  %4397 = vmatpush1.bf16.msra.mxu0 %v7266_v57 }
 0xa0b   : > { %4398 = vmatprep.subr.bf16.mxu0 %v7274_v12 }
 0xac1   : > { %v4104_v26 = vpop.f32.mrf.mxu0  ;;  %v4147_v27 = vpop.f32.mrf.mxu1 }
 0xac2   : > { %v9072_v24 = vadd.f32 %v4104_v26, %v8986_v63  ;;  %v9075_v30 = vadd.f32 %v4147_v27, %v8988_v0  ;;  %v7281_v26 = vld [vmem:[%s9560_s3 + $0x1a8] ss:$16 sps:$4 sm:$0xff]   ;;  %v7286_v27 = vld [vmem:[%s9560_s3 + $0x184] ss:$16 sps:$4 sm:$0xff]  }
 0xac3   : > { %v4106_v31 = vpop.f32.mrf.mxu0  ;;  %v4149_v28 = vpop.f32.mrf.mxu1 }
 0xac4   : > { %v9078_v33 = vadd.f32 %v4106_v31, %v8991_v6  ;;  %v9081_v35 = vadd.f32 %v4149_v28, %v8993_v7  ;;  %v7289_v31 = vld [vmem:[%s9560_s3 + $0x18c] ss:$16 sps:$4 sm:$0xff]   ;;  %v7284_v28 = vld [vmem:[%s9560_s3 + $0x180] ss:$16 sps:$4 sm:$0xff]  }
 0xac5   : > { %v4108_v3 = vpop.f32.mrf.mxu0  ;;  %v4151_v38 = vpop.f32.mrf.mxu1 }
 0xac6   : > { %v9084_v43 = vadd.f32 %v4108_v3, %v8996_v11  ;;  %v9087_v5 = vadd.f32 %v4151_v38, %v8998_v21  ;;  %v7287_v3 = vld [vmem:[%s9560_s3 + $0x188] ss:$16 sps:$4 sm:$0xff]  }
 0xac7   : > { %v4110_v63 = vpop.f32.mrf.mxu0  ;;  %v9152_v38 = vpop.f32.mrf.mxu1 }
 0xac8   : > { %v9090_v0 = vadd.f32 %v4110_v63, %v9000_v37 }
 0xac9   : > { %v4210_v44 = vpop.f32.mrf.mxu0 }
 0xaca   : > { %v4217_v45 = vsel %vm3273_vm2, %v4210_v44, -inf }
 0xacb   : > { %4218 = vmax.xlane.f32.xlu0 %v4217_v45  ;;  %v6550_v6 = vpop.f32.mrf.mxu0 }
 0xacd   : > { %v4213_v8 = vpop.f32.mrf.mxu0 }
 0xace   : > { %v4220_v7 = vsel %vm3273_vm2, %v4213_v8, -inf }
 0xacf   : > { %4221 = vmax.xlane.f32.xlu1 %v4220_v7  ;;  %v6551_v48 = vpop.f32.mrf.mxu0  ;;  %v4489_v7 = vsel %vm3225_vm1, %v8795_v23, 0 }
 0xb54   : > { %v4219_v10 = vpop.xlane.xlu0 %4218 }
 0xb55   : > { %v4223_v11 = vsub.f32 %v4210_v44, %v4219_v10 }
 0xb57   : > { %v4225_v49 = vmul.f32 1.442695, %v4223_v11 }
 0xb58   : > { %v4222_v13 = vpop.xlane.xlu1 %4221 }
 0xb59   : > { %7410 = vpow2.f32 %v4225_v49  ;;  %v4224_v21 = vsub.f32 %v4213_v8, %v4222_v13 }
 0xb5b   : > { %v4227_v50 = vmul.f32 1.442695, %v4224_v21 }
 0xb5d   : > { %7412 = vpow2.f32 %v4227_v50 }
 0xb66   : > { %v7411_v37 = vpop.eup %7410 }
 0xb67   : > { %v4229_v51 = vsel %vm3273_vm2, %v7411_v37, 0.0 }
 0xb68   : > { %4230 = vadd.xlane.f32.xlu0 %v4229_v51 }
 0xb6a   : > { %v7413_v52 = vpop.eup %7412 }
 0xb6b   : > { %v4232_v56 = vsel %vm3273_vm2, %v7413_v52, 0.0 }
 0xb6c   : > { %4233 = vadd.xlane.f32.xlu0 %v4232_v56 }
 0xb82   : > { %4241 = vrot.lane.b32.xlu0 %v8806_v62, %s7472_s11  ;;  %v7272_v62 = vld [vmem:[%s9560_s3 + $0x1c0] ss:$16 sps:$4 sm:$0xff]  }
 0xb83   : > { %4399 = vmatpush1.bf16.msra.mxu0 %v7272_v62 }
 0xb84   : > { %4400 = vmatprep.subr.bf16.mxu0 %v7280_v59 }
 0xb86   : > { %4794 = vrot.lane.b32.xlu0 %v8618_v40, %s7472_s11 }
 0xb87   : > { %4401 = vmatpush1.bf16.msra.mxu0 %v7278_v61 }
 0xb88   : > { %4402 = vmatprep.subr.bf16.mxu0 %v7286_v27 }
 0xb8b   : > { %4403 = vmatpush1.bf16.msra.mxu0 %v7284_v28 }
 0xb8c   : > { %6558 = vmatprep.subr.bf16.mxu0 %v7470_v39 }
 0xbf1   : > { %v4231_v1 = vpop.xlane.xlu0 %4230 }
 0xbf2   : > { %7414 = vrcp.f32 %v4231_v1 }
 0xbf5   : > { %v4234_v2 = vpop.xlane.xlu0 %4233 }
 0xbf6   : > { %7416 = vrcp.f32 %v4234_v2 }
 0xbf9   : > { %v4242_v4 = vpop.permute.xlu0 %4241 }
 0xbfa   : > { %6553 = vmatpush3.bf16.msra.mxu1 %v4242_v4 }
 0xbfb   : > { %4439 = vmatprep.subr.bf16.mxu1 %v7271_v19 }
 0xbff   : > { %v7415_v46 = vpop.eup %7414 }
 0xc00   : > { %v4237_v14 = vmul.f32 %v7415_v46, %v7411_v37 }
 0xc03   : > { %v7417_v47 = vpop.eup %7416 }
 0xc04   : > { %v4238_v17 = vmul.f32 %v7417_v47, %v7413_v52  ;;  %v7290_v47 = vld [vmem:[%s9560_s3 + $0x260] ss:$16 sps:$4 sm:$0xff]  }
 0xc06   : > { %v4239_v22 = vpack.c.bf16 %v4238_v17, %v4237_v14  ;;  %v7292_v14 = vld [vmem:[%s9560_s3 + $0x264] ss:$16 sps:$4 sm:$0xff]   ;;  %v7295_v17 = vld [vmem:[%s9560_s3 + $0x26c] ss:$16 sps:$4 sm:$0xff]  }
 0xc08   : > { %6555 = vmatmul.mubr.msk.bf16.vlgmr.msra.gmra.mxu1 %vm3273_vm2, %v4239_v22  ;;  %v7304_v22 = vld [vmem:[%s9560_s3 + $0x224] ss:$16 sps:$4 sm:$0xff]  }
 0xc09   : > { %4440 = vmatpush1.bf16.msra.mxu1 %v7269_v53  ;;  %4463 = vmatprep.mubr.bf16.mxu1 %v7473_v9  ;;  %v7298_v53 = vld [vmem:[%s9560_s3 + $0x244] ss:$16 sps:$4 sm:$0xff]  }
 0xc0a   : > { %4441 = vmatprep.subr.bf16.mxu1 %v7277_v15  ;;  %v7302_v15 = vld [vmem:[%s9560_s3 + $0x220] ss:$16 sps:$4 sm:$0xff]  }
 0xc0d   : > { %4442 = vmatpush1.bf16.msra.mxu1 %v7275_v54 }
 0xc0e   : > { %4443 = vmatprep.subr.bf16.mxu1 %v7283_v25 }
 0xc11   : > { %4444 = vmatpush1.bf16.msra.mxu1 %v7281_v26 }
 0xc12   : > { %4445 = vmatprep.subr.bf16.mxu1 %v7289_v31 }
 0xc15   : > { %4446 = vmatpush1.bf16.msra.mxu1 %v7287_v3  ;;  %v7293_v3 = vld [vmem:[%s9560_s3 + $0x268] ss:$16 sps:$4 sm:$0xff]  }
 0xc16   : > { %6564 = vmatprep.subr.bf16.mxu1 %v7470_v39 }
 0xcc8   : > { %v4281_v63 = vpop.f32.mrf.mxu1 }
 0xcca   : > { %v6556_v44 = vpop.f32.mrf.mxu1 }
 0xccb   : > { %v7301_v44 = vld [vmem:[%s9560_s3 + $0x24c] ss:$16 sps:$4 sm:$0xff]  }
 0xccc   : > { %v4284_v45 = vpop.f32.mrf.mxu1 }
 0xccd   : > { %v4288_v6 = vpack.c.bf16 %v4284_v45, %v4281_v63  ;;  %v7299_v45 = vld [vmem:[%s9560_s3 + $0x248] ss:$16 sps:$4 sm:$0xff]  }
 0xcce   : > { %v6557_v8 = vpop.f32.mrf.mxu1 }
 0xccf   : > { %6392 = vmatmul.mubr.msk.bf16.vlgmr.msra.gmra.mxu0 %vm3225_vm1, %v4288_v6  ;;  %6393 = vmatmul.mubr.msk.bf16.vlgmr.msra.gmra.mxu1 %vm3225_vm1, %v4288_v6  ;;  %v7307_v6 = vld [vmem:[%s9560_s3 + $0x22c] ss:$16 sps:$4 sm:$0xff]   ;;  %v7305_v8 = vld [vmem:[%s9560_s3 + $0x228] ss:$16 sps:$4 sm:$0xff]  }
 0xcd0   : > { %6559 = vmatpush3.bf16.xpose.msra.mxu0 %v4489_v7  ;;  %6565 = vmatpush3.bf16.msra.mxu1 %v8811_v18  ;;  %v7310_v7 = vld [vmem:[%s9560_s3 + $0x204] ss:$16 sps:$4 sm:$0xff]  }
 0xcd1   : > { %6560 = vmatprep.mubr.msk.bf16.mxu0 %vm7471_vm0, %v7470_v39  ;;  %6566 = vmatprep.mubr.msk.bf16.mxu1 %vm7471_vm0, %v7470_v39 }
 0xcd2   : > { %4707 = vmatprep.subr.bf16.mxu0 %v7292_v14  ;;  %4750 = vmatprep.subr.bf16.mxu1 %v7295_v17 }
 0xcd7   : > { %6561 = vmatmul.mubr.msk.bf16.vlgmr.msra.gmra.mxu0 %vm3225_vm1, %v8618_v40 }
 0xcd8   : > { %4731 = vmatprep.mubr.bf16.mxu0 %v7473_v9  ;;  %4708 = vmatpush1.bf16.msra.mxu0 %v7290_v47 }
 0xcd9   : > { %4709 = vmatprep.subr.bf16.mxu0 %v7298_v53 }
 0xd8f   : > { %v4422_v48 = vpop.f32.mrf.mxu0  ;;  %v4465_v10 = vpop.f32.mrf.mxu1 }
 0xd90   : > { %v9167_v11 = vadd.f32 %v4422_v48, %v9072_v24  ;;  %v9170_v49 = vadd.f32 %v4465_v10, %v9075_v30  ;;  %v7308_v48 = vld [vmem:[%s9560_s3 + $0x200] ss:$16 sps:$4 sm:$0xff]   ;;  %v7311_v10 = vld [vmem:[%s9560_s3 + $0x208] ss:$16 sps:$4 sm:$0xff]  }
 0xd91   : > { %v4424_v13 = vpop.f32.mrf.mxu0  ;;  %v4467_v21 = vpop.f32.mrf.mxu1 }
 0xd92   : > { %v9173_v50 = vadd.f32 %v4424_v13, %v9078_v33  ;;  %v9176_v37 = vadd.f32 %v4467_v21, %v9081_v35  ;;  %v7313_v13 = vld [vmem:[%s9560_s3 + $0x20c] ss:$16 sps:$4 sm:$0xff]  }
 0xd93   : > { %v4426_v51 = vpop.f32.mrf.mxu0  ;;  %v4469_v40 = vpop.f32.mrf.mxu1 }
 0xd94   : > { %v9179_v52 = vadd.f32 %v4426_v51, %v9084_v43  ;;  %v9182_v56 = vadd.f32 %v4469_v40, %v9087_v5 }
 0xd95   : > { %v4428_v24 = vpop.f32.mrf.mxu0  ;;  %v9245_v21 = vpop.f32.mrf.mxu1 }
 0xd96   : > { %v9185_v30 = vadd.f32 %v4428_v24, %v9090_v0 }
 0xd97   : > { %v4525_v57 = vpop.f32.mrf.mxu0 }
 0xd98   : > { %v4532_v58 = vsel %vm3273_vm2, %v4525_v57, -inf }
 0xd99   : > { %4533 = vmax.xlane.f32.xlu1 %v4532_v58  ;;  %v6562_v33 = vpop.f32.mrf.mxu0 }
 0xd9b   : > { %v4528_v12 = vpop.f32.mrf.mxu0 }
 0xd9c   : > { %v4535_v35 = vsel %vm3273_vm2, %v4528_v12, -inf }
 0xd9d   : > { %4536 = vmax.xlane.f32.xlu1 %v4535_v35  ;;  %v6563_v62 = vpop.f32.mrf.mxu0  ;;  %v4795_v35 = vpop.permute.xlu0 %4794 }
 0xe22   : > { %v4534_v59 = vpop.xlane.xlu1 %4533 }
 0xe23   : > { %v4538_v43 = vsub.f32 %v4525_v57, %v4534_v59 }
 0xe25   : > { %v4540_v61 = vmul.f32 1.442695, %v4538_v43 }
 0xe26   : > { %v4537_v1 = vpop.xlane.xlu1 %4536 }
 0xe27   : > { %7418 = vpow2.f32 %v4540_v61  ;;  %v4539_v5 = vsub.f32 %v4528_v12, %v4537_v1 }
 0xe29   : > { %v4542_v2 = vmul.f32 1.442695, %v4539_v5 }
 0xe2b   : > { %7420 = vpow2.f32 %v4542_v2 }
 0xe34   : > { %v7419_v0 = vpop.eup %7418 }
 0xe35   : > { %v4544_v19 = vsel %vm3273_vm2, %v7419_v0, 0.0 }
 0xe36   : > { %4545 = vadd.xlane.f32.xlu1 %v4544_v19 }
 0xe38   : > { %v7421_v4 = vpop.eup %7420 }
 0xe39   : > { %v4547_v46 = vsel %vm3273_vm2, %v7421_v4, 0.0 }
 0xe3a   : > { %4548 = vadd.xlane.f32.xlu1 %v4547_v46 }
 0xe4b   : > { %4797 = vrot.lane.b32.xlu1 %v8795_v23, %s7472_s11  ;;  %v7296_v23 = vld [vmem:[%s9560_s3 + $0x240] ss:$16 sps:$4 sm:$0xff]  }
 0xe4c   : > { %4710 = vmatpush1.bf16.msra.mxu0 %v7296_v23 }
 0xe4d   : > { %4711 = vmatprep.subr.bf16.mxu0 %v7304_v22 }
 0xe50   : > { %4712 = vmatpush1.bf16.msra.mxu0 %v7302_v15 }
 0xe51   : > { %4713 = vmatprep.subr.bf16.mxu0 %v7310_v7  ;;  %v7319_v7 = vld [vmem:[%s9560_s3 + $0x2ec] ss:$16 sps:$4 sm:$0xff]  }
 0xe54   : > { %4714 = vmatpush1.bf16.msra.mxu0 %v7308_v48 }
 0xe55   : > { %6570 = vmatprep.subr.bf16.mxu0 %v7470_v39 }
 0xebf   : > { %v4546_v54 = vpop.xlane.xlu1 %4545 }
 0xec0   : > { %7422 = vrcp.f32 %v4546_v54 }
 0xec3   : > { %v4549_v25 = vpop.xlane.xlu1 %4548 }
 0xec4   : > { %7424 = vrcp.f32 %v4549_v25 }
 0xec7   : > { %v4798_v24 = vpop.permute.xlu1 %4797 }
 0xec8   : > { %v4803_v12 = vsel %vm3225_vm1, %v4798_v24, 0  ;;  %v7317_v24 = vld [vmem:[%s9560_s3 + $0x2e8] ss:$16 sps:$4 sm:$0xff]  }
 0xecd   : > { %v7423_v26 = vpop.eup %7422 }
 0xece   : > { %v4552_v31 = vmul.f32 %v7423_v26, %v7419_v0 }
 0xed1   : > { %v7425_v27 = vpop.eup %7424 }
 0xed2   : > { %v4553_v28 = vmul.f32 %v7425_v27, %v7421_v4 }
 0xed4   : > { %v4554_v63 = vpack.c.bf16 %v4553_v28, %v4552_v31  ;;  %v7314_v28 = vld [vmem:[%s9560_s3 + $0x2e0] ss:$16 sps:$4 sm:$0xff]  }
 0xed6   : > { %6567 = vmatmul.mubr.msk.bf16.vlgmr.msra.gmra.mxu1 %vm3273_vm2, %v4554_v63  ;;  %v7322_v63 = vld [vmem:[%s9560_s3 + $0x2c4] ss:$16 sps:$4 sm:$0xff]  }
 0xed7   : > { %4751 = vmatpush1.bf16.msra.mxu1 %v7293_v3  ;;  %4774 = vmatprep.mubr.bf16.mxu1 %v7473_v9  ;;  %v7316_v3 = vld [vmem:[%s9560_s3 + $0x2e4] ss:$16 sps:$4 sm:$0xff]  }
 0xed8   : > { %4752 = vmatprep.subr.bf16.mxu1 %v7301_v44  ;;  %v7328_v44 = vld [vmem:[%s9560_s3 + $0x2a4] ss:$16 sps:$4 sm:$0xff]  }
 0xedb   : > { %4753 = vmatpush1.bf16.msra.mxu1 %v7299_v45  ;;  %v7326_v45 = vld [vmem:[%s9560_s3 + $0x2a0] ss:$16 sps:$4 sm:$0xff]  }
 0xedc   : > { %4754 = vmatprep.subr.bf16.mxu1 %v7307_v6 }
 0xedf   : > { %4755 = vmatpush1.bf16.msra.mxu1 %v7305_v8 }
 0xee0   : > { %4756 = vmatprep.subr.bf16.mxu1 %v7313_v13 }
 0xee3   : > { %4757 = vmatpush1.bf16.msra.mxu1 %v7311_v10 }
 0xee4   : > { %6576 = vmatprep.subr.bf16.mxu1 %v7470_v39 }
 0xf96   : > { %v4592_v51 = vpop.f32.mrf.mxu1 }
 0xf98   : > { %v6568_v40 = vpop.f32.mrf.mxu1 }
 0xf9a   : > { %v4595_v57 = vpop.f32.mrf.mxu1 }
 0xf9b   : > { %v4599_v58 = vpack.c.bf16 %v4595_v57, %v4592_v51 }
 0xf9c   : > { %v6569_v33 = vpop.f32.mrf.mxu1 }
 0xf9d   : > { %6412 = vmatmul.mubr.msk.bf16.vlgmr.msra.gmra.mxu0 %vm3225_vm1, %v4599_v58  ;;  %6413 = vmatmul.mubr.msk.bf16.vlgmr.msra.gmra.mxu1 %vm3225_vm1, %v4599_v58  ;;  %v7325_v58 = vld [vmem:[%s9560_s3 + $0x2cc] ss:$16 sps:$4 sm:$0xff]   ;;  %v7323_v33 = vld [vmem:[%s9560_s3 + $0x2c8] ss:$16 sps:$4 sm:$0xff]  }
 0xf9e   : > { %6571 = vmatpush3.bf16.xpose.msra.mxu0 %v4803_v12  ;;  %6572 = vmatprep.mubr.msk.bf16.mxu0 %vm7471_vm0, %v7470_v39  ;;  %v7331_v12 = vld [vmem:[%s9560_s3 + $0x2ac] ss:$16 sps:$4 sm:$0xff]  }
 0xf9f   : > { %6578 = vmatprep.mubr.msk.bf16.mxu1 %vm7471_vm0, %v7470_v39  ;;  %5025 = vmatprep.subr.bf16.mxu0 %v7316_v3 }
 0xfa5   : > { %6573 = vmatmul.mubr.msk.bf16.vlgmr.msra.gmra.mxu0 %vm3225_vm1, %v4795_v35  ;;  %v7329_v35 = vld [vmem:[%s9560_s3 + $0x2a8] ss:$16 sps:$4 sm:$0xff]  }
 0xfa6   : > { %5049 = vmatprep.mubr.bf16.mxu0 %v7473_v9  ;;  %5026 = vmatpush1.bf16.msra.mxu0 %v7314_v28 }
 0xfa7   : > { %5027 = vmatprep.subr.bf16.mxu0 %v7322_v63 }
0x105d   : > { %v4733_v62 = vpop.f32.mrf.mxu0  ;;  %v4776_v59 = vpop.f32.mrf.mxu1 }
0x105e   : > { %v9257_v43 = vadd.f32 %v4733_v62, %v9167_v11  ;;  %v9260_v61 = vadd.f32 %v4776_v59, %v9170_v49  ;;  %v7334_v62 = vld [vmem:[%s9560_s3 + $0x284] ss:$16 sps:$4 sm:$0xff]   ;;  %v7337_v59 = vld [vmem:[%s9560_s3 + $0x28c] ss:$16 sps:$4 sm:$0xff]  }
0x105f   : > { %v4735_v1 = vpop.f32.mrf.mxu0  ;;  %v4778_v5 = vpop.f32.mrf.mxu1 }
0x1060   : > { %v9263_v2 = vadd.f32 %v4735_v1, %v9173_v50  ;;  %v9266_v0 = vadd.f32 %v4778_v5, %v9176_v37  ;;  %v7332_v1 = vld [vmem:[%s9560_s3 + $0x280] ss:$16 sps:$4 sm:$0xff]   ;;  %v7335_v5 = vld [vmem:[%s9560_s3 + $0x288] ss:$16 sps:$4 sm:$0xff]  }
0x1061   : > { %v4737_v19 = vpop.f32.mrf.mxu0  ;;  %v4780_v4 = vpop.f32.mrf.mxu1 }
0x1062   : > { %v9269_v46 = vadd.f32 %v4737_v19, %v9179_v52  ;;  %v9272_v47 = vadd.f32 %v4780_v4, %v9182_v56 }
0x1063   : > { %v4739_v11 = vpop.f32.mrf.mxu0  ;;  %v9337_v19 = vpop.f32.mrf.mxu1 }
0x1064   : > { %v9275_v49 = vadd.f32 %v4739_v11, %v9185_v30 }
0x1065   : > { %v4839_v14 = vpop.f32.mrf.mxu0 }
0x1066   : > { %v4846_v17 = vsel %vm3273_vm2, %v4839_v14, -inf }
0x1067   : > { %4847 = vmax.xlane.f32.xlu0 %v4846_v17  ;;  %v6574_v50 = vpop.f32.mrf.mxu0 }
0x1069   : > { %v4842_v53 = vpop.f32.mrf.mxu0 }
0x106a   : > { %v4849_v37 = vsel %vm3273_vm2, %v4842_v53, -inf }
0x106b   : > { %4850 = vmax.xlane.f32.xlu1 %v4849_v37  ;;  %v6575_v23 = vpop.f32.mrf.mxu0 }
0x10f0   : > { %v4848_v22 = vpop.xlane.xlu0 %4847 }
0x10f1   : > { %v4852_v52 = vsub.f32 %v4839_v14, %v4848_v22 }
0x10f3   : > { %v4854_v15 = vmul.f32 1.442695, %v4852_v52 }
0x10f4   : > { %v4851_v54 = vpop.xlane.xlu1 %4850 }
0x10f5   : > { %7426 = vpow2.f32 %v4854_v15  ;;  %v4853_v56 = vsub.f32 %v4842_v53, %v4851_v54  ;;  %v5118_v53 = vsel %vm3225_vm1, %v8797_v32, 0 }
0x10f7   : > { %v4856_v25 = vmul.f32 1.442695, %v4853_v56 }
0x10f9   : > { %7428 = vpow2.f32 %v4856_v25 }
0x1102   : > { %v7427_v30 = vpop.eup %7426 }
0x1103   : > { %v4858_v26 = vsel %vm3273_vm2, %v7427_v30, 0.0 }
0x1104   : > { %4859 = vadd.xlane.f32.xlu0 %v4858_v26 }
0x1106   : > { %v7429_v27 = vpop.eup %7428 }
0x1107   : > { %v4861_v31 = vsel %vm3273_vm2, %v7429_v27, 0.0 }
0x1108   : > { %4862 = vadd.xlane.f32.xlu0 %v4861_v31 }
0x111e   : > { %4870 = vrot.lane.b32.xlu0 %v8811_v18, %s7472_s11  ;;  %v7320_v18 = vld [vmem:[%s9560_s3 + $0x2c0] ss:$16 sps:$4 sm:$0xff]  }
0x111f   : > { %5028 = vmatpush1.bf16.msra.mxu0 %v7320_v18 }
0x1120   : > { %5029 = vmatprep.subr.bf16.mxu0 %v7328_v44 }
0x1122   : > { %5426 = vrot.lane.b32.xlu0 %v8797_v32, %s7472_s11 }
0x1123   : > { %5030 = vmatpush1.bf16.msra.mxu0 %v7326_v45 }
0x1124   : > { %5031 = vmatprep.subr.bf16.mxu0 %v7334_v62 }
0x1127   : > { %5032 = vmatpush1.bf16.msra.mxu0 %v7332_v1  ;;  %v7341_v1 = vld [vmem:[%s9560_s3 + $0x368] ss:$16 sps:$4 sm:$0xff]  }
0x1128   : > { %6582 = vmatprep.subr.bf16.mxu0 %v7470_v39 }
0x118d   : > { %v4860_v6 = vpop.xlane.xlu0 %4859 }
0x118e   : > { %7430 = vrcp.f32 %v4860_v6 }
0x1191   : > { %v4863_v8 = vpop.xlane.xlu0 %4862 }
0x1192   : > { %7432 = vrcp.f32 %v4863_v8 }
0x1195   : > { %v4871_v48 = vpop.permute.xlu0 %4870 }
0x1196   : > { %6577 = vmatpush3.bf16.msra.mxu1 %v4871_v48 }
0x1197   : > { %5068 = vmatprep.subr.bf16.mxu1 %v7319_v7 }
0x119b   : > { %v7431_v10 = vpop.eup %7430 }
0x119c   : > { %v4866_v51 = vmul.f32 %v7431_v10, %v7427_v30  ;;  %v7338_v10 = vld [vmem:[%s9560_s3 + $0x360] ss:$16 sps:$4 sm:$0xff]  }
0x119f   : > { %v7433_v13 = vpop.eup %7432 }
0x11a0   : > { %v4867_v40 = vmul.f32 %v7433_v13, %v7429_v27  ;;  %v7340_v13 = vld [vmem:[%s9560_s3 + $0x364] ss:$16 sps:$4 sm:$0xff]  }
0x11a2   : > { %v4868_v57 = vpack.c.bf16 %v4867_v40, %v4866_v51  ;;  %v7343_v51 = vld [vmem:[%s9560_s3 + $0x36c] ss:$16 sps:$4 sm:$0xff]   ;;  %v7346_v40 = vld [vmem:[%s9560_s3 + $0x344] ss:$16 sps:$4 sm:$0xff]  }
0x11a4   : > { %6579 = vmatmul.mubr.msk.bf16.vlgmr.msra.gmra.mxu1 %vm3273_vm2, %v4868_v57  ;;  %v7350_v57 = vld [vmem:[%s9560_s3 + $0x320] ss:$16 sps:$4 sm:$0xff]  }
0x11a5   : > { %5069 = vmatpush1.bf16.msra.mxu1 %v7317_v24  ;;  %5092 = vmatprep.mubr.bf16.mxu1 %v7473_v9  ;;  %v7352_v24 = vld [vmem:[%s9560_s3 + $0x324] ss:$16 sps:$4 sm:$0xff]  }
0x11a6   : > { %5070 = vmatprep.subr.bf16.mxu1 %v7325_v58 }
0x11a9   : > { %5071 = vmatpush1.bf16.msra.mxu1 %v7323_v33 }
0x11aa   : > { %5072 = vmatprep.subr.bf16.mxu1 %v7331_v12 }
0x11ad   : > { %5073 = vmatpush1.bf16.msra.mxu1 %v7329_v35 }
0x11ae   : > { %5074 = vmatprep.subr.bf16.mxu1 %v7337_v59 }
0x11b1   : > { %5075 = vmatpush1.bf16.msra.mxu1 %v7335_v5 }
0x11b2   : > { %6588 = vmatprep.subr.bf16.mxu1 %v7470_v39 }
0x1264   : > { %v4910_v4 = vpop.f32.mrf.mxu1 }
0x1266   : > { %v6580_v11 = vpop.f32.mrf.mxu1 }
0x1267   : > { %v7347_v11 = vld [vmem:[%s9560_s3 + $0x348] ss:$16 sps:$4 sm:$0xff]  }
0x1268   : > { %v4913_v14 = vpop.f32.mrf.mxu1 }
0x1269   : > { %v4917_v17 = vpack.c.bf16 %v4913_v14, %v4910_v4  ;;  %v7349_v4 = vld [vmem:[%s9560_s3 + $0x34c] ss:$16 sps:$4 sm:$0xff]  }
0x126a   : > { %v6581_v50 = vpop.f32.mrf.mxu1  ;;  %v7355_v14 = vld [vmem:[%s9560_s3 + $0x32c] ss:$16 sps:$4 sm:$0xff]  }
0x126b   : > { %6432 = vmatmul.mubr.msk.bf16.vlgmr.msra.gmra.mxu0 %vm3225_vm1, %v4917_v17  ;;  %6433 = vmatmul.mubr.msk.bf16.vlgmr.msra.gmra.mxu1 %vm3225_vm1, %v4917_v17  ;;  %v7353_v17 = vld [vmem:[%s9560_s3 + $0x328] ss:$16 sps:$4 sm:$0xff]   ;;  %v7358_v50 = vld [vmem:[%s9560_s3 + $0x304] ss:$16 sps:$4 sm:$0xff]  }
0x126c   : > { %6583 = vmatpush3.bf16.xpose.msra.mxu0 %v5118_v53  ;;  %6589 = vmatpush3.bf16.msra.mxu1 %v8813_v20  ;;  %v7356_v53 = vld [vmem:[%s9560_s3 + $0x300] ss:$16 sps:$4 sm:$0xff]  }
0x126d   : > { %6584 = vmatprep.mubr.msk.bf16.mxu0 %vm7471_vm0, %v7470_v39  ;;  %6590 = vmatprep.mubr.msk.bf16.mxu1 %vm7471_vm0, %v7470_v39 }
0x126e   : > { %5336 = vmatprep.subr.bf16.mxu0 %v7340_v13  ;;  %5379 = vmatprep.subr.bf16.mxu1 %v7343_v51 }
0x1273   : > { %6585 = vmatmul.mubr.msk.bf16.vlgmr.msra.gmra.mxu0 %vm3225_vm1, %v8620_v42 }
0x1274   : > { %5360 = vmatprep.mubr.bf16.mxu0 %v7473_v9  ;;  %5337 = vmatpush1.bf16.msra.mxu0 %v7338_v10 }
0x1275   : > { %5338 = vmatprep.subr.bf16.mxu0 %v7346_v40 }
0x132b   : > { %v5051_v37 = vpop.f32.mrf.mxu0  ;;  %v5094_v23 = vpop.f32.mrf.mxu1 }
0x132c   : > { %v9352_v22 = vadd.f32 %v5051_v37, %v9257_v43  ;;  %v9355_v32 = vadd.f32 %v5094_v23, %v9260_v61  ;;  %v7359_v37 = vld [vmem:[%s9560_s3 + $0x308] ss:$16 sps:$4 sm:$0xff]   ;;  %v7361_v23 = vld [vmem:[%s9560_s3 + $0x30c] ss:$16 sps:$4 sm:$0xff]  }
0x132d   : > { %v5053_v52 = vpop.f32.mrf.mxu0  ;;  %v5096_v15 = vpop.f32.mrf.mxu1 }
0x132e   : > { %v9358_v54 = vadd.f32 %v5053_v52, %v9263_v2  ;;  %v9361_v56 = vadd.f32 %v5096_v15, %v9266_v0 }
0x132f   : > { %v5055_v25 = vpop.f32.mrf.mxu0  ;;  %v5098_v30 = vpop.f32.mrf.mxu1 }
0x1330   : > { %v9364_v26 = vadd.f32 %v5055_v25, %v9269_v46  ;;  %v9367_v27 = vadd.f32 %v5098_v30, %v9272_v47  ;;  %v5427_v30 = vpop.permute.xlu0 %5426 }
0x1331   : > { %v5057_v43 = vpop.f32.mrf.mxu0  ;;  %v9430_v52 = vpop.f32.mrf.mxu1 }
0x1332   : > { %v9370_v61 = vadd.f32 %v5057_v43, %v9275_v49 }
0x1333   : > { %v5154_v31 = vpop.f32.mrf.mxu0 }
0x1334   : > { %v5161_v28 = vsel %vm3273_vm2, %v5154_v31, -inf }
0x1335   : > { %5162 = vmax.xlane.f32.xlu1 %v5161_v28  ;;  %v6586_v2 = vpop.f32.mrf.mxu0 }
0x1336   : > { %v5432_v2 = vsel %vm3225_vm1, %v5427_v30, 0  ;;  %v7373_v30 = vld [vmem:[%s9560_s3 + $0x3cc] ss:$16 sps:$4 sm:$0xff]  }
0x1337   : > { %v5157_v3 = vpop.f32.mrf.mxu0 }
0x1338   : > { %v5164_v0 = vsel %vm3273_vm2, %v5157_v3, -inf }
0x1339   : > { %5165 = vmax.xlane.f32.xlu1 %v5164_v0  ;;  %v6587_v63 = vpop.f32.mrf.mxu0 }
0x13be   : > { %v5163_v18 = vpop.xlane.xlu1 %5162 }
0x13bf   : > { %v5167_v46 = vsub.f32 %v5154_v31, %v5163_v18 }
0x13c1   : > { %v5169_v44 = vmul.f32 1.442695, %v5167_v46 }
0x13c2   : > { %v5166_v45 = vpop.xlane.xlu1 %5165 }
0x13c3   : > { %7434 = vpow2.f32 %v5169_v44  ;;  %v5168_v47 = vsub.f32 %v5157_v3, %v5166_v45 }
0x13c5   : > { %v5171_v6 = vmul.f32 1.442695, %v5168_v47 }
0x13c7   : > { %7436 = vpow2.f32 %v5171_v6 }
0x13d0   : > { %v7435_v49 = vpop.eup %7434 }
0x13d1   : > { %v5173_v8 = vsel %vm3273_vm2, %v7435_v49, 0.0 }
0x13d2   : > { %5174 = vadd.xlane.f32.xlu1 %v5173_v8 }
0x13d4   : > { %v7437_v7 = vpop.eup %7436 }
0x13d5   : > { %v5176_v48 = vsel %vm3273_vm2, %v7437_v7, 0.0 }
0x13d6   : > { %5177 = vadd.xlane.f32.xlu1 %v5176_v48 }
0x13e7   : > { %5423 = vrot.lane.b32.xlu1 %v8620_v42, %s7472_s11  ;;  %v7344_v42 = vld [vmem:[%s9560_s3 + $0x340] ss:$16 sps:$4 sm:$0xff]  }
0x13e8   : > { %5339 = vmatpush1.bf16.msra.mxu0 %v7344_v42 }
0x13e9   : > { %5340 = vmatprep.subr.bf16.mxu0 %v7352_v24 }
0x13ec   : > { %5341 = vmatpush1.bf16.msra.mxu0 %v7350_v57 }
0x13ed   : > { %5342 = vmatprep.subr.bf16.mxu0 %v7358_v50 }
0x13f0   : > { %5343 = vmatpush1.bf16.msra.mxu0 %v7356_v53 }
0x13f1   : > { %6594 = vmatprep.subr.bf16.mxu0 %v7470_v39 }
0x145b   : > { %v5175_v58 = vpop.xlane.xlu1 %5174 }
0x145c   : > { %7438 = vrcp.f32 %v5175_v58 }
0x145f   : > { %v5178_v33 = vpop.xlane.xlu1 %5177 }
0x1460   : > { %7440 = vrcp.f32 %v5178_v33 }
0x1463   : > { %v5424_v3 = vpop.permute.xlu1 %5423 }
0x1469   : > { %v7439_v12 = vpop.eup %7438 }
0x146a   : > { %v5181_v62 = vmul.f32 %v7439_v12, %v7435_v49 }
0x146d   : > { %v7441_v35 = vpop.eup %7440 }
0x146e   : > { %v5182_v59 = vmul.f32 %v7441_v35, %v7437_v7  ;;  %v7362_v35 = vld [vmem:[%s9560_s3 + $0x3e0] ss:$16 sps:$4 sm:$0xff]  }
0x1470   : > { %v5183_v5 = vpack.c.bf16 %v5182_v59, %v5181_v62  ;;  %v7364_v62 = vld [vmem:[%s9560_s3 + $0x3e4] ss:$16 sps:$4 sm:$0xff]  }
0x1471   : > { %v7370_v59 = vld [vmem:[%s9560_s3 + $0x3c4] ss:$16 sps:$4 sm:$0xff]  }
0x1472   : > { %6591 = vmatmul.mubr.msk.bf16.vlgmr.msra.gmra.mxu1 %vm3273_vm2, %v5183_v5  ;;  %v7374_v5 = vld [vmem:[%s9560_s3 + $0x3a0] ss:$16 sps:$4 sm:$0xff]  }
0x1473   : > { %5380 = vmatpush1.bf16.msra.mxu1 %v7341_v1  ;;  %5403 = vmatprep.mubr.bf16.mxu1 %v7473_v9  ;;  %v7368_v1 = vld [vmem:[%s9560_s3 + $0x3c0] ss:$16 sps:$4 sm:$0xff]  }
0x1474   : > { %5381 = vmatprep.subr.bf16.mxu1 %v7349_v4 }
0x1477   : > { %5382 = vmatpush1.bf16.msra.mxu1 %v7347_v11 }
0x1478   : > { %5383 = vmatprep.subr.bf16.mxu1 %v7355_v14  ;;  %v7367_v14 = vld [vmem:[%s9560_s3 + $0x3ec] ss:$16 sps:$4 sm:$0xff]  }
0x147b   : > { %5384 = vmatpush1.bf16.msra.mxu1 %v7353_v17 }
0x147c   : > { %5385 = vmatprep.subr.bf16.mxu1 %v7361_v23 }
0x147f   : > { %5386 = vmatpush1.bf16.msra.mxu1 %v7359_v37 }
0x1480   : > { %6600 = vmatprep.subr.bf16.mxu1 %v7470_v39 }
0x1532   : > { %v5221_v15 = vpop.f32.mrf.mxu1 }
0x1534   : > { %v6592_v25 = vpop.f32.mrf.mxu1 }
0x1536   : > { %v5224_v43 = vpop.f32.mrf.mxu1 }
0x1537   : > { %v5228_v31 = vpack.c.bf16 %v5224_v43, %v5221_v15  ;;  %v7365_v15 = vld [vmem:[%s9560_s3 + $0x3e8] ss:$16 sps:$4 sm:$0xff]  }
0x1538   : > { %v6593_v28 = vpop.f32.mrf.mxu1  ;;  %v7371_v43 = vld [vmem:[%s9560_s3 + $0x3c8] ss:$16 sps:$4 sm:$0xff]  }
0x1539   : > { %6452 = vmatmul.mubr.msk.bf16.vlgmr.msra.gmra.mxu0 %vm3225_vm1, %v5228_v31  ;;  %6453 = vmatmul.mubr.msk.bf16.vlgmr.msra.gmra.mxu1 %vm3225_vm1, %v5228_v31  ;;  %v7379_v31 = vld [vmem:[%s9560_s3 + $0x3ac] ss:$16 sps:$4 sm:$0xff]   ;;  %v7377_v28 = vld [vmem:[%s9560_s3 + $0x3a8] ss:$16 sps:$4 sm:$0xff]  }
0x153a   : > { %6595 = vmatpush3.bf16.xpose.msra.mxu0 %v5432_v2  ;;  %6596 = vmatprep.mubr.msk.bf16.mxu0 %vm7471_vm0, %v7470_v39  ;;  %v7380_v2 = vld [vmem:[%s9560_s3 + $0x380] ss:$16 sps:$4 sm:$0xff]  }
0x153b   : > { %6602 = vmatprep.mubr.msk.bf16.mxu1 %vm7471_vm0, %v7470_v39  ;;  %5654 = vmatprep.subr.bf16.mxu0 %v7364_v62 }
0x1541   : > { %6597 = vmatmul.mubr.msk.bf16.vlgmr.msra.gmra.mxu0 %vm3225_vm1, %v5424_v3  ;;  %v7383_v3 = vld [vmem:[%s9560_s3 + $0x388] ss:$16 sps:$4 sm:$0xff]  }
0x1542   : > { %5678 = vmatprep.mubr.bf16.mxu0 %v7473_v9  ;;  %5655 = vmatpush1.bf16.msra.mxu0 %v7362_v35 }
0x1543   : > { %5656 = vmatprep.subr.bf16.mxu0 %v7370_v59 }
0x1546   : > { %5657 = vmatpush1.bf16.msra.mxu0 %v7368_v1 }
0x15f9   : > { %v5362_v0 = vpop.f32.mrf.mxu0  ;;  %v5405_v63 = vpop.f32.mrf.mxu1 }
0x15fa   : > { %v9442_v18 = vadd.f32 %v5362_v0, %v9352_v22  ;;  %v9445_v46 = vadd.f32 %v5405_v63, %v9355_v32  ;;  %v7385_v0 = vld [vmem:[%s9560_s3 + $0x38c] ss:$16 sps:$4 sm:$0xff]  }
0x15fb   : > { %v5364_v44 = vpop.f32.mrf.mxu0  ;;  %v5407_v45 = vpop.f32.mrf.mxu1 }
0x15fc   : > { %v9448_v47 = vadd.f32 %v5364_v44, %v9358_v54  ;;  %v9451_v39 = vadd.f32 %v5407_v45, %v9361_v56 }
0x15fd   : > { %v5366_v6 = vpop.f32.mrf.mxu0  ;;  %v5409_v49 = vpop.f32.mrf.mxu1 }
0x15fe   : > { %v9454_v8 = vadd.f32 %v5366_v6, %v9364_v26  ;;  %v9457_v7 = vadd.f32 %v5409_v49, %v9367_v27 }
0x15ff   : > { %v5368_v22 = vpop.f32.mrf.mxu0  ;;  %v5411_v63 = vpop.f32.mrf.mxu1 }
0x1600   : > { %v9460_v32 = vadd.f32 %v5368_v22, %v9370_v61 }
0x1601   : > { %v5468_v48 = vpop.f32.mrf.mxu0 }
0x1602   : > { %v5475_v10 = vsel %vm3273_vm2, %v5468_v48, -inf }
0x1603   : > { %5476 = vmax.xlane.f32.xlu0 %v5475_v10  ;;  %v6598_v54 = vpop.f32.mrf.mxu0 }
0x1605   : > { %v5471_v13 = vpop.f32.mrf.mxu0 }
0x1606   : > { %v5478_v56 = vsel %vm3273_vm2, %v5471_v13, -inf }
0x1607   : > { %5479 = vmax.xlane.f32.xlu1 %v5478_v56  ;;  %v6599_v51 = vpop.f32.mrf.mxu0 }
0x168c   : > { %v5477_v40 = vpop.xlane.xlu0 %5476 }
0x168d   : > { %v5481_v26 = vsub.f32 %v5468_v48, %v5477_v40  ;;  %v7461_v48 = vld [vmem:[%s7664_s10 + $0x38] sm:$0xff] }
0x168e   : > { %v3221_v10 = vadd.f32 %v7461_v48, %v8974_v34 }
0x168f   : > { %v5483_v42 = vmul.f32 1.442695, %v5481_v26 }
0x1690   : > { %v5480_v24 = vpop.xlane.xlu1 %5479  ;;  %v3534_v54 = vadd.f32 %v8953_v16, %v3221_v10 }
0x1691   : > { %7442 = vpow2.f32 %v5483_v42  ;;  %v5482_v27 = vsub.f32 %v5471_v13, %v5480_v24 }
0x1692   : > { %v3852_v13 = vadd.f32 %v9060_v36, %v3534_v54 }
0x1693   : > { %v5485_v57 = vmul.f32 1.442695, %v5482_v27 }
0x1694   : > { %v4163_v56 = vadd.f32 %v9152_v38, %v3852_v13  ;;  %v5793_v13 = vld [vmem:[%s9562_s5] sm:$0xf] }
0x1695   : > { %7444 = vpow2.f32 %v5485_v57 }
0x1696   : > { %v4481_v26 = vadd.f32 %v9245_v21, %v4163_v56  ;;  %v5823_v56 = vld [vmem:[%s9563_s6] sm:$0xf] }
0x169e   : > { %v7443_v61 = vpop.eup %7442 }
0x169f   : > { %v5487_v58 = vsel %vm3273_vm2, %v7443_v61, 0.0 }
0x16a0   : > { %5488 = vadd.xlane.f32.xlu0 %v5487_v58 }
0x16a2   : > { %v7445_v33 = vpop.eup %7444 }
0x16a3   : > { %v5490_v12 = vsel %vm3273_vm2, %v7445_v33, 0.0 }
0x16a4   : > { %5491 = vadd.xlane.f32.xlu0 %v5490_v12 }
0x16ba   : > { %5499 = vrot.lane.b32.xlu0 %v8813_v20, %s7472_s11  ;;  %v7376_v20 = vld [vmem:[%s9560_s3 + $0x3a4] ss:$16 sps:$4 sm:$0xff]  }
0x16bb   : > { %5658 = vmatprep.subr.bf16.mxu0 %v7376_v20 }
0x16bc   : > { %5659 = vmatpush1.bf16.msra.mxu0 %v7374_v5 }
0x1729   : > { %v5489_v4 = vpop.xlane.xlu0 %5488 }
0x172a   : > { %7446 = vrcp.f32 %v5489_v4 }
0x172d   : > { %v5492_v11 = vpop.xlane.xlu0 %5491 }
0x172e   : > { %7448 = vrcp.f32 %v5492_v11 }
0x1731   : > { %v5500_v17 = vpop.permute.xlu0 %5499 }
0x1732   : > { %6601 = vmatpush3.bf16.msra.mxu1 %v5500_v17 }
0x1733   : > { %5697 = vmatprep.subr.bf16.mxu1 %v7367_v14 }
0x1737   : > { %v7447_v50 = vpop.eup %7446 }
0x1738   : > { %v5495_v37 = vmul.f32 %v7447_v50, %v7443_v61  ;;  %v4792_v61 = vadd.f32 %v9337_v19, %v4481_v26  ;;  %v5806_v26 = vrot.slane %v5793_v13, %v8545_v55 }
0x173a   : > { %v5110_v36 = vadd.f32 %v9430_v52, %v4792_v61  ;;  %v5836_v61 = vrot.slane %v5823_v56, %v8545_v55 }
0x173b   : > { %v7449_v53 = vpop.eup %7448 }
0x173c   : > { %v5496_v23 = vmul.f32 %v7449_v53, %v7445_v33  ;;  %v5421_v59 = vadd.f32 %v5411_v63, %v5110_v36 }
0x173e   : > { %v5497_v25 = vpack.c.bf16 %v5496_v23, %v5495_v37 }
0x1740   : > { %6603 = vmatmul.mubr.msk.bf16.vlgmr.msra.gmra.mxu1 %vm3273_vm2, %v5497_v25 }
0x1741   : > { %5698 = vmatpush1.bf16.msra.mxu1 %v7365_v15  ;;  %5721 = vmatprep.mubr.bf16.mxu1 %v7473_v9  ;;  %v7382_v9 = vld [vmem:[%s9560_s3 + $0x384] ss:$16 sps:$4 sm:$0xff]  }
0x1742   : > { %5699 = vmatprep.subr.bf16.mxu1 %v7373_v30  ;;  %5660 = vmatprep.subr.bf16.mxu0 %v7382_v9 }
0x1743   : > { %5661 = vmatpush1.bf16.msra.mxu0 %v7380_v2 }
0x1745   : > { %5700 = vmatpush1.bf16.msra.mxu1 %v7371_v43 }
0x1746   : > { %5701 = vmatprep.subr.bf16.mxu1 %v7379_v31 }
0x1749   : > { %5702 = vmatpush1.bf16.msra.mxu1 %v7377_v28 }
0x174a   : > { %5703 = vmatprep.subr.bf16.mxu1 %v7385_v0 }
0x174d   : > { %5704 = vmatpush1.bf16.msra.mxu1 %v7383_v3 }
0x1800   : > { %v5539_v44 = vpop.f32.mrf.mxu1 }
0x1802   : > { %v6604_v45 = vpop.f32.mrf.mxu1 }
0x1804   : > { %v5542_v6 = vpop.f32.mrf.mxu1 }
0x1805   : > { %v5546_v49 = vpack.c.bf16 %v5542_v6, %v5539_v44 }
0x1806   : > { %v6605_v22 = vpop.f32.mrf.mxu1 }
0x1807   : > { %6472 = vmatmul.mubr.msk.bf16.vlgmr.msra.gmra.mxu0 %vm3225_vm1, %v5546_v49  ;;  %6473 = vmatmul.mubr.msk.bf16.vlgmr.msra.gmra.mxu1 %vm3225_vm1, %v5546_v49 }
0x18c7   : > { %v5680_v51 = vpop.f32.mrf.mxu0  ;;  %v5723_v40 = vpop.f32.mrf.mxu1 }
0x18c8   : > { %v5732_v27 = vadd.f32 %v5680_v51, %v9442_v18  ;;  %v5734_v16 = vadd.f32 %v5723_v40, %v9445_v46  ;;  %v5798_v51 = vrot.slane %v5793_v13, %v8765_v41  ;;  %v5802_v40 = vrot.slane %v5793_v13, %v8346_v29 }
0x18c9   : > { %v5682_v42 = vpop.f32.mrf.mxu0  ;;  %v5725_v24 = vpop.f32.mrf.mxu1 }
0x18ca   : > { %v5733_v57 = vadd.f32 %v5682_v42, %v9448_v47  ;;  %v5735_v12 = vadd.f32 %v5725_v24, %v9451_v39  ;;  %v5810_v42 = vrot.slane %v5793_v13, %v8560_v60 }
0x18cb   : > { %v5684_v58 = vpop.f32.mrf.mxu0  ;;  %v5727_v34 = vpop.f32.mrf.mxu1 }
0x18cc   : > { %v5740_v33 = vadd.f32 %v5733_v57, %v5732_v27  ;;  %v5736_v21 = vadd.f32 %v5684_v58, %v9454_v8  ;;  %v5738_v47 = vadd.f32 %v5727_v34, %v9457_v7  ;;  %v5840_v58 = vrot.slane %v5823_v56, %v8560_v60 }
0x18cd   : > { %v5686_v38 = vpop.f32.mrf.mxu0  ;;  %v5729_v18 = vpop.f32.mrf.mxu1 }
0x18ce   : > { %v5737_v35 = vadd.f32 %v5686_v38, %v9460_v32  ;;  %v5741_v62 = vadd.f32 %v5740_v33, %v5734_v16  ;;  %v5739_v20 = vadd.f32 %v5729_v18, %v5421_v59 }
0x18d0   : > { %v5745_v19 = vadd.f32 %v5737_v35, %v5736_v21  ;;  %v5742_v1 = vadd.f32 %v5741_v62, %v5735_v12 }
0x18d2   : > { %5743 = vadd.xlane.f32.xlu1 %v5742_v1  ;;  %v5746_v46 = vadd.f32 %v5745_v19, %v5738_v47 }
0x18d4   : > { %v5747_v5 = vadd.f32 %v5746_v46, %v5739_v20 }
0x18d6   : > { %5748 = vadd.xlane.f32.xlu1 %v5747_v5 }
0x195b   : > { %v5744_v52 = vpop.xlane.xlu1 %5743 }
0x195c   : > { %v5751_v4 = vmul.f32 0.001953125, %v5744_v52 }
0x195e   : > { %v5753_v11 = vsub.f32 %v5732_v27, %v5751_v4  ;;  %v5754_v39 = vsub.f32 %v5733_v57, %v5751_v4  ;;  %v5755_v14 = vsub.f32 %v5734_v16, %v5751_v4  ;;  %v5756_v17 = vsub.f32 %v5735_v12, %v5751_v4 }
0x195f   : > { %v5749_v8 = vpop.xlane.xlu1 %5748  ;;  %v5828_v27 = vrot.slane %v5823_v56, %v8765_v41  ;;  %v5832_v57 = vrot.slane %v5823_v56, %v8346_v29 }
0x1960   : > { %v5752_v32 = vmul.f32 0.001953125, %v5749_v8  ;;  %v5761_v50 = vmul.f32 %v5753_v11, %v5753_v11  ;;  %v5762_v53 = vmul.f32 %v5754_v39, %v5754_v39  ;;  %v5763_v37 = vmul.f32 %v5755_v14, %v5755_v14 }
0x1961   : > { %v5764_v30 = vmul.f32 %v5756_v17, %v5756_v17 }
0x1962   : > { %v5757_v23 = vsub.f32 %v5736_v21, %v5752_v32  ;;  %v5758_v7 = vsub.f32 %v5737_v35, %v5752_v32  ;;  %v5769_v15 = vadd.f32 %v5762_v53, %v5761_v50  ;;  %v5759_v25 = vsub.f32 %v5738_v47, %v5752_v32 }
0x1963   : > { %v5760_v31 = vsub.f32 %v5739_v20, %v5752_v32 }
0x1964   : > { %v5770_v43 = vadd.f32 %v5769_v15, %v5763_v37  ;;  %v5765_v28 = vmul.f32 %v5757_v23, %v5757_v23  ;;  %v5766_v2 = vmul.f32 %v5758_v7, %v5758_v7  ;;  %v5767_v3 = vmul.f32 %v5759_v25, %v5759_v25 }
0x1965   : > { %v5768_v63 = vmul.f32 %v5760_v31, %v5760_v31 }
0x1966   : > { %v5771_v9 = vadd.f32 %v5770_v43, %v5764_v30  ;;  %v5774_v0 = vadd.f32 %v5766_v2, %v5765_v28 }
0x1968   : > { %5772 = vadd.xlane.f32.xlu1 %v5771_v9  ;;  %v5775_v44 = vadd.f32 %v5774_v0, %v5767_v3 }
0x196a   : > { %v5776_v45 = vadd.f32 %v5775_v44, %v5768_v63 }
0x196c   : > { %5777 = vadd.xlane.f32.xlu0 %v5776_v45 }
0x19f1   : > { %v5773_v6 = vpop.xlane.xlu1 %5772 }
0x19f2   : > { %v5779_v49 = vmul.f32 0.001953125, %v5773_v6 }
0x19f4   : > { %v5781_v22 = vadd.f32 1e-05, %v5779_v49 }
0x19f5   : > { %v5778_v48 = vpop.xlane.xlu0 %5777 }
0x19f6   : > { %7450 = vrsqrt.f32 %v5781_v22  ;;  %v5780_v10 = vmul.f32 0.001953125, %v5778_v48 }
0x19f8   : > { %v5782_v54 = vadd.f32 1e-05, %v5780_v10 }
0x19fa   : > { %7452 = vrsqrt.f32 %v5782_v54 }
0x1a03   : > { %v7451_v24 = vpop.eup %7450 }
0x1a04   : > { %v5785_v34 = vmul.f32 %v7451_v24, %v5753_v11  ;;  %v5786_v16 = vmul.f32 %v7451_v24, %v5754_v39  ;;  %v5787_v33 = vmul.f32 %v7451_v24, %v5755_v14  ;;  %v5788_v36 = vmul.f32 %v7451_v24, %v5756_v17 }
0x1a06   : > { %v5815_v38 = vmul.f32 %v5798_v51, %v5785_v34  ;;  %v5816_v12 = vmul.f32 %v5802_v40, %v5786_v16  ;;  %v5817_v21 = vmul.f32 %v5806_v26, %v5787_v33  ;;  %v5818_v35 = vmul.f32 %v5810_v42, %v5788_v36 }
0x1a07   : > { %v7453_v62 = vpop.eup %7452 }
0x1a08   : > { %v5845_v41 = vadd.f32 %v5828_v27, %v5815_v38  ;;  %v5846_v29 = vadd.f32 %v5832_v57, %v5816_v12  ;;  %v5847_v18 = vadd.f32 %v5836_v61, %v5817_v21  ;;  %v5848_v55 = vadd.f32 %v5840_v58, %v5818_v35 }
0x1a09   : > { %v5789_v59 = vmul.f32 %v7453_v62, %v5757_v23  ;;  %v5790_v60 = vmul.f32 %v7453_v62, %v5758_v7  ;;  %v5791_v47 = vmul.f32 %v7453_v62, %v5759_v25  ;;  %v5792_v19 = vmul.f32 %v7453_v62, %v5760_v31 }
0x1a0a   : > { %5853 = vst [vmem:[%s285_s22] sm:$0xff] %v5845_v41  ;;  %5854 = vst [vmem:[%s285_s22 + $0x8] sm:$0xff] %v5846_v29 }
0x1a0b   : > { %5855 = vst [vmem:[%s285_s22 + $0x10] sm:$0xff] %v5847_v18  ;;  %5856 = vst [vmem:[%s285_s22 + $0x18] sm:$0xff] %v5848_v55  ;;  %v5819_v1 = vmul.f32 %v5798_v51, %v5789_v59  ;;  %v5820_v20 = vmul.f32 %v5802_v40, %v5790_v60  ;;  %v5821_v46 = vmul.f32 %v5806_v26, %v5791_v47 }
0x1a0c   : > { %v5822_v5 = vmul.f32 %v5810_v42, %v5792_v19 }
0x1a0d   : > { %v5849_v52 = vadd.f32 %v5828_v27, %v5819_v1  ;;  %v5850_v4 = vadd.f32 %v5832_v57, %v5820_v20  ;;  %v5851_v11 = vadd.f32 %v5836_v61, %v5821_v46 }
0x1a0e   : > { %v5852_v39 = vadd.f32 %v5840_v58, %v5822_v5 }
0x1a0f   : > { %5857 = vst [vmem:[%s285_s22 + $0x20] sm:$0xff] %v5849_v52  ;;  %5858 = vst [vmem:[%s285_s22 + $0x28] sm:$0xff] %v5850_v4 }
0x1a10   : > { %5859 = vst [vmem:[%s285_s22 + $0x30] sm:$0xff] %v5851_v11  ;;  %5860 = vst [vmem:[%s285_s22 + $0x38] sm:$0xff] %v5852_v39 }
0x1a11 PF: > { %s17_s24 = sadd.s32 1, %s7468_s24  }
0x1a12   : > { %p14_p4 = scmp.ge.s32.totalorder %s17_s24, 4  }
0x1a14   :  { %16 = sbr.rel (!%p14_p4) target bundleno = 1 (0x1), region = 78 }

// kernel: transformer_classifier_forward.12
= control target key start
LH: loop header
LB: loop body
LE: loop exit
PB: predicated region body
PF: predicated region fallthrough
CT: control target
= control target key end

     0   :  { %12 = vsyncpa [#allocation3], 0  ;;  %s8425_s0 = inlined_call_operand.vmem [shape: f32[32,512], index: 0, kind: input, shape index: {}]   ;;  %s8426_s1 = inlined_call_operand.hbm [shape: bf16[512,1536], index: 1, kind: input, shape index: {}]   ;;  %s8427_s2 = inlined_call_operand.vmem [shape: f32[1,1536], index: 2, kind: input, shape index: {}]   ;;  %s8428_s3 = inlined_call_operand.hbm [shape: bf16[512,512], index: 3, kind: input, shape index: {}]   ;;  %s8429_s4 = inlined_call_operand.hbm [shape: f32[1,512], index: 4, kind: input, shape index: {}]   ;;  %s8430_s5 = inlined_call_operand.hbm [shape: f32[1,512], index: 5, kind: input, shape index: {}]   ;;  %s8431_s6 = inlined_call_operand.hbm [shape: f32[1,512], index: 6, kind: input, shape index: {}]   ;;  %s8432_s7 = inlined_call_operand.vmem [shape: f32[32,512], index: 7, kind: output, shape index: {}]  }
   0x1   :  { %13 = vsyncpa [#allocation5], 0 }
   0x2   :  { %14 = vsyncpa [#allocation8], 0  ;;  %s7847_s24 = smov 0  }
   0x3 LB: > { %s7794_s25 = smov [#allocation4]   ;;  %s6036_s27 = sadd.s32 4294967295, %s7792_s24   ;;  %s7792_s24 = sphi %s7847_s24, %s20_s24  }
   0x4   : > { %s231_s26 = sshll.u32 %s7794_s25, 4  ;;  %p6038_p0 = scmp.ge.s32.totalorder %s7792_s24, 1  ;;  %s232_s26 = int_to_ptr.vmem [resolvable:$true] %s231_s26 }
   0x5   : > { %p203_p1 = scmp.lt.s32.totalorder %s7792_s24, 3  ;;  %p7857_p2 = scmp.eq.s32.totalorder %s6036_s27, 0 }
   0x6   : > { %s7795_s30 = smov [#allocation7]   ;;  %s7796_s10 = smov [#allocation2]  }
   0x7   : > { %s8436_s28 = scalar_select %p7857_p2, 1, 0 }
   0x8   : > { %p7861_p3 = pnand %p6038_p0, %p203_p1  ;;  %s256_s8 = sshll.u32 %s7795_s30, 4  ;;  %s257_s8 = int_to_ptr.vmem [resolvable:$true] %s256_s8 }
   0x9   : > { %s215_s11 = sshll.u32 %s7796_s10, 4  ;;  %s7655_s13 = scalar_lea.vmem %s232_s26, 16384  ;;  %s7873_s11 = int_to_ptr.vmem [resolvable:$true] %s215_s11 }
   0xa   : > { %s8437_s29 = scalar_select %p7861_p3, 1, 0 }
   0xb   : > { %p6753_p4 = pneg %p7861_p3  ;;  %p7656_p7 = scmp.ne.s32.totalorder %s232_s26, %s7655_s13 }
   0xc   : > { %p7663_p10 = scmp.lt.s32.totalorder %s232_s26, %s232_s26  ;;  %p7664_p11 = scmp.lt.s32.totalorder %s7655_s13, %s7655_s13 }
   0xd   : > { %p7869_p5 = pnand %p7857_p2, %p6753_p4 }
   0xe   : > { %p7665_p12 = por %p7664_p11, %p7663_p10 }
   0xf   : > { %p7877_p6 = pneg %p7869_p5 }
  0x11   : > { %p7658_p8 = pnand %p7656_p7, %p7877_p6 }
  0x13   : > { %p7659_p9 = pneg %p7658_p8 }
  0x15   : > { %p7666_p13 = pnand %p7665_p12, %p7659_p9 }
  0x17   : > { %7669 = shalt.err (!%p7666_p13)
}
  0x18   : > { %s7797_s14 = smov 256   ;;  %s7798_s15 = smov 16  }
  0x19   : > { %6759 = dma.hbm_to_vmem [thread:$0]  (!%p7869_p5), %s8428_s3, 16384, %s232_s26, [#allocation5], %s7797_s14, %s7797_s14, %s7798_s15  }
  0x1a   : > { %s7681_s18 = scalar_lea.vmem %s257_s8, 64  ;;  %p7689_p7 = scmp.lt.s32.totalorder %s257_s8, %s257_s8 }
  0x1b   : > { %p7682_p0 = scmp.ne.s32.totalorder %s257_s8, %s7681_s18  ;;  %p7690_p8 = scmp.lt.s32.totalorder %s7681_s18, %s7681_s18 }
  0x1d   : > { %p7684_p1 = pnand %p7682_p0, %p7877_p6  ;;  %p7691_p2 = por %p7690_p8, %p7689_p7 }
  0x1f   : > { %p7685_p4 = pneg %p7684_p1 }
  0x21   : > { %p7692_p10 = pnand %p7691_p2, %p7685_p4 }
  0x23   : > { %7695 = shalt.err (!%p7692_p10)
}
  0x24   : > { %6765 = dma.hbm_to_vmem [thread:$0]  (!%p7869_p5), %s8430_s5, 64, %s257_s8, [#allocation8]  }
  0x25   : > { %s7707_s21 = scalar_lea.vmem %s7873_s11, 49152  ;;  %p7715_p13 = scmp.lt.s32.totalorder %s7873_s11, %s7873_s11 }
  0x26   : > { %p7708_p9 = scmp.ne.s32.totalorder %s7873_s11, %s7707_s21  ;;  %p7716_p0 = scmp.lt.s32.totalorder %s7707_s21, %s7707_s21 }
  0x28   : > { %p7710_p11 = pnand %p7708_p9, %p7877_p6  ;;  %p7717_p2 = por %p7716_p0, %p7715_p13 }
  0x2a   : > { %p7711_p12 = pneg %p7710_p11 }
  0x2c   : > { %p7718_p1 = pnand %p7717_p2, %p7711_p12 }
  0x2e   : > { %7721 = shalt.err (!%p7718_p1)
}
  0x2f   : > { %s7799_s22 = smov 768   ;;  %s7800_s23 = smov 48  }
  0x30   : > { %6756 = dma.hbm_to_vmem [thread:$0]  (!%p7869_p5), %s8426_s1, 49152, %s7873_s11, [#allocation3], %s7799_s22, %s7799_s22, %s7800_s23  }
  0x31   : > { %s7801_s30 = smov [#allocation6]   ;;  %s7802_s10 = smov [#allocation9]  }
  0x32   : > { %s245_s8 = sshll.u32 %s7801_s30, 4  ;;  %s267_s13 = sshll.u32 %s7802_s10, 4  ;;  %s246_s8 = int_to_ptr.vmem [resolvable:$true] %s245_s8  ;;  %s268_s13 = int_to_ptr.vmem [resolvable:$true] %s267_s13 }
  0x33   : > { %s7733_s14 = scalar_lea.vmem %s246_s8, 64  ;;  %p7741_p10 = scmp.lt.s32.totalorder %s246_s8, %s246_s8 }
  0x34   : > { %p7734_p4 = scmp.ne.s32.totalorder %s246_s8, %s7733_s14  ;;  %p7742_p9 = scmp.lt.s32.totalorder %s7733_s14, %s7733_s14 }
  0x36   : > { %p7736_p7 = pnand %p7734_p4, %p7877_p6  ;;  %p7743_p11 = por %p7742_p9, %p7741_p10 }
  0x38   : > { %p7737_p8 = pneg %p7736_p7 }
  0x3a   : > { %p7744_p12 = pnand %p7743_p11, %p7737_p8 }
  0x3c   : > { %7747 = shalt.err (!%p7744_p12)
}
  0x3d   : > { %6762 = dma.hbm_to_vmem [thread:$0]  (!%p7869_p5), %s8429_s4, 64, %s246_s8, [#allocation5]  }
  0x3e   : > { %s7759_s16 = scalar_lea.vmem %s268_s13, 64  ;;  %p7767_p1 = scmp.lt.s32.totalorder %s268_s13, %s268_s13 }
  0x3f   : > { %p7760_p13 = scmp.ne.s32.totalorder %s268_s13, %s7759_s16  ;;  %p7768_p4 = scmp.lt.s32.totalorder %s7759_s16, %s7759_s16 }
  0x41   : > { %p7762_p0 = pnand %p7760_p13, %p7877_p6  ;;  %p7769_p7 = por %p7768_p4, %p7767_p1 }
  0x43   : > { %p7763_p2 = pneg %p7762_p0 }
  0x45   : > { %p7770_p3 = pnand %p7769_p7, %p7763_p2 }
  0x47   : > { %7773 = shalt.err (!%p7770_p3)
}
  0x48   : > { %6768 = dma.hbm_to_vmem [thread:$0]  (!%p7869_p5), %s8431_s6, 64, %s268_s13, [#allocation8]  }
  0x49   : > { %p8440_p8 = scmp.ne.s32.totalorder %s8437_s29, 0 }
  0x4a   : > { %p8441_p10 = scmp.ne.s32.totalorder (!%p8440_p8), %s8436_s28, 0 }
  0x4b   : > { %290 = sbr.rel (%p8440_p8) target bundleno = 6747 (0x1a5b), region = 48 }
  0x50   : > { %7779 = dma.done.wait (%p8441_p10), [#allocation3], 49152  }
  0x51   : > { %7781 = vsyncadd (%p8441_p10), [#allocation3], 4294918144 }
  0x52   : > { %7783 = dma.done.wait (%p8441_p10), [#allocation5], 16448  }
  0x53   : > { %7785 = vsyncadd (%p8441_p10), [#allocation5], 4294950848 }
  0x54   : > { %7787 = dma.done.wait (%p8441_p10), [#allocation8], 128  }
  0x55   : > { %7789 = vsyncadd (%p8441_p10), [#allocation8], 4294967168  ;;  %v6800_v0 = vld [vmem:[#allocation2 + $0x2a4] ss:$48 sps:$4 sm:$0xff]   ;;  %v6804_v2 = vld [vmem:[#allocation2 + $0x2a0] ss:$48 sps:$4 sm:$0xff]  }
  0x56   : > { %v6802_v1 = vld [vmem:[#allocation2 + $0x8a4] ss:$48 sps:$4 sm:$0xff]   ;;  %2735 = vmatprep.subr.bf16.mxu0 %v6800_v0  ;;  %v6805_v3 = vld [vmem:[#allocation2 + $0x8a0] ss:$48 sps:$4 sm:$0xff]   ;;  %s6051_s28 = sshll.u32 %s6036_s27, 1  ;;  %vm7804_vm0 = vmmov 0  }
  0x57   : > { %2778 = vmatprep.subr.bf16.mxu1 %v6802_v1  ;;  %v6806_v4 = vld [vmem:[#allocation2 + $0x244] ss:$48 sps:$4 sm:$0xff]   ;;  %2736 = vmatpush1.bf16.msra.mxu0 %v6804_v2  ;;  %v6810_v6 = vld [vmem:[#allocation2 + $0x240] ss:$48 sps:$4 sm:$0xff]   ;;  %p341_p3 = scmp.lt.s32.totalorder %s6051_s28, 3  ;;  %vm3292_vm1 = vcmask 523264  }
  0x58   : > { %2779 = vmatpush1.bf16.msra.mxu1 %v6805_v3  ;;  %v6808_v5 = vld [vmem:[#allocation2 + $0x844] ss:$48 sps:$4 sm:$0xff]   ;;  %2737 = vmatprep.subr.bf16.mxu0 %v6806_v4  ;;  %v6811_v7 = vld [vmem:[#allocation2 + $0x840] ss:$48 sps:$4 sm:$0xff]   ;;  %vm3340_vm2 = vcmask 130048   ;;  %s7805_s23 = smov 64  }
  0x59   : > { %2780 = vmatprep.subr.bf16.mxu1 %v6808_v5  ;;  %v6812_v8 = vld [vmem:[#allocation2 + $0x1e4] ss:$48 sps:$4 sm:$0xff]   ;;  %v6816_v10 = vld [vmem:[#allocation2 + $0x1e0] ss:$48 sps:$4 sm:$0xff]   ;;  %s8443_s28 = smov (!%p341_p3, %s6051_s28), 3 }
  0x5a   : > { %v6814_v9 = vld [vmem:[#allocation2 + $0x7e4] ss:$48 sps:$4 sm:$0xff]   ;;  %v6817_v11 = vld [vmem:[#allocation2 + $0x7e0] ss:$48 sps:$4 sm:$0xff]   ;;  %s6603_s27 = sshll.u32 %s8443_s28, 5 }
  0x5b   : > { %2738 = vmatpush1.bf16.msra.mxu0 %v6810_v6  ;;  %v6818_v12 = vld [vmem:[#allocation2 + $0x184] ss:$48 sps:$4 sm:$0xff]   ;;  %v6822_v14 = vld [vmem:[#allocation2 + $0x180] ss:$48 sps:$4 sm:$0xff]   ;;  %s7945_s12 = scalar_lea.vmem %s8425_s0, %s6603_s27  ;;  %s352_s30 = scalar_lea.vmem %s8432_s7, %s6603_s27 }
  0x5c   : > { %2781 = vmatpush1.bf16.msra.mxu1 %v6811_v7  ;;  %2739 = vmatprep.subr.bf16.mxu0 %v6812_v8  ;;  %v6820_v13 = vld [vmem:[#allocation2 + $0x784] ss:$48 sps:$4 sm:$0xff]   ;;  %v6823_v15 = vld [vmem:[#allocation2 + $0x780] ss:$48 sps:$4 sm:$0xff]   ;;  %v356_v46 = vld [vmem:[%s7945_s12 + $0x8] sm:$0xff] }
  0x5d   : > { %2782 = vmatprep.subr.bf16.mxu1 %v6814_v9  ;;  %v6824_v16 = vld [vmem:[#allocation2 + $0x124] ss:$48 sps:$4 sm:$0xff]   ;;  %v6828_v18 = vld [vmem:[#allocation2 + $0x120] ss:$48 sps:$4 sm:$0xff]   ;;  %v360_v47 = vld [vmem:[%s7945_s12 + $0x28] sm:$0xff] }
  0x5e   : > { %v6826_v17 = vld [vmem:[#allocation2 + $0x724] ss:$48 sps:$4 sm:$0xff]   ;;  %v6829_v19 = vld [vmem:[#allocation2 + $0x720] ss:$48 sps:$4 sm:$0xff]   ;;  %v358_v48 = vld [vmem:[%s7945_s12 + $0x18] sm:$0xff]  ;;  %v7951_v53 = vpack.c.bf16 %v360_v47, %v356_v46 }
  0x5f   : > { %2740 = vmatpush1.bf16.msra.mxu0 %v6816_v10  ;;  %v6830_v20 = vld [vmem:[#allocation2 + $0xc4] ss:$48 sps:$4 sm:$0xff]   ;;  %v6834_v22 = vld [vmem:[#allocation2 + $0xc0] ss:$48 sps:$4 sm:$0xff]   ;;  %v362_v49 = vld [vmem:[%s7945_s12 + $0x38] sm:$0xff] }
  0x60   : > { %2783 = vmatpush1.bf16.msra.mxu1 %v6817_v11  ;;  %2741 = vmatprep.subr.bf16.mxu0 %v6818_v12  ;;  %v6832_v21 = vld [vmem:[#allocation2 + $0x6c4] ss:$48 sps:$4 sm:$0xff]   ;;  %v6835_v23 = vld [vmem:[#allocation2 + $0x6c0] ss:$48 sps:$4 sm:$0xff]   ;;  %v7953_v54 = vpack.c.bf16 %v362_v49, %v358_v48  ;;  %v6898_v10 = vld [vmem:[#allocation2 + $0x2ac] ss:$48 sps:$4 sm:$0xff]  }
  0x61   : > { %2784 = vmatprep.subr.bf16.mxu1 %v6820_v13  ;;  %v6836_v24 = vld [vmem:[#allocation2 + $0x64] ss:$48 sps:$4 sm:$0xff]   ;;  %v6840_v26 = vld [vmem:[#allocation2 + $0x60] ss:$48 sps:$4 sm:$0xff]   ;;  %2767 = vmatprep.mubr.bf16.mxu0 %v7951_v53  ;;  %v6901_v11 = vld [vmem:[#allocation2 + $0x8ac] ss:$48 sps:$4 sm:$0xff]  }
  0x62   : > { %v6838_v25 = vld [vmem:[#allocation2 + $0x664] ss:$48 sps:$4 sm:$0xff]   ;;  %v6841_v27 = vld [vmem:[#allocation2 + $0x660] ss:$48 sps:$4 sm:$0xff]   ;;  %2810 = vmatprep.mubr.bf16.mxu1 %v7953_v54  ;;  %v6944_v46 = vld [vmem:[#allocation2 + $0x5a8] ss:$48 sps:$4 sm:$0xff]  }
  0x63   : > { %2742 = vmatpush1.bf16.msra.mxu0 %v6822_v14  ;;  %v6842_v28 = vld [vmem:[#allocation2 + $0x4] ss:$48 sps:$4 sm:$0xff]   ;;  %v6846_v30 = vld [vmem:[#allocation2] ss:$48 sps:$4 sm:$0xff]   ;;  %v6896_v14 = vld [vmem:[#allocation2 + $0x2a8] ss:$48 sps:$4 sm:$0xff]  }
  0x64   : > { %2785 = vmatpush1.bf16.msra.mxu1 %v6823_v15  ;;  %2743 = vmatprep.subr.bf16.mxu0 %v6824_v16  ;;  %v6844_v29 = vld [vmem:[#allocation2 + $0x604] ss:$48 sps:$4 sm:$0xff]   ;;  %v6847_v31 = vld [vmem:[#allocation2 + $0x600] ss:$48 sps:$4 sm:$0xff]   ;;  %v6899_v15 = vld [vmem:[#allocation2 + $0x8a8] ss:$48 sps:$4 sm:$0xff]  }
  0x65   : > { %2786 = vmatprep.subr.bf16.mxu1 %v6826_v17  ;;  %v6848_v32 = vld [vmem:[#allocation2 + $0x5a4] ss:$48 sps:$4 sm:$0xff]   ;;  %v6852_v34 = vld [vmem:[#allocation2 + $0x5a0] ss:$48 sps:$4 sm:$0xff]   ;;  %v6904_v16 = vld [vmem:[#allocation2 + $0x24c] ss:$48 sps:$4 sm:$0xff]  }
  0x66   : > { %v6850_v33 = vld [vmem:[#allocation2 + $0xba4] ss:$48 sps:$4 sm:$0xff]   ;;  %v6853_v35 = vld [vmem:[#allocation2 + $0xba0] ss:$48 sps:$4 sm:$0xff]   ;;  %v6907_v17 = vld [vmem:[#allocation2 + $0x84c] ss:$48 sps:$4 sm:$0xff]  }
  0x67   : > { %2744 = vmatpush1.bf16.msra.mxu0 %v6828_v18  ;;  %v6854_v36 = vld [vmem:[#allocation2 + $0x544] ss:$48 sps:$4 sm:$0xff]   ;;  %v6858_v38 = vld [vmem:[#allocation2 + $0x540] ss:$48 sps:$4 sm:$0xff]   ;;  %v6902_v18 = vld [vmem:[#allocation2 + $0x248] ss:$48 sps:$4 sm:$0xff]  }
  0x68   : > { %2787 = vmatpush1.bf16.msra.mxu1 %v6829_v19  ;;  %2745 = vmatprep.subr.bf16.mxu0 %v6830_v20  ;;  %v6856_v37 = vld [vmem:[#allocation2 + $0xb44] ss:$48 sps:$4 sm:$0xff]   ;;  %v6859_v39 = vld [vmem:[#allocation2 + $0xb40] ss:$48 sps:$4 sm:$0xff]   ;;  %v6905_v19 = vld [vmem:[#allocation2 + $0x848] ss:$48 sps:$4 sm:$0xff]  }
  0x69   : > { %2788 = vmatprep.subr.bf16.mxu1 %v6832_v21  ;;  %v6860_v40 = vld [vmem:[#allocation2 + $0x4e4] ss:$48 sps:$4 sm:$0xff]   ;;  %v6864_v42 = vld [vmem:[#allocation2 + $0x4e0] ss:$48 sps:$4 sm:$0xff]   ;;  %v6910_v20 = vld [vmem:[#allocation2 + $0x1ec] ss:$48 sps:$4 sm:$0xff]  }
  0x6a   : > { %v6862_v41 = vld [vmem:[#allocation2 + $0xae4] ss:$48 sps:$4 sm:$0xff]   ;;  %v6865_v43 = vld [vmem:[#allocation2 + $0xae0] ss:$48 sps:$4 sm:$0xff]   ;;  %v6913_v21 = vld [vmem:[#allocation2 + $0x7ec] ss:$48 sps:$4 sm:$0xff]  }
  0x6b   : > { %2746 = vmatpush1.bf16.msra.mxu0 %v6834_v22  ;;  %v6866_v44 = vld [vmem:[#allocation2 + $0x484] ss:$48 sps:$4 sm:$0xff]   ;;  %v6870_v50 = vld [vmem:[#allocation2 + $0x480] ss:$48 sps:$4 sm:$0xff]   ;;  %v6908_v22 = vld [vmem:[#allocation2 + $0x1e8] ss:$48 sps:$4 sm:$0xff]  }
  0x6c   : > { %2789 = vmatpush1.bf16.msra.mxu1 %v6835_v23  ;;  %2747 = vmatprep.subr.bf16.mxu0 %v6836_v24  ;;  %v6868_v45 = vld [vmem:[#allocation2 + $0xa84] ss:$48 sps:$4 sm:$0xff]   ;;  %v6871_v51 = vld [vmem:[#allocation2 + $0xa80] ss:$48 sps:$4 sm:$0xff]   ;;  %v6911_v23 = vld [vmem:[#allocation2 + $0x7e8] ss:$48 sps:$4 sm:$0xff]  }
  0x6d   : > { %2790 = vmatprep.subr.bf16.mxu1 %v6838_v25  ;;  %v6872_v52 = vld [vmem:[#allocation2 + $0x424] ss:$48 sps:$4 sm:$0xff]   ;;  %v6876_v56 = vld [vmem:[#allocation2 + $0x420] ss:$48 sps:$4 sm:$0xff]   ;;  %v6916_v24 = vld [vmem:[#allocation2 + $0x18c] ss:$48 sps:$4 sm:$0xff]  }
  0x6e   : > { %v6874_v55 = vld [vmem:[#allocation2 + $0xa24] ss:$48 sps:$4 sm:$0xff]   ;;  %v6877_v57 = vld [vmem:[#allocation2 + $0xa20] ss:$48 sps:$4 sm:$0xff]   ;;  %v6919_v25 = vld [vmem:[#allocation2 + $0x78c] ss:$48 sps:$4 sm:$0xff]  }
  0x6f   : > { %2748 = vmatpush1.bf16.msra.mxu0 %v6840_v26  ;;  %v6878_v58 = vld [vmem:[#allocation2 + $0x3c4] ss:$48 sps:$4 sm:$0xff]   ;;  %v6882_v60 = vld [vmem:[#allocation2 + $0x3c0] ss:$48 sps:$4 sm:$0xff]   ;;  %v6914_v26 = vld [vmem:[#allocation2 + $0x188] ss:$48 sps:$4 sm:$0xff]  }
  0x70   : > { %2791 = vmatpush1.bf16.msra.mxu1 %v6841_v27  ;;  %2749 = vmatprep.subr.bf16.mxu0 %v6842_v28  ;;  %v6880_v59 = vld [vmem:[#allocation2 + $0x9c4] ss:$48 sps:$4 sm:$0xff]   ;;  %v6883_v61 = vld [vmem:[#allocation2 + $0x9c0] ss:$48 sps:$4 sm:$0xff]   ;;  %v6917_v27 = vld [vmem:[#allocation2 + $0x788] ss:$48 sps:$4 sm:$0xff]  }
  0x71   : > { %2792 = vmatprep.subr.bf16.mxu1 %v6844_v29  ;;  %v6884_v62 = vld [vmem:[#allocation2 + $0x364] ss:$48 sps:$4 sm:$0xff]   ;;  %v6888_v0 = vld [vmem:[#allocation2 + $0x360] ss:$48 sps:$4 sm:$0xff]   ;;  %v6922_v28 = vld [vmem:[#allocation2 + $0x12c] ss:$48 sps:$4 sm:$0xff]  }
  0x72   : > { %v6886_v63 = vld [vmem:[#allocation2 + $0x964] ss:$48 sps:$4 sm:$0xff]   ;;  %v6889_v1 = vld [vmem:[#allocation2 + $0x960] ss:$48 sps:$4 sm:$0xff]   ;;  %v6925_v29 = vld [vmem:[#allocation2 + $0x72c] ss:$48 sps:$4 sm:$0xff]  }
  0x73   : > { %2750 = vmatpush1.bf16.msra.mxu0 %v6846_v30  ;;  %v6890_v2 = vld [vmem:[#allocation2 + $0x304] ss:$48 sps:$4 sm:$0xff]   ;;  %v6894_v4 = vld [vmem:[#allocation2 + $0x300] ss:$48 sps:$4 sm:$0xff]   ;;  %v6920_v30 = vld [vmem:[#allocation2 + $0x128] ss:$48 sps:$4 sm:$0xff]  }
  0x74   : > { %2793 = vmatpush1.bf16.msra.mxu1 %v6847_v31  ;;  %2751 = vmatprep.subr.bf16.mxu0 %v6848_v32  ;;  %v6892_v3 = vld [vmem:[#allocation2 + $0x904] ss:$48 sps:$4 sm:$0xff]   ;;  %v6895_v5 = vld [vmem:[#allocation2 + $0x900] ss:$48 sps:$4 sm:$0xff]   ;;  %v6923_v31 = vld [vmem:[#allocation2 + $0x728] ss:$48 sps:$4 sm:$0xff]  }
  0x75   : > { %2794 = vmatprep.subr.bf16.mxu1 %v6850_v33  ;;  %v355_v6 = vld [vmem:[%s7945_s12] sm:$0xff]  ;;  %v357_v8 = vld [vmem:[%s7945_s12 + $0x10] sm:$0xff]  ;;  %v6928_v32 = vld [vmem:[#allocation2 + $0xcc] ss:$48 sps:$4 sm:$0xff]  }
  0x76   : > { %v359_v7 = vld [vmem:[%s7945_s12 + $0x20] sm:$0xff]  ;;  %v361_v9 = vld [vmem:[%s7945_s12 + $0x30] sm:$0xff]  ;;  %v6931_v33 = vld [vmem:[#allocation2 + $0x6cc] ss:$48 sps:$4 sm:$0xff]  }
  0x77   : > { %2752 = vmatpush2.bf16.msra.mxu0 %v6852_v34  ;;  %v7961_v12 = vpack.c.bf16 %v359_v7, %v355_v6  ;;  %v7963_v13 = vpack.c.bf16 %v361_v9, %v357_v8  ;;  %v6926_v34 = vld [vmem:[#allocation2 + $0xc8] ss:$48 sps:$4 sm:$0xff]   ;;  %v6952_v48 = vld [vmem:[#allocation2 + $0x54c] ss:$48 sps:$4 sm:$0xff]  }
  0x78   : > { %2795 = vmatpush2.bf16.msra.mxu1 %v6853_v35  ;;  %2753 = vmatprep.subr.bf16.mxu0 %v6854_v36  ;;  %v6929_v35 = vld [vmem:[#allocation2 + $0x6c8] ss:$48 sps:$4 sm:$0xff]   ;;  %v6934_v36 = vld [vmem:[#allocation2 + $0x6c] ss:$48 sps:$4 sm:$0xff]  }
  0x79   : > { %2796 = vmatprep.subr.bf16.mxu1 %v6856_v37  ;;  %v6937_v37 = vld [vmem:[#allocation2 + $0x66c] ss:$48 sps:$4 sm:$0xff]   ;;  %v6947_v47 = vld [vmem:[#allocation2 + $0xba8] ss:$48 sps:$4 sm:$0xff]  }
  0x7a   : > { %v6955_v49 = vld [vmem:[#allocation2 + $0xb4c] ss:$48 sps:$4 sm:$0xff]   ;;  %v6980_v8 = vld [vmem:[#allocation2 + $0x368] ss:$48 sps:$4 sm:$0xff]  }
  0x7b   : > { %2754 = vmatpush2.bf16.msra.mxu0 %v6858_v38  ;;  %v6932_v38 = vld [vmem:[#allocation2 + $0x68] ss:$48 sps:$4 sm:$0xff]   ;;  %v6982_v6 = vld [vmem:[#allocation2 + $0x36c] ss:$48 sps:$4 sm:$0xff]  }
  0x7c   : > { %2797 = vmatpush2.bf16.msra.mxu1 %v6859_v39  ;;  %2755 = vmatprep.subr.bf16.mxu0 %v6860_v40  ;;  %v6935_v39 = vld [vmem:[#allocation2 + $0x668] ss:$48 sps:$4 sm:$0xff]   ;;  %v6940_v40 = vld [vmem:[#allocation2 + $0xc] ss:$48 sps:$4 sm:$0xff]  }
  0x7d   : > { %2798 = vmatprep.subr.bf16.mxu1 %v6862_v41  ;;  %v6943_v41 = vld [vmem:[#allocation2 + $0x60c] ss:$48 sps:$4 sm:$0xff]   ;;  %v6983_v9 = vld [vmem:[#allocation2 + $0x968] ss:$48 sps:$4 sm:$0xff]  }
  0x7e   : > { %v6985_v7 = vld [vmem:[#allocation2 + $0x96c] ss:$48 sps:$4 sm:$0xff]  }
  0x7f   : > { %2756 = vmatpush2.bf16.msra.mxu0 %v6864_v42  ;;  %v6938_v42 = vld [vmem:[#allocation2 + $0x8] ss:$48 sps:$4 sm:$0xff]  }
  0x80   : > { %2799 = vmatpush2.bf16.msra.mxu1 %v6865_v43  ;;  %2757 = vmatprep.subr.bf16.mxu0 %v6866_v44  ;;  %v6941_v43 = vld [vmem:[#allocation2 + $0x608] ss:$48 sps:$4 sm:$0xff]   ;;  %v6946_v44 = vld [vmem:[#allocation2 + $0x5ac] ss:$48 sps:$4 sm:$0xff]  }
  0x81   : > { %2800 = vmatprep.subr.bf16.mxu1 %v6868_v45  ;;  %v6949_v45 = vld [vmem:[#allocation2 + $0xbac] ss:$48 sps:$4 sm:$0xff]  }
  0x83   : > { %2758 = vmatpush2.bf16.msra.mxu0 %v6870_v50  ;;  %v6950_v50 = vld [vmem:[#allocation2 + $0x548] ss:$48 sps:$4 sm:$0xff]  }
  0x84   : > { %2801 = vmatpush2.bf16.msra.mxu1 %v6871_v51  ;;  %2759 = vmatprep.subr.bf16.mxu0 %v6872_v52  ;;  %v6953_v51 = vld [vmem:[#allocation2 + $0xb48] ss:$48 sps:$4 sm:$0xff]   ;;  %v6958_v52 = vld [vmem:[#allocation2 + $0x4ec] ss:$48 sps:$4 sm:$0xff]  }
  0x85   : > { %2802 = vmatprep.subr.bf16.mxu1 %v6874_v55  ;;  %v6961_v55 = vld [vmem:[#allocation2 + $0xaec] ss:$48 sps:$4 sm:$0xff]  }
  0x87   : > { %2760 = vmatpush2.bf16.msra.mxu0 %v6876_v56  ;;  %v6956_v56 = vld [vmem:[#allocation2 + $0x4e8] ss:$48 sps:$4 sm:$0xff]  }
  0x88   : > { %2803 = vmatpush2.bf16.msra.mxu1 %v6877_v57  ;;  %2761 = vmatprep.subr.bf16.mxu0 %v6878_v58  ;;  %v6959_v57 = vld [vmem:[#allocation2 + $0xae8] ss:$48 sps:$4 sm:$0xff]   ;;  %v6964_v58 = vld [vmem:[#allocation2 + $0x48c] ss:$48 sps:$4 sm:$0xff]  }
  0x89   : > { %2804 = vmatprep.subr.bf16.mxu1 %v6880_v59  ;;  %v6967_v59 = vld [vmem:[#allocation2 + $0xa8c] ss:$48 sps:$4 sm:$0xff]  }
  0x8b   : > { %2762 = vmatpush2.bf16.msra.mxu0 %v6882_v60  ;;  %v6962_v60 = vld [vmem:[#allocation2 + $0x488] ss:$48 sps:$4 sm:$0xff]  }
  0x8c   : > { %2805 = vmatpush2.bf16.msra.mxu1 %v6883_v61  ;;  %2763 = vmatprep.subr.bf16.mxu0 %v6884_v62  ;;  %v6965_v61 = vld [vmem:[#allocation2 + $0xa88] ss:$48 sps:$4 sm:$0xff]   ;;  %v6970_v62 = vld [vmem:[#allocation2 + $0x42c] ss:$48 sps:$4 sm:$0xff]  }
  0x8d   : > { %2806 = vmatprep.subr.bf16.mxu1 %v6886_v63  ;;  %v6973_v63 = vld [vmem:[#allocation2 + $0xa2c] ss:$48 sps:$4 sm:$0xff]  }
  0x8f   : > { %2764 = vmatpush2.bf16.msra.mxu0 %v6888_v0  ;;  %v6968_v0 = vld [vmem:[#allocation2 + $0x428] ss:$48 sps:$4 sm:$0xff]  }
  0x90   : > { %2807 = vmatpush2.bf16.msra.mxu1 %v6889_v1  ;;  %2765 = vmatprep.subr.bf16.mxu0 %v6890_v2  ;;  %v6971_v1 = vld [vmem:[#allocation2 + $0xa28] ss:$48 sps:$4 sm:$0xff]   ;;  %v6976_v2 = vld [vmem:[#allocation2 + $0x3cc] ss:$48 sps:$4 sm:$0xff]  }
  0x91   : > { %2808 = vmatprep.subr.bf16.mxu1 %v6892_v3  ;;  %v6979_v3 = vld [vmem:[#allocation2 + $0x9cc] ss:$48 sps:$4 sm:$0xff]  }
  0x93   : > { %2766 = vmatpush2.bf16.msra.mxu0 %v6894_v4  ;;  %v6974_v4 = vld [vmem:[#allocation2 + $0x3c8] ss:$48 sps:$4 sm:$0xff]  }
  0x94   : > { %2809 = vmatpush2.bf16.msra.mxu1 %v6895_v5  ;;  %2821 = vmatprep.subr.bf16.mxu0 %v6898_v10  ;;  %v6977_v5 = vld [vmem:[#allocation2 + $0x9c8] ss:$48 sps:$4 sm:$0xff]   ;;  %v6988_v10 = vld [vmem:[#allocation2 + $0x30c] ss:$48 sps:$4 sm:$0xff]  }
  0x95   : > { %2864 = vmatprep.subr.bf16.mxu1 %v6901_v11  ;;  %v6991_v11 = vld [vmem:[#allocation2 + $0x90c] ss:$48 sps:$4 sm:$0xff]  }
  0x96   : > { %2768 = vmatmul.mubr.bf16.vlgmr.msra.gmra.mxu0 %v7961_v12 }
  0x97   : > { %2811 = vmatmul.mubr.bf16.vlgmr.msra.gmra.mxu1 %v7963_v13  ;;  %2822 = vmatpush1.bf16.msra.mxu0 %v6896_v14  ;;  %v6986_v14 = vld [vmem:[#allocation2 + $0x308] ss:$48 sps:$4 sm:$0xff]  }
  0x98   : > { %2865 = vmatpush1.bf16.msra.mxu1 %v6899_v15  ;;  %2823 = vmatprep.subr.bf16.mxu0 %v6904_v16  ;;  %v6989_v15 = vld [vmem:[#allocation2 + $0x908] ss:$48 sps:$4 sm:$0xff]   ;;  %v6994_v16 = vld [vmem:[#allocation2 + $0x2b4] ss:$48 sps:$4 sm:$0xff]  }
  0x99   : > { %2866 = vmatprep.subr.bf16.mxu1 %v6907_v17  ;;  %2853 = vmatprep.mubr.bf16.mxu0 %v7951_v53  ;;  %v6997_v17 = vld [vmem:[#allocation2 + $0x8b4] ss:$48 sps:$4 sm:$0xff]  }
  0x9a   : > { %2896 = vmatprep.mubr.bf16.mxu1 %v7953_v54 }
  0x9b   : > { %2824 = vmatpush1.bf16.msra.mxu0 %v6902_v18  ;;  %v6992_v18 = vld [vmem:[#allocation2 + $0x2b0] ss:$48 sps:$4 sm:$0xff]  }
  0x9c   : > { %2867 = vmatpush1.bf16.msra.mxu1 %v6905_v19  ;;  %2825 = vmatprep.subr.bf16.mxu0 %v6910_v20  ;;  %v6995_v19 = vld [vmem:[#allocation2 + $0x8b0] ss:$48 sps:$4 sm:$0xff]   ;;  %v7000_v20 = vld [vmem:[#allocation2 + $0x254] ss:$48 sps:$4 sm:$0xff]  }
  0x9d   : > { %2868 = vmatprep.subr.bf16.mxu1 %v6913_v21  ;;  %v7003_v21 = vld [vmem:[#allocation2 + $0x854] ss:$48 sps:$4 sm:$0xff]  }
  0x9f   : > { %2826 = vmatpush1.bf16.msra.mxu0 %v6908_v22  ;;  %v6998_v22 = vld [vmem:[#allocation2 + $0x250] ss:$48 sps:$4 sm:$0xff]  }
  0xa0   : > { %2869 = vmatpush1.bf16.msra.mxu1 %v6911_v23  ;;  %2827 = vmatprep.subr.bf16.mxu0 %v6916_v24  ;;  %v7001_v23 = vld [vmem:[#allocation2 + $0x850] ss:$48 sps:$4 sm:$0xff]   ;;  %v7006_v24 = vld [vmem:[#allocation2 + $0x1f4] ss:$48 sps:$4 sm:$0xff]  }
  0xa1   : > { %2870 = vmatprep.subr.bf16.mxu1 %v6919_v25  ;;  %v7009_v25 = vld [vmem:[#allocation2 + $0x7f4] ss:$48 sps:$4 sm:$0xff]  }
  0xa3   : > { %2828 = vmatpush1.bf16.msra.mxu0 %v6914_v26  ;;  %v7004_v26 = vld [vmem:[#allocation2 + $0x1f0] ss:$48 sps:$4 sm:$0xff]  }
  0xa4   : > { %2871 = vmatpush1.bf16.msra.mxu1 %v6917_v27  ;;  %2829 = vmatprep.subr.bf16.mxu0 %v6922_v28  ;;  %v7007_v27 = vld [vmem:[#allocation2 + $0x7f0] ss:$48 sps:$4 sm:$0xff]   ;;  %v7012_v28 = vld [vmem:[#allocation2 + $0x194] ss:$48 sps:$4 sm:$0xff]  }
  0xa5   : > { %2872 = vmatprep.subr.bf16.mxu1 %v6925_v29  ;;  %v7015_v29 = vld [vmem:[#allocation2 + $0x794] ss:$48 sps:$4 sm:$0xff]  }
  0xa7   : > { %2830 = vmatpush1.bf16.msra.mxu0 %v6920_v30  ;;  %v7010_v30 = vld [vmem:[#allocation2 + $0x190] ss:$48 sps:$4 sm:$0xff]  }
  0xa8   : > { %2873 = vmatpush1.bf16.msra.mxu1 %v6923_v31  ;;  %2831 = vmatprep.subr.bf16.mxu0 %v6928_v32  ;;  %v7013_v31 = vld [vmem:[#allocation2 + $0x790] ss:$48 sps:$4 sm:$0xff]   ;;  %v7018_v32 = vld [vmem:[#allocation2 + $0x134] ss:$48 sps:$4 sm:$0xff]  }
  0xa9   : > { %2874 = vmatprep.subr.bf16.mxu1 %v6931_v33  ;;  %v7021_v33 = vld [vmem:[#allocation2 + $0x734] ss:$48 sps:$4 sm:$0xff]  }
  0xab   : > { %2832 = vmatpush1.bf16.msra.mxu0 %v6926_v34  ;;  %v7016_v34 = vld [vmem:[#allocation2 + $0x130] ss:$48 sps:$4 sm:$0xff]  }
  0xac   : > { %2875 = vmatpush1.bf16.msra.mxu1 %v6929_v35  ;;  %2833 = vmatprep.subr.bf16.mxu0 %v6934_v36  ;;  %v7019_v35 = vld [vmem:[#allocation2 + $0x730] ss:$48 sps:$4 sm:$0xff]   ;;  %v7024_v36 = vld [vmem:[#allocation2 + $0xd4] ss:$48 sps:$4 sm:$0xff]  }
  0xad   : > { %2876 = vmatprep.subr.bf16.mxu1 %v6937_v37  ;;  %v7027_v37 = vld [vmem:[#allocation2 + $0x6d4] ss:$48 sps:$4 sm:$0xff]  }
  0xaf   : > { %2834 = vmatpush1.bf16.msra.mxu0 %v6932_v38  ;;  %v7022_v38 = vld [vmem:[#allocation2 + $0xd0] ss:$48 sps:$4 sm:$0xff]  }
  0xb0   : > { %2877 = vmatpush1.bf16.msra.mxu1 %v6935_v39  ;;  %2835 = vmatprep.subr.bf16.mxu0 %v6940_v40  ;;  %v7025_v39 = vld [vmem:[#allocation2 + $0x6d0] ss:$48 sps:$4 sm:$0xff]   ;;  %v7030_v40 = vld [vmem:[#allocation2 + $0x74] ss:$48 sps:$4 sm:$0xff]  }
  0xb1   : > { %2878 = vmatprep.subr.bf16.mxu1 %v6943_v41  ;;  %v7033_v41 = vld [vmem:[#allocation2 + $0x674] ss:$48 sps:$4 sm:$0xff]  }
  0xb3   : > { %2836 = vmatpush1.bf16.msra.mxu0 %v6938_v42  ;;  %v7028_v42 = vld [vmem:[#allocation2 + $0x70] ss:$48 sps:$4 sm:$0xff]  }
  0xb4   : > { %2879 = vmatpush1.bf16.msra.mxu1 %v6941_v43  ;;  %2837 = vmatprep.subr.bf16.mxu0 %v6946_v44  ;;  %v7031_v43 = vld [vmem:[#allocation2 + $0x670] ss:$48 sps:$4 sm:$0xff]   ;;  %v7036_v44 = vld [vmem:[#allocation2 + $0x14] ss:$48 sps:$4 sm:$0xff]  }
  0xb5   : > { %2880 = vmatprep.subr.bf16.mxu1 %v6949_v45  ;;  %v7039_v45 = vld [vmem:[#allocation2 + $0x614] ss:$48 sps:$4 sm:$0xff]  }
  0xb7   : > { %2838 = vmatpush2.bf16.msra.mxu0 %v6944_v46  ;;  %v7034_v46 = vld [vmem:[#allocation2 + $0x10] ss:$48 sps:$4 sm:$0xff]  }
  0xb8   : > { %2881 = vmatpush2.bf16.msra.mxu1 %v6947_v47  ;;  %2839 = vmatprep.subr.bf16.mxu0 %v6952_v48  ;;  %v7037_v47 = vld [vmem:[#allocation2 + $0x610] ss:$48 sps:$4 sm:$0xff]   ;;  %v7042_v48 = vld [vmem:[#allocation2 + $0x5b4] ss:$48 sps:$4 sm:$0xff]  }
  0xb9   : > { %2882 = vmatprep.subr.bf16.mxu1 %v6955_v49  ;;  %v7045_v49 = vld [vmem:[#allocation2 + $0xbb4] ss:$48 sps:$4 sm:$0xff]  }
  0xbb   : > { %2840 = vmatpush2.bf16.msra.mxu0 %v6950_v50  ;;  %v7040_v50 = vld [vmem:[#allocation2 + $0x5b0] ss:$48 sps:$4 sm:$0xff]  }
  0xbc   : > { %2883 = vmatpush2.bf16.msra.mxu1 %v6953_v51  ;;  %2841 = vmatprep.subr.bf16.mxu0 %v6958_v52  ;;  %v7043_v51 = vld [vmem:[#allocation2 + $0xbb0] ss:$48 sps:$4 sm:$0xff]   ;;  %v7048_v52 = vld [vmem:[#allocation2 + $0x554] ss:$48 sps:$4 sm:$0xff]  }
  0xbd   : > { %2884 = vmatprep.subr.bf16.mxu1 %v6961_v55  ;;  %v7051_v55 = vld [vmem:[#allocation2 + $0xb54] ss:$48 sps:$4 sm:$0xff]  }
  0xbf   : > { %2842 = vmatpush2.bf16.msra.mxu0 %v6956_v56  ;;  %v7046_v56 = vld [vmem:[#allocation2 + $0x550] ss:$48 sps:$4 sm:$0xff]  }
  0xc0   : > { %2885 = vmatpush2.bf16.msra.mxu1 %v6959_v57  ;;  %2843 = vmatprep.subr.bf16.mxu0 %v6964_v58  ;;  %v7049_v57 = vld [vmem:[#allocation2 + $0xb50] ss:$48 sps:$4 sm:$0xff]   ;;  %v7054_v58 = vld [vmem:[#allocation2 + $0x4f4] ss:$48 sps:$4 sm:$0xff]  }
  0xc1   : > { %2886 = vmatprep.subr.bf16.mxu1 %v6967_v59  ;;  %v7057_v59 = vld [vmem:[#allocation2 + $0xaf4] ss:$48 sps:$4 sm:$0xff]  }
  0xc3   : > { %2844 = vmatpush2.bf16.msra.mxu0 %v6962_v60  ;;  %v7052_v60 = vld [vmem:[#allocation2 + $0x4f0] ss:$48 sps:$4 sm:$0xff]  }
  0xc4   : > { %2887 = vmatpush2.bf16.msra.mxu1 %v6965_v61  ;;  %2845 = vmatprep.subr.bf16.mxu0 %v6970_v62  ;;  %v7055_v61 = vld [vmem:[#allocation2 + $0xaf0] ss:$48 sps:$4 sm:$0xff]   ;;  %v7060_v62 = vld [vmem:[#allocation2 + $0x494] ss:$48 sps:$4 sm:$0xff]  }
  0xc5   : > { %2888 = vmatprep.subr.bf16.mxu1 %v6973_v63  ;;  %v7063_v63 = vld [vmem:[#allocation2 + $0xa94] ss:$48 sps:$4 sm:$0xff]  }
  0xc7   : > { %2846 = vmatpush2.bf16.msra.mxu0 %v6968_v0  ;;  %v7058_v0 = vld [vmem:[#allocation2 + $0x490] ss:$48 sps:$4 sm:$0xff]  }
  0xc8   : > { %2889 = vmatpush2.bf16.msra.mxu1 %v6971_v1  ;;  %2847 = vmatprep.subr.bf16.mxu0 %v6976_v2  ;;  %v7061_v1 = vld [vmem:[#allocation2 + $0xa90] ss:$48 sps:$4 sm:$0xff]   ;;  %v7066_v2 = vld [vmem:[#allocation2 + $0x434] ss:$48 sps:$4 sm:$0xff]  }
  0xc9   : > { %2890 = vmatprep.subr.bf16.mxu1 %v6979_v3  ;;  %v7069_v3 = vld [vmem:[#allocation2 + $0xa34] ss:$48 sps:$4 sm:$0xff]  }
  0xcb   : > { %2848 = vmatpush2.bf16.msra.mxu0 %v6974_v4  ;;  %v7064_v4 = vld [vmem:[#allocation2 + $0x430] ss:$48 sps:$4 sm:$0xff]  }
  0xcc   : > { %2891 = vmatpush2.bf16.msra.mxu1 %v6977_v5  ;;  %2849 = vmatprep.subr.bf16.mxu0 %v6982_v6  ;;  %v7067_v5 = vld [vmem:[#allocation2 + $0xa30] ss:$48 sps:$4 sm:$0xff]   ;;  %v7072_v6 = vld [vmem:[#allocation2 + $0x3d4] ss:$48 sps:$4 sm:$0xff]  }
  0xcd   : > { %2892 = vmatprep.subr.bf16.mxu1 %v6985_v7  ;;  %v7075_v7 = vld [vmem:[#allocation2 + $0x9d4] ss:$48 sps:$4 sm:$0xff]  }
  0xcf   : > { %2850 = vmatpush2.bf16.msra.mxu0 %v6980_v8  ;;  %v7070_v8 = vld [vmem:[#allocation2 + $0x3d0] ss:$48 sps:$4 sm:$0xff]  }
  0xd0   : > { %2893 = vmatpush2.bf16.msra.mxu1 %v6983_v9  ;;  %2851 = vmatprep.subr.bf16.mxu0 %v6988_v10  ;;  %v7073_v9 = vld [vmem:[#allocation2 + $0x9d0] ss:$48 sps:$4 sm:$0xff]   ;;  %v7078_v10 = vld [vmem:[#allocation2 + $0x374] ss:$48 sps:$4 sm:$0xff]  }
  0xd1   : > { %2894 = vmatprep.subr.bf16.mxu1 %v6991_v11  ;;  %v7081_v11 = vld [vmem:[#allocation2 + $0x974] ss:$48 sps:$4 sm:$0xff]  }
  0xd3   : > { %2852 = vmatpush2.bf16.msra.mxu0 %v6986_v14  ;;  %v7076_v14 = vld [vmem:[#allocation2 + $0x370] ss:$48 sps:$4 sm:$0xff]  }
  0xd4   : > { %2895 = vmatpush2.bf16.msra.mxu1 %v6989_v15  ;;  %2907 = vmatprep.subr.bf16.mxu0 %v6994_v16  ;;  %v7079_v15 = vld [vmem:[#allocation2 + $0x970] ss:$48 sps:$4 sm:$0xff]   ;;  %v7084_v16 = vld [vmem:[#allocation2 + $0x314] ss:$48 sps:$4 sm:$0xff]  }
  0xd5   : > { %2950 = vmatprep.subr.bf16.mxu1 %v6997_v17  ;;  %v7087_v17 = vld [vmem:[#allocation2 + $0x914] ss:$48 sps:$4 sm:$0xff]  }
  0xd6   : > { %2854 = vmatmul.mubr.bf16.vlgmr.msra.gmra.mxu0 %v7961_v12 }
  0xd7   : > { %2897 = vmatmul.mubr.bf16.vlgmr.msra.gmra.mxu1 %v7963_v13  ;;  %2908 = vmatpush1.bf16.msra.mxu0 %v6992_v18  ;;  %v7082_v18 = vld [vmem:[#allocation2 + $0x310] ss:$48 sps:$4 sm:$0xff]  }
  0xd8   : > { %2951 = vmatpush1.bf16.msra.mxu1 %v6995_v19  ;;  %2909 = vmatprep.subr.bf16.mxu0 %v7000_v20  ;;  %v7085_v19 = vld [vmem:[#allocation2 + $0x910] ss:$48 sps:$4 sm:$0xff]   ;;  %v7090_v20 = vld [vmem:[#allocation2 + $0x2bc] ss:$48 sps:$4 sm:$0xff]  }
  0xd9   : > { %2952 = vmatprep.subr.bf16.mxu1 %v7003_v21  ;;  %2939 = vmatprep.mubr.bf16.mxu0 %v7951_v53  ;;  %v7093_v21 = vld [vmem:[#allocation2 + $0x8bc] ss:$48 sps:$4 sm:$0xff]  }
  0xda   : > { %2982 = vmatprep.mubr.bf16.mxu1 %v7953_v54 }
  0xdb   : > { %2910 = vmatpush1.bf16.msra.mxu0 %v6998_v22  ;;  %v7088_v22 = vld [vmem:[#allocation2 + $0x2b8] ss:$48 sps:$4 sm:$0xff]  }
  0xdc   : > { %2953 = vmatpush1.bf16.msra.mxu1 %v7001_v23  ;;  %2911 = vmatprep.subr.bf16.mxu0 %v7006_v24  ;;  %v7091_v23 = vld [vmem:[#allocation2 + $0x8b8] ss:$48 sps:$4 sm:$0xff]   ;;  %v7096_v24 = vld [vmem:[#allocation2 + $0x25c] ss:$48 sps:$4 sm:$0xff]  }
  0xdd   : > { %2954 = vmatprep.subr.bf16.mxu1 %v7009_v25  ;;  %v7099_v25 = vld [vmem:[#allocation2 + $0x85c] ss:$48 sps:$4 sm:$0xff]  }
  0xdf   : > { %2912 = vmatpush1.bf16.msra.mxu0 %v7004_v26  ;;  %v7094_v26 = vld [vmem:[#allocation2 + $0x258] ss:$48 sps:$4 sm:$0xff]  }
  0xe0   : > { %2955 = vmatpush1.bf16.msra.mxu1 %v7007_v27  ;;  %2913 = vmatprep.subr.bf16.mxu0 %v7012_v28  ;;  %v7097_v27 = vld [vmem:[#allocation2 + $0x858] ss:$48 sps:$4 sm:$0xff]   ;;  %v7102_v28 = vld [vmem:[#allocation2 + $0x1fc] ss:$48 sps:$4 sm:$0xff]  }
  0xe1   : > { %2956 = vmatprep.subr.bf16.mxu1 %v7015_v29  ;;  %v7105_v29 = vld [vmem:[#allocation2 + $0x7fc] ss:$48 sps:$4 sm:$0xff]  }
  0xe3   : > { %2914 = vmatpush1.bf16.msra.mxu0 %v7010_v30  ;;  %v7100_v30 = vld [vmem:[#allocation2 + $0x1f8] ss:$48 sps:$4 sm:$0xff]  }
  0xe4   : > { %2957 = vmatpush1.bf16.msra.mxu1 %v7013_v31  ;;  %2915 = vmatprep.subr.bf16.mxu0 %v7018_v32  ;;  %v7103_v31 = vld [vmem:[#allocation2 + $0x7f8] ss:$48 sps:$4 sm:$0xff]   ;;  %v7108_v32 = vld [vmem:[#allocation2 + $0x19c] ss:$48 sps:$4 sm:$0xff]  }
  0xe5   : > { %2958 = vmatprep.subr.bf16.mxu1 %v7021_v33  ;;  %v7111_v33 = vld [vmem:[#allocation2 + $0x79c] ss:$48 sps:$4 sm:$0xff]  }
  0xe7   : > { %2916 = vmatpush1.bf16.msra.mxu0 %v7016_v34  ;;  %v7106_v34 = vld [vmem:[#allocation2 + $0x198] ss:$48 sps:$4 sm:$0xff]  }
  0xe8   : > { %2959 = vmatpush1.bf16.msra.mxu1 %v7019_v35  ;;  %2917 = vmatprep.subr.bf16.mxu0 %v7024_v36  ;;  %v7109_v35 = vld [vmem:[#allocation2 + $0x798] ss:$48 sps:$4 sm:$0xff]   ;;  %v7114_v36 = vld [vmem:[#allocation2 + $0x13c] ss:$48 sps:$4 sm:$0xff]  }
  0xe9   : > { %2960 = vmatprep.subr.bf16.mxu1 %v7027_v37  ;;  %v7117_v37 = vld [vmem:[#allocation2 + $0x73c] ss:$48 sps:$4 sm:$0xff]  }
  0xeb   : > { %2918 = vmatpush1.bf16.msra.mxu0 %v7022_v38  ;;  %v7112_v38 = vld [vmem:[#allocation2 + $0x138] ss:$48 sps:$4 sm:$0xff]  }
  0xec   : > { %2961 = vmatpush1.bf16.msra.mxu1 %v7025_v39  ;;  %2919 = vmatprep.subr.bf16.mxu0 %v7030_v40  ;;  %v7115_v39 = vld [vmem:[#allocation2 + $0x738] ss:$48 sps:$4 sm:$0xff]   ;;  %v7120_v40 = vld [vmem:[#allocation2 + $0xdc] ss:$48 sps:$4 sm:$0xff]  }
  0xed   : > { %2962 = vmatprep.subr.bf16.mxu1 %v7033_v41  ;;  %v7123_v41 = vld [vmem:[#allocation2 + $0x6dc] ss:$48 sps:$4 sm:$0xff]  }
  0xef   : > { %2920 = vmatpush1.bf16.msra.mxu0 %v7028_v42  ;;  %v7118_v42 = vld [vmem:[#allocation2 + $0xd8] ss:$48 sps:$4 sm:$0xff]  }
  0xf0   : > { %2963 = vmatpush1.bf16.msra.mxu1 %v7031_v43  ;;  %2921 = vmatprep.subr.bf16.mxu0 %v7036_v44  ;;  %v7121_v43 = vld [vmem:[#allocation2 + $0x6d8] ss:$48 sps:$4 sm:$0xff]   ;;  %v7126_v44 = vld [vmem:[#allocation2 + $0x7c] ss:$48 sps:$4 sm:$0xff]  }
  0xf1   : > { %2964 = vmatprep.subr.bf16.mxu1 %v7039_v45  ;;  %v7129_v45 = vld [vmem:[#allocation2 + $0x67c] ss:$48 sps:$4 sm:$0xff]  }
  0xf3   : > { %2922 = vmatpush1.bf16.msra.mxu0 %v7034_v46  ;;  %v7124_v46 = vld [vmem:[#allocation2 + $0x78] ss:$48 sps:$4 sm:$0xff]  }
  0xf4   : > { %2965 = vmatpush1.bf16.msra.mxu1 %v7037_v47  ;;  %2923 = vmatprep.subr.bf16.mxu0 %v7042_v48  ;;  %v7127_v47 = vld [vmem:[#allocation2 + $0x678] ss:$48 sps:$4 sm:$0xff]   ;;  %v7132_v48 = vld [vmem:[#allocation2 + $0x1c] ss:$48 sps:$4 sm:$0xff]  }
  0xf5   : > { %2966 = vmatprep.subr.bf16.mxu1 %v7045_v49  ;;  %v7135_v49 = vld [vmem:[#allocation2 + $0x61c] ss:$48 sps:$4 sm:$0xff]  }
  0xf7   : > { %2924 = vmatpush2.bf16.msra.mxu0 %v7040_v50  ;;  %v7130_v50 = vld [vmem:[#allocation2 + $0x18] ss:$48 sps:$4 sm:$0xff]  }
  0xf8   : > { %2967 = vmatpush2.bf16.msra.mxu1 %v7043_v51  ;;  %2925 = vmatprep.subr.bf16.mxu0 %v7048_v52  ;;  %v7133_v51 = vld [vmem:[#allocation2 + $0x618] ss:$48 sps:$4 sm:$0xff]   ;;  %v7138_v52 = vld [vmem:[#allocation2 + $0x5bc] ss:$48 sps:$4 sm:$0xff]  }
  0xf9   : > { %2968 = vmatprep.subr.bf16.mxu1 %v7051_v55  ;;  %v7141_v55 = vld [vmem:[#allocation2 + $0xbbc] ss:$48 sps:$4 sm:$0xff]  }
  0xfb   : > { %2926 = vmatpush2.bf16.msra.mxu0 %v7046_v56  ;;  %v7136_v56 = vld [vmem:[#allocation2 + $0x5b8] ss:$48 sps:$4 sm:$0xff]  }
  0xfc   : > { %2969 = vmatpush2.bf16.msra.mxu1 %v7049_v57  ;;  %2927 = vmatprep.subr.bf16.mxu0 %v7054_v58  ;;  %v7139_v57 = vld [vmem:[#allocation2 + $0xbb8] ss:$48 sps:$4 sm:$0xff]   ;;  %v7144_v58 = vld [vmem:[#allocation2 + $0x55c] ss:$48 sps:$4 sm:$0xff]  }
  0xfd   : > { %2970 = vmatprep.subr.bf16.mxu1 %v7057_v59  ;;  %v7147_v59 = vld [vmem:[#allocation2 + $0xb5c] ss:$48 sps:$4 sm:$0xff]  }
  0xff   : > { %2928 = vmatpush2.bf16.msra.mxu0 %v7052_v60  ;;  %v7142_v60 = vld [vmem:[#allocation2 + $0x558] ss:$48 sps:$4 sm:$0xff]  }
 0x100   : > { %2971 = vmatpush2.bf16.msra.mxu1 %v7055_v61  ;;  %2929 = vmatprep.subr.bf16.mxu0 %v7060_v62  ;;  %v7145_v61 = vld [vmem:[#allocation2 + $0xb58] ss:$48 sps:$4 sm:$0xff]   ;;  %v7150_v62 = vld [vmem:[#allocation2 + $0x4fc] ss:$48 sps:$4 sm:$0xff]  }
 0x101   : > { %2972 = vmatprep.subr.bf16.mxu1 %v7063_v63  ;;  %v7153_v63 = vld [vmem:[#allocation2 + $0xafc] ss:$48 sps:$4 sm:$0xff]  }
 0x103   : > { %2930 = vmatpush2.bf16.msra.mxu0 %v7058_v0  ;;  %v7148_v0 = vld [vmem:[#allocation2 + $0x4f8] ss:$48 sps:$4 sm:$0xff]  }
 0x104   : > { %2973 = vmatpush2.bf16.msra.mxu1 %v7061_v1  ;;  %2931 = vmatprep.subr.bf16.mxu0 %v7066_v2  ;;  %v7151_v1 = vld [vmem:[#allocation2 + $0xaf8] ss:$48 sps:$4 sm:$0xff]   ;;  %v7156_v2 = vld [vmem:[#allocation2 + $0x49c] ss:$48 sps:$4 sm:$0xff]  }
 0x105   : > { %2974 = vmatprep.subr.bf16.mxu1 %v7069_v3  ;;  %v7159_v3 = vld [vmem:[#allocation2 + $0xa9c] ss:$48 sps:$4 sm:$0xff]  }
 0x107   : > { %2932 = vmatpush2.bf16.msra.mxu0 %v7064_v4  ;;  %v7154_v4 = vld [vmem:[#allocation2 + $0x498] ss:$48 sps:$4 sm:$0xff]  }
 0x108   : > { %2975 = vmatpush2.bf16.msra.mxu1 %v7067_v5  ;;  %2933 = vmatprep.subr.bf16.mxu0 %v7072_v6  ;;  %v7157_v5 = vld [vmem:[#allocation2 + $0xa98] ss:$48 sps:$4 sm:$0xff]   ;;  %v7162_v6 = vld [vmem:[#allocation2 + $0x43c] ss:$48 sps:$4 sm:$0xff]  }
 0x109   : > { %2976 = vmatprep.subr.bf16.mxu1 %v7075_v7  ;;  %v7165_v7 = vld [vmem:[#allocation2 + $0xa3c] ss:$48 sps:$4 sm:$0xff]  }
 0x10b   : > { %2934 = vmatpush2.bf16.msra.mxu0 %v7070_v8  ;;  %v7160_v8 = vld [vmem:[#allocation2 + $0x438] ss:$48 sps:$4 sm:$0xff]  }
 0x10c   : > { %2977 = vmatpush2.bf16.msra.mxu1 %v7073_v9  ;;  %2935 = vmatprep.subr.bf16.mxu0 %v7078_v10  ;;  %v7163_v9 = vld [vmem:[#allocation2 + $0xa38] ss:$48 sps:$4 sm:$0xff]   ;;  %v7168_v10 = vld [vmem:[#allocation2 + $0x3dc] ss:$48 sps:$4 sm:$0xff]  }
 0x10d   : > { %2978 = vmatprep.subr.bf16.mxu1 %v7081_v11  ;;  %v7171_v11 = vld [vmem:[#allocation2 + $0x9dc] ss:$48 sps:$4 sm:$0xff]  }
 0x10f   : > { %2936 = vmatpush2.bf16.msra.mxu0 %v7076_v14  ;;  %v7166_v14 = vld [vmem:[#allocation2 + $0x3d8] ss:$48 sps:$4 sm:$0xff]  }
 0x110   : > { %2979 = vmatpush2.bf16.msra.mxu1 %v7079_v15  ;;  %2937 = vmatprep.subr.bf16.mxu0 %v7084_v16  ;;  %v7169_v15 = vld [vmem:[#allocation2 + $0x9d8] ss:$48 sps:$4 sm:$0xff]   ;;  %v7174_v16 = vld [vmem:[#allocation2 + $0x37c] ss:$48 sps:$4 sm:$0xff]  }
 0x111   : > { %2980 = vmatprep.subr.bf16.mxu1 %v7087_v17  ;;  %v7177_v17 = vld [vmem:[#allocation2 + $0x97c] ss:$48 sps:$4 sm:$0xff]  }
 0x113   : > { %2938 = vmatpush2.bf16.msra.mxu0 %v7082_v18  ;;  %v755_v18 = vlaneseq }
 0x114   : > { %2981 = vmatpush2.bf16.msra.mxu1 %v7085_v19  ;;  %2993 = vmatprep.subr.bf16.mxu0 %v7090_v20  ;;  %v7172_v19 = vld [vmem:[#allocation2 + $0x378] ss:$48 sps:$4 sm:$0xff]  }
 0x115   : > { %3036 = vmatprep.subr.bf16.mxu1 %v7093_v21  ;;  %v7175_v20 = vld [vmem:[#allocation2 + $0x978] ss:$48 sps:$4 sm:$0xff]   ;;  %v7180_v21 = vld [vmem:[#allocation2 + $0x31c] ss:$48 sps:$4 sm:$0xff]  }
 0x116   : > { %2940 = vmatmul.mubr.bf16.vlgmr.msra.gmra.mxu0 %v7961_v12 }
 0x117   : > { %2983 = vmatmul.mubr.bf16.vlgmr.msra.gmra.mxu1 %v7963_v13  ;;  %2994 = vmatpush1.bf16.msra.mxu0 %v7088_v22  ;;  %v7183_v22 = vld [vmem:[#allocation2 + $0x91c] ss:$48 sps:$4 sm:$0xff]  }
 0x118   : > { %3037 = vmatpush1.bf16.msra.mxu1 %v7091_v23  ;;  %2995 = vmatprep.subr.bf16.mxu0 %v7096_v24  ;;  %v7977_v23 = vshrl.u32 %v755_v18, 7  ;;  %v7178_v24 = vld [vmem:[#allocation2 + $0x318] ss:$48 sps:$4 sm:$0xff]   ;;  %v7232_v18 = vld [vmem:[#allocation2 + $0x5c0] ss:$48 sps:$4 sm:$0xff]  }
 0x119   : > { %3038 = vmatprep.subr.bf16.mxu1 %v7099_v25  ;;  %3025 = vmatprep.mubr.bf16.mxu0 %v7951_v53  ;;  %v7181_v25 = vld [vmem:[#allocation2 + $0x918] ss:$48 sps:$4 sm:$0xff]  }
 0x11a   : > { %3068 = vmatprep.mubr.bf16.mxu1 %v7953_v54 }
 0x11b   : > { %2996 = vmatpush1.bf16.msra.mxu0 %v7094_v26  ;;  %v7186_v26 = vld [vmem:[#allocation2 + $0x2c4] ss:$48 sps:$4 sm:$0xff]  }
 0x11c   : > { %3039 = vmatpush1.bf16.msra.mxu1 %v7097_v27  ;;  %2997 = vmatprep.subr.bf16.mxu0 %v7102_v28  ;;  %v7189_v27 = vld [vmem:[#allocation2 + $0x8c4] ss:$48 sps:$4 sm:$0xff]  }
 0x11d   : > { %3040 = vmatprep.subr.bf16.mxu1 %v7105_v29  ;;  %v7982_v28 = vld [vmem:[%s8427_s2] sm:$0xff]  ;;  %v7985_v29 = vsub.s32 1, %v7977_v23 }
 0x11f   : > { %2998 = vmatpush1.bf16.msra.mxu0 %v7100_v30  ;;  %v7184_v30 = vld [vmem:[#allocation2 + $0x2c0] ss:$48 sps:$4 sm:$0xff]  }
 0x120   : > { %3041 = vmatpush1.bf16.msra.mxu1 %v7103_v31  ;;  %2999 = vmatprep.subr.bf16.mxu0 %v7108_v32  ;;  %v7187_v31 = vld [vmem:[#allocation2 + $0x8c0] ss:$48 sps:$4 sm:$0xff]   ;;  %v7192_v32 = vld [vmem:[#allocation2 + $0x264] ss:$48 sps:$4 sm:$0xff]  }
 0x121   : > { %3042 = vmatprep.subr.bf16.mxu1 %v7111_v33  ;;  %v7195_v33 = vld [vmem:[#allocation2 + $0x864] ss:$48 sps:$4 sm:$0xff]  }
 0x123   : > { %3000 = vmatpush1.bf16.msra.mxu0 %v7106_v34  ;;  %v762_v34 = vrot.slane %v7982_v28, %v7985_v29 }
 0x124   : > { %3043 = vmatpush1.bf16.msra.mxu1 %v7109_v35  ;;  %3001 = vmatprep.subr.bf16.mxu0 %v7114_v36  ;;  %v7190_v35 = vld [vmem:[#allocation2 + $0x260] ss:$48 sps:$4 sm:$0xff]  }
 0x125   : > { %3044 = vmatprep.subr.bf16.mxu1 %v7117_v37 }
 0x127   : > { %3002 = vmatpush1.bf16.msra.mxu0 %v7112_v38  ;;  %v7193_v38 = vld [vmem:[#allocation2 + $0x860] ss:$48 sps:$4 sm:$0xff]  }
 0x128   : > { %3045 = vmatpush1.bf16.msra.mxu1 %v7115_v39  ;;  %3003 = vmatprep.subr.bf16.mxu0 %v7120_v40  ;;  %v7198_v39 = vld [vmem:[#allocation2 + $0x204] ss:$48 sps:$4 sm:$0xff]  }
 0x129   : > { %3046 = vmatprep.subr.bf16.mxu1 %v7123_v41 }
 0x12b   : > { %3004 = vmatpush1.bf16.msra.mxu0 %v7118_v42  ;;  %v7201_v42 = vld [vmem:[#allocation2 + $0x804] ss:$48 sps:$4 sm:$0xff]  }
 0x12c   : > { %3047 = vmatpush1.bf16.msra.mxu1 %v7121_v43  ;;  %3005 = vmatprep.subr.bf16.mxu0 %v7126_v44  ;;  %v7196_v44 = vld [vmem:[#allocation2 + $0x200] ss:$48 sps:$4 sm:$0xff]  }
 0x12d   : > { %3048 = vmatprep.subr.bf16.mxu1 %v7129_v45  ;;  %v7199_v45 = vld [vmem:[#allocation2 + $0x800] ss:$48 sps:$4 sm:$0xff]  }
 0x12f   : > { %3006 = vmatpush1.bf16.msra.mxu0 %v7124_v46 }
 0x130   : > { %3049 = vmatpush1.bf16.msra.mxu1 %v7127_v47  ;;  %3007 = vmatprep.subr.bf16.mxu0 %v7132_v48  ;;  %v7204_v48 = vld [vmem:[#allocation2 + $0x1a4] ss:$48 sps:$4 sm:$0xff]  }
 0x131   : > { %3050 = vmatprep.subr.bf16.mxu1 %v7135_v49  ;;  %v7207_v49 = vld [vmem:[#allocation2 + $0x7a4] ss:$48 sps:$4 sm:$0xff]  }
 0x133   : > { %3008 = vmatpush1.bf16.msra.mxu0 %v7130_v50 }
 0x134   : > { %3051 = vmatpush1.bf16.msra.mxu1 %v7133_v51  ;;  %3009 = vmatprep.subr.bf16.mxu0 %v7138_v52 }
 0x135   : > { %3052 = vmatprep.subr.bf16.mxu1 %v7141_v55  ;;  %v7202_v55 = vld [vmem:[#allocation2 + $0x1a0] ss:$48 sps:$4 sm:$0xff]  }
 0x137   : > { %3010 = vmatpush2.bf16.msra.mxu0 %v7136_v56  ;;  %v7205_v56 = vld [vmem:[#allocation2 + $0x7a0] ss:$48 sps:$4 sm:$0xff]  }
 0x138   : > { %3053 = vmatpush2.bf16.msra.mxu1 %v7139_v57  ;;  %3011 = vmatprep.subr.bf16.mxu0 %v7144_v58  ;;  %v7210_v58 = vld [vmem:[#allocation2 + $0x144] ss:$48 sps:$4 sm:$0xff]  }
 0x139   : > { %3054 = vmatprep.subr.bf16.mxu1 %v7147_v59  ;;  %v7213_v59 = vld [vmem:[#allocation2 + $0x744] ss:$48 sps:$4 sm:$0xff]  }
 0x13b   : > { %3012 = vmatpush2.bf16.msra.mxu0 %v7142_v60 }
 0x13c   : > { %3055 = vmatpush2.bf16.msra.mxu1 %v7145_v61  ;;  %3013 = vmatprep.subr.bf16.mxu0 %v7150_v62 }
 0x13d   : > { %3056 = vmatprep.subr.bf16.mxu1 %v7153_v63  ;;  %v7208_v63 = vld [vmem:[#allocation2 + $0x140] ss:$48 sps:$4 sm:$0xff]  }
 0x13f   : > { %3014 = vmatpush2.bf16.msra.mxu0 %v7148_v0  ;;  %v7211_v0 = vld [vmem:[#allocation2 + $0x740] ss:$48 sps:$4 sm:$0xff]  }
 0x140   : > { %3057 = vmatpush2.bf16.msra.mxu1 %v7151_v1  ;;  %3015 = vmatprep.subr.bf16.mxu0 %v7156_v2  ;;  %v7216_v1 = vld [vmem:[#allocation2 + $0xe4] ss:$48 sps:$4 sm:$0xff]  }
 0x141   : > { %3058 = vmatprep.subr.bf16.mxu1 %v7159_v3  ;;  %v7219_v2 = vld [vmem:[#allocation2 + $0x6e4] ss:$48 sps:$4 sm:$0xff]  }
 0x143   : > { %3016 = vmatpush2.bf16.msra.mxu0 %v7154_v4  ;;  %v7214_v4 = vld [vmem:[#allocation2 + $0xe0] ss:$48 sps:$4 sm:$0xff]  }
 0x144   : > { %3059 = vmatpush2.bf16.msra.mxu1 %v7157_v5  ;;  %3017 = vmatprep.subr.bf16.mxu0 %v7162_v6  ;;  %v7217_v5 = vld [vmem:[#allocation2 + $0x6e0] ss:$48 sps:$4 sm:$0xff]   ;;  %v7222_v6 = vld [vmem:[#allocation2 + $0x84] ss:$48 sps:$4 sm:$0xff]  }
 0x145   : > { %3060 = vmatprep.subr.bf16.mxu1 %v7165_v7  ;;  %v7225_v7 = vld [vmem:[#allocation2 + $0x684] ss:$48 sps:$4 sm:$0xff]  }
 0x147   : > { %3018 = vmatpush2.bf16.msra.mxu0 %v7160_v8  ;;  %v7220_v8 = vld [vmem:[#allocation2 + $0x80] ss:$48 sps:$4 sm:$0xff]  }
 0x148   : > { %3061 = vmatpush2.bf16.msra.mxu1 %v7163_v9  ;;  %3019 = vmatprep.subr.bf16.mxu0 %v7168_v10  ;;  %v7223_v9 = vld [vmem:[#allocation2 + $0x680] ss:$48 sps:$4 sm:$0xff]   ;;  %v7228_v10 = vld [vmem:[#allocation2 + $0x24] ss:$48 sps:$4 sm:$0xff]  }
 0x149   : > { %3062 = vmatprep.subr.bf16.mxu1 %v7171_v11  ;;  %v7231_v11 = vld [vmem:[#allocation2 + $0x624] ss:$48 sps:$4 sm:$0xff]  }
 0x14b   : > { %3020 = vmatpush2.bf16.msra.mxu0 %v7166_v14  ;;  %v7226_v14 = vld [vmem:[#allocation2 + $0x20] ss:$48 sps:$4 sm:$0xff]  }
 0x14c   : > { %3063 = vmatpush2.bf16.msra.mxu1 %v7169_v15  ;;  %3021 = vmatprep.subr.bf16.mxu0 %v7174_v16  ;;  %v7229_v15 = vld [vmem:[#allocation2 + $0x620] ss:$48 sps:$4 sm:$0xff]   ;;  %v7234_v16 = vld [vmem:[#allocation2 + $0x5c4] ss:$48 sps:$4 sm:$0xff]  }
 0x14d   : > { %3064 = vmatprep.subr.bf16.mxu1 %v7177_v17  ;;  %v7237_v17 = vld [vmem:[#allocation2 + $0xbc4] ss:$48 sps:$4 sm:$0xff]  }
 0x14f   : > { %3022 = vmatpush2.bf16.msra.mxu0 %v7172_v19  ;;  %v7235_v19 = vld [vmem:[#allocation2 + $0xbc0] ss:$48 sps:$4 sm:$0xff]  }
 0x150   : > { %3065 = vmatpush2.bf16.msra.mxu1 %v7175_v20  ;;  %3023 = vmatprep.subr.bf16.mxu0 %v7180_v21  ;;  %v7240_v20 = vld [vmem:[#allocation2 + $0x564] ss:$48 sps:$4 sm:$0xff]  }
 0x151   : > { %3066 = vmatprep.subr.bf16.mxu1 %v7183_v22  ;;  %v7243_v21 = vld [vmem:[#allocation2 + $0xb64] ss:$48 sps:$4 sm:$0xff]   ;;  %v7238_v22 = vld [vmem:[#allocation2 + $0x560] ss:$48 sps:$4 sm:$0xff]  }
 0x153   : > { %3024 = vmatpush2.bf16.msra.mxu0 %v7178_v24  ;;  %v7241_v24 = vld [vmem:[#allocation2 + $0xb60] ss:$48 sps:$4 sm:$0xff]  }
 0x154   : > { %3067 = vmatpush2.bf16.msra.mxu1 %v7181_v25  ;;  %3079 = vmatprep.subr.bf16.mxu0 %v7186_v26  ;;  %v7246_v25 = vld [vmem:[#allocation2 + $0x504] ss:$48 sps:$4 sm:$0xff]  }
 0x155   : > { %3122 = vmatprep.subr.bf16.mxu1 %v7189_v27  ;;  %v7249_v26 = vld [vmem:[#allocation2 + $0xb04] ss:$48 sps:$4 sm:$0xff]   ;;  %v7244_v27 = vld [vmem:[#allocation2 + $0x500] ss:$48 sps:$4 sm:$0xff]  }
 0x156   : > { %v7989_v36 = vpop.f32.mrf.mxu0  ;;  %3026 = vmatmul.mubr.bf16.vlgmr.msra.gmra.mxu0 %v7961_v12 }
 0x157   : > { %v7991_v37 = vpop.f32.mrf.mxu1  ;;  %3069 = vmatmul.mubr.bf16.vlgmr.msra.gmra.mxu1 %v7963_v13  ;;  %3080 = vmatpush1.bf16.msra.mxu0 %v7184_v30  ;;  %v7247_v30 = vld [vmem:[#allocation2 + $0xb00] ss:$48 sps:$4 sm:$0xff]  }
 0x158   : > { %3123 = vmatpush1.bf16.msra.mxu1 %v7187_v31  ;;  %v2771_v40 = vpop.f32.mrf.mxu0  ;;  %3081 = vmatprep.subr.bf16.mxu0 %v7192_v32  ;;  %v7252_v31 = vld [vmem:[#allocation2 + $0x4a4] ss:$48 sps:$4 sm:$0xff]  }
 0x159   : > { %v2814_v41 = vpop.f32.mrf.mxu1  ;;  %3124 = vmatprep.subr.bf16.mxu1 %v7195_v33  ;;  %v2772_v43 = vadd.f32 %v2771_v40, %v762_v34  ;;  %3111 = vmatprep.mubr.bf16.mxu0 %v7951_v53  ;;  %v7255_v32 = vld [vmem:[#allocation2 + $0xaa4] ss:$48 sps:$4 sm:$0xff]   ;;  %v7250_v33 = vld [vmem:[#allocation2 + $0x4a0] ss:$48 sps:$4 sm:$0xff]  }
 0x15a   : > { %3154 = vmatprep.mubr.bf16.mxu1 %v7953_v54  ;;  %v7997_v46 = vpop.f32.mrf.mxu0  ;;  %v7259_v40 = vld [vmem:[#allocation2 + $0xa40] ss:$48 sps:$4 sm:$0xff]  }
 0x15b   : > { %v7999_v47 = vpop.f32.mrf.mxu1  ;;  %v2815_v50 = vadd.f32 %v2814_v41, %v2772_v43  ;;  %3082 = vmatpush1.bf16.msra.mxu0 %v7190_v35  ;;  %v7258_v35 = vld [vmem:[#allocation2 + $0x444] ss:$48 sps:$4 sm:$0xff]   ;;  %v7262_v43 = vld [vmem:[#allocation2 + $0x3e0] ss:$48 sps:$4 sm:$0xff]  }
 0x15c   : > { %3125 = vmatpush1.bf16.msra.mxu1 %v7193_v38  ;;  %v2775_v51 = vpop.f32.mrf.mxu0  ;;  %3083 = vmatprep.subr.bf16.mxu0 %v7198_v39  ;;  %v7261_v38 = vld [vmem:[#allocation2 + $0xa44] ss:$48 sps:$4 sm:$0xff]   ;;  %v7256_v39 = vld [vmem:[#allocation2 + $0x440] ss:$48 sps:$4 sm:$0xff]  }
 0x15d   : > { %3126 = vmatprep.subr.bf16.mxu1 %v7201_v42  ;;  %v2776_v52 = vadd.f32 %v2775_v51, %v762_v34  ;;  %v2818_v57 = vpop.f32.mrf.mxu1  ;;  %v3252_v61 = vmul.f32 0.125, %v2815_v50  ;;  %v7253_v34 = vld [vmem:[#allocation2 + $0xaa0] ss:$48 sps:$4 sm:$0xff]   ;;  %v7264_v41 = vld [vmem:[#allocation2 + $0x3e4] ss:$48 sps:$4 sm:$0xff]  }
 0x15e   : > { %v7267_v42 = vld [vmem:[#allocation2 + $0x9e4] ss:$48 sps:$4 sm:$0xff]   ;;  %v7271_v50 = vld [vmem:[#allocation2 + $0x980] ss:$48 sps:$4 sm:$0xff]  }
 0x15f   : > { %v2819_v60 = vadd.f32 %v2818_v57, %v2776_v52  ;;  %3084 = vmatpush1.bf16.msra.mxu0 %v7196_v44  ;;  %v7265_v44 = vld [vmem:[#allocation2 + $0x9e0] ss:$48 sps:$4 sm:$0xff]   ;;  %v7276_v51 = vld [vmem:[#allocation2 + $0x324] ss:$48 sps:$4 sm:$0xff]  }
 0x160   : > { %3127 = vmatpush1.bf16.msra.mxu1 %v7199_v45  ;;  %3085 = vmatprep.subr.bf16.mxu0 %v7204_v48  ;;  %v7270_v45 = vld [vmem:[#allocation2 + $0x384] ss:$48 sps:$4 sm:$0xff]   ;;  %v7277_v57 = vld [vmem:[#allocation2 + $0x920] ss:$48 sps:$4 sm:$0xff]  }
 0x161   : > { %3128 = vmatprep.subr.bf16.mxu1 %v7207_v49  ;;  %v3256_v62 = vmul.f32 0.125, %v2819_v60  ;;  %v7273_v48 = vld [vmem:[#allocation2 + $0x984] ss:$48 sps:$4 sm:$0xff]   ;;  %v7268_v49 = vld [vmem:[#allocation2 + $0x380] ss:$48 sps:$4 sm:$0xff]   ;;  %v8007_v60 = vsub.s32 3, %v7977_v23 }
 0x162   : > { %v7279_v52 = vld [vmem:[#allocation2 + $0x924] ss:$48 sps:$4 sm:$0xff]  }
 0x163   : > { %v8001_v3 = vpack.c.bf16 %v3256_v62, %v3252_v61  ;;  %3086 = vmatpush1.bf16.msra.mxu0 %v7202_v55  ;;  %v8004_v55 = vsub.s32 2, %v7977_v23  ;;  %v7280_v62 = vld [vmem:[#allocation2 + $0x2c8] ss:$48 sps:$4 sm:$0xff]  }
 0x164   : > { %3129 = vmatpush1.bf16.msra.mxu1 %v7205_v56  ;;  %3087 = vmatprep.subr.bf16.mxu0 %v7210_v58  ;;  %v7274_v56 = vld [vmem:[#allocation2 + $0x320] ss:$48 sps:$4 sm:$0xff]   ;;  %v7282_v58 = vld [vmem:[#allocation2 + $0x2cc] ss:$48 sps:$4 sm:$0xff]  }
 0x165   : > { %3130 = vmatprep.subr.bf16.mxu1 %v7213_v59  ;;  %v7285_v59 = vld [vmem:[#allocation2 + $0x8cc] ss:$48 sps:$4 sm:$0xff]   ;;  %v766_v61 = vrot.slane %v7982_v28, %v8004_v55 }
 0x167   : > { %3088 = vmatpush1.bf16.msra.mxu0 %v7208_v63  ;;  %v7283_v63 = vld [vmem:[#allocation2 + $0x8c8] ss:$48 sps:$4 sm:$0xff]  }
 0x168   : > { %3131 = vmatpush1.bf16.msra.mxu1 %v7211_v0  ;;  %3089 = vmatprep.subr.bf16.mxu0 %v7216_v1  ;;  %v7288_v0 = vld [vmem:[#allocation2 + $0x26c] ss:$48 sps:$4 sm:$0xff]  }
 0x169   : > { %3132 = vmatprep.subr.bf16.mxu1 %v7219_v2  ;;  %v7291_v1 = vld [vmem:[#allocation2 + $0x86c] ss:$48 sps:$4 sm:$0xff]   ;;  %v770_v2 = vrot.slane %v7982_v28, %v8007_v60 }
 0x16b   : > { %3090 = vmatpush1.bf16.msra.mxu0 %v7214_v4 }
 0x16c   : > { %3133 = vmatpush1.bf16.msra.mxu1 %v7217_v5  ;;  %3091 = vmatprep.subr.bf16.mxu0 %v7222_v6 }
 0x16d   : > { %3134 = vmatprep.subr.bf16.mxu1 %v7225_v7  ;;  %v7286_v7 = vld [vmem:[#allocation2 + $0x268] ss:$48 sps:$4 sm:$0xff]  }
 0x16f   : > { %3092 = vmatpush1.bf16.msra.mxu0 %v7220_v8  ;;  %v7289_v8 = vld [vmem:[#allocation2 + $0x868] ss:$48 sps:$4 sm:$0xff]  }
 0x170   : > { %3135 = vmatpush1.bf16.msra.mxu1 %v7223_v9  ;;  %3093 = vmatprep.subr.bf16.mxu0 %v7228_v10 }
 0x171   : > { %3136 = vmatprep.subr.bf16.mxu1 %v7231_v11  ;;  %v7294_v11 = vld [vmem:[#allocation2 + $0x20c] ss:$48 sps:$4 sm:$0xff]  }
 0x173   : > { %3094 = vmatpush1.bf16.msra.mxu0 %v7226_v14  ;;  %v7297_v14 = vld [vmem:[#allocation2 + $0x80c] ss:$48 sps:$4 sm:$0xff]  }
 0x174   : > { %3137 = vmatpush1.bf16.msra.mxu1 %v7229_v15  ;;  %3095 = vmatprep.subr.bf16.mxu0 %v7234_v16 }
 0x175   : > { %3138 = vmatprep.subr.bf16.mxu1 %v7237_v17 }
 0x177   : > { %3096 = vmatpush2.bf16.msra.mxu0 %v7232_v18 }
 0x178   : > { %3139 = vmatpush2.bf16.msra.mxu1 %v7235_v19  ;;  %3097 = vmatprep.subr.bf16.mxu0 %v7240_v20 }
 0x179   : > { %3140 = vmatprep.subr.bf16.mxu1 %v7243_v21  ;;  %v7292_v21 = vld [vmem:[#allocation2 + $0x208] ss:$48 sps:$4 sm:$0xff]  }
 0x17b   : > { %3098 = vmatpush2.bf16.msra.mxu0 %v7238_v22  ;;  %v7295_v22 = vld [vmem:[#allocation2 + $0x808] ss:$48 sps:$4 sm:$0xff]  }
 0x17c   : > { %3141 = vmatpush2.bf16.msra.mxu1 %v7241_v24  ;;  %3099 = vmatprep.subr.bf16.mxu0 %v7246_v25  ;;  %v7300_v25 = vld [vmem:[#allocation2 + $0x1ac] ss:$48 sps:$4 sm:$0xff]  }
 0x17d   : > { %3142 = vmatprep.subr.bf16.mxu1 %v7249_v26  ;;  %v7303_v26 = vld [vmem:[#allocation2 + $0x7ac] ss:$48 sps:$4 sm:$0xff]  }
 0x17f   : > { %3100 = vmatpush2.bf16.msra.mxu0 %v7244_v27 }
 0x180   : > { %3143 = vmatpush2.bf16.msra.mxu1 %v7247_v30  ;;  %3101 = vmatprep.subr.bf16.mxu0 %v7252_v31 }
 0x181   : > { %3144 = vmatprep.subr.bf16.mxu1 %v7255_v32 }
 0x183   : > { %3102 = vmatpush2.bf16.msra.mxu0 %v7250_v33 }
 0x184   : > { %3145 = vmatpush2.bf16.msra.mxu1 %v7253_v34  ;;  %3103 = vmatprep.subr.bf16.mxu0 %v7258_v35  ;;  %v7301_v34 = vld [vmem:[#allocation2 + $0x7a8] ss:$48 sps:$4 sm:$0xff]   ;;  %v7306_v35 = vld [vmem:[#allocation2 + $0x14c] ss:$48 sps:$4 sm:$0xff]  }
 0x185   : > { %3146 = vmatprep.subr.bf16.mxu1 %v7261_v38  ;;  %v7309_v38 = vld [vmem:[#allocation2 + $0x74c] ss:$48 sps:$4 sm:$0xff]  }
 0x187   : > { %3104 = vmatpush2.bf16.msra.mxu0 %v7256_v39 }
 0x188   : > { %3147 = vmatpush2.bf16.msra.mxu1 %v7259_v40  ;;  %3105 = vmatprep.subr.bf16.mxu0 %v7264_v41 }
 0x189   : > { %3148 = vmatprep.subr.bf16.mxu1 %v7267_v42 }
 0x18b   : > { %3106 = vmatpush2.bf16.msra.mxu0 %v7262_v43  ;;  %v7304_v43 = vld [vmem:[#allocation2 + $0x148] ss:$48 sps:$4 sm:$0xff]  }
 0x18c   : > { %3149 = vmatpush2.bf16.msra.mxu1 %v7265_v44  ;;  %3107 = vmatprep.subr.bf16.mxu0 %v7270_v45  ;;  %v7307_v44 = vld [vmem:[#allocation2 + $0x748] ss:$48 sps:$4 sm:$0xff]   ;;  %v7312_v45 = vld [vmem:[#allocation2 + $0xec] ss:$48 sps:$4 sm:$0xff]  }
 0x18d   : > { %3150 = vmatprep.subr.bf16.mxu1 %v7273_v48  ;;  %v7315_v48 = vld [vmem:[#allocation2 + $0x6ec] ss:$48 sps:$4 sm:$0xff]  }
 0x18f   : > { %3108 = vmatpush2.bf16.msra.mxu0 %v7268_v49  ;;  %v7310_v49 = vld [vmem:[#allocation2 + $0xe8] ss:$48 sps:$4 sm:$0xff]  }
 0x190   : > { %3151 = vmatpush2.bf16.msra.mxu1 %v7271_v50  ;;  %3109 = vmatprep.subr.bf16.mxu0 %v7276_v51  ;;  %v7313_v50 = vld [vmem:[#allocation2 + $0x6e8] ss:$48 sps:$4 sm:$0xff]   ;;  %v7318_v51 = vld [vmem:[#allocation2 + $0x8c] ss:$48 sps:$4 sm:$0xff]  }
 0x191   : > { %3152 = vmatprep.subr.bf16.mxu1 %v7279_v52  ;;  %v7321_v52 = vld [vmem:[#allocation2 + $0x68c] ss:$48 sps:$4 sm:$0xff]  }
 0x193   : > { %3110 = vmatpush2.bf16.msra.mxu0 %v7274_v56  ;;  %v7316_v56 = vld [vmem:[#allocation2 + $0x88] ss:$48 sps:$4 sm:$0xff]  }
 0x194   : > { %3153 = vmatpush2.bf16.msra.mxu1 %v7277_v57  ;;  %3165 = vmatprep.subr.bf16.mxu0 %v7282_v58  ;;  %v7319_v57 = vld [vmem:[#allocation2 + $0x688] ss:$48 sps:$4 sm:$0xff]   ;;  %v7324_v58 = vld [vmem:[#allocation2 + $0x2c] ss:$48 sps:$4 sm:$0xff]  }
 0x195   : > { %3208 = vmatprep.subr.bf16.mxu1 %v7285_v59  ;;  %v7327_v59 = vld [vmem:[#allocation2 + $0x62c] ss:$48 sps:$4 sm:$0xff]  }
 0x196   : > { %v2855_v4 = vpop.f32.mrf.mxu0  ;;  %3112 = vmatmul.mubr.bf16.vlgmr.msra.gmra.mxu0 %v7961_v12 }
 0x197   : > { %v2898_v5 = vpop.f32.mrf.mxu1  ;;  %3155 = vmatmul.mubr.bf16.vlgmr.msra.gmra.mxu1 %v7963_v13  ;;  %v2856_v6 = vadd.f32 %v2855_v4, %v766_v61  ;;  %3166 = vmatpush1.bf16.msra.mxu0 %v7280_v62  ;;  %v7325_v62 = vld [vmem:[#allocation2 + $0x628] ss:$48 sps:$4 sm:$0xff]   ;;  %v7336_v4 = vld [vmem:[#allocation2 + $0x56c] ss:$48 sps:$4 sm:$0xff]  }
 0x198   : > { %3209 = vmatpush1.bf16.msra.mxu1 %v7283_v63  ;;  %v2857_v9 = vpop.f32.mrf.mxu0  ;;  %3167 = vmatprep.subr.bf16.mxu0 %v7288_v0  ;;  %v7330_v63 = vld [vmem:[#allocation2 + $0x5cc] ss:$48 sps:$4 sm:$0xff]  }
 0x199   : > { %v2900_v10 = vpop.f32.mrf.mxu1  ;;  %3210 = vmatprep.subr.bf16.mxu1 %v7291_v1  ;;  %v2899_v15 = vadd.f32 %v2898_v5, %v2856_v6  ;;  %v2858_v16 = vadd.f32 %v2857_v9, %v770_v2  ;;  %3197 = vmatprep.mubr.bf16.mxu0 %v7951_v53  ;;  %v7333_v0 = vld [vmem:[#allocation2 + $0xbcc] ss:$48 sps:$4 sm:$0xff]   ;;  %v7328_v1 = vld [vmem:[#allocation2 + $0x5c8] ss:$48 sps:$4 sm:$0xff]  }
 0x19a   : > { %3240 = vmatprep.mubr.bf16.mxu1 %v7953_v54  ;;  %v2859_v17 = vpop.f32.mrf.mxu0  ;;  %v7298_v54 = vld [vmem:[#allocation2 + $0x1a8] ss:$48 sps:$4 sm:$0xff]   ;;  %v7339_v5 = vld [vmem:[#allocation2 + $0xb6c] ss:$48 sps:$4 sm:$0xff]  }
 0x19b   : > { %v2902_v18 = vpop.f32.mrf.mxu1  ;;  %v2901_v19 = vadd.f32 %v2900_v10, %v2858_v16  ;;  %v2860_v20 = vadd.f32 %v2859_v17, %v766_v61  ;;  %3168 = vmatpush1.bf16.msra.mxu0 %v7286_v7  ;;  %v3253_v32 = vmul.f32 0.125, %v2899_v15  ;;  %v7322_v61 = vld [vmem:[#allocation2 + $0x28] ss:$48 sps:$4 sm:$0xff]   ;;  %v7345_v9 = vld [vmem:[#allocation2 + $0xb0c] ss:$48 sps:$4 sm:$0xff]  }
 0x19c   : > { %3211 = vmatpush1.bf16.msra.mxu1 %v7289_v8  ;;  %v2861_v24 = vpop.f32.mrf.mxu0  ;;  %3169 = vmatprep.subr.bf16.mxu0 %v7294_v11  ;;  %v7334_v6 = vld [vmem:[#allocation2 + $0x568] ss:$48 sps:$4 sm:$0xff]   ;;  %v7342_v8 = vld [vmem:[#allocation2 + $0x50c] ss:$48 sps:$4 sm:$0xff]  }
 0x19d   : > { %3212 = vmatprep.subr.bf16.mxu1 %v7297_v14  ;;  %v2903_v27 = vadd.f32 %v2902_v18, %v2860_v20  ;;  %v2862_v30 = vadd.f32 %v2861_v24, %v770_v2  ;;  %v2904_v31 = vpop.f32.mrf.mxu1  ;;  %v3254_v39 = vmul.f32 0.125, %v2901_v19  ;;  %v7331_v2 = vld [vmem:[#allocation2 + $0xbc8] ss:$48 sps:$4 sm:$0xff]   ;;  %v7348_v14 = vld [vmem:[#allocation2 + $0x4ac] ss:$48 sps:$4 sm:$0xff]  }
 0x19e   : > { %v7337_v7 = vld [vmem:[#allocation2 + $0xb68] ss:$48 sps:$4 sm:$0xff]   ;;  %v7351_v15 = vld [vmem:[#allocation2 + $0xaac] ss:$48 sps:$4 sm:$0xff]  }
 0x19f   : > { %v3257_v53 = vmul.f32 0.125, %v2903_v27  ;;  %v2905_v33 = vadd.f32 %v2904_v31, %v2862_v30  ;;  %3170 = vmatpush1.bf16.msra.mxu0 %v7292_v21  ;;  %v7340_v10 = vld [vmem:[#allocation2 + $0x508] ss:$48 sps:$4 sm:$0xff]   ;;  %v7354_v18 = vld [vmem:[#allocation2 + $0x44c] ss:$48 sps:$4 sm:$0xff]  }
 0x1a0   : > { %3213 = vmatpush1.bf16.msra.mxu1 %v7295_v22  ;;  %3171 = vmatprep.subr.bf16.mxu0 %v7300_v25  ;;  %v7343_v11 = vld [vmem:[#allocation2 + $0xb08] ss:$48 sps:$4 sm:$0xff]   ;;  %v7357_v19 = vld [vmem:[#allocation2 + $0xa4c] ss:$48 sps:$4 sm:$0xff]  }
 0x1a1   : > { %3214 = vmatprep.subr.bf16.mxu1 %v7303_v26  ;;  %v8017_v40 = vpack.c.bf16 %v3257_v53, %v3253_v32  ;;  %v3258_v41 = vmul.f32 0.125, %v2905_v33  ;;  %v7346_v16 = vld [vmem:[#allocation2 + $0x4a8] ss:$48 sps:$4 sm:$0xff]   ;;  %v7360_v22 = vld [vmem:[#allocation2 + $0x3ec] ss:$48 sps:$4 sm:$0xff]  }
 0x1a2   : > { %v7349_v17 = vld [vmem:[#allocation2 + $0xaa8] ss:$48 sps:$4 sm:$0xff]   ;;  %v7363_v24 = vld [vmem:[#allocation2 + $0x9ec] ss:$48 sps:$4 sm:$0xff]  }
 0x1a3   : > { %v8019_v42 = vpack.c.bf16 %v3258_v41, %v3254_v39  ;;  %3172 = vmatpush1.bf16.msra.mxu0 %v7298_v54  ;;  %v7352_v20 = vld [vmem:[#allocation2 + $0x448] ss:$48 sps:$4 sm:$0xff]   ;;  %v7366_v27 = vld [vmem:[#allocation2 + $0x38c] ss:$48 sps:$4 sm:$0xff]   ;;  %v7803_v39 = vmov 0.0   ;;  %v8026_v41 = vsub.s32 0, %v7977_v23 }
 0x1a4   : > { %3215 = vmatpush1.bf16.msra.mxu1 %v7301_v34  ;;  %3173 = vmatprep.subr.bf16.mxu0 %v7306_v35  ;;  %v7355_v21 = vld [vmem:[#allocation2 + $0xa48] ss:$48 sps:$4 sm:$0xff]   ;;  %v7369_v30 = vld [vmem:[#allocation2 + $0x98c] ss:$48 sps:$4 sm:$0xff]   ;;  %v773_v35 = vsub.s32 4, %v7977_v23 }
 0x1a5   : > { %3216 = vmatprep.subr.bf16.mxu1 %v7309_v38  ;;  %v7358_v25 = vld [vmem:[#allocation2 + $0x3e8] ss:$48 sps:$4 sm:$0xff]   ;;  %v7372_v53 = vld [vmem:[#allocation2 + $0x32c] ss:$48 sps:$4 sm:$0xff]   ;;  %v777_v38 = vsub.s32 5, %v7977_v23 }
 0x1a6   : > { %v7361_v26 = vld [vmem:[#allocation2 + $0x9e8] ss:$48 sps:$4 sm:$0xff]   ;;  %v7375_v33 = vld [vmem:[#allocation2 + $0x92c] ss:$48 sps:$4 sm:$0xff]  }
 0x1a7   : > { %3174 = vmatpush1.bf16.msra.mxu0 %v7304_v43  ;;  %v7364_v31 = vld [vmem:[#allocation2 + $0x388] ss:$48 sps:$4 sm:$0xff]   ;;  %v774_v43 = vrot.slane %v7982_v28, %v773_v35 }
 0x1a8   : > { %3217 = vmatpush1.bf16.msra.mxu1 %v7307_v44  ;;  %3175 = vmatprep.subr.bf16.mxu0 %v7312_v45  ;;  %v7367_v32 = vld [vmem:[#allocation2 + $0x988] ss:$48 sps:$4 sm:$0xff]   ;;  %v778_v44 = vrot.slane %v7982_v28, %v777_v38 }
 0x1a9   : > { %3218 = vmatprep.subr.bf16.mxu1 %v7315_v48  ;;  %v7370_v54 = vld [vmem:[#allocation2 + $0x328] ss:$48 sps:$4 sm:$0xff]  }
 0x1aa   : > { %v7373_v34 = vld [vmem:[#allocation2 + $0x928] ss:$48 sps:$4 sm:$0xff]  }
 0x1ab   : > { %3176 = vmatpush1.bf16.msra.mxu0 %v7310_v49 }
 0x1ac   : > { %3219 = vmatpush1.bf16.msra.mxu1 %v7313_v50  ;;  %3177 = vmatprep.subr.bf16.mxu0 %v7318_v51  ;;  %v758_v51 = vrot.slane %v7982_v28, %v8026_v41 }
 0x1ad   : > { %3220 = vmatprep.subr.bf16.mxu1 %v7321_v52 }
 0x1af   : > { %3178 = vmatpush1.bf16.msra.mxu0 %v7316_v56 }
 0x1b0   : > { %3221 = vmatpush1.bf16.msra.mxu1 %v7319_v57  ;;  %3179 = vmatprep.subr.bf16.mxu0 %v7324_v58 }
 0x1b1   : > { %3222 = vmatprep.subr.bf16.mxu1 %v7327_v59 }
 0x1b3   : > { %3180 = vmatpush1.bf16.msra.mxu0 %v7322_v61 }
 0x1b4   : > { %3223 = vmatpush1.bf16.msra.mxu1 %v7325_v62  ;;  %3181 = vmatprep.subr.bf16.mxu0 %v7330_v63  ;;  %v2770_v62 = vadd.f32 %v7989_v36, %v758_v51 }
 0x1b5   : > { %3224 = vmatprep.subr.bf16.mxu1 %v7333_v0 }
 0x1b7   : > { %3182 = vmatpush2.bf16.msra.mxu0 %v7328_v1 }
 0x1b8   : > { %3225 = vmatpush2.bf16.msra.mxu1 %v7331_v2  ;;  %3183 = vmatprep.subr.bf16.mxu0 %v7336_v4 }
 0x1b9   : > { %3226 = vmatprep.subr.bf16.mxu1 %v7339_v5 }
 0x1bb   : > { %3184 = vmatpush2.bf16.msra.mxu0 %v7334_v6 }
 0x1bc   : > { %3227 = vmatpush2.bf16.msra.mxu1 %v7337_v7  ;;  %3185 = vmatprep.subr.bf16.mxu0 %v7342_v8  ;;  %v2813_v7 = vadd.f32 %v7991_v37, %v2770_v62 }
 0x1bd   : > { %3228 = vmatprep.subr.bf16.mxu1 %v7345_v9 }
 0x1be   : > { %v3251_v36 = vmul.f32 0.125, %v2813_v7 }
 0x1bf   : > { %3186 = vmatpush2.bf16.msra.mxu0 %v7340_v10 }
 0x1c0   : > { %3229 = vmatpush2.bf16.msra.mxu1 %v7343_v11  ;;  %3187 = vmatprep.subr.bf16.mxu0 %v7348_v14  ;;  %v785_v11 = vsub.s32 7, %v7977_v23 }
 0x1c1   : > { %3230 = vmatprep.subr.bf16.mxu1 %v7351_v15 }
 0x1c2   : > { %v786_v37 = vrot.slane %v7982_v28, %v785_v11 }
 0x1c3   : > { %3188 = vmatpush2.bf16.msra.mxu0 %v7346_v16 }
 0x1c4   : > { %3231 = vmatpush2.bf16.msra.mxu1 %v7349_v17  ;;  %3189 = vmatprep.subr.bf16.mxu0 %v7354_v18 }
 0x1c5   : > { %3232 = vmatprep.subr.bf16.mxu1 %v7357_v19 }
 0x1c7   : > { %3190 = vmatpush2.bf16.msra.mxu0 %v7352_v20 }
 0x1c8   : > { %3233 = vmatpush2.bf16.msra.mxu1 %v7355_v21  ;;  %3191 = vmatprep.subr.bf16.mxu0 %v7360_v22 }
 0x1c9   : > { %3234 = vmatprep.subr.bf16.mxu1 %v7363_v24 }
 0x1cb   : > { %3192 = vmatpush2.bf16.msra.mxu0 %v7358_v25 }
 0x1cc   : > { %3235 = vmatpush2.bf16.msra.mxu1 %v7361_v26  ;;  %3193 = vmatprep.subr.bf16.mxu0 %v7366_v27 }
 0x1cd   : > { %3236 = vmatprep.subr.bf16.mxu1 %v7369_v30 }
 0x1cf   : > { %3194 = vmatpush2.bf16.msra.mxu0 %v7364_v31 }
 0x1d0   : > { %3237 = vmatpush2.bf16.msra.mxu1 %v7367_v32  ;;  %3195 = vmatprep.subr.bf16.mxu0 %v7372_v53 }
 0x1d1   : > { %3238 = vmatprep.subr.bf16.mxu1 %v7375_v33 }
 0x1d3   : > { %3196 = vmatpush2.bf16.msra.mxu0 %v7370_v54 }
 0x1d4   : > { %3239 = vmatpush2.bf16.msra.mxu1 %v7373_v34  ;;  %6637 = vmatprep.subr.bf16.mxu0 %v7803_v39 }
 0x1d5   : > { %6643 = vmatprep.subr.bf16.mxu1 %v7803_v39 }
 0x1d6   : > { %v2941_v45 = vpop.f32.mrf.mxu0  ;;  %3198 = vmatmul.mubr.bf16.vlgmr.msra.gmra.mxu0 %v7961_v12  ;;  %v2774_v12 = vadd.f32 %v7997_v46, %v758_v51 }
 0x1d7   : > { %v2984_v48 = vpop.f32.mrf.mxu1  ;;  %3241 = vmatmul.mubr.bf16.vlgmr.msra.gmra.mxu1 %v7963_v13  ;;  %6639 = vmatprep.mubr.msk.bf16.mxu0 %vm7804_vm0, %v7803_v39  ;;  %v2942_v52 = vadd.f32 %v2941_v45, %v774_v43 }
 0x1d8   : > { %6645 = vmatprep.mubr.msk.bf16.mxu1 %vm7804_vm0, %v7803_v39  ;;  %v2943_v49 = vpop.f32.mrf.mxu0  ;;  %v2817_v4 = vadd.f32 %v7999_v47, %v2774_v12  ;;  %v781_v47 = vsub.s32 6, %v7977_v23 }
 0x1d9   : > { %v2986_v50 = vpop.f32.mrf.mxu1  ;;  %v2944_v56 = vadd.f32 %v2943_v49, %v778_v44  ;;  %v2985_v63 = vadd.f32 %v2984_v48, %v2942_v52 }
 0x1da   : > { %v2945_v57 = vpop.f32.mrf.mxu0  ;;  %v3255_v9 = vmul.f32 0.125, %v2817_v4  ;;  %v782_v14 = vrot.slane %v7982_v28, %v781_v47  ;;  %v752_v28 = vld [vmem:[%s8427_s2 + $0x8] sm:$0xf] }
 0x1db   : > { %v2988_v58 = vpop.f32.mrf.mxu1  ;;  %v2987_v59 = vadd.f32 %v2986_v50, %v2944_v56  ;;  %v2946_v13 = vadd.f32 %v2945_v57, %v774_v43  ;;  %v790_v54 = vrot.slane %v752_v28, %v8026_v41  ;;  %v794_v34 = vrot.slane %v752_v28, %v7985_v29 }
 0x1dc   : > { %v2947_v61 = vpop.f32.mrf.mxu0  ;;  %v8048_v10 = vpack.c.bf16 %v3255_v9, %v3251_v36 }
 0x1dd   : > { %v2989_v0 = vadd.f32 %v2988_v58, %v2946_v13  ;;  %v2948_v1 = vadd.f32 %v2947_v61, %v778_v44  ;;  %v2990_v2 = vpop.f32.mrf.mxu1 }
 0x1df   : > { %v8041_v5 = vpack.c.bf16 %v2989_v0, %v2985_v63  ;;  %v2991_v6 = vadd.f32 %v2990_v2, %v2948_v1  ;;  %v798_v63 = vrot.slane %v752_v28, %v8004_v55  ;;  %v802_v0 = vrot.slane %v752_v28, %v8007_v60 }
 0x1e1   : > { %v8044_v8 = vpack.c.bf16 %v2991_v6, %v2987_v59  ;;  %v3297_v46 = vsel %vm3292_vm1, %v8041_v5, 0 }
 0x1e2   : > { %6638 = vmatpush3.bf16.xpose.msra.mxu0 %v3297_v46 }
 0x1e9   : > { %6640 = vmatmul.mubr.msk.bf16.vlgmr.msra.gmra.mxu0 %vm3292_vm1, %v8048_v10 }
 0x216   : > { %v3027_v15 = vpop.f32.mrf.mxu0 }
 0x217   : > { %v3070_v16 = vpop.f32.mrf.mxu1  ;;  %v3028_v17 = vadd.f32 %v3027_v15, %v782_v14 }
 0x218   : > { %v3029_v18 = vpop.f32.mrf.mxu0 }
 0x219   : > { %v3072_v19 = vpop.f32.mrf.mxu1  ;;  %v3030_v20 = vadd.f32 %v3029_v18, %v786_v37  ;;  %v3071_v21 = vadd.f32 %v3070_v16, %v3028_v17 }
 0x21a   : > { %v3031_v22 = vpop.f32.mrf.mxu0 }
 0x21b   : > { %v3074_v24 = vpop.f32.mrf.mxu1  ;;  %v3032_v25 = vadd.f32 %v3031_v22, %v782_v14  ;;  %v3073_v26 = vadd.f32 %v3072_v19, %v3030_v20 }
 0x21c   : > { %v3033_v27 = vpop.f32.mrf.mxu0 }
 0x21d   : > { %v3076_v30 = vpop.f32.mrf.mxu1  ;;  %v3034_v31 = vadd.f32 %v3033_v27, %v786_v37  ;;  %v3075_v32 = vadd.f32 %v3074_v24, %v3032_v25 }
 0x21f   : > { %v8056_v23 = vpack.c.bf16 %v3075_v32, %v3071_v21  ;;  %v3077_v53 = vadd.f32 %v3076_v30, %v3034_v31 }
 0x221   : > { %v8058_v33 = vpack.c.bf16 %v3077_v53, %v3073_v26 }
 0x256   : > { %v3113_v35 = vpop.f32.mrf.mxu0 }
 0x257   : > { %v3156_v38 = vpop.f32.mrf.mxu1  ;;  %v3114_v43 = vadd.f32 %v3113_v35, %v790_v54 }
 0x258   : > { %v3115_v44 = vpop.f32.mrf.mxu0 }
 0x259   : > { %v3158_v45 = vpop.f32.mrf.mxu1  ;;  %v3116_v48 = vadd.f32 %v3115_v44, %v794_v34  ;;  %v3157_v51 = vadd.f32 %v3156_v38, %v3114_v43  ;;  %v7378_v44 = vld [vmem:[#allocation4 + $0x64] ss:$16 sps:$4 sm:$0xff]  }
 0x25a   : > { %v3117_v49 = vpop.f32.mrf.mxu0  ;;  %3516 = vmatprep.subr.bf16.mxu0 %v7378_v44 }
 0x25b   : > { %v3160_v50 = vpop.f32.mrf.mxu1  ;;  %v3118_v52 = vadd.f32 %v3117_v49, %v790_v54  ;;  %v3159_v56 = vadd.f32 %v3158_v45, %v3116_v48  ;;  %v7381_v45 = vld [vmem:[#allocation4 + $0x6c] ss:$16 sps:$4 sm:$0xff]   ;;  %v7384_v48 = vld [vmem:[#allocation4 + $0x44] ss:$16 sps:$4 sm:$0xff]   ;;  %v7382_v49 = vld [vmem:[#allocation4 + $0x40] ss:$16 sps:$4 sm:$0xff]  }
 0x25c   : > { %v3119_v57 = vpop.f32.mrf.mxu0 }
 0x25d   : > { %v3162_v58 = vpop.f32.mrf.mxu1  ;;  %v3120_v12 = vadd.f32 %v3119_v57, %v794_v34  ;;  %v3161_v59 = vadd.f32 %v3160_v50, %v3118_v52  ;;  %v7390_v50 = vld [vmem:[#allocation4 + $0x24] ss:$16 sps:$4 sm:$0xff]  }
 0x25f   : > { %v8065_v13 = vpack.c.bf16 %v3161_v59, %v3157_v51  ;;  %v3163_v61 = vadd.f32 %v3162_v58, %v3120_v12  ;;  %v7388_v51 = vld [vmem:[#allocation4 + $0x20] ss:$16 sps:$4 sm:$0xff]   ;;  %v7379_v59 = vld [vmem:[#allocation4 + $0x68] ss:$16 sps:$4 sm:$0xff]  }
 0x261   : > { %v8067_v62 = vpack.c.bf16 %v3163_v61, %v3159_v56  ;;  %6644 = vmatpush3.bf16.msra.mxu1 %v8065_v13 }
 0x262   : > { %3559 = vmatprep.subr.bf16.mxu1 %v7381_v45 }
 0x296   : > { %v3199_v1 = vpop.f32.mrf.mxu0 }
 0x297   : > { %v3242_v2 = vpop.f32.mrf.mxu1  ;;  %v3200_v4 = vadd.f32 %v3199_v1, %v798_v63  ;;  %v7393_v1 = vld [vmem:[#allocation4 + $0x2c] ss:$16 sps:$4 sm:$0xff]  }
 0x298   : > { %v3201_v6 = vpop.f32.mrf.mxu0 }
 0x299   : > { %v3244_v7 = vpop.f32.mrf.mxu1  ;;  %v3202_v46 = vadd.f32 %v3201_v6, %v802_v0  ;;  %v3243_v9 = vadd.f32 %v3242_v2, %v3200_v4  ;;  %v7391_v2 = vld [vmem:[#allocation4 + $0x28] ss:$16 sps:$4 sm:$0xff]   ;;  %v7396_v4 = vld [vmem:[#allocation4 + $0x4] ss:$16 sps:$4 sm:$0xff]   ;;  %v7394_v6 = vld [vmem:[#allocation4] ss:$16 sps:$4 sm:$0xff]  }
 0x29a   : > { %v3203_v36 = vpop.f32.mrf.mxu0 }
 0x29b   : > { %v3246_v47 = vpop.f32.mrf.mxu1  ;;  %v3204_v11 = vadd.f32 %v3203_v36, %v798_v63  ;;  %v3245_v14 = vadd.f32 %v3244_v7, %v3202_v46  ;;  %v7387_v63 = vld [vmem:[#allocation4 + $0x4c] ss:$16 sps:$4 sm:$0xff]   ;;  %v7397_v46 = vld [vmem:[#allocation4 + $0x8] ss:$16 sps:$4 sm:$0xff]  }
 0x29c   : > { %v3205_v37 = vpop.f32.mrf.mxu0  ;;  %v7399_v7 = vld [vmem:[#allocation4 + $0xc] ss:$16 sps:$4 sm:$0xff]  }
 0x29d   : > { %v3248_v15 = vpop.f32.mrf.mxu1  ;;  %v3206_v16 = vadd.f32 %v3205_v37, %v802_v0  ;;  %v3247_v17 = vadd.f32 %v3246_v47, %v3204_v11  ;;  %v7385_v0 = vld [vmem:[#allocation4 + $0x48] ss:$16 sps:$4 sm:$0xff]  }
 0x29f   : > { %v8072_v18 = vpack.c.bf16 %v3247_v17, %v3243_v9  ;;  %v3249_v19 = vadd.f32 %v3248_v15, %v3206_v16  ;;  %v7806_v9 = vmov 0  }
 0x2a0   : > { %3540 = vmatprep.mubr.bf16.mxu0 %v7806_v9 }
 0x2a1   : > { %v8074_v20 = vpack.c.bf16 %v3249_v19, %v3245_v14 }
 0x2a9   : > { %v3333_v21 = vpop.f32.mrf.mxu0 }
 0x2aa   : > { %v3341_v22 = vsel %vm3340_vm2, %v3333_v21, -inf }
 0x2ab   : > { %3342 = vmax.xlane.f32.xlu0 %v3341_v22  ;;  %v6641_v24 = vpop.f32.mrf.mxu0 }
 0x2ad   : > { %v3336_v25 = vpop.f32.mrf.mxu0 }
 0x2ae   : > { %v3344_v26 = vsel %vm3340_vm2, %v3336_v25, -inf }
 0x2af   : > { %3345 = vmax.xlane.f32.xlu0 %v3344_v26  ;;  %v6642_v27 = vpop.f32.mrf.mxu0 }
 0x2c5   : > { %3606 = vrot.lane.b32.xlu0 %v8041_v5, %s7805_s23  ;;  %v7376_v5 = vld [vmem:[#allocation4 + $0x60] ss:$16 sps:$4 sm:$0xff]  }
 0x2c6   : > { %3517 = vmatpush1.bf16.msra.mxu0 %v7376_v5 }
 0x2c7   : > { %3518 = vmatprep.subr.bf16.mxu0 %v7384_v48  ;;  %v7400_v48 = vld [vmem:[#allocation4 + $0xe0] ss:$16 sps:$4 sm:$0xff]  }
 0x2ca   : > { %3519 = vmatpush1.bf16.msra.mxu0 %v7382_v49  ;;  %v7402_v49 = vld [vmem:[#allocation4 + $0xe4] ss:$16 sps:$4 sm:$0xff]  }
 0x2cb   : > { %3520 = vmatprep.subr.bf16.mxu0 %v7390_v50  ;;  %v7408_v50 = vld [vmem:[#allocation4 + $0xc4] ss:$16 sps:$4 sm:$0xff]  }
 0x2ce   : > { %3521 = vmatpush1.bf16.msra.mxu0 %v7388_v51  ;;  %v7406_v51 = vld [vmem:[#allocation4 + $0xc0] ss:$16 sps:$4 sm:$0xff]  }
 0x2cf   : > { %3522 = vmatprep.subr.bf16.mxu0 %v7396_v4  ;;  %v7409_v4 = vld [vmem:[#allocation4 + $0xc8] ss:$16 sps:$4 sm:$0xff]  }
 0x2d2   : > { %3523 = vmatpush1.bf16.msra.mxu0 %v7394_v6  ;;  %v7417_v6 = vld [vmem:[#allocation4 + $0xac] ss:$16 sps:$4 sm:$0xff]  }
 0x2d3   : > { %6649 = vmatprep.subr.bf16.mxu0 %v7803_v39 }
 0x334   : > { %v3343_v30 = vpop.xlane.xlu0 %3342 }
 0x335   : > { %v3347_v31 = vsub.f32 %v3333_v21, %v3343_v30 }
 0x337   : > { %v3349_v32 = vmul.f32 1.442695, %v3347_v31 }
 0x338   : > { %v3346_v53 = vpop.xlane.xlu0 %3345 }
 0x339   : > { %7568 = vpow2.f32 %v3349_v32  ;;  %v3348_v28 = vsub.f32 %v3336_v25, %v3346_v53 }
 0x33b   : > { %v3351_v54 = vmul.f32 1.442695, %v3348_v28 }
 0x33c   : > { %v3607_v11 = vpop.permute.xlu0 %3606 }
 0x33d   : > { %7570 = vpow2.f32 %v3351_v54  ;;  %v3612_v16 = vsel %vm3292_vm1, %v3607_v11, 0  ;;  %v7421_v11 = vld [vmem:[#allocation4 + $0x88] ss:$16 sps:$4 sm:$0xff]  }
 0x346   : > { %v7569_v34 = vpop.eup %7568 }
 0x347   : > { %v3353_v35 = vsel %vm3340_vm2, %v7569_v34, 0.0 }
 0x348   : > { %3354 = vadd.xlane.f32.xlu1 %v3353_v35 }
 0x34a   : > { %v7571_v38 = vpop.eup %7570 }
 0x34b   : > { %v3356_v43 = vsel %vm3340_vm2, %v7571_v38, 0.0 }
 0x34c   : > { %3357 = vadd.xlane.f32.xlu1 %v3356_v43 }
 0x35d   : > { %3603 = vrot.lane.b32.xlu1 %v8048_v10, %s7805_s23 }
 0x3d1   : > { %v3355_v52 = vpop.xlane.xlu1 %3354 }
 0x3d2   : > { %7572 = vrcp.f32 %v3355_v52  ;;  %v7414_v52 = vld [vmem:[#allocation4 + $0xa4] ss:$16 sps:$4 sm:$0xff]  }
 0x3d5   : > { %v3358_v56 = vpop.xlane.xlu1 %3357 }
 0x3d6   : > { %7574 = vrcp.f32 %v3358_v56  ;;  %v7412_v56 = vld [vmem:[#allocation4 + $0xa0] ss:$16 sps:$4 sm:$0xff]  }
 0x3d9   : > { %v3604_v17 = vpop.permute.xlu1 %3603 }
 0x3df   : > { %v7573_v57 = vpop.eup %7572 }
 0x3e0   : > { %v3361_v58 = vmul.f32 %v7573_v57, %v7569_v34 }
 0x3e3   : > { %v7575_v10 = vpop.eup %7574 }
 0x3e4   : > { %v3362_v12 = vmul.f32 %v7575_v10, %v7571_v38  ;;  %v7405_v10 = vld [vmem:[#allocation4 + $0xec] ss:$16 sps:$4 sm:$0xff]  }
 0x3e6   : > { %v3363_v61 = vpack.c.bf16 %v3362_v12, %v3361_v58 }
 0x3e8   : > { %6646 = vmatmul.mubr.msk.bf16.vlgmr.msra.gmra.mxu1 %vm3340_vm2, %v3363_v61 }
 0x3e9   : > { %3560 = vmatpush1.bf16.msra.mxu1 %v7379_v59  ;;  %3583 = vmatprep.mubr.bf16.mxu1 %v7806_v9 }
 0x3ea   : > { %3561 = vmatprep.subr.bf16.mxu1 %v7387_v63 }
 0x3ed   : > { %3562 = vmatpush1.bf16.msra.mxu1 %v7385_v0  ;;  %v7403_v0 = vld [vmem:[#allocation4 + $0xe8] ss:$16 sps:$4 sm:$0xff]  }
 0x3ee   : > { %3563 = vmatprep.subr.bf16.mxu1 %v7393_v1 }
 0x3f1   : > { %3564 = vmatpush1.bf16.msra.mxu1 %v7391_v2  ;;  %v7411_v2 = vld [vmem:[#allocation4 + $0xcc] ss:$16 sps:$4 sm:$0xff]  }
 0x3f2   : > { %3565 = vmatprep.subr.bf16.mxu1 %v7399_v7  ;;  %v7415_v7 = vld [vmem:[#allocation4 + $0xa8] ss:$16 sps:$4 sm:$0xff]  }
 0x3f5   : > { %3566 = vmatpush1.bf16.msra.mxu1 %v7397_v46  ;;  %v7420_v46 = vld [vmem:[#allocation4 + $0x84] ss:$16 sps:$4 sm:$0xff]  }
 0x3f6   : > { %6655 = vmatprep.subr.bf16.mxu1 %v7803_v39 }
 0x4a8   : > { %v3401_v36 = vpop.f32.mrf.mxu1 }
 0x4aa   : > { %v6647_v47 = vpop.f32.mrf.mxu1 }
 0x4ab   : > { %v7418_v47 = vld [vmem:[#allocation4 + $0x80] ss:$16 sps:$4 sm:$0xff]  }
 0x4ac   : > { %v3404_v14 = vpop.f32.mrf.mxu1 }
 0x4ad   : > { %v3408_v37 = vpack.c.bf16 %v3404_v14, %v3401_v36  ;;  %v7423_v36 = vld [vmem:[#allocation4 + $0x8c] ss:$16 sps:$4 sm:$0xff]  }
 0x4ae   : > { %v6648_v15 = vpop.f32.mrf.mxu1 }
 0x4af   : > { %6459 = vmatmul.mubr.msk.bf16.vlgmr.msra.gmra.mxu0 %vm3292_vm1, %v3408_v37  ;;  %6460 = vmatmul.mubr.msk.bf16.vlgmr.msra.gmra.mxu1 %vm3292_vm1, %v3408_v37 }
 0x4b0   : > { %6650 = vmatpush3.bf16.xpose.msra.mxu0 %v3612_v16  ;;  %6651 = vmatprep.mubr.msk.bf16.mxu0 %vm7804_vm0, %v7803_v39 }
 0x4b1   : > { %6657 = vmatprep.mubr.msk.bf16.mxu1 %vm7804_vm0, %v7803_v39  ;;  %3834 = vmatprep.subr.bf16.mxu0 %v7402_v49 }
 0x4b7   : > { %6652 = vmatmul.mubr.msk.bf16.vlgmr.msra.gmra.mxu0 %vm3292_vm1, %v3604_v17 }
 0x4b8   : > { %3858 = vmatprep.mubr.bf16.mxu0 %v7806_v9  ;;  %3835 = vmatpush1.bf16.msra.mxu0 %v7400_v48 }
 0x4b9   : > { %3836 = vmatprep.subr.bf16.mxu0 %v7408_v50 }
 0x4bc   : > { %3837 = vmatpush1.bf16.msra.mxu0 %v7406_v51  ;;  %v7640_v51 = vld [vmem:[%s7945_s12 + $0x20] sm:$0xff] }
 0x4bd   : > { %3838 = vmatprep.subr.bf16.mxu0 %v7414_v52 }
 0x4c0   : > { %3839 = vmatpush1.bf16.msra.mxu0 %v7412_v56  ;;  %v7641_v56 = vld [vmem:[%s7945_s12 + $0x30] sm:$0xff] }
 0x4c1   : > { %3840 = vmatprep.subr.bf16.mxu0 %v7420_v46 }
 0x4c4   : > { %3841 = vmatpush1.bf16.msra.mxu0 %v7418_v47 }
 0x4c5   : > { %6661 = vmatprep.subr.bf16.mxu0 %v7803_v39 }
 0x56f   : > { %v8098_v19 = vpop.f32.mrf.mxu0  ;;  %v3585_v14 = vpop.f32.mrf.mxu1 }
 0x571   : > { %v8100_v21 = vpop.f32.mrf.mxu0  ;;  %v3587_v37 = vpop.f32.mrf.mxu1 }
 0x573   : > { %v8102_v22 = vpop.f32.mrf.mxu0  ;;  %v3589_v15 = vpop.f32.mrf.mxu1 }
 0x575   : > { %v8104_v24 = vpop.f32.mrf.mxu0  ;;  %v8118_v16 = vpop.f32.mrf.mxu1 }
 0x577   : > { %v3648_v25 = vpop.f32.mrf.mxu0 }
 0x578   : > { %v3655_v26 = vsel %vm3340_vm2, %v3648_v25, -inf }
 0x579   : > { %3656 = vmax.xlane.f32.xlu1 %v3655_v26  ;;  %v6653_v27 = vpop.f32.mrf.mxu0 }
 0x57b   : > { %v3651_v30 = vpop.f32.mrf.mxu0 }
 0x57c   : > { %v3658_v31 = vsel %vm3340_vm2, %v3651_v30, -inf }
 0x57d   : > { %3659 = vmax.xlane.f32.xlu0 %v3658_v31  ;;  %v6654_v32 = vpop.f32.mrf.mxu0  ;;  %v3927_v31 = vsel %vm3292_vm1, %v8044_v8, 0 }
 0x57e   : > { %v3259_v32 = vld [vmem:[#allocation6] sm:$0xf] }
 0x602   : > { %v3657_v53 = vpop.xlane.xlu1 %3656 }
 0x603   : > { %v3661_v28 = vsub.f32 %v3648_v25, %v3657_v53  ;;  %v3264_v53 = vrot.slane %v3259_v32, %v8026_v41 }
 0x605   : > { %v3663_v54 = vmul.f32 1.442695, %v3661_v28  ;;  %v3272_v28 = vrot.slane %v3259_v32, %v8004_v55  ;;  %v3285_v52 = vadd.f32 %v7640_v51, %v3264_v53 }
 0x606   : > { %v3660_v34 = vpop.xlane.xlu0 %3659 }
 0x607   : > { %7576 = vpow2.f32 %v3663_v54  ;;  %v3662_v35 = vsub.f32 %v3651_v30, %v3660_v34  ;;  %v3268_v54 = vrot.slane %v3259_v32, %v7985_v29  ;;  %v8136_v34 = vrot.slane %v3259_v32, %v8007_v60 }
 0x609   : > { %v3665_v38 = vmul.f32 1.442695, %v3662_v35  ;;  %v7636_v35 = vld [vmem:[%s7945_s12] sm:$0xff] }
 0x60b   : > { %7578 = vpow2.f32 %v3665_v38  ;;  %v3281_v38 = vadd.f32 %v7636_v35, %v3264_v53 }
 0x60d   : > { %v3594_v49 = vadd.f32 %v8098_v19, %v3281_v38  ;;  %v3598_v19 = vadd.f32 %v8102_v22, %v3285_v52 }
 0x614   : > { %v7577_v43 = vpop.eup %7576 }
 0x615   : > { %v3667_v5 = vsel %vm3340_vm2, %v7577_v43, 0.0 }
 0x616   : > { %3668 = vadd.xlane.f32.xlu0 %v3667_v5 }
 0x618   : > { %v7579_v44 = vpop.eup %7578 }
 0x619   : > { %v3670_v45 = vsel %vm3340_vm2, %v7579_v44, 0.0 }
 0x61a   : > { %3671 = vadd.xlane.f32.xlu1 %v3670_v45  ;;  %v7639_v45 = vld [vmem:[%s7945_s12 + $0x18] sm:$0xff] }
 0x61b   : > { %v3284_v48 = vadd.f32 %v7639_v45, %v8136_v34  ;;  %v7432_v45 = vld [vmem:[#allocation4 + $0x144] ss:$16 sps:$4 sm:$0xff]  }
 0x62c   : > { %3679 = vrot.lane.b32.xlu0 %v8065_v13, %s7805_s23 }
 0x630   : > { %4232 = vrot.lane.b32.xlu0 %v8001_v3, %s7805_s23 }
 0x69f   : > { %v3669_v57 = vpop.xlane.xlu0 %3668 }
 0x6a0   : > { %7580 = vrcp.f32 %v3669_v57  ;;  %v3287_v57 = vadd.f32 %v7641_v56, %v3272_v28 }
 0x6a3   : > { %v3672_v58 = vpop.xlane.xlu1 %3671  ;;  %v3680_v13 = vpop.permute.xlu0 %3679 }
 0x6a4   : > { %7582 = vrcp.f32 %v3672_v58  ;;  %6656 = vmatpush3.bf16.msra.mxu1 %v3680_v13 }
 0x6a5   : > { %3877 = vmatprep.subr.bf16.mxu1 %v7405_v10  ;;  %v7642_v10 = vld [vmem:[%s7945_s12 + $0x28] sm:$0xff] }
 0x6a6   : > { %v3286_v58 = vadd.f32 %v7642_v10, %v3268_v54 }
 0x6a8   : > { %v3599_v47 = vadd.f32 %v8104_v24, %v3286_v58  ;;  %v7427_v58 = vld [vmem:[#allocation4 + $0x168] ss:$16 sps:$4 sm:$0xff]  }
 0x6ad   : > { %v7581_v12 = vpop.eup %7580 }
 0x6ae   : > { %v3675_v61 = vmul.f32 %v7581_v12, %v7577_v43  ;;  %v7637_v43 = vld [vmem:[%s7945_s12 + $0x10] sm:$0xff] }
 0x6af   : > { %v3283_v5 = vadd.f32 %v7637_v43, %v3272_v28 }
 0x6b1   : > { %v7583_v59 = vpop.eup %7582  ;;  %v3596_v50 = vadd.f32 %v3585_v14, %v3283_v5  ;;  %v7424_v5 = vld [vmem:[#allocation4 + $0x160] ss:$16 sps:$4 sm:$0xff]  }
 0x6b2   : > { %v3676_v63 = vmul.f32 %v7583_v59, %v7579_v44 }
 0x6b4   : > { %v3677_v1 = vpack.c.bf16 %v3676_v63, %v3675_v61  ;;  %v3597_v61 = vadd.f32 %v3587_v37, %v3284_v48  ;;  %v7430_v48 = vld [vmem:[#allocation4 + $0x140] ss:$16 sps:$4 sm:$0xff]  }
 0x6b6   : > { %6658 = vmatmul.mubr.msk.bf16.vlgmr.msra.gmra.mxu1 %vm3340_vm2, %v3677_v1 }
 0x6b7   : > { %3878 = vmatpush1.bf16.msra.mxu1 %v7403_v0  ;;  %3901 = vmatprep.mubr.bf16.mxu1 %v7806_v9 }
 0x6b8   : > { %3879 = vmatprep.subr.bf16.mxu1 %v7411_v2 }
 0x6bb   : > { %3880 = vmatpush1.bf16.msra.mxu1 %v7409_v4  ;;  %v3600_v4 = vadd.f32 %v3589_v15, %v3287_v57 }
 0x6bc   : > { %3881 = vmatprep.subr.bf16.mxu1 %v7417_v6 }
 0x6bf   : > { %3882 = vmatpush1.bf16.msra.mxu1 %v7415_v7 }
 0x6c0   : > { %3883 = vmatprep.subr.bf16.mxu1 %v7423_v36 }
 0x6c3   : > { %3884 = vmatpush1.bf16.msra.mxu1 %v7421_v11 }
 0x6c4   : > { %6667 = vmatprep.subr.bf16.mxu1 %v7803_v39 }
 0x776   : > { %v3719_v17 = vpop.f32.mrf.mxu1 }
 0x778   : > { %v6659_v25 = vpop.f32.mrf.mxu1 }
 0x77a   : > { %v3722_v26 = vpop.f32.mrf.mxu1 }
 0x77b   : > { %v3726_v27 = vpack.c.bf16 %v3722_v26, %v3719_v17 }
 0x77c   : > { %v6660_v30 = vpop.f32.mrf.mxu1 }
 0x77d   : > { %6479 = vmatmul.mubr.msk.bf16.vlgmr.msra.gmra.mxu0 %vm3292_vm1, %v3726_v27  ;;  %6480 = vmatmul.mubr.msk.bf16.vlgmr.msra.gmra.mxu1 %vm3292_vm1, %v3726_v27 }
 0x77e   : > { %6662 = vmatpush3.bf16.xpose.msra.mxu0 %v3927_v31  ;;  %6668 = vmatpush3.bf16.msra.mxu1 %v8067_v62 }
 0x77f   : > { %6663 = vmatprep.mubr.msk.bf16.mxu0 %vm7804_vm0, %v7803_v39  ;;  %6669 = vmatprep.mubr.msk.bf16.mxu1 %vm7804_vm0, %v7803_v39 }
 0x785   : > { %6664 = vmatmul.mubr.msk.bf16.vlgmr.msra.gmra.mxu0 %vm3292_vm1, %v8001_v3  ;;  %v7638_v3 = vld [vmem:[%s7945_s12 + $0x8] sm:$0xff] }
 0x786   : > { %4169 = vmatprep.mubr.bf16.mxu0 %v7806_v9  ;;  %v3282_v44 = vadd.f32 %v7638_v3, %v3268_v54  ;;  %v7426_v3 = vld [vmem:[#allocation4 + $0x164] ss:$16 sps:$4 sm:$0xff]  }
 0x787   : > { %4145 = vmatprep.subr.bf16.mxu0 %v7426_v3 }
 0x788   : > { %v3595_v59 = vadd.f32 %v8100_v21, %v3282_v44  ;;  %v7429_v44 = vld [vmem:[#allocation4 + $0x16c] ss:$16 sps:$4 sm:$0xff]   ;;  %4146 = vmatpush1.bf16.msra.mxu0 %v7424_v5 }
 0x789   : > { %4188 = vmatprep.subr.bf16.mxu1 %v7429_v44  ;;  %4147 = vmatprep.subr.bf16.mxu0 %v7432_v45 }
 0x78c   : > { %4148 = vmatpush1.bf16.msra.mxu0 %v7430_v48 }
 0x83d   : > { %v3860_v13 = vpop.f32.mrf.mxu0  ;;  %v3903_v12 = vpop.f32.mrf.mxu1 }
 0x83e   : > { %v8148_v63 = vadd.f32 %v3860_v13, %v3594_v49  ;;  %v8150_v0 = vadd.f32 %v3903_v12, %v3596_v50  ;;  %v7438_v49 = vld [vmem:[#allocation4 + $0x124] ss:$16 sps:$4 sm:$0xff]   ;;  %v7436_v50 = vld [vmem:[#allocation4 + $0x120] ss:$16 sps:$4 sm:$0xff]   ;;  %v7435_v12 = vld [vmem:[#allocation4 + $0x14c] ss:$16 sps:$4 sm:$0xff]  }
 0x83f   : > { %v3862_v1 = vpop.f32.mrf.mxu0  ;;  %v3905_v2 = vpop.f32.mrf.mxu1  ;;  %4149 = vmatprep.subr.bf16.mxu0 %v7438_v49 }
 0x840   : > { %v8153_v6 = vadd.f32 %v3862_v1, %v3595_v59  ;;  %v8155_v7 = vadd.f32 %v3905_v2, %v3597_v61  ;;  %4150 = vmatpush1.bf16.msra.mxu0 %v7436_v50  ;;  %v7433_v59 = vld [vmem:[#allocation4 + $0x148] ss:$16 sps:$4 sm:$0xff]   ;;  %v7441_v61 = vld [vmem:[#allocation4 + $0x12c] ss:$16 sps:$4 sm:$0xff]   ;;  %v7444_v2 = vld [vmem:[#allocation4 + $0x104] ss:$16 sps:$4 sm:$0xff]  }
 0x841   : > { %v3864_v46 = vpop.f32.mrf.mxu0  ;;  %v3907_v36 = vpop.f32.mrf.mxu1  ;;  %v7439_v1 = vld [vmem:[#allocation4 + $0x128] ss:$16 sps:$4 sm:$0xff]   ;;  %4151 = vmatprep.subr.bf16.mxu0 %v7444_v2 }
 0x842   : > { %v8158_v11 = vadd.f32 %v3864_v46, %v3598_v19  ;;  %v8160_v21 = vadd.f32 %v3907_v36, %v3600_v4  ;;  %v7442_v19 = vld [vmem:[#allocation4 + $0x100] ss:$16 sps:$4 sm:$0xff]   ;;  %v7445_v4 = vld [vmem:[#allocation4 + $0x108] ss:$16 sps:$4 sm:$0xff]   ;;  %v7447_v46 = vld [vmem:[#allocation4 + $0x10c] ss:$16 sps:$4 sm:$0xff]  }
 0x843   : > { %v3866_v14 = vpop.f32.mrf.mxu0  ;;  %v8174_v36 = vpop.f32.mrf.mxu1 }
 0x844   : > { %v8162_v37 = vadd.f32 %v3866_v14, %v3599_v47  ;;  %4152 = vmatpush1.bf16.msra.mxu0 %v7442_v19 }
 0x845   : > { %v3963_v17 = vpop.f32.mrf.mxu0  ;;  %6673 = vmatprep.subr.bf16.mxu0 %v7803_v39 }
 0x846   : > { %v3970_v25 = vsel %vm3340_vm2, %v3963_v17, -inf }
 0x847   : > { %3971 = vmax.xlane.f32.xlu1 %v3970_v25  ;;  %v6665_v22 = vpop.f32.mrf.mxu0 }
 0x849   : > { %v3966_v15 = vpop.f32.mrf.mxu0 }
 0x84a   : > { %v3973_v26 = vsel %vm3340_vm2, %v3966_v15, -inf }
 0x84b   : > { %3974 = vmax.xlane.f32.xlu1 %v3973_v26  ;;  %v6666_v27 = vpop.f32.mrf.mxu0 }
 0x84c   : > { %v4233_v27 = vpop.permute.xlu0 %4232 }
 0x8d0   : > { %v3972_v30 = vpop.xlane.xlu1 %3971 }
 0x8d1   : > { %v3976_v31 = vsub.f32 %v3963_v17, %v3972_v30 }
 0x8d3   : > { %v3978_v24 = vmul.f32 1.442695, %v3976_v31 }
 0x8d4   : > { %v3975_v32 = vpop.xlane.xlu1 %3974 }
 0x8d5   : > { %7584 = vpow2.f32 %v3978_v24  ;;  %v3977_v53 = vsub.f32 %v3966_v15, %v3975_v32 }
 0x8d7   : > { %v3980_v28 = vmul.f32 1.442695, %v3977_v53 }
 0x8d9   : > { %7586 = vpow2.f32 %v3980_v28 }
 0x8e2   : > { %v7585_v54 = vpop.eup %7584 }
 0x8e3   : > { %v3982_v35 = vsel %vm3340_vm2, %v7585_v54, 0.0 }
 0x8e4   : > { %3983 = vadd.xlane.f32.xlu1 %v3982_v35 }
 0x8e6   : > { %v7587_v38 = vpop.eup %7586 }
 0x8e7   : > { %v3985_v43 = vsel %vm3340_vm2, %v7587_v38, 0.0 }
 0x8e8   : > { %3986 = vadd.xlane.f32.xlu1 %v3985_v43 }
 0x8f9   : > { %4235 = vrot.lane.b32.xlu1 %v8044_v8, %s7805_s23 }
 0x96d   : > { %v3984_v51 = vpop.xlane.xlu1 %3983 }
 0x96e   : > { %7588 = vrcp.f32 %v3984_v51 }
 0x971   : > { %v3987_v52 = vpop.xlane.xlu1 %3986 }
 0x972   : > { %7590 = vrcp.f32 %v3987_v52 }
 0x975   : > { %v4236_v17 = vpop.permute.xlu1 %4235 }
 0x976   : > { %v4241_v26 = vsel %vm3292_vm1, %v4236_v17, 0 }
 0x97b   : > { %v7589_v56 = vpop.eup %7588 }
 0x97c   : > { %v3990_v57 = vmul.f32 %v7589_v56, %v7585_v54 }
 0x97f   : > { %v7591_v8 = vpop.eup %7590 }
 0x980   : > { %v3991_v10 = vmul.f32 %v7591_v8, %v7587_v38 }
 0x982   : > { %v3992_v13 = vpack.c.bf16 %v3991_v10, %v3990_v57 }
 0x984   : > { %6670 = vmatmul.mubr.msk.bf16.vlgmr.msra.gmra.mxu1 %vm3340_vm2, %v3992_v13  ;;  %v7450_v13 = vld [vmem:[#allocation4 + $0x1e4] ss:$16 sps:$4 sm:$0xff]  }
 0x985   : > { %4189 = vmatpush1.bf16.msra.mxu1 %v7427_v58  ;;  %4212 = vmatprep.mubr.bf16.mxu1 %v7806_v9  ;;  %v7448_v58 = vld [vmem:[#allocation4 + $0x1e0] ss:$16 sps:$4 sm:$0xff]  }
 0x986   : > { %4190 = vmatprep.subr.bf16.mxu1 %v7435_v12  ;;  %v7456_v12 = vld [vmem:[#allocation4 + $0x1c4] ss:$16 sps:$4 sm:$0xff]  }
 0x989   : > { %4191 = vmatpush1.bf16.msra.mxu1 %v7433_v59  ;;  %v7454_v59 = vld [vmem:[#allocation4 + $0x1c0] ss:$16 sps:$4 sm:$0xff]  }
 0x98a   : > { %4192 = vmatprep.subr.bf16.mxu1 %v7441_v61  ;;  %v7462_v61 = vld [vmem:[#allocation4 + $0x1a4] ss:$16 sps:$4 sm:$0xff]  }
 0x98d   : > { %4193 = vmatpush1.bf16.msra.mxu1 %v7439_v1  ;;  %v7460_v1 = vld [vmem:[#allocation4 + $0x1a0] ss:$16 sps:$4 sm:$0xff]  }
 0x98e   : > { %4194 = vmatprep.subr.bf16.mxu1 %v7447_v46 }
 0x991   : > { %4195 = vmatpush1.bf16.msra.mxu1 %v7445_v4 }
 0x992   : > { %6679 = vmatprep.subr.bf16.mxu1 %v7803_v39 }
 0xa44   : > { %v4030_v47 = vpop.f32.mrf.mxu1 }
 0xa46   : > { %v6671_v14 = vpop.f32.mrf.mxu1 }
 0xa48   : > { %v4033_v25 = vpop.f32.mrf.mxu1 }
 0xa49   : > { %v4037_v22 = vpack.c.bf16 %v4033_v25, %v4030_v47  ;;  %v7451_v25 = vld [vmem:[#allocation4 + $0x1e8] ss:$16 sps:$4 sm:$0xff]  }
 0xa4a   : > { %v6672_v15 = vpop.f32.mrf.mxu1 }
 0xa4b   : > { %6499 = vmatmul.mubr.msk.bf16.vlgmr.msra.gmra.mxu0 %vm3292_vm1, %v4037_v22  ;;  %6500 = vmatmul.mubr.msk.bf16.vlgmr.msra.gmra.mxu1 %vm3292_vm1, %v4037_v22  ;;  %v7459_v15 = vld [vmem:[#allocation4 + $0x1cc] ss:$16 sps:$4 sm:$0xff]  }
 0xa4c   : > { %6674 = vmatpush3.bf16.xpose.msra.mxu0 %v4241_v26  ;;  %6675 = vmatprep.mubr.msk.bf16.mxu0 %vm7804_vm0, %v7803_v39  ;;  %v7457_v26 = vld [vmem:[#allocation4 + $0x1c8] ss:$16 sps:$4 sm:$0xff]  }
 0xa4d   : > { %6681 = vmatprep.mubr.msk.bf16.mxu1 %vm7804_vm0, %v7803_v39  ;;  %4463 = vmatprep.subr.bf16.mxu0 %v7450_v13 }
 0xa53   : > { %6676 = vmatmul.mubr.msk.bf16.vlgmr.msra.gmra.mxu0 %vm3292_vm1, %v4233_v27  ;;  %v7465_v27 = vld [vmem:[#allocation4 + $0x1ac] ss:$16 sps:$4 sm:$0xff]  }
 0xa54   : > { %4487 = vmatprep.mubr.bf16.mxu0 %v7806_v9  ;;  %4464 = vmatpush1.bf16.msra.mxu0 %v7448_v58 }
 0xa55   : > { %4465 = vmatprep.subr.bf16.mxu0 %v7456_v12 }
 0xa58   : > { %4466 = vmatpush1.bf16.msra.mxu0 %v7454_v59 }
 0xa59   : > { %4467 = vmatprep.subr.bf16.mxu0 %v7462_v61 }
 0xa5c   : > { %4468 = vmatpush1.bf16.msra.mxu0 %v7460_v1 }
 0xb0b   : > { %v4171_v30 = vpop.f32.mrf.mxu0  ;;  %v4214_v31 = vpop.f32.mrf.mxu1 }
 0xb0c   : > { %v8186_v24 = vadd.f32 %v4171_v30, %v8148_v63  ;;  %v8189_v32 = vadd.f32 %v4214_v31, %v8150_v0  ;;  %v7463_v30 = vld [vmem:[#allocation4 + $0x1a8] ss:$16 sps:$4 sm:$0xff]   ;;  %v7468_v31 = vld [vmem:[#allocation4 + $0x184] ss:$16 sps:$4 sm:$0xff]  }
 0xb0d   : > { %v4173_v53 = vpop.f32.mrf.mxu0  ;;  %v4216_v28 = vpop.f32.mrf.mxu1  ;;  %4469 = vmatprep.subr.bf16.mxu0 %v7468_v31 }
 0xb0e   : > { %v8192_v54 = vadd.f32 %v4173_v53, %v8153_v6  ;;  %v8195_v35 = vadd.f32 %v4216_v28, %v8155_v7  ;;  %v7471_v53 = vld [vmem:[#allocation4 + $0x18c] ss:$16 sps:$4 sm:$0xff]   ;;  %v7466_v28 = vld [vmem:[#allocation4 + $0x180] ss:$16 sps:$4 sm:$0xff]  }
 0xb0f   : > { %v4175_v38 = vpop.f32.mrf.mxu0  ;;  %v4218_v43 = vpop.f32.mrf.mxu1  ;;  %4470 = vmatpush1.bf16.msra.mxu0 %v7466_v28 }
 0xb10   : > { %v8198_v5 = vadd.f32 %v4175_v38, %v8158_v11  ;;  %v8201_v3 = vadd.f32 %v4218_v43, %v8160_v21  ;;  %v7469_v38 = vld [vmem:[#allocation4 + $0x188] ss:$16 sps:$4 sm:$0xff]   ;;  %6685 = vmatprep.subr.bf16.mxu0 %v7803_v39 }
 0xb11   : > { %v4177_v63 = vpop.f32.mrf.mxu0  ;;  %v8218_v43 = vpop.f32.mrf.mxu1 }
 0xb12   : > { %v8204_v0 = vadd.f32 %v4177_v63, %v8162_v37 }
 0xb13   : > { %v4277_v44 = vpop.f32.mrf.mxu0 }
 0xb14   : > { %v4284_v45 = vsel %vm3340_vm2, %v4277_v44, -inf }
 0xb15   : > { %4285 = vmax.xlane.f32.xlu0 %v4284_v45  ;;  %v6677_v6 = vpop.f32.mrf.mxu0 }
 0xb17   : > { %v4280_v48 = vpop.f32.mrf.mxu0 }
 0xb18   : > { %v4287_v7 = vsel %vm3340_vm2, %v4280_v48, -inf }
 0xb19   : > { %4288 = vmax.xlane.f32.xlu1 %v4287_v7  ;;  %v6678_v49 = vpop.f32.mrf.mxu0  ;;  %v4556_v7 = vsel %vm3292_vm1, %v8056_v23, 0 }
 0xb9e   : > { %v4286_v50 = vpop.xlane.xlu0 %4285 }
 0xb9f   : > { %v4290_v11 = vsub.f32 %v4277_v44, %v4286_v50 }
 0xba1   : > { %v4292_v51 = vmul.f32 1.442695, %v4290_v11 }
 0xba2   : > { %v4289_v52 = vpop.xlane.xlu1 %4288 }
 0xba3   : > { %7592 = vpow2.f32 %v4292_v51  ;;  %v4291_v21 = vsub.f32 %v4280_v48, %v4289_v52 }
 0xba5   : > { %v4294_v56 = vmul.f32 1.442695, %v4291_v21 }
 0xba7   : > { %7594 = vpow2.f32 %v4294_v56 }
 0xbb0   : > { %v7593_v37 = vpop.eup %7592 }
 0xbb1   : > { %v4296_v8 = vsel %vm3340_vm2, %v7593_v37, 0.0 }
 0xbb2   : > { %4297 = vadd.xlane.f32.xlu0 %v4296_v8 }
 0xbb4   : > { %v7595_v57 = vpop.eup %7594 }
 0xbb5   : > { %v4299_v10 = vsel %vm3340_vm2, %v7595_v57, 0.0 }
 0xbb6   : > { %4300 = vadd.xlane.f32.xlu0 %v4299_v10 }
 0xbcc   : > { %4308 = vrot.lane.b32.xlu0 %v8067_v62, %s7805_s23  ;;  %v7453_v62 = vld [vmem:[#allocation4 + $0x1ec] ss:$16 sps:$4 sm:$0xff]  }
 0xbd0   : > { %4861 = vrot.lane.b32.xlu0 %v8017_v40, %s7805_s23 }
 0xc3b   : > { %v4298_v2 = vpop.xlane.xlu0 %4297 }
 0xc3c   : > { %7596 = vrcp.f32 %v4298_v2 }
 0xc3f   : > { %v4301_v19 = vpop.xlane.xlu0 %4300 }
 0xc40   : > { %7598 = vrcp.f32 %v4301_v19 }
 0xc43   : > { %v4309_v4 = vpop.permute.xlu0 %4308 }
 0xc44   : > { %6680 = vmatpush3.bf16.msra.mxu1 %v4309_v4 }
 0xc45   : > { %4506 = vmatprep.subr.bf16.mxu1 %v7453_v62 }
 0xc49   : > { %v7597_v46 = vpop.eup %7596 }
 0xc4a   : > { %v4304_v14 = vmul.f32 %v7597_v46, %v7593_v37 }
 0xc4d   : > { %v7599_v47 = vpop.eup %7598 }
 0xc4e   : > { %v4305_v17 = vmul.f32 %v7599_v47, %v7595_v57  ;;  %v7472_v47 = vld [vmem:[#allocation4 + $0x260] ss:$16 sps:$4 sm:$0xff]  }
 0xc50   : > { %v4306_v22 = vpack.c.bf16 %v4305_v17, %v4304_v14  ;;  %v7474_v14 = vld [vmem:[#allocation4 + $0x264] ss:$16 sps:$4 sm:$0xff]   ;;  %v7477_v17 = vld [vmem:[#allocation4 + $0x26c] ss:$16 sps:$4 sm:$0xff]  }
 0xc52   : > { %6682 = vmatmul.mubr.msk.bf16.vlgmr.msra.gmra.mxu1 %vm3340_vm2, %v4306_v22  ;;  %v7478_v22 = vld [vmem:[#allocation4 + $0x240] ss:$16 sps:$4 sm:$0xff]  }
 0xc53   : > { %4507 = vmatpush1.bf16.msra.mxu1 %v7451_v25  ;;  %4530 = vmatprep.mubr.bf16.mxu1 %v7806_v9  ;;  %v7480_v25 = vld [vmem:[#allocation4 + $0x244] ss:$16 sps:$4 sm:$0xff]  }
 0xc54   : > { %4508 = vmatprep.subr.bf16.mxu1 %v7459_v15  ;;  %v7486_v15 = vld [vmem:[#allocation4 + $0x224] ss:$16 sps:$4 sm:$0xff]  }
 0xc57   : > { %4509 = vmatpush1.bf16.msra.mxu1 %v7457_v26  ;;  %v7484_v26 = vld [vmem:[#allocation4 + $0x220] ss:$16 sps:$4 sm:$0xff]  }
 0xc58   : > { %4510 = vmatprep.subr.bf16.mxu1 %v7465_v27 }
 0xc5b   : > { %4511 = vmatpush1.bf16.msra.mxu1 %v7463_v30 }
 0xc5c   : > { %4512 = vmatprep.subr.bf16.mxu1 %v7471_v53 }
 0xc5f   : > { %4513 = vmatpush1.bf16.msra.mxu1 %v7469_v38  ;;  %v7475_v38 = vld [vmem:[#allocation4 + $0x268] ss:$16 sps:$4 sm:$0xff]  }
 0xc60   : > { %6691 = vmatprep.subr.bf16.mxu1 %v7803_v39 }
 0xd12   : > { %v4348_v63 = vpop.f32.mrf.mxu1 }
 0xd14   : > { %v6683_v44 = vpop.f32.mrf.mxu1 }
 0xd15   : > { %v7483_v44 = vld [vmem:[#allocation4 + $0x24c] ss:$16 sps:$4 sm:$0xff]  }
 0xd16   : > { %v4351_v45 = vpop.f32.mrf.mxu1 }
 0xd17   : > { %v4355_v6 = vpack.c.bf16 %v4351_v45, %v4348_v63  ;;  %v7481_v45 = vld [vmem:[#allocation4 + $0x248] ss:$16 sps:$4 sm:$0xff]  }
 0xd18   : > { %v6684_v48 = vpop.f32.mrf.mxu1 }
 0xd19   : > { %6519 = vmatmul.mubr.msk.bf16.vlgmr.msra.gmra.mxu0 %vm3292_vm1, %v4355_v6  ;;  %6520 = vmatmul.mubr.msk.bf16.vlgmr.msra.gmra.mxu1 %vm3292_vm1, %v4355_v6  ;;  %v7489_v6 = vld [vmem:[#allocation4 + $0x22c] ss:$16 sps:$4 sm:$0xff]   ;;  %v7487_v48 = vld [vmem:[#allocation4 + $0x228] ss:$16 sps:$4 sm:$0xff]  }
 0xd1a   : > { %6686 = vmatpush3.bf16.xpose.msra.mxu0 %v4556_v7  ;;  %6692 = vmatpush3.bf16.msra.mxu1 %v8072_v18  ;;  %v7492_v7 = vld [vmem:[#allocation4 + $0x204] ss:$16 sps:$4 sm:$0xff]  }
 0xd1b   : > { %6687 = vmatprep.mubr.msk.bf16.mxu0 %vm7804_vm0, %v7803_v39  ;;  %6693 = vmatprep.mubr.msk.bf16.mxu1 %vm7804_vm0, %v7803_v39 }
 0xd1c   : > { %4774 = vmatprep.subr.bf16.mxu0 %v7474_v14  ;;  %4817 = vmatprep.subr.bf16.mxu1 %v7477_v17 }
 0xd21   : > { %6688 = vmatmul.mubr.msk.bf16.vlgmr.msra.gmra.mxu0 %vm3292_vm1, %v8017_v40 }
 0xd22   : > { %4798 = vmatprep.mubr.bf16.mxu0 %v7806_v9  ;;  %4775 = vmatpush1.bf16.msra.mxu0 %v7472_v47 }
 0xd23   : > { %4776 = vmatprep.subr.bf16.mxu0 %v7480_v25 }
 0xd26   : > { %4777 = vmatpush1.bf16.msra.mxu0 %v7478_v22 }
 0xd27   : > { %4778 = vmatprep.subr.bf16.mxu0 %v7486_v15 }
 0xd2a   : > { %4779 = vmatpush1.bf16.msra.mxu0 %v7484_v26 }
 0xd2b   : > { %4780 = vmatprep.subr.bf16.mxu0 %v7492_v7 }
 0xdd9   : > { %v4489_v49 = vpop.f32.mrf.mxu0  ;;  %v4532_v50 = vpop.f32.mrf.mxu1 }
 0xdda   : > { %v8233_v11 = vadd.f32 %v4489_v49, %v8186_v24  ;;  %v8236_v51 = vadd.f32 %v4532_v50, %v8189_v32  ;;  %v7490_v49 = vld [vmem:[#allocation4 + $0x200] ss:$16 sps:$4 sm:$0xff]   ;;  %v7493_v50 = vld [vmem:[#allocation4 + $0x208] ss:$16 sps:$4 sm:$0xff]  }
 0xddb   : > { %v4491_v52 = vpop.f32.mrf.mxu0  ;;  %v4534_v21 = vpop.f32.mrf.mxu1  ;;  %4781 = vmatpush1.bf16.msra.mxu0 %v7490_v49 }
 0xddc   : > { %v8239_v56 = vadd.f32 %v4491_v52, %v8192_v54  ;;  %v8242_v37 = vadd.f32 %v4534_v21, %v8195_v35  ;;  %v7495_v52 = vld [vmem:[#allocation4 + $0x20c] ss:$16 sps:$4 sm:$0xff]   ;;  %6697 = vmatprep.subr.bf16.mxu0 %v7803_v39 }
 0xddd   : > { %v4493_v8 = vpop.f32.mrf.mxu0  ;;  %v4536_v40 = vpop.f32.mrf.mxu1 }
 0xdde   : > { %v8245_v57 = vadd.f32 %v4493_v8, %v8198_v5  ;;  %v8248_v10 = vadd.f32 %v4536_v40, %v8201_v3 }
 0xddf   : > { %v4495_v24 = vpop.f32.mrf.mxu0  ;;  %v8263_v21 = vpop.f32.mrf.mxu1 }
 0xde0   : > { %v8251_v32 = vadd.f32 %v4495_v24, %v8204_v0 }
 0xde1   : > { %v4592_v58 = vpop.f32.mrf.mxu0 }
 0xde2   : > { %v4599_v13 = vsel %vm3340_vm2, %v4592_v58, -inf }
 0xde3   : > { %4600 = vmax.xlane.f32.xlu1 %v4599_v13  ;;  %v6689_v54 = vpop.f32.mrf.mxu0 }
 0xde5   : > { %v4595_v12 = vpop.f32.mrf.mxu0 }
 0xde6   : > { %v4602_v35 = vsel %vm3340_vm2, %v4595_v12, -inf }
 0xde7   : > { %4603 = vmax.xlane.f32.xlu1 %v4602_v35  ;;  %v6690_v59 = vpop.f32.mrf.mxu0  ;;  %v4862_v35 = vpop.permute.xlu0 %4861 }
 0xe6c   : > { %v4601_v61 = vpop.xlane.xlu1 %4600 }
 0xe6d   : > { %v4605_v5 = vsub.f32 %v4592_v58, %v4601_v61 }
 0xe6f   : > { %v4607_v1 = vmul.f32 1.442695, %v4605_v5 }
 0xe70   : > { %v4604_v2 = vpop.xlane.xlu1 %4603 }
 0xe71   : > { %7600 = vpow2.f32 %v4607_v1  ;;  %v4606_v3 = vsub.f32 %v4595_v12, %v4604_v2 }
 0xe73   : > { %v4609_v19 = vmul.f32 1.442695, %v4606_v3 }
 0xe75   : > { %7602 = vpow2.f32 %v4609_v19 }
 0xe7e   : > { %v7601_v0 = vpop.eup %7600 }
 0xe7f   : > { %v4611_v62 = vsel %vm3340_vm2, %v7601_v0, 0.0 }
 0xe80   : > { %4612 = vadd.xlane.f32.xlu1 %v4611_v62 }
 0xe82   : > { %v7603_v4 = vpop.eup %7602 }
 0xe83   : > { %v4614_v46 = vsel %vm3340_vm2, %v7603_v4, 0.0 }
 0xe84   : > { %4615 = vadd.xlane.f32.xlu1 %v4614_v46 }
 0xe95   : > { %4864 = vrot.lane.b32.xlu1 %v8056_v23, %s7805_s23 }
 0xf09   : > { %v4613_v27 = vpop.xlane.xlu1 %4612 }
 0xf0a   : > { %7604 = vrcp.f32 %v4613_v27 }
 0xf0d   : > { %v4616_v30 = vpop.xlane.xlu1 %4615 }
 0xf0e   : > { %7606 = vrcp.f32 %v4616_v30 }
 0xf11   : > { %v4865_v24 = vpop.permute.xlu1 %4864 }
 0xf12   : > { %v4870_v12 = vsel %vm3292_vm1, %v4865_v24, 0  ;;  %v7499_v24 = vld [vmem:[#allocation4 + $0x2e8] ss:$16 sps:$4 sm:$0xff]  }
 0xf17   : > { %v7605_v31 = vpop.eup %7604 }
 0xf18   : > { %v4619_v53 = vmul.f32 %v7605_v31, %v7601_v0 }
 0xf1b   : > { %v7607_v23 = vpop.eup %7606 }
 0xf1c   : > { %v4620_v28 = vmul.f32 %v7607_v23, %v7603_v4 }
 0xf1e   : > { %v4621_v63 = vpack.c.bf16 %v4620_v28, %v4619_v53  ;;  %v7496_v28 = vld [vmem:[#allocation4 + $0x2e0] ss:$16 sps:$4 sm:$0xff]  }
 0xf20   : > { %6694 = vmatmul.mubr.msk.bf16.vlgmr.msra.gmra.mxu1 %vm3340_vm2, %v4621_v63  ;;  %v7504_v63 = vld [vmem:[#allocation4 + $0x2c4] ss:$16 sps:$4 sm:$0xff]  }
 0xf21   : > { %4818 = vmatpush1.bf16.msra.mxu1 %v7475_v38  ;;  %4841 = vmatprep.mubr.bf16.mxu1 %v7806_v9  ;;  %v7498_v38 = vld [vmem:[#allocation4 + $0x2e4] ss:$16 sps:$4 sm:$0xff]  }
 0xf22   : > { %4819 = vmatprep.subr.bf16.mxu1 %v7483_v44  ;;  %v7502_v44 = vld [vmem:[#allocation4 + $0x2c0] ss:$16 sps:$4 sm:$0xff]  }
 0xf25   : > { %4820 = vmatpush1.bf16.msra.mxu1 %v7481_v45  ;;  %v7510_v45 = vld [vmem:[#allocation4 + $0x2a4] ss:$16 sps:$4 sm:$0xff]  }
 0xf26   : > { %4821 = vmatprep.subr.bf16.mxu1 %v7489_v6  ;;  %v7508_v6 = vld [vmem:[#allocation4 + $0x2a0] ss:$16 sps:$4 sm:$0xff]  }
 0xf29   : > { %4822 = vmatpush1.bf16.msra.mxu1 %v7487_v48 }
 0xf2a   : > { %4823 = vmatprep.subr.bf16.mxu1 %v7495_v52 }
 0xf2d   : > { %4824 = vmatpush1.bf16.msra.mxu1 %v7493_v50 }
 0xf2e   : > { %6703 = vmatprep.subr.bf16.mxu1 %v7803_v39 }
 0xfe0   : > { %v4659_v8 = vpop.f32.mrf.mxu1 }
 0xfe2   : > { %v6695_v40 = vpop.f32.mrf.mxu1 }
 0xfe4   : > { %v4662_v58 = vpop.f32.mrf.mxu1 }
 0xfe5   : > { %v4666_v13 = vpack.c.bf16 %v4662_v58, %v4659_v8 }
 0xfe6   : > { %v6696_v54 = vpop.f32.mrf.mxu1 }
 0xfe7   : > { %6539 = vmatmul.mubr.msk.bf16.vlgmr.msra.gmra.mxu0 %vm3292_vm1, %v4666_v13  ;;  %6540 = vmatmul.mubr.msk.bf16.vlgmr.msra.gmra.mxu1 %vm3292_vm1, %v4666_v13  ;;  %v7507_v13 = vld [vmem:[#allocation4 + $0x2cc] ss:$16 sps:$4 sm:$0xff]   ;;  %v7505_v54 = vld [vmem:[#allocation4 + $0x2c8] ss:$16 sps:$4 sm:$0xff]  }
 0xfe8   : > { %6698 = vmatpush3.bf16.xpose.msra.mxu0 %v4870_v12  ;;  %6699 = vmatprep.mubr.msk.bf16.mxu0 %vm7804_vm0, %v7803_v39  ;;  %v7513_v12 = vld [vmem:[#allocation4 + $0x2ac] ss:$16 sps:$4 sm:$0xff]  }
 0xfe9   : > { %6705 = vmatprep.mubr.msk.bf16.mxu1 %vm7804_vm0, %v7803_v39  ;;  %5092 = vmatprep.subr.bf16.mxu0 %v7498_v38 }
 0xfef   : > { %6700 = vmatmul.mubr.msk.bf16.vlgmr.msra.gmra.mxu0 %vm3292_vm1, %v4862_v35  ;;  %v7511_v35 = vld [vmem:[#allocation4 + $0x2a8] ss:$16 sps:$4 sm:$0xff]  }
 0xff0   : > { %5116 = vmatprep.mubr.bf16.mxu0 %v7806_v9  ;;  %5093 = vmatpush1.bf16.msra.mxu0 %v7496_v28 }
 0xff1   : > { %5094 = vmatprep.subr.bf16.mxu0 %v7504_v63 }
 0xff4   : > { %5095 = vmatpush1.bf16.msra.mxu0 %v7502_v44 }
 0xff5   : > { %5096 = vmatprep.subr.bf16.mxu0 %v7510_v45 }
 0xff8   : > { %5097 = vmatpush1.bf16.msra.mxu0 %v7508_v6 }
0x10a7   : > { %v4800_v59 = vpop.f32.mrf.mxu0  ;;  %v4843_v61 = vpop.f32.mrf.mxu1 }
0x10a8   : > { %v8275_v5 = vadd.f32 %v4800_v59, %v8233_v11  ;;  %v8278_v1 = vadd.f32 %v4843_v61, %v8236_v51  ;;  %v7516_v59 = vld [vmem:[#allocation4 + $0x284] ss:$16 sps:$4 sm:$0xff]   ;;  %v7519_v61 = vld [vmem:[#allocation4 + $0x28c] ss:$16 sps:$4 sm:$0xff]  }
0x10a9   : > { %v4802_v2 = vpop.f32.mrf.mxu0  ;;  %v4845_v3 = vpop.f32.mrf.mxu1  ;;  %5098 = vmatprep.subr.bf16.mxu0 %v7516_v59 }
0x10aa   : > { %v8281_v19 = vadd.f32 %v4802_v2, %v8239_v56  ;;  %v8284_v0 = vadd.f32 %v4845_v3, %v8242_v37  ;;  %v7514_v2 = vld [vmem:[#allocation4 + $0x280] ss:$16 sps:$4 sm:$0xff]   ;;  %v7517_v3 = vld [vmem:[#allocation4 + $0x288] ss:$16 sps:$4 sm:$0xff]  }
0x10ab   : > { %v4804_v62 = vpop.f32.mrf.mxu0  ;;  %v4847_v4 = vpop.f32.mrf.mxu1  ;;  %5099 = vmatpush1.bf16.msra.mxu0 %v7514_v2  ;;  %v7523_v2 = vld [vmem:[#allocation4 + $0x368] ss:$16 sps:$4 sm:$0xff]  }
0x10ac   : > { %v8287_v46 = vadd.f32 %v4804_v62, %v8245_v57  ;;  %v8290_v47 = vadd.f32 %v4847_v4, %v8248_v10  ;;  %6709 = vmatprep.subr.bf16.mxu0 %v7803_v39 }
0x10ad   : > { %v4806_v11 = vpop.f32.mrf.mxu0  ;;  %v8307_v62 = vpop.f32.mrf.mxu1 }
0x10ae   : > { %v8293_v51 = vadd.f32 %v4806_v11, %v8251_v32 }
0x10af   : > { %v4906_v14 = vpop.f32.mrf.mxu0 }
0x10b0   : > { %v4913_v17 = vsel %vm3340_vm2, %v4906_v14, -inf }
0x10b1   : > { %4914 = vmax.xlane.f32.xlu0 %v4913_v17  ;;  %v6701_v56 = vpop.f32.mrf.mxu0 }
0x10b3   : > { %v4909_v25 = vpop.f32.mrf.mxu0 }
0x10b4   : > { %v4916_v37 = vsel %vm3340_vm2, %v4909_v25, -inf }
0x10b5   : > { %4917 = vmax.xlane.f32.xlu1 %v4916_v37  ;;  %v6702_v22 = vpop.f32.mrf.mxu0 }
0x113a   : > { %v4915_v15 = vpop.xlane.xlu0 %4914 }
0x113b   : > { %v4919_v57 = vsub.f32 %v4906_v14, %v4915_v15 }
0x113d   : > { %v4921_v26 = vmul.f32 1.442695, %v4919_v57 }
0x113e   : > { %v4918_v27 = vpop.xlane.xlu1 %4917 }
0x113f   : > { %7608 = vpow2.f32 %v4921_v26  ;;  %v4920_v10 = vsub.f32 %v4909_v25, %v4918_v27  ;;  %v5185_v25 = vsel %vm3292_vm1, %v8058_v33, 0 }
0x1141   : > { %v4923_v30 = vmul.f32 1.442695, %v4920_v10 }
0x1143   : > { %7610 = vpow2.f32 %v4923_v30 }
0x114c   : > { %v7609_v32 = vpop.eup %7608 }
0x114d   : > { %v4925_v31 = vsel %vm3340_vm2, %v7609_v32, 0.0 }
0x114e   : > { %4926 = vadd.xlane.f32.xlu0 %v4925_v31 }
0x1150   : > { %v7611_v23 = vpop.eup %7610 }
0x1151   : > { %v4928_v53 = vsel %vm3340_vm2, %v7611_v23, 0.0 }
0x1152   : > { %4929 = vadd.xlane.f32.xlu0 %v4928_v53 }
0x1168   : > { %4937 = vrot.lane.b32.xlu0 %v8072_v18, %s7805_s23  ;;  %v7501_v18 = vld [vmem:[#allocation4 + $0x2ec] ss:$16 sps:$4 sm:$0xff]  }
0x116c   : > { %5493 = vrot.lane.b32.xlu0 %v8058_v33, %s7805_s23 }
0x11d7   : > { %v4927_v48 = vpop.xlane.xlu0 %4926 }
0x11d8   : > { %7612 = vrcp.f32 %v4927_v48 }
0x11db   : > { %v4930_v7 = vpop.xlane.xlu0 %4929 }
0x11dc   : > { %7614 = vrcp.f32 %v4930_v7 }
0x11df   : > { %v4938_v49 = vpop.permute.xlu0 %4937 }
0x11e0   : > { %6704 = vmatpush3.bf16.msra.mxu1 %v4938_v49 }
0x11e1   : > { %5135 = vmatprep.subr.bf16.mxu1 %v7501_v18 }
0x11e5   : > { %v7613_v50 = vpop.eup %7612 }
0x11e6   : > { %v4933_v8 = vmul.f32 %v7613_v50, %v7609_v32  ;;  %v7520_v50 = vld [vmem:[#allocation4 + $0x360] ss:$16 sps:$4 sm:$0xff]  }
0x11e9   : > { %v7615_v52 = vpop.eup %7614 }
0x11ea   : > { %v4934_v40 = vmul.f32 %v7615_v52, %v7611_v23  ;;  %v7522_v52 = vld [vmem:[#allocation4 + $0x364] ss:$16 sps:$4 sm:$0xff]  }
0x11ec   : > { %v4935_v58 = vpack.c.bf16 %v4934_v40, %v4933_v8  ;;  %v7525_v8 = vld [vmem:[#allocation4 + $0x36c] ss:$16 sps:$4 sm:$0xff]   ;;  %v7528_v40 = vld [vmem:[#allocation4 + $0x344] ss:$16 sps:$4 sm:$0xff]  }
0x11ee   : > { %6706 = vmatmul.mubr.msk.bf16.vlgmr.msra.gmra.mxu1 %vm3340_vm2, %v4935_v58  ;;  %v7534_v58 = vld [vmem:[#allocation4 + $0x324] ss:$16 sps:$4 sm:$0xff]  }
0x11ef   : > { %5136 = vmatpush1.bf16.msra.mxu1 %v7499_v24  ;;  %5159 = vmatprep.mubr.bf16.mxu1 %v7806_v9  ;;  %v7526_v24 = vld [vmem:[#allocation4 + $0x340] ss:$16 sps:$4 sm:$0xff]  }
0x11f0   : > { %5137 = vmatprep.subr.bf16.mxu1 %v7507_v13  ;;  %v7532_v13 = vld [vmem:[#allocation4 + $0x320] ss:$16 sps:$4 sm:$0xff]  }
0x11f3   : > { %5138 = vmatpush1.bf16.msra.mxu1 %v7505_v54 }
0x11f4   : > { %5139 = vmatprep.subr.bf16.mxu1 %v7513_v12 }
0x11f7   : > { %5140 = vmatpush1.bf16.msra.mxu1 %v7511_v35 }
0x11f8   : > { %5141 = vmatprep.subr.bf16.mxu1 %v7519_v61 }
0x11fb   : > { %5142 = vmatpush1.bf16.msra.mxu1 %v7517_v3 }
0x11fc   : > { %6715 = vmatprep.subr.bf16.mxu1 %v7803_v39 }
0x12ae   : > { %v4977_v4 = vpop.f32.mrf.mxu1 }
0x12b0   : > { %v6707_v11 = vpop.f32.mrf.mxu1 }
0x12b1   : > { %v7529_v11 = vld [vmem:[#allocation4 + $0x348] ss:$16 sps:$4 sm:$0xff]  }
0x12b2   : > { %v4980_v14 = vpop.f32.mrf.mxu1 }
0x12b3   : > { %v4984_v17 = vpack.c.bf16 %v4980_v14, %v4977_v4  ;;  %v7531_v4 = vld [vmem:[#allocation4 + $0x34c] ss:$16 sps:$4 sm:$0xff]  }
0x12b4   : > { %v6708_v56 = vpop.f32.mrf.mxu1  ;;  %v7537_v14 = vld [vmem:[#allocation4 + $0x32c] ss:$16 sps:$4 sm:$0xff]  }
0x12b5   : > { %6559 = vmatmul.mubr.msk.bf16.vlgmr.msra.gmra.mxu0 %vm3292_vm1, %v4984_v17  ;;  %6560 = vmatmul.mubr.msk.bf16.vlgmr.msra.gmra.mxu1 %vm3292_vm1, %v4984_v17  ;;  %v7535_v17 = vld [vmem:[#allocation4 + $0x328] ss:$16 sps:$4 sm:$0xff]   ;;  %v7540_v56 = vld [vmem:[#allocation4 + $0x304] ss:$16 sps:$4 sm:$0xff]  }
0x12b6   : > { %6710 = vmatpush3.bf16.xpose.msra.mxu0 %v5185_v25  ;;  %6716 = vmatpush3.bf16.msra.mxu1 %v8074_v20  ;;  %v7538_v25 = vld [vmem:[#allocation4 + $0x300] ss:$16 sps:$4 sm:$0xff]  }
0x12b7   : > { %6711 = vmatprep.mubr.msk.bf16.mxu0 %vm7804_vm0, %v7803_v39  ;;  %6717 = vmatprep.mubr.msk.bf16.mxu1 %vm7804_vm0, %v7803_v39 }
0x12b8   : > { %5403 = vmatprep.subr.bf16.mxu0 %v7522_v52  ;;  %5446 = vmatprep.subr.bf16.mxu1 %v7525_v8 }
0x12bd   : > { %6712 = vmatmul.mubr.msk.bf16.vlgmr.msra.gmra.mxu0 %vm3292_vm1, %v8019_v42 }
0x12be   : > { %5427 = vmatprep.mubr.bf16.mxu0 %v7806_v9  ;;  %5404 = vmatpush1.bf16.msra.mxu0 %v7520_v50 }
0x12bf   : > { %5405 = vmatprep.subr.bf16.mxu0 %v7528_v40 }
0x12c2   : > { %5406 = vmatpush1.bf16.msra.mxu0 %v7526_v24 }
0x12c3   : > { %5407 = vmatprep.subr.bf16.mxu0 %v7534_v58 }
0x12c6   : > { %5408 = vmatpush1.bf16.msra.mxu0 %v7532_v13 }
0x12c7   : > { %5409 = vmatprep.subr.bf16.mxu0 %v7540_v56 }
0x12ca   : > { %5410 = vmatpush1.bf16.msra.mxu0 %v7538_v25 }
0x12cb   : > { %6721 = vmatprep.subr.bf16.mxu0 %v7803_v39 }
0x1375   : > { %v5118_v37 = vpop.f32.mrf.mxu0  ;;  %v5161_v22 = vpop.f32.mrf.mxu1 }
0x1376   : > { %v8322_v15 = vadd.f32 %v5118_v37, %v8275_v5  ;;  %v8325_v33 = vadd.f32 %v5161_v22, %v8278_v1  ;;  %v7541_v37 = vld [vmem:[#allocation4 + $0x308] ss:$16 sps:$4 sm:$0xff]   ;;  %v7543_v22 = vld [vmem:[#allocation4 + $0x30c] ss:$16 sps:$4 sm:$0xff]  }
0x1377   : > { %v5120_v57 = vpop.f32.mrf.mxu0  ;;  %v5163_v26 = vpop.f32.mrf.mxu1 }
0x1378   : > { %v8328_v27 = vadd.f32 %v5120_v57, %v8281_v19  ;;  %v8331_v10 = vadd.f32 %v5163_v26, %v8284_v0 }
0x1379   : > { %v5122_v30 = vpop.f32.mrf.mxu0  ;;  %v5165_v32 = vpop.f32.mrf.mxu1 }
0x137a   : > { %v8334_v31 = vadd.f32 %v5122_v30, %v8287_v46  ;;  %v8337_v23 = vadd.f32 %v5165_v32, %v8290_v47  ;;  %v5494_v32 = vpop.permute.xlu0 %5493 }
0x137b   : > { %v5124_v5 = vpop.f32.mrf.mxu0  ;;  %v8352_v57 = vpop.f32.mrf.mxu1 }
0x137c   : > { %v8340_v1 = vadd.f32 %v5124_v5, %v8293_v51 }
0x137d   : > { %v5221_v53 = vpop.f32.mrf.mxu0 }
0x137e   : > { %v5228_v28 = vsel %vm3340_vm2, %v5221_v53, -inf }
0x137f   : > { %5229 = vmax.xlane.f32.xlu1 %v5228_v28  ;;  %v6713_v19 = vpop.f32.mrf.mxu0 }
0x1380   : > { %v5499_v19 = vsel %vm3292_vm1, %v5494_v32, 0  ;;  %v7555_v32 = vld [vmem:[#allocation4 + $0x3cc] ss:$16 sps:$4 sm:$0xff]  }
0x1381   : > { %v5224_v38 = vpop.f32.mrf.mxu0 }
0x1382   : > { %v5231_v0 = vsel %vm3340_vm2, %v5224_v38, -inf }
0x1383   : > { %5232 = vmax.xlane.f32.xlu1 %v5231_v0  ;;  %v6714_v63 = vpop.f32.mrf.mxu0 }
0x1408   : > { %v5230_v44 = vpop.xlane.xlu1 %5229 }
0x1409   : > { %v5234_v46 = vsub.f32 %v5221_v53, %v5230_v44 }
0x140b   : > { %v5236_v45 = vmul.f32 1.442695, %v5234_v46 }
0x140c   : > { %v5233_v6 = vpop.xlane.xlu1 %5232 }
0x140d   : > { %7616 = vpow2.f32 %v5236_v45  ;;  %v5235_v47 = vsub.f32 %v5224_v38, %v5233_v6 }
0x140f   : > { %v5238_v48 = vmul.f32 1.442695, %v5235_v47 }
0x1411   : > { %7618 = vpow2.f32 %v5238_v48 }
0x141a   : > { %v7617_v51 = vpop.eup %7616 }
0x141b   : > { %v5240_v7 = vsel %vm3340_vm2, %v7617_v51, 0.0 }
0x141c   : > { %5241 = vadd.xlane.f32.xlu1 %v5240_v7 }
0x141e   : > { %v7619_v18 = vpop.eup %7618 }
0x141f   : > { %v5243_v49 = vsel %vm3340_vm2, %v7619_v18, 0.0 }
0x1420   : > { %5244 = vadd.xlane.f32.xlu1 %v5243_v49 }
0x1431   : > { %5490 = vrot.lane.b32.xlu1 %v8019_v42, %s7805_s23 }
0x14a5   : > { %v5242_v54 = vpop.xlane.xlu1 %5241 }
0x14a6   : > { %7620 = vrcp.f32 %v5242_v54 }
0x14a9   : > { %v5245_v12 = vpop.xlane.xlu1 %5244 }
0x14aa   : > { %7622 = vrcp.f32 %v5245_v12 }
0x14ad   : > { %v5491_v38 = vpop.permute.xlu1 %5490 }
0x14b3   : > { %v7621_v35 = vpop.eup %7620 }
0x14b4   : > { %v5248_v59 = vmul.f32 %v7621_v35, %v7617_v51 }
0x14b7   : > { %v7623_v42 = vpop.eup %7622 }
0x14b8   : > { %v5249_v61 = vmul.f32 %v7623_v42, %v7619_v18  ;;  %v7544_v42 = vld [vmem:[#allocation4 + $0x3e0] ss:$16 sps:$4 sm:$0xff]  }
0x14ba   : > { %v5250_v3 = vpack.c.bf16 %v5249_v61, %v5248_v59  ;;  %v7546_v59 = vld [vmem:[#allocation4 + $0x3e4] ss:$16 sps:$4 sm:$0xff]  }
0x14bb   : > { %v7552_v61 = vld [vmem:[#allocation4 + $0x3c4] ss:$16 sps:$4 sm:$0xff]  }
0x14bc   : > { %6718 = vmatmul.mubr.msk.bf16.vlgmr.msra.gmra.mxu1 %vm3340_vm2, %v5250_v3  ;;  %v7558_v3 = vld [vmem:[#allocation4 + $0x3a4] ss:$16 sps:$4 sm:$0xff]  }
0x14bd   : > { %5447 = vmatpush1.bf16.msra.mxu1 %v7523_v2  ;;  %5470 = vmatprep.mubr.bf16.mxu1 %v7806_v9  ;;  %v7550_v2 = vld [vmem:[#allocation4 + $0x3c0] ss:$16 sps:$4 sm:$0xff]  }
0x14be   : > { %5448 = vmatprep.subr.bf16.mxu1 %v7531_v4  ;;  %v7556_v4 = vld [vmem:[#allocation4 + $0x3a0] ss:$16 sps:$4 sm:$0xff]  }
0x14c1   : > { %5449 = vmatpush1.bf16.msra.mxu1 %v7529_v11 }
0x14c2   : > { %5450 = vmatprep.subr.bf16.mxu1 %v7537_v14 }
0x14c5   : > { %5451 = vmatpush1.bf16.msra.mxu1 %v7535_v17  ;;  %v7549_v17 = vld [vmem:[#allocation4 + $0x3ec] ss:$16 sps:$4 sm:$0xff]  }
0x14c6   : > { %5452 = vmatprep.subr.bf16.mxu1 %v7543_v22 }
0x14c9   : > { %5453 = vmatpush1.bf16.msra.mxu1 %v7541_v37 }
0x14ca   : > { %6727 = vmatprep.subr.bf16.mxu1 %v7803_v39 }
0x157c   : > { %v5288_v26 = vpop.f32.mrf.mxu1 }
0x157e   : > { %v6719_v30 = vpop.f32.mrf.mxu1 }
0x1580   : > { %v5291_v5 = vpop.f32.mrf.mxu1 }
0x1581   : > { %v5295_v53 = vpack.c.bf16 %v5291_v5, %v5288_v26  ;;  %v7547_v26 = vld [vmem:[#allocation4 + $0x3e8] ss:$16 sps:$4 sm:$0xff]  }
0x1582   : > { %v6720_v28 = vpop.f32.mrf.mxu1  ;;  %v7553_v5 = vld [vmem:[#allocation4 + $0x3c8] ss:$16 sps:$4 sm:$0xff]  }
0x1583   : > { %6579 = vmatmul.mubr.msk.bf16.vlgmr.msra.gmra.mxu0 %vm3292_vm1, %v5295_v53  ;;  %6580 = vmatmul.mubr.msk.bf16.vlgmr.msra.gmra.mxu1 %vm3292_vm1, %v5295_v53  ;;  %v7561_v53 = vld [vmem:[#allocation4 + $0x3ac] ss:$16 sps:$4 sm:$0xff]   ;;  %v7559_v28 = vld [vmem:[#allocation4 + $0x3a8] ss:$16 sps:$4 sm:$0xff]  }
0x1584   : > { %6722 = vmatpush3.bf16.xpose.msra.mxu0 %v5499_v19  ;;  %6723 = vmatprep.mubr.msk.bf16.mxu0 %vm7804_vm0, %v7803_v39  ;;  %v7562_v19 = vld [vmem:[#allocation4 + $0x380] ss:$16 sps:$4 sm:$0xff]  }
0x1585   : > { %6729 = vmatprep.mubr.msk.bf16.mxu1 %vm7804_vm0, %v7803_v39  ;;  %5721 = vmatprep.subr.bf16.mxu0 %v7546_v59 }
0x158b   : > { %6724 = vmatmul.mubr.msk.bf16.vlgmr.msra.gmra.mxu0 %vm3292_vm1, %v5491_v38  ;;  %v7564_v38 = vld [vmem:[#allocation4 + $0x384] ss:$16 sps:$4 sm:$0xff]  }
0x158c   : > { %5745 = vmatprep.mubr.bf16.mxu0 %v7806_v9  ;;  %5722 = vmatpush1.bf16.msra.mxu0 %v7544_v42 }
0x158d   : > { %5723 = vmatprep.subr.bf16.mxu0 %v7552_v61 }
0x1590   : > { %5724 = vmatpush1.bf16.msra.mxu0 %v7550_v2 }
0x1591   : > { %5725 = vmatprep.subr.bf16.mxu0 %v7558_v3 }
0x1594   : > { %5726 = vmatpush1.bf16.msra.mxu0 %v7556_v4 }
0x1595   : > { %5727 = vmatprep.subr.bf16.mxu0 %v7564_v38 }
0x1598   : > { %5728 = vmatpush1.bf16.msra.mxu0 %v7562_v19 }
0x1643   : > { %v5429_v0 = vpop.f32.mrf.mxu0  ;;  %v5472_v63 = vpop.f32.mrf.mxu1 }
0x1644   : > { %v8364_v44 = vadd.f32 %v5429_v0, %v8322_v15  ;;  %v8367_v46 = vadd.f32 %v5472_v63, %v8325_v33  ;;  %v7565_v0 = vld [vmem:[#allocation4 + $0x388] ss:$16 sps:$4 sm:$0xff]   ;;  %v7567_v63 = vld [vmem:[#allocation4 + $0x38c] ss:$16 sps:$4 sm:$0xff]  }
0x1645   : > { %v5431_v45 = vpop.f32.mrf.mxu0  ;;  %v5474_v6 = vpop.f32.mrf.mxu1 }
0x1646   : > { %v8370_v47 = vadd.f32 %v5431_v45, %v8328_v27  ;;  %v8373_v39 = vadd.f32 %v5474_v6, %v8331_v10 }
0x1647   : > { %v5433_v48 = vpop.f32.mrf.mxu0  ;;  %v5476_v51 = vpop.f32.mrf.mxu1 }
0x1648   : > { %v8376_v7 = vadd.f32 %v5433_v48, %v8334_v31  ;;  %v8379_v18 = vadd.f32 %v5476_v51, %v8337_v23 }
0x1649   : > { %v5435_v15 = vpop.f32.mrf.mxu0  ;;  %v5478_v45 = vpop.f32.mrf.mxu1 }
0x164a   : > { %v8382_v33 = vadd.f32 %v5435_v15, %v8340_v1 }
0x164b   : > { %v5535_v49 = vpop.f32.mrf.mxu0 }
0x164c   : > { %v5542_v50 = vsel %vm3340_vm2, %v5535_v49, -inf }
0x164d   : > { %5543 = vmax.xlane.f32.xlu0 %v5542_v50  ;;  %v6725_v27 = vpop.f32.mrf.mxu0 }
0x164f   : > { %v5538_v52 = vpop.f32.mrf.mxu0 }
0x1650   : > { %v5545_v10 = vsel %vm3340_vm2, %v5538_v52, -inf }
0x1651   : > { %5546 = vmax.xlane.f32.xlu1 %v5545_v10  ;;  %v6726_v8 = vpop.f32.mrf.mxu0 }
0x16d6   : > { %v5544_v40 = vpop.xlane.xlu0 %5543 }
0x16d7   : > { %v5548_v31 = vsub.f32 %v5535_v49, %v5544_v40  ;;  %v7643_v49 = vld [vmem:[%s7945_s12 + $0x38] sm:$0xff] }
0x16d8   : > { %v3288_v50 = vadd.f32 %v7643_v49, %v8136_v34 }
0x16d9   : > { %v5550_v24 = vmul.f32 1.442695, %v5548_v31 }
0x16da   : > { %v5547_v58 = vpop.xlane.xlu1 %5546  ;;  %v3601_v27 = vadd.f32 %v8118_v16, %v3288_v50 }
0x16db   : > { %7624 = vpow2.f32 %v5550_v24  ;;  %v5549_v23 = vsub.f32 %v5538_v52, %v5547_v58 }
0x16dc   : > { %v3919_v52 = vadd.f32 %v8174_v36, %v3601_v27 }
0x16dd   : > { %v5552_v13 = vmul.f32 1.442695, %v5549_v23 }
0x16de   : > { %v4230_v10 = vadd.f32 %v8218_v43, %v3919_v52  ;;  %v5860_v52 = vld [vmem:[#allocation7] sm:$0xf] }
0x16df   : > { %7626 = vpow2.f32 %v5552_v13 }
0x16e0   : > { %v4548_v31 = vadd.f32 %v8263_v21, %v4230_v10  ;;  %v5890_v10 = vld [vmem:[#allocation9] sm:$0xf] }
0x16e8   : > { %v7625_v1 = vpop.eup %7624 }
0x16e9   : > { %v5554_v54 = vsel %vm3340_vm2, %v7625_v1, 0.0 }
0x16ea   : > { %5555 = vadd.xlane.f32.xlu0 %v5554_v54 }
0x16ec   : > { %v7627_v12 = vpop.eup %7626 }
0x16ed   : > { %v5557_v35 = vsel %vm3340_vm2, %v7627_v12, 0.0 }
0x16ee   : > { %5558 = vadd.xlane.f32.xlu0 %v5557_v35 }
0x1704   : > { %5566 = vrot.lane.b32.xlu0 %v8074_v20, %s7805_s23 }
0x1773   : > { %v5556_v11 = vpop.xlane.xlu0 %5555 }
0x1774   : > { %7628 = vrcp.f32 %v5556_v11 }
0x1777   : > { %v5559_v14 = vpop.xlane.xlu0 %5558 }
0x1778   : > { %7630 = vrcp.f32 %v5559_v14 }
0x177b   : > { %v5567_v56 = vpop.permute.xlu0 %5566 }
0x177c   : > { %6728 = vmatpush3.bf16.msra.mxu1 %v5567_v56 }
0x177d   : > { %5764 = vmatprep.subr.bf16.mxu1 %v7549_v17 }
0x1781   : > { %v7629_v20 = vpop.eup %7628 }
0x1782   : > { %v5562_v37 = vmul.f32 %v7629_v20, %v7625_v1  ;;  %v4859_v1 = vadd.f32 %v8307_v62, %v4548_v31  ;;  %v5873_v31 = vrot.slane %v5860_v52, %v8004_v55 }
0x1784   : > { %v5177_v36 = vadd.f32 %v8352_v57, %v4859_v1  ;;  %v5903_v1 = vrot.slane %v5890_v10, %v8004_v55 }
0x1785   : > { %v7631_v25 = vpop.eup %7630 }
0x1786   : > { %v5563_v22 = vmul.f32 %v7631_v25, %v7627_v12  ;;  %v5488_v61 = vadd.f32 %v5478_v45, %v5177_v36 }
0x1788   : > { %v5564_v30 = vpack.c.bf16 %v5563_v22, %v5562_v37 }
0x178a   : > { %6730 = vmatmul.mubr.msk.bf16.vlgmr.msra.gmra.mxu1 %vm3340_vm2, %v5564_v30 }
0x178b   : > { %5765 = vmatpush1.bf16.msra.mxu1 %v7547_v26  ;;  %5788 = vmatprep.mubr.bf16.mxu1 %v7806_v9 }
0x178c   : > { %5766 = vmatprep.subr.bf16.mxu1 %v7555_v32 }
0x178f   : > { %5767 = vmatpush1.bf16.msra.mxu1 %v7553_v5 }
0x1790   : > { %5768 = vmatprep.subr.bf16.mxu1 %v7561_v53 }
0x1793   : > { %5769 = vmatpush1.bf16.msra.mxu1 %v7559_v28 }
0x1794   : > { %5770 = vmatprep.subr.bf16.mxu1 %v7567_v63 }
0x1797   : > { %5771 = vmatpush1.bf16.msra.mxu1 %v7565_v0 }
0x184a   : > { %v5606_v6 = vpop.f32.mrf.mxu1 }
0x184c   : > { %v6731_v48 = vpop.f32.mrf.mxu1 }
0x184e   : > { %v5609_v51 = vpop.f32.mrf.mxu1 }
0x184f   : > { %v5613_v9 = vpack.c.bf16 %v5609_v51, %v5606_v6 }
0x1850   : > { %v6732_v15 = vpop.f32.mrf.mxu1 }
0x1851   : > { %6599 = vmatmul.mubr.msk.bf16.vlgmr.msra.gmra.mxu0 %vm3292_vm1, %v5613_v9  ;;  %6600 = vmatmul.mubr.msk.bf16.vlgmr.msra.gmra.mxu1 %vm3292_vm1, %v5613_v9 }
0x1911   : > { %v5747_v8 = vpop.f32.mrf.mxu0  ;;  %v5790_v40 = vpop.f32.mrf.mxu1 }
0x1912   : > { %v5799_v23 = vadd.f32 %v5747_v8, %v8364_v44  ;;  %v5801_v16 = vadd.f32 %v5790_v40, %v8367_v46  ;;  %v5865_v8 = vrot.slane %v5860_v52, %v8026_v41  ;;  %v5869_v40 = vrot.slane %v5860_v52, %v7985_v29 }
0x1913   : > { %v5749_v24 = vpop.f32.mrf.mxu0  ;;  %v5792_v58 = vpop.f32.mrf.mxu1 }
0x1914   : > { %v5800_v13 = vadd.f32 %v5749_v24, %v8370_v47  ;;  %v5802_v35 = vadd.f32 %v5792_v58, %v8373_v39  ;;  %v5877_v24 = vrot.slane %v5860_v52, %v8007_v60 }
0x1915   : > { %v5751_v54 = vpop.f32.mrf.mxu0  ;;  %v5794_v34 = vpop.f32.mrf.mxu1 }
0x1916   : > { %v5807_v12 = vadd.f32 %v5800_v13, %v5799_v23  ;;  %v5803_v21 = vadd.f32 %v5751_v54, %v8376_v7  ;;  %v5805_v47 = vadd.f32 %v5794_v34, %v8379_v18  ;;  %v5907_v54 = vrot.slane %v5890_v10, %v8007_v60 }
0x1917   : > { %v5753_v43 = vpop.f32.mrf.mxu0  ;;  %v5796_v44 = vpop.f32.mrf.mxu1 }
0x1918   : > { %v5804_v42 = vadd.f32 %v5753_v43, %v8382_v33  ;;  %v5808_v59 = vadd.f32 %v5807_v12, %v5801_v16  ;;  %v5806_v3 = vadd.f32 %v5796_v44, %v5488_v61 }
0x191a   : > { %v5812_v62 = vadd.f32 %v5804_v42, %v5803_v21  ;;  %v5809_v2 = vadd.f32 %v5808_v59, %v5802_v35 }
0x191c   : > { %5810 = vadd.xlane.f32.xlu1 %v5809_v2  ;;  %v5813_v46 = vadd.f32 %v5812_v62, %v5805_v47 }
0x191e   : > { %v5814_v4 = vadd.f32 %v5813_v46, %v5806_v3 }
0x1920   : > { %5815 = vadd.xlane.f32.xlu1 %v5814_v4 }
0x19a5   : > { %v5811_v57 = vpop.xlane.xlu1 %5810 }
0x19a6   : > { %v5818_v11 = vmul.f32 0.001953125, %v5811_v57 }
0x19a8   : > { %v5820_v14 = vsub.f32 %v5799_v23, %v5818_v11  ;;  %v5821_v39 = vsub.f32 %v5800_v13, %v5818_v11  ;;  %v5822_v17 = vsub.f32 %v5801_v16, %v5818_v11  ;;  %v5823_v56 = vsub.f32 %v5802_v35, %v5818_v11 }
0x19a9   : > { %v5816_v7 = vpop.xlane.xlu1 %5815  ;;  %v5895_v23 = vrot.slane %v5890_v10, %v8026_v41  ;;  %v5899_v13 = vrot.slane %v5890_v10, %v7985_v29 }
0x19aa   : > { %v5819_v33 = vmul.f32 0.001953125, %v5816_v7  ;;  %v5828_v20 = vmul.f32 %v5820_v14, %v5820_v14  ;;  %v5829_v25 = vmul.f32 %v5821_v39, %v5821_v39  ;;  %v5830_v37 = vmul.f32 %v5822_v17, %v5822_v17 }
0x19ab   : > { %v5831_v32 = vmul.f32 %v5823_v56, %v5823_v56 }
0x19ac   : > { %v5824_v22 = vsub.f32 %v5803_v21, %v5819_v33  ;;  %v5825_v18 = vsub.f32 %v5804_v42, %v5819_v33  ;;  %v5836_v26 = vadd.f32 %v5829_v25, %v5828_v20  ;;  %v5826_v30 = vsub.f32 %v5805_v47, %v5819_v33 }
0x19ad   : > { %v5827_v53 = vsub.f32 %v5806_v3, %v5819_v33 }
0x19ae   : > { %v5837_v5 = vadd.f32 %v5836_v26, %v5830_v37  ;;  %v5832_v28 = vmul.f32 %v5824_v22, %v5824_v22  ;;  %v5833_v19 = vmul.f32 %v5825_v18, %v5825_v18  ;;  %v5834_v0 = vmul.f32 %v5826_v30, %v5826_v30 }
0x19af   : > { %v5835_v45 = vmul.f32 %v5827_v53, %v5827_v53 }
0x19b0   : > { %v5838_v38 = vadd.f32 %v5837_v5, %v5831_v32  ;;  %v5841_v63 = vadd.f32 %v5833_v19, %v5832_v28 }
0x19b2   : > { %5839 = vadd.xlane.f32.xlu1 %v5838_v38  ;;  %v5842_v6 = vadd.f32 %v5841_v63, %v5834_v0 }
0x19b4   : > { %v5843_v48 = vadd.f32 %v5842_v6, %v5835_v45 }
0x19b6   : > { %5844 = vadd.xlane.f32.xlu0 %v5843_v48 }
0x1a3b   : > { %v5840_v51 = vpop.xlane.xlu1 %5839 }
0x1a3c   : > { %v5846_v9 = vmul.f32 0.001953125, %v5840_v51 }
0x1a3e   : > { %v5848_v15 = vadd.f32 1e-05, %v5846_v9 }
0x1a3f   : > { %v5845_v49 = vpop.xlane.xlu0 %5844 }
0x1a40   : > { %7632 = vrsqrt.f32 %v5848_v15  ;;  %v5847_v50 = vmul.f32 0.001953125, %v5845_v49 }
0x1a42   : > { %v5849_v27 = vadd.f32 1e-05, %v5847_v50 }
0x1a44   : > { %7634 = vrsqrt.f32 %v5849_v27 }
0x1a4d   : > { %v7633_v58 = vpop.eup %7632 }
0x1a4e   : > { %v5852_v34 = vmul.f32 %v7633_v58, %v5820_v14  ;;  %v5853_v16 = vmul.f32 %v7633_v58, %v5821_v39  ;;  %v5854_v12 = vmul.f32 %v7633_v58, %v5822_v17  ;;  %v5855_v36 = vmul.f32 %v7633_v58, %v5823_v56 }
0x1a50   : > { %v5882_v43 = vmul.f32 %v5865_v8, %v5852_v34  ;;  %v5883_v35 = vmul.f32 %v5869_v40, %v5853_v16  ;;  %v5884_v21 = vmul.f32 %v5873_v31, %v5854_v12  ;;  %v5885_v42 = vmul.f32 %v5877_v24, %v5855_v36 }
0x1a51   : > { %v7635_v59 = vpop.eup %7634 }
0x1a52   : > { %v5912_v41 = vadd.f32 %v5895_v23, %v5882_v43  ;;  %v5913_v29 = vadd.f32 %v5899_v13, %v5883_v35  ;;  %v5914_v44 = vadd.f32 %v5903_v1, %v5884_v21  ;;  %v5915_v55 = vadd.f32 %v5907_v54, %v5885_v42 }
0x1a53   : > { %v5856_v61 = vmul.f32 %v7635_v59, %v5824_v22  ;;  %v5857_v60 = vmul.f32 %v7635_v59, %v5825_v18  ;;  %v5858_v47 = vmul.f32 %v7635_v59, %v5826_v30  ;;  %v5859_v62 = vmul.f32 %v7635_v59, %v5827_v53 }
0x1a54   : > { %5920 = vst [vmem:[%s352_s30] sm:$0xff] %v5912_v41  ;;  %5921 = vst [vmem:[%s352_s30 + $0x8] sm:$0xff] %v5913_v29 }
0x1a55   : > { %5922 = vst [vmem:[%s352_s30 + $0x10] sm:$0xff] %v5914_v44  ;;  %5923 = vst [vmem:[%s352_s30 + $0x18] sm:$0xff] %v5915_v55  ;;  %v5886_v2 = vmul.f32 %v5865_v8, %v5856_v61  ;;  %v5887_v3 = vmul.f32 %v5869_v40, %v5857_v60  ;;  %v5888_v46 = vmul.f32 %v5873_v31, %v5858_v47 }
0x1a56   : > { %v5889_v4 = vmul.f32 %v5877_v24, %v5859_v62 }
0x1a57   : > { %v5916_v57 = vadd.f32 %v5895_v23, %v5886_v2  ;;  %v5917_v11 = vadd.f32 %v5899_v13, %v5887_v3  ;;  %v5918_v14 = vadd.f32 %v5903_v1, %v5888_v46 }
0x1a58   : > { %v5919_v39 = vadd.f32 %v5907_v54, %v5889_v4 }
0x1a59   : > { %5924 = vst [vmem:[%s352_s30 + $0x20] sm:$0xff] %v5916_v57  ;;  %5925 = vst [vmem:[%s352_s30 + $0x28] sm:$0xff] %v5917_v11 }
0x1a5a   : > { %5926 = vst [vmem:[%s352_s30 + $0x30] sm:$0xff] %v5918_v14  ;;  %5927 = vst [vmem:[%s352_s30 + $0x38] sm:$0xff] %v5919_v39 }
0x1a5b PF: > { %s20_s24 = sadd.s32 1, %s7792_s24  }
0x1a5c   : > { %p17_p5 = scmp.ge.s32.totalorder %s20_s24, 4  }
0x1a5e   :  { %19 = sbr.rel (!%p17_p5) target bundleno = 3 (0x3), region = 99 }
0x1a63   :  { %5952 = vsyncpa [#allocation3], 1 }
0x1a64   :  { %5954 = vsyncpa [#allocation3 + $0x1], 1 }
0x1a65   :  { %5955 = vsyncpa [#allocation5], 1 }
0x1a66   :  { %5956 = vsyncpa [#allocation8], 1 }

</bundles_post_ra>
